<compile_context>
chip_gen: v6e
topology: v6e:2x2x1
jax: 0.10.0
libtpu: 0.0.40
codegen_flags: <defaults>
</compile_context>

<pallas_src>
import math
import functools

import jax
import jax.numpy as jnp
from jax.experimental import pallas as pl
from jax.experimental.pallas import tpu as pltpu

# ---- model hyperparameters (small, consistent with the standard composition) ----
D_MODEL = 32
N_HEADS = 4
D_HEAD = D_MODEL // N_HEADS
D_FF = 64
N_LAYERS = 2
VOCAB = 16
EPS = 1e-6
NEG_INF = -1e9


# ============================ in-kernel helpers (traced, static shapes) ============================

def _layer_norm(x, g, b):
    """Annotated-Transformer LayerNorm: g*(x-mean)/(std+eps)+b, std with ddof=1 (torch.std)."""
    mean = jnp.mean(x, axis=-1, keepdims=True)
    d = x - mean
    var = jnp.sum(d * d, axis=-1, keepdims=True) * (1.0 / (D_MODEL - 1))
    inv = pl.reciprocal(jnp.sqrt(var) + EPS, approx=True)
    return g[None, :] * d * inv + b[None, :]


def _softmax_last(s):
    s = s - jnp.max(s, axis=-1, keepdims=True)
    p = jnp.exp(s)
    return p * pl.reciprocal(jnp.sum(p, axis=-1, keepdims=True), approx=True)


def _mha(xq, xkv, mask_pos, qkv_w, qkv_b, o_w, o_b, B, Sq, Sk, cross):
    """Multi-head attention block, fully in-registers/VMEM.

    xq: (B*Sq, D)   xkv: (B*Sk, D)   mask_pos: (B, Sq, Sk) bool (pre-broadcast, hoisted)
    qkv_w: (D, 3D)  qkv_b: (3D,)     o_w: (D, D)  o_b: (D,)
    """
    if cross:
        q2 = jnp.dot(xq, qkv_w[:, :D_MODEL],
                     preferred_element_type=jnp.float32) + qkv_b[None, :D_MODEL]
        kv = jnp.dot(xkv, qkv_w[:, D_MODEL:],
                     preferred_element_type=jnp.float32) + qkv_b[None, D_MODEL:]
        k2 = kv[:, :D_MODEL]
        v2 = kv[:, D_MODEL:]
    else:
        qkv = jnp.dot(xq, qkv_w, preferred_element_type=jnp.float32) + qkv_b[None, :]
        q2 = qkv[:, :D_MODEL]
        k2 = qkv[:, D_MODEL:2 * D_MODEL]
        v2 = qkv[:, 2 * D_MODEL:]

    q = q2.reshape(B, Sq, D_MODEL)
    k = k2.reshape(B, Sk, D_MODEL)
    v = v2.reshape(B, Sk, D_MODEL)

    scale = 1.0 / math.sqrt(D_HEAD)

    # Accumulate the per-head output projection; seed with the output bias.
    out = jnp.broadcast_to(o_b[None, :], (B * Sq, D_MODEL))
    for h in range(N_HEADS):
        lo, hi = h * D_HEAD, (h + 1) * D_HEAD
        # scores via batched contraction of last dims (no explicit transpose of k)
        s = jnp.einsum('bqd,bkd->bqk', q[:, :, lo:hi], k[:, :, lo:hi],
                       preferred_element_type=jnp.float32) * scale
        s = jnp.where(mask_pos, s, NEG_INF)              # masked_fill(mask == 0, -1e9)
        p = _softmax_last(s)
        ctx = jnp.einsum('bqk,bkd->bqd', p, v[:, :, lo:hi],
                         preferred_element_type=jnp.float32)
        out = out + jnp.dot(ctx.reshape(B * Sq, D_HEAD), o_w[lo:hi, :],
                            preferred_element_type=jnp.float32)
    return out


def _ffn(x, w1, b1, w2, b2):
    h = jnp.maximum(jnp.dot(x, w1, preferred_element_type=jnp.float32) + b1[None, :], 0.0)
    return jnp.dot(h, w2, preferred_element_type=jnp.float32) + b2[None, :]


# ============================ the single fused kernel ============================

def _encoder_decoder_kernel(
        # activations / masks
        src_x_ref, tgt_x_ref, src_mask_ref, tgt_mask_ref,
        # encoder weights (stacked over layers)
        e_ln1_g, e_ln1_b, e_qkv_w, e_qkv_b, e_o_w, e_o_b,
        e_ln2_g, e_ln2_b, e_ff1_w, e_ff1_b, e_ff2_w, e_ff2_b,
        e_ng, e_nb,
        # decoder weights (stacked over layers)
        d_ln1_g, d_ln1_b, d_sa_qkv_w, d_sa_qkv_b, d_sa_o_w, d_sa_o_b,
        d_ln2_g, d_ln2_b, d_ca_qkv_w, d_ca_qkv_b, d_ca_o_w, d_ca_o_b,
        d_ln3_g, d_ln3_b, d_ff1_w, d_ff1_b, d_ff2_w, d_ff2_b,
        d_ng, d_nb,
        # output
        out_ref,
        *, B, Ss, St):
    src_mask = src_mask_ref[...]          # (B, 1, Ss) float
    tgt_mask = tgt_mask_ref[...]          # (B, St, St) float

    # Hoisted mask broadcasts (one per attention pattern, reused across all layers).
    enc_mask = jnp.broadcast_to(src_mask, (B, Ss, Ss)) > 0.0   # encoder self-attn
    dec_sa_mask = tgt_mask > 0.0                               # decoder self-attn
    dec_ca_mask = jnp.broadcast_to(src_mask, (B, St, Ss)) > 0.0  # decoder cross-attn

    # ---------------- encoder ----------------
    x = src_x_ref[...]                    # (B*Ss, D)
    for l in range(N_LAYERS):             # static unroll: weights stay resident in VMEM
        xn = _layer_norm(x, e_ln1_g[l], e_ln1_b[l])
        x = x + _mha(xn, xn, enc_mask, e_qkv_w[l], e_qkv_b[l], e_o_w[l], e_o_b[l],
                     B, Ss, Ss, cross=False)
        xn = _layer_norm(x, e_ln2_g[l], e_ln2_b[l])
        x = x + _ffn(xn, e_ff1_w[l], e_ff1_b[l], e_ff2_w[l], e_ff2_b[l])
    memory = _layer_norm(x, e_ng[0], e_nb[0])

    # ---------------- decoder ----------------
    y = tgt_x_ref[...]                    # (B*St, D)
    for l in range(N_LAYERS):
        yn = _layer_norm(y, d_ln1_g[l], d_ln1_b[l])
        y = y + _mha(yn, yn, dec_sa_mask, d_sa_qkv_w[l], d_sa_qkv_b[l],
                     d_sa_o_w[l], d_sa_o_b[l], B, St, St, cross=False)
        yn = _layer_norm(y, d_ln2_g[l], d_ln2_b[l])
        y = y + _mha(yn, memory, dec_ca_mask, d_ca_qkv_w[l], d_ca_qkv_b[l],
                     d_ca_o_w[l], d_ca_o_b[l], B, St, Ss, cross=True)
        yn = _layer_norm(y, d_ln3_g[l], d_ln3_b[l])
        y = y + _ffn(yn, d_ff1_w[l], d_ff1_b[l], d_ff2_w[l], d_ff2_b[l])

    out_ref[...] = _layer_norm(y, d_ng[0], d_nb[0])


# ============================ generator (separate, not part of forward) ============================

def _generator_kernel(x_ref, w_ref, b_ref, o_ref):
    """Generator: log_softmax(x @ w + b, axis=-1). Single program, no grid."""
    logits = jnp.dot(x_ref[...], w_ref[...], preferred_element_type=jnp.float32) + b_ref[...]
    z = logits - jnp.max(logits, axis=-1, keepdims=True)
    lse = jnp.log(jnp.sum(jnp.exp(z), axis=-1, keepdims=True))
    o_ref[...] = z - lse


def generate(params, dec_out):
    """Generator (Linear + log_softmax). Defined per __init__; not invoked by forward()."""
    B, S, D = dec_out.shape
    logp = pl.pallas_call(
        _generator_kernel,
        out_shape=jax.ShapeDtypeStruct((B * S, VOCAB), jnp.float32),
    )(dec_out.reshape(B * S, D),
      params["generator"]["w"],
      params["generator"]["b"].reshape(1, VOCAB))
    return logp.reshape(B, S, VOCAB)


# ============================ model glue (plain JAX) ============================

def positional_encoding(S, D):
    pos = jnp.arange(S, dtype=jnp.float32)[:, None]
    div = jnp.exp(jnp.arange(0, D, 2, dtype=jnp.float32) * (-math.log(10000.0) / D))
    pe = jnp.zeros((S, D), jnp.float32)
    pe = pe.at[:, 0::2].set(jnp.sin(pos * div))
    pe = pe.at[:, 1::2].set(jnp.cos(pos * div))
    return pe


def _embed(tokens, table, S):
    # nn.Embedding lookup * sqrt(d_model) + positional encoding (dropout = identity in eval)
    # TODO(synk): embedding gather stays in plain JAX (tiny, fused by XLA with the PE add).
    return table[tokens] * math.sqrt(D_MODEL) + positional_encoding(S, D_MODEL)[None]


def forward(params, src, tgt, src_mask, tgt_mask):
    """EncoderDecoder.forward: decode(encode(src, src_mask), src_mask, tgt, tgt_mask)."""
    B, Ss = src.shape
    _, St = tgt.shape
    src_x = _embed(src, params["src_emb"], Ss).reshape(B * Ss, D_MODEL)
    tgt_x = _embed(tgt, params["tgt_emb"], St).reshape(B * St, D_MODEL)

    enc = params["encoder"]
    dec = params["decoder"]
    args = (
        src_x, tgt_x, src_mask.astype(jnp.float32), tgt_mask.astype(jnp.float32),
        enc["ln1_g"], enc["ln1_b"], enc["qkv_w"], enc["qkv_b"], enc["o_w"], enc["o_b"],
        enc["ln2_g"], enc["ln2_b"], enc["ff1_w"], enc["ff1_b"], enc["ff2_w"], enc["ff2_b"],
        enc["norm_g"], enc["norm_b"],
        dec["ln1_g"], dec["ln1_b"], dec["sa_qkv_w"], dec["sa_qkv_b"], dec["sa_o_w"], dec["sa_o_b"],
        dec["ln2_g"], dec["ln2_b"], dec["ca_qkv_w"], dec["ca_qkv_b"], dec["ca_o_w"], dec["ca_o_b"],
        dec["ln3_g"], dec["ln3_b"], dec["ff1_w"], dec["ff1_b"], dec["ff2_w"], dec["ff2_b"],
        dec["norm_g"], dec["norm_b"],
    )

    out = pl.pallas_call(
        functools.partial(_encoder_decoder_kernel, B=B, Ss=Ss, St=St),
        out_shape=jax.ShapeDtypeStruct((B * St, D_MODEL), jnp.float32),
        # single program, no grid: all operands live as whole-array VMEM blocks
    )(*args)
    return out.reshape(B, St, D_MODEL)


# ============================ deterministic parameter init ============================

def init_params(seed=0):
    key = jax.random.PRNGKey(seed)
    keys = iter(jax.random.split(key, 1024))

    def lin(din, dout):
        lim = 1.0 / math.sqrt(din)
        w = jax.random.uniform(next(keys), (din, dout), jnp.float32, -lim, lim)
        b = jax.random.uniform(next(keys), (dout,), jnp.float32, -lim, lim)
        return w, b

    def attn_pack():
        qw, qb = lin(D_MODEL, D_MODEL)
        kw, kb = lin(D_MODEL, D_MODEL)
        vw, vb = lin(D_MODEL, D_MODEL)
        ow, ob = lin(D_MODEL, D_MODEL)
        return (jnp.concatenate([qw, kw, vw], axis=1),   # (D, 3D) fused QKV
                jnp.concatenate([qb, kb, vb], axis=0),   # (3D,)
                ow, ob)

    ones = jnp.ones((D_MODEL,), jnp.float32)
    zeros = jnp.zeros((D_MODEL,), jnp.float32)

    # ---- encoder (stacked over layers) ----
    e = {k: [] for k in ["ln1_g", "ln1_b", "qkv_w", "qkv_b", "o_w", "o_b",
                         "ln2_g", "ln2_b", "ff1_w", "ff1_b", "ff2_w", "ff2_b"]}
    for _ in range(N_LAYERS):
        qkv_w, qkv_b, o_w, o_b = attn_pack()
        f1w, f1b = lin(D_MODEL, D_FF)
        f2w, f2b = lin(D_FF, D_MODEL)
        vals = dict(ln1_g=ones, ln1_b=zeros, qkv_w=qkv_w, qkv_b=qkv_b, o_w=o_w, o_b=o_b,
                    ln2_g=ones, ln2_b=zeros, ff1_w=f1w, ff1_b=f1b, ff2_w=f2w, ff2_b=f2b)
        for k, v in vals.items():
            e[k].append(v)
    encoder = {k: jnp.stack(v) for k, v in e.items()}
    encoder["norm_g"] = ones[None, :]
    encoder["norm_b"] = zeros[None, :]

    # ---- decoder (stacked over layers) ----
    d = {k: [] for k in ["ln1_g", "ln1_b", "sa_qkv_w", "sa_qkv_b", "sa_o_w", "sa_o_b",
                         "ln2_g", "ln2_b", "ca_qkv_w", "ca_qkv_b", "ca_o_w", "ca_o_b",
                         "ln3_g", "ln3_b", "ff1_w", "ff1_b", "ff2_w", "ff2_b"]}
    for _ in range(N_LAYERS):
        sa = attn_pack()
        ca = attn_pack()
        f1w, f1b = lin(D_MODEL, D_FF)
        f2w, f2b = lin(D_FF, D_MODEL)
        vals = dict(ln1_g=ones, ln1_b=zeros,
                    sa_qkv_w=sa[0], sa_qkv_b=sa[1], sa_o_w=sa[2], sa_o_b=sa[3],
                    ln2_g=ones, ln2_b=zeros,
                    ca_qkv_w=ca[0], ca_qkv_b=ca[1], ca_o_w=ca[2], ca_o_b=ca[3],
                    ln3_g=ones, ln3_b=zeros,
                    ff1_w=f1w, ff1_b=f1b, ff2_w=f2w, ff2_b=f2b)
        for k, v in vals.items():
            d[k].append(v)
    decoder = {k: jnp.stack(v) for k, v in d.items()}
    decoder["norm_g"] = ones[None, :]
    decoder["norm_b"] = zeros[None, :]

    gw, gb = lin(D_MODEL, VOCAB)

    return {
        "src_emb": jax.random.normal(next(keys), (VOCAB, D_MODEL), jnp.float32),
        "tgt_emb": jax.random.normal(next(keys), (VOCAB, D_MODEL), jnp.float32),
        "encoder": encoder,
        "decoder": decoder,
        "generator": {"w": gw, "b": gb},
    }


# ============================ main ============================

if __name__ == "__main__":
    B, S_SRC, S_TGT = 2, 8, 8
    key = jax.random.PRNGKey(0)
    k1, k2 = jax.random.split(key)
    src = jax.random.randint(k1, (B, S_SRC), 1, VOCAB, dtype=jnp.int32)
    tgt = jax.random.randint(k2, (B, S_TGT), 1, VOCAB, dtype=jnp.int32)
    src = src.at[1, -2:].set(0)   # pad tokens
    tgt = tgt.at[1, -1:].set(0)

    src_mask = (src != 0)[:, None, :].astype(jnp.float32)                     # (B, 1, S_src)
    subsequent = jnp.tril(jnp.ones((S_TGT, S_TGT), jnp.float32))
    tgt_mask = (tgt != 0)[:, None, :].astype(jnp.float32) * subsequent[None]  # (B, S_tgt, S_tgt)

    params = init_params(0)

    fwd = jax.jit(forward)
    out = fwd(params, src, tgt, src_mask, tgt_mask)       # (B, S_tgt, D_MODEL)
    logp = generate(params, out)                          # generator exercised separately
    jax.block_until_ready(out)
    jax.block_until_ready(logp)

    assert out.shape == (B, S_TGT, D_MODEL)
    assert logp.shape == (B, S_TGT, VOCAB)
    assert bool(jnp.all(jnp.isfinite(out)))
    assert bool(jnp.all(jnp.isfinite(logp)))
    print("KERNEL_OK")
</pallas_src>

<mosaic_0001>
module attributes {stable_mosaic.version = 11 : i64} {
  func.func @_encoder_decoder_kernel(%arg0: memref<16x32xf32, #tpu.memory_space<vmem>>, %arg1: memref<16x32xf32, #tpu.memory_space<vmem>>, %arg2: memref<2x1x8xf32, #tpu.memory_space<vmem>>, %arg3: memref<2x8x8xf32, #tpu.memory_space<vmem>>, %arg4: memref<2x32xf32, #tpu.memory_space<vmem>>, %arg5: memref<2x32xf32, #tpu.memory_space<vmem>>, %arg6: memref<2x32x96xf32, #tpu.memory_space<vmem>>, %arg7: memref<2x96xf32, #tpu.memory_space<vmem>>, %arg8: memref<2x32x32xf32, #tpu.memory_space<vmem>>, %arg9: memref<2x32xf32, #tpu.memory_space<vmem>>, %arg10: memref<2x32xf32, #tpu.memory_space<vmem>>, %arg11: memref<2x32xf32, #tpu.memory_space<vmem>>, %arg12: memref<2x32x64xf32, #tpu.memory_space<vmem>>, %arg13: memref<2x64xf32, #tpu.memory_space<vmem>>, %arg14: memref<2x64x32xf32, #tpu.memory_space<vmem>>, %arg15: memref<2x32xf32, #tpu.memory_space<vmem>>, %arg16: memref<1x32xf32, #tpu.memory_space<vmem>>, %arg17: memref<1x32xf32, #tpu.memory_space<vmem>>, %arg18: memref<2x32xf32, #tpu.memory_space<vmem>>, %arg19: memref<2x32xf32, #tpu.memory_space<vmem>>, %arg20: memref<2x32x96xf32, #tpu.memory_space<vmem>>, %arg21: memref<2x96xf32, #tpu.memory_space<vmem>>, %arg22: memref<2x32x32xf32, #tpu.memory_space<vmem>>, %arg23: memref<2x32xf32, #tpu.memory_space<vmem>>, %arg24: memref<2x32xf32, #tpu.memory_space<vmem>>, %arg25: memref<2x32xf32, #tpu.memory_space<vmem>>, %arg26: memref<2x32x96xf32, #tpu.memory_space<vmem>>, %arg27: memref<2x96xf32, #tpu.memory_space<vmem>>, %arg28: memref<2x32x32xf32, #tpu.memory_space<vmem>>, %arg29: memref<2x32xf32, #tpu.memory_space<vmem>>, %arg30: memref<2x32xf32, #tpu.memory_space<vmem>>, %arg31: memref<2x32xf32, #tpu.memory_space<vmem>>, %arg32: memref<2x32x64xf32, #tpu.memory_space<vmem>>, %arg33: memref<2x64xf32, #tpu.memory_space<vmem>>, %arg34: memref<2x64x32xf32, #tpu.memory_space<vmem>>, %arg35: memref<2x32xf32, #tpu.memory_space<vmem>>, %arg36: memref<1x32xf32, #tpu.memory_space<vmem>>, %arg37: memref<1x32xf32, #tpu.memory_space<vmem>>, %arg38: memref<16x32xf32, #tpu.memory_space<vmem>>) attributes {dimension_semantics = [], scalar_prefetch = 0 : i64, scratch_operands = 0 : i64, tpu.core_type = #tpu.core_type<tc>} {
    %c0 = arith.constant 0 : index
    %c0_0 = arith.constant 0 : index
    %c0_1 = arith.constant 0 : index
    %0 = vector.load %arg2[%c0, %c0_0, %c0_1] : memref<2x1x8xf32, #tpu.memory_space<vmem>>, vector<2x1x8xf32>
    %c0_2 = arith.constant 0 : index
    %c0_3 = arith.constant 0 : index
    %c0_4 = arith.constant 0 : index
    %1 = vector.load %arg3[%c0_2, %c0_3, %c0_4] : memref<2x8x8xf32, #tpu.memory_space<vmem>>, vector<2x8x8xf32>
    %2 = vector.shape_cast %0 : vector<2x1x8xf32> to vector<2x1x8xf32>
    %3 = vector.broadcast %2 : vector<2x1x8xf32> to vector<2x8x8xf32>
    %cst = arith.constant 0.000000e+00 : f32
    %4 = vector.broadcast %cst : f32 to vector<2x8x8xf32>
    %5 = arith.cmpf ogt, %3, %4 : vector<2x8x8xf32>
    %cst_5 = arith.constant 0.000000e+00 : f32
    %6 = vector.broadcast %cst_5 : f32 to vector<2x8x8xf32>
    %7 = arith.cmpf ogt, %1, %6 : vector<2x8x8xf32>
    %8 = vector.shape_cast %0 : vector<2x1x8xf32> to vector<2x1x8xf32>
    %9 = vector.broadcast %8 : vector<2x1x8xf32> to vector<2x8x8xf32>
    %cst_6 = arith.constant 0.000000e+00 : f32
    %10 = vector.broadcast %cst_6 : f32 to vector<2x8x8xf32>
    %11 = arith.cmpf ogt, %9, %10 : vector<2x8x8xf32>
    %c0_7 = arith.constant 0 : index
    %c0_8 = arith.constant 0 : index
    %12 = vector.load %arg0[%c0_7, %c0_8] : memref<16x32xf32, #tpu.memory_space<vmem>>, vector<16x32xf32>
    %c0_9 = arith.constant 0 : index
    %c0_10 = arith.constant 0 : index
    %13 = vector.load %arg4[%c0_9, %c0_10] : memref<2x32xf32, #tpu.memory_space<vmem>>, vector<1x32xf32>
    %14 = vector.shape_cast %13 : vector<1x32xf32> to vector<32xf32>
    %c0_11 = arith.constant 0 : index
    %c0_12 = arith.constant 0 : index
    %15 = vector.load %arg5[%c0_11, %c0_12] : memref<2x32xf32, #tpu.memory_space<vmem>>, vector<1x32xf32>
    %16 = vector.shape_cast %15 : vector<1x32xf32> to vector<32xf32>
    %cst_13 = arith.constant dense<0.000000e+00> : vector<16xf32>
    %17 = vector.multi_reduction <add>, %12, %cst_13 [1] : vector<16x32xf32> to vector<16xf32>
    %18 = vector.shape_cast %17 : vector<16xf32> to vector<16x1xf32>
    %cst_14 = arith.constant 3.200000e+01 : f32
    %19 = vector.broadcast %cst_14 : f32 to vector<16x1xf32>
    %20 = arith.divf %18, %19 : vector<16x1xf32>
    %21 = vector.broadcast %20 : vector<16x1xf32> to vector<16x32xf32>
    %22 = arith.subf %12, %21 : vector<16x32xf32>
    %23 = arith.mulf %22, %22 : vector<16x32xf32>
    %cst_15 = arith.constant dense<0.000000e+00> : vector<16xf32>
    %24 = vector.multi_reduction <add>, %23, %cst_15 [1] : vector<16x32xf32> to vector<16xf32>
    %25 = vector.shape_cast %24 : vector<16xf32> to vector<16x1xf32>
    %cst_16 = arith.constant 0.0322580636 : f32
    %26 = vector.broadcast %cst_16 : f32 to vector<16x1xf32>
    %27 = arith.mulf %25, %26 : vector<16x1xf32>
    %28 = math.sqrt %27 : vector<16x1xf32>
    %cst_17 = arith.constant 9.99999997E-7 : f32
    %29 = vector.broadcast %cst_17 : f32 to vector<16x1xf32>
    %30 = arith.addf %28, %29 : vector<16x1xf32>
    %31 = tpu.reciprocal %30 {approx = true} : vector<16x1xf32> -> vector<16x1xf32>
    %32 = vector.shape_cast %14 : vector<32xf32> to vector<1x32xf32>
    %33 = vector.broadcast %32 : vector<1x32xf32> to vector<16x32xf32>
    %34 = arith.mulf %33, %22 : vector<16x32xf32>
    %35 = vector.broadcast %31 : vector<16x1xf32> to vector<16x32xf32>
    %36 = arith.mulf %34, %35 : vector<16x32xf32>
    %37 = vector.shape_cast %16 : vector<32xf32> to vector<1x32xf32>
    %38 = vector.broadcast %37 : vector<1x32xf32> to vector<16x32xf32>
    %39 = arith.addf %36, %38 : vector<16x32xf32>
    %c0_18 = arith.constant 0 : index
    %c0_19 = arith.constant 0 : index
    %c0_20 = arith.constant 0 : index
    %40 = vector.load %arg6[%c0_18, %c0_19, %c0_20] : memref<2x32x96xf32, #tpu.memory_space<vmem>>, vector<1x32x96xf32>
    %41 = vector.shape_cast %40 : vector<1x32x96xf32> to vector<32x96xf32>
    %c0_21 = arith.constant 0 : index
    %c0_22 = arith.constant 0 : index
    %42 = vector.load %arg7[%c0_21, %c0_22] : memref<2x96xf32, #tpu.memory_space<vmem>>, vector<1x96xf32>
    %43 = vector.shape_cast %42 : vector<1x96xf32> to vector<96xf32>
    %c0_23 = arith.constant 0 : index
    %c0_24 = arith.constant 0 : index
    %c0_25 = arith.constant 0 : index
    %44 = vector.load %arg8[%c0_23, %c0_24, %c0_25] : memref<2x32x32xf32, #tpu.memory_space<vmem>>, vector<1x32x32xf32>
    %45 = vector.shape_cast %44 : vector<1x32x32xf32> to vector<32x32xf32>
    %c0_26 = arith.constant 0 : index
    %c0_27 = arith.constant 0 : index
    %46 = vector.load %arg9[%c0_26, %c0_27] : memref<2x32xf32, #tpu.memory_space<vmem>>, vector<1x32xf32>
    %47 = vector.shape_cast %46 : vector<1x32xf32> to vector<32xf32>
    %cst_28 = arith.constant dense<0.000000e+00> : vector<16x96xf32>
    %48 = tpu.matmul %39, %41, %cst_28 {dimension_numbers = #tpu.dot_dimension_numbers<[1], [0], [0], [1], [0, 0, 1, 1], [], []>} : vector<16x32xf32>, vector<32x96xf32>, vector<16x96xf32> -> vector<16x96xf32>
    %49 = vector.shape_cast %43 : vector<96xf32> to vector<1x96xf32>
    %50 = vector.broadcast %49 : vector<1x96xf32> to vector<16x96xf32>
    %51 = arith.addf %48, %50 : vector<16x96xf32>
    %52 = vector.extract_strided_slice %51 {offsets = [0, 0], sizes = [16, 32], strides = [1, 1]} : vector<16x96xf32> to vector<16x32xf32>
    %53 = vector.extract_strided_slice %51 {offsets = [0, 32], sizes = [16, 32], strides = [1, 1]} : vector<16x96xf32> to vector<16x32xf32>
    %54 = vector.extract_strided_slice %51 {offsets = [0, 64], sizes = [16, 32], strides = [1, 1]} : vector<16x96xf32> to vector<16x32xf32>
    %55 = vector.shape_cast %52 : vector<16x32xf32> to vector<2x8x32xf32>
    %56 = vector.shape_cast %53 : vector<16x32xf32> to vector<2x8x32xf32>
    %57 = vector.shape_cast %54 : vector<16x32xf32> to vector<2x8x32xf32>
    %58 = vector.shape_cast %47 : vector<32xf32> to vector<1x32xf32>
    %59 = vector.shape_cast %58 : vector<1x32xf32> to vector<1x32xf32>
    %60 = vector.broadcast %59 : vector<1x32xf32> to vector<16x32xf32>
    %61 = vector.extract_strided_slice %55 {offsets = [0, 0, 0], sizes = [2, 8, 8], strides = [1, 1, 1]} : vector<2x8x32xf32> to vector<2x8x8xf32>
    %62 = vector.extract_strided_slice %56 {offsets = [0, 0, 0], sizes = [2, 8, 8], strides = [1, 1, 1]} : vector<2x8x32xf32> to vector<2x8x8xf32>
    "tpu.trace_start"() <{level = 10 : i32, message = "bqd,bkd->bqk"}> : () -> ()
    %cst_29 = arith.constant dense<0.000000e+00> : vector<2x8x8xf32>
    %63 = tpu.matmul %61, %62, %cst_29 {dimension_numbers = #tpu.dot_dimension_numbers<[2], [2], [1], [1], [0, 0, 0, 1, 1, 1], [0], [0]>} : vector<2x8x8xf32>, vector<2x8x8xf32>, vector<2x8x8xf32> -> vector<2x8x8xf32>
    "tpu.trace_stop"() : () -> ()
    %cst_30 = arith.constant 0.353553385 : f32
    %64 = vector.broadcast %cst_30 : f32 to vector<2x8x8xf32>
    %65 = arith.mulf %63, %64 : vector<2x8x8xf32>
    %cst_31 = arith.constant -1.000000e+09 : f32
    %66 = vector.broadcast %cst_31 : f32 to vector<2x8x8xf32>
    %67 = arith.select %5, %65, %66 : vector<2x8x8xi1>, vector<2x8x8xf32>
    %cst_32 = arith.constant dense<0xFF800000> : vector<2x8xf32>
    %68 = vector.multi_reduction <maximumf>, %67, %cst_32 [2] : vector<2x8x8xf32> to vector<2x8xf32>
    %69 = vector.shape_cast %68 : vector<2x8xf32> to vector<2x8x1xf32>
    %70 = vector.broadcast %69 : vector<2x8x1xf32> to vector<2x8x8xf32>
    %71 = arith.subf %67, %70 : vector<2x8x8xf32>
    %72 = math.exp %71 : vector<2x8x8xf32>
    %cst_33 = arith.constant dense<0.000000e+00> : vector<2x8xf32>
    %73 = vector.multi_reduction <add>, %72, %cst_33 [2] : vector<2x8x8xf32> to vector<2x8xf32>
    %74 = vector.shape_cast %73 : vector<2x8xf32> to vector<2x8x1xf32>
    %75 = tpu.reciprocal %74 {approx = true} : vector<2x8x1xf32> -> vector<2x8x1xf32>
    %76 = vector.broadcast %75 : vector<2x8x1xf32> to vector<2x8x8xf32>
    %77 = arith.mulf %72, %76 : vector<2x8x8xf32>
    %78 = vector.extract_strided_slice %57 {offsets = [0, 0, 0], sizes = [2, 8, 8], strides = [1, 1, 1]} : vector<2x8x32xf32> to vector<2x8x8xf32>
    "tpu.trace_start"() <{level = 10 : i32, message = "bqk,bkd->bqd"}> : () -> ()
    %cst_34 = arith.constant dense<0.000000e+00> : vector<2x8x8xf32>
    %79 = tpu.matmul %77, %78, %cst_34 {dimension_numbers = #tpu.dot_dimension_numbers<[2], [1], [1], [2], [0, 0, 0, 1, 1, 2], [0], [0]>} : vector<2x8x8xf32>, vector<2x8x8xf32>, vector<2x8x8xf32> -> vector<2x8x8xf32>
    "tpu.trace_stop"() : () -> ()
    %80 = vector.shape_cast %79 : vector<2x8x8xf32> to vector<16x8xf32>
    %81 = vector.extract_strided_slice %45 {offsets = [0, 0], sizes = [8, 32], strides = [1, 1]} : vector<32x32xf32> to vector<8x32xf32>
    %cst_35 = arith.constant dense<0.000000e+00> : vector<16x32xf32>
    %82 = tpu.matmul %80, %81, %cst_35 {dimension_numbers = #tpu.dot_dimension_numbers<[1], [0], [0], [1], [0, 0, 1, 1], [], []>} : vector<16x8xf32>, vector<8x32xf32>, vector<16x32xf32> -> vector<16x32xf32>
    %83 = arith.addf %60, %82 : vector<16x32xf32>
    %84 = vector.extract_strided_slice %55 {offsets = [0, 0, 8], sizes = [2, 8, 8], strides = [1, 1, 1]} : vector<2x8x32xf32> to vector<2x8x8xf32>
    %85 = vector.extract_strided_slice %56 {offsets = [0, 0, 8], sizes = [2, 8, 8], strides = [1, 1, 1]} : vector<2x8x32xf32> to vector<2x8x8xf32>
    "tpu.trace_start"() <{level = 10 : i32, message = "bqd,bkd->bqk"}> : () -> ()
    %cst_36 = arith.constant dense<0.000000e+00> : vector<2x8x8xf32>
    %86 = tpu.matmul %84, %85, %cst_36 {dimension_numbers = #tpu.dot_dimension_numbers<[2], [2], [1], [1], [0, 0, 0, 1, 1, 1], [0], [0]>} : vector<2x8x8xf32>, vector<2x8x8xf32>, vector<2x8x8xf32> -> vector<2x8x8xf32>
    "tpu.trace_stop"() : () -> ()
    %cst_37 = arith.constant 0.353553385 : f32
    %87 = vector.broadcast %cst_37 : f32 to vector<2x8x8xf32>
    %88 = arith.mulf %86, %87 : vector<2x8x8xf32>
    %cst_38 = arith.constant -1.000000e+09 : f32
    %89 = vector.broadcast %cst_38 : f32 to vector<2x8x8xf32>
    %90 = arith.select %5, %88, %89 : vector<2x8x8xi1>, vector<2x8x8xf32>
    %cst_39 = arith.constant dense<0xFF800000> : vector<2x8xf32>
    %91 = vector.multi_reduction <maximumf>, %90, %cst_39 [2] : vector<2x8x8xf32> to vector<2x8xf32>
    %92 = vector.shape_cast %91 : vector<2x8xf32> to vector<2x8x1xf32>
    %93 = vector.broadcast %92 : vector<2x8x1xf32> to vector<2x8x8xf32>
    %94 = arith.subf %90, %93 : vector<2x8x8xf32>
    %95 = math.exp %94 : vector<2x8x8xf32>
    %cst_40 = arith.constant dense<0.000000e+00> : vector<2x8xf32>
    %96 = vector.multi_reduction <add>, %95, %cst_40 [2] : vector<2x8x8xf32> to vector<2x8xf32>
    %97 = vector.shape_cast %96 : vector<2x8xf32> to vector<2x8x1xf32>
    %98 = tpu.reciprocal %97 {approx = true} : vector<2x8x1xf32> -> vector<2x8x1xf32>
    %99 = vector.broadcast %98 : vector<2x8x1xf32> to vector<2x8x8xf32>
    %100 = arith.mulf %95, %99 : vector<2x8x8xf32>
    %101 = vector.extract_strided_slice %57 {offsets = [0, 0, 8], sizes = [2, 8, 8], strides = [1, 1, 1]} : vector<2x8x32xf32> to vector<2x8x8xf32>
    "tpu.trace_start"() <{level = 10 : i32, message = "bqk,bkd->bqd"}> : () -> ()
    %cst_41 = arith.constant dense<0.000000e+00> : vector<2x8x8xf32>
    %102 = tpu.matmul %100, %101, %cst_41 {dimension_numbers = #tpu.dot_dimension_numbers<[2], [1], [1], [2], [0, 0, 0, 1, 1, 2], [0], [0]>} : vector<2x8x8xf32>, vector<2x8x8xf32>, vector<2x8x8xf32> -> vector<2x8x8xf32>
    "tpu.trace_stop"() : () -> ()
    %103 = vector.shape_cast %102 : vector<2x8x8xf32> to vector<16x8xf32>
    %104 = vector.extract_strided_slice %45 {offsets = [8, 0], sizes = [8, 32], strides = [1, 1]} : vector<32x32xf32> to vector<8x32xf32>
    %cst_42 = arith.constant dense<0.000000e+00> : vector<16x32xf32>
    %105 = tpu.matmul %103, %104, %cst_42 {dimension_numbers = #tpu.dot_dimension_numbers<[1], [0], [0], [1], [0, 0, 1, 1], [], []>} : vector<16x8xf32>, vector<8x32xf32>, vector<16x32xf32> -> vector<16x32xf32>
    %106 = arith.addf %83, %105 : vector<16x32xf32>
    %107 = vector.extract_strided_slice %55 {offsets = [0, 0, 16], sizes = [2, 8, 8], strides = [1, 1, 1]} : vector<2x8x32xf32> to vector<2x8x8xf32>
    %108 = vector.extract_strided_slice %56 {offsets = [0, 0, 16], sizes = [2, 8, 8], strides = [1, 1, 1]} : vector<2x8x32xf32> to vector<2x8x8xf32>
    "tpu.trace_start"() <{level = 10 : i32, message = "bqd,bkd->bqk"}> : () -> ()
    %cst_43 = arith.constant dense<0.000000e+00> : vector<2x8x8xf32>
    %109 = tpu.matmul %107, %108, %cst_43 {dimension_numbers = #tpu.dot_dimension_numbers<[2], [2], [1], [1], [0, 0, 0, 1, 1, 1], [0], [0]>} : vector<2x8x8xf32>, vector<2x8x8xf32>, vector<2x8x8xf32> -> vector<2x8x8xf32>
    "tpu.trace_stop"() : () -> ()
    %cst_44 = arith.constant 0.353553385 : f32
    %110 = vector.broadcast %cst_44 : f32 to vector<2x8x8xf32>
    %111 = arith.mulf %109, %110 : vector<2x8x8xf32>
    %cst_45 = arith.constant -1.000000e+09 : f32
    %112 = vector.broadcast %cst_45 : f32 to vector<2x8x8xf32>
    %113 = arith.select %5, %111, %112 : vector<2x8x8xi1>, vector<2x8x8xf32>
    %cst_46 = arith.constant dense<0xFF800000> : vector<2x8xf32>
    %114 = vector.multi_reduction <maximumf>, %113, %cst_46 [2] : vector<2x8x8xf32> to vector<2x8xf32>
    %115 = vector.shape_cast %114 : vector<2x8xf32> to vector<2x8x1xf32>
    %116 = vector.broadcast %115 : vector<2x8x1xf32> to vector<2x8x8xf32>
    %117 = arith.subf %113, %116 : vector<2x8x8xf32>
    %118 = math.exp %117 : vector<2x8x8xf32>
    %cst_47 = arith.constant dense<0.000000e+00> : vector<2x8xf32>
    %119 = vector.multi_reduction <add>, %118, %cst_47 [2] : vector<2x8x8xf32> to vector<2x8xf32>
    %120 = vector.shape_cast %119 : vector<2x8xf32> to vector<2x8x1xf32>
    %121 = tpu.reciprocal %120 {approx = true} : vector<2x8x1xf32> -> vector<2x8x1xf32>
    %122 = vector.broadcast %121 : vector<2x8x1xf32> to vector<2x8x8xf32>
    %123 = arith.mulf %118, %122 : vector<2x8x8xf32>
    %124 = vector.extract_strided_slice %57 {offsets = [0, 0, 16], sizes = [2, 8, 8], strides = [1, 1, 1]} : vector<2x8x32xf32> to vector<2x8x8xf32>
    "tpu.trace_start"() <{level = 10 : i32, message = "bqk,bkd->bqd"}> : () -> ()
    %cst_48 = arith.constant dense<0.000000e+00> : vector<2x8x8xf32>
    %125 = tpu.matmul %123, %124, %cst_48 {dimension_numbers = #tpu.dot_dimension_numbers<[2], [1], [1], [2], [0, 0, 0, 1, 1, 2], [0], [0]>} : vector<2x8x8xf32>, vector<2x8x8xf32>, vector<2x8x8xf32> -> vector<2x8x8xf32>
    "tpu.trace_stop"() : () -> ()
    %126 = vector.shape_cast %125 : vector<2x8x8xf32> to vector<16x8xf32>
    %127 = vector.extract_strided_slice %45 {offsets = [16, 0], sizes = [8, 32], strides = [1, 1]} : vector<32x32xf32> to vector<8x32xf32>
    %cst_49 = arith.constant dense<0.000000e+00> : vector<16x32xf32>
    %128 = tpu.matmul %126, %127, %cst_49 {dimension_numbers = #tpu.dot_dimension_numbers<[1], [0], [0], [1], [0, 0, 1, 1], [], []>} : vector<16x8xf32>, vector<8x32xf32>, vector<16x32xf32> -> vector<16x32xf32>
    %129 = arith.addf %106, %128 : vector<16x32xf32>
    %130 = vector.extract_strided_slice %55 {offsets = [0, 0, 24], sizes = [2, 8, 8], strides = [1, 1, 1]} : vector<2x8x32xf32> to vector<2x8x8xf32>
    %131 = vector.extract_strided_slice %56 {offsets = [0, 0, 24], sizes = [2, 8, 8], strides = [1, 1, 1]} : vector<2x8x32xf32> to vector<2x8x8xf32>
    "tpu.trace_start"() <{level = 10 : i32, message = "bqd,bkd->bqk"}> : () -> ()
    %cst_50 = arith.constant dense<0.000000e+00> : vector<2x8x8xf32>
    %132 = tpu.matmul %130, %131, %cst_50 {dimension_numbers = #tpu.dot_dimension_numbers<[2], [2], [1], [1], [0, 0, 0, 1, 1, 1], [0], [0]>} : vector<2x8x8xf32>, vector<2x8x8xf32>, vector<2x8x8xf32> -> vector<2x8x8xf32>
    "tpu.trace_stop"() : () -> ()
    %cst_51 = arith.constant 0.353553385 : f32
    %133 = vector.broadcast %cst_51 : f32 to vector<2x8x8xf32>
    %134 = arith.mulf %132, %133 : vector<2x8x8xf32>
    %cst_52 = arith.constant -1.000000e+09 : f32
    %135 = vector.broadcast %cst_52 : f32 to vector<2x8x8xf32>
    %136 = arith.select %5, %134, %135 : vector<2x8x8xi1>, vector<2x8x8xf32>
    %cst_53 = arith.constant dense<0xFF800000> : vector<2x8xf32>
    %137 = vector.multi_reduction <maximumf>, %136, %cst_53 [2] : vector<2x8x8xf32> to vector<2x8xf32>
    %138 = vector.shape_cast %137 : vector<2x8xf32> to vector<2x8x1xf32>
    %139 = vector.broadcast %138 : vector<2x8x1xf32> to vector<2x8x8xf32>
    %140 = arith.subf %136, %139 : vector<2x8x8xf32>
    %141 = math.exp %140 : vector<2x8x8xf32>
    %cst_54 = arith.constant dense<0.000000e+00> : vector<2x8xf32>
    %142 = vector.multi_reduction <add>, %141, %cst_54 [2] : vector<2x8x8xf32> to vector<2x8xf32>
    %143 = vector.shape_cast %142 : vector<2x8xf32> to vector<2x8x1xf32>
    %144 = tpu.reciprocal %143 {approx = true} : vector<2x8x1xf32> -> vector<2x8x1xf32>
    %145 = vector.broadcast %144 : vector<2x8x1xf32> to vector<2x8x8xf32>
    %146 = arith.mulf %141, %145 : vector<2x8x8xf32>
    %147 = vector.extract_strided_slice %57 {offsets = [0, 0, 24], sizes = [2, 8, 8], strides = [1, 1, 1]} : vector<2x8x32xf32> to vector<2x8x8xf32>
    "tpu.trace_start"() <{level = 10 : i32, message = "bqk,bkd->bqd"}> : () -> ()
    %cst_55 = arith.constant dense<0.000000e+00> : vector<2x8x8xf32>
    %148 = tpu.matmul %146, %147, %cst_55 {dimension_numbers = #tpu.dot_dimension_numbers<[2], [1], [1], [2], [0, 0, 0, 1, 1, 2], [0], [0]>} : vector<2x8x8xf32>, vector<2x8x8xf32>, vector<2x8x8xf32> -> vector<2x8x8xf32>
    "tpu.trace_stop"() : () -> ()
    %149 = vector.shape_cast %148 : vector<2x8x8xf32> to vector<16x8xf32>
    %150 = vector.extract_strided_slice %45 {offsets = [24, 0], sizes = [8, 32], strides = [1, 1]} : vector<32x32xf32> to vector<8x32xf32>
    %cst_56 = arith.constant dense<0.000000e+00> : vector<16x32xf32>
    %151 = tpu.matmul %149, %150, %cst_56 {dimension_numbers = #tpu.dot_dimension_numbers<[1], [0], [0], [1], [0, 0, 1, 1], [], []>} : vector<16x8xf32>, vector<8x32xf32>, vector<16x32xf32> -> vector<16x32xf32>
    %152 = arith.addf %129, %151 : vector<16x32xf32>
    %153 = arith.addf %12, %152 : vector<16x32xf32>
    %c0_57 = arith.constant 0 : index
    %c0_58 = arith.constant 0 : index
    %154 = vector.load %arg10[%c0_57, %c0_58] : memref<2x32xf32, #tpu.memory_space<vmem>>, vector<1x32xf32>
    %155 = vector.shape_cast %154 : vector<1x32xf32> to vector<32xf32>
    %c0_59 = arith.constant 0 : index
    %c0_60 = arith.constant 0 : index
    %156 = vector.load %arg11[%c0_59, %c0_60] : memref<2x32xf32, #tpu.memory_space<vmem>>, vector<1x32xf32>
    %157 = vector.shape_cast %156 : vector<1x32xf32> to vector<32xf32>
    %cst_61 = arith.constant dense<0.000000e+00> : vector<16xf32>
    %158 = vector.multi_reduction <add>, %153, %cst_61 [1] : vector<16x32xf32> to vector<16xf32>
    %159 = vector.shape_cast %158 : vector<16xf32> to vector<16x1xf32>
    %cst_62 = arith.constant 3.200000e+01 : f32
    %160 = vector.broadcast %cst_62 : f32 to vector<16x1xf32>
    %161 = arith.divf %159, %160 : vector<16x1xf32>
    %162 = vector.broadcast %161 : vector<16x1xf32> to vector<16x32xf32>
    %163 = arith.subf %153, %162 : vector<16x32xf32>
    %164 = arith.mulf %163, %163 : vector<16x32xf32>
    %cst_63 = arith.constant dense<0.000000e+00> : vector<16xf32>
    %165 = vector.multi_reduction <add>, %164, %cst_63 [1] : vector<16x32xf32> to vector<16xf32>
    %166 = vector.shape_cast %165 : vector<16xf32> to vector<16x1xf32>
    %cst_64 = arith.constant 0.0322580636 : f32
    %167 = vector.broadcast %cst_64 : f32 to vector<16x1xf32>
    %168 = arith.mulf %166, %167 : vector<16x1xf32>
    %169 = math.sqrt %168 : vector<16x1xf32>
    %cst_65 = arith.constant 9.99999997E-7 : f32
    %170 = vector.broadcast %cst_65 : f32 to vector<16x1xf32>
    %171 = arith.addf %169, %170 : vector<16x1xf32>
    %172 = tpu.reciprocal %171 {approx = true} : vector<16x1xf32> -> vector<16x1xf32>
    %173 = vector.shape_cast %155 : vector<32xf32> to vector<1x32xf32>
    %174 = vector.broadcast %173 : vector<1x32xf32> to vector<16x32xf32>
    %175 = arith.mulf %174, %163 : vector<16x32xf32>
    %176 = vector.broadcast %172 : vector<16x1xf32> to vector<16x32xf32>
    %177 = arith.mulf %175, %176 : vector<16x32xf32>
    %178 = vector.shape_cast %157 : vector<32xf32> to vector<1x32xf32>
    %179 = vector.broadcast %178 : vector<1x32xf32> to vector<16x32xf32>
    %180 = arith.addf %177, %179 : vector<16x32xf32>
    %c0_66 = arith.constant 0 : index
    %c0_67 = arith.constant 0 : index
    %c0_68 = arith.constant 0 : index
    %181 = vector.load %arg12[%c0_66, %c0_67, %c0_68] : memref<2x32x64xf32, #tpu.memory_space<vmem>>, vector<1x32x64xf32>
    %182 = vector.shape_cast %181 : vector<1x32x64xf32> to vector<32x64xf32>
    %c0_69 = arith.constant 0 : index
    %c0_70 = arith.constant 0 : index
    %183 = vector.load %arg13[%c0_69, %c0_70] : memref<2x64xf32, #tpu.memory_space<vmem>>, vector<1x64xf32>
    %184 = vector.shape_cast %183 : vector<1x64xf32> to vector<64xf32>
    %c0_71 = arith.constant 0 : index
    %c0_72 = arith.constant 0 : index
    %c0_73 = arith.constant 0 : index
    %185 = vector.load %arg14[%c0_71, %c0_72, %c0_73] : memref<2x64x32xf32, #tpu.memory_space<vmem>>, vector<1x64x32xf32>
    %186 = vector.shape_cast %185 : vector<1x64x32xf32> to vector<64x32xf32>
    %c0_74 = arith.constant 0 : index
    %c0_75 = arith.constant 0 : index
    %187 = vector.load %arg15[%c0_74, %c0_75] : memref<2x32xf32, #tpu.memory_space<vmem>>, vector<1x32xf32>
    %188 = vector.shape_cast %187 : vector<1x32xf32> to vector<32xf32>
    %cst_76 = arith.constant dense<0.000000e+00> : vector<16x64xf32>
    %189 = tpu.matmul %180, %182, %cst_76 {dimension_numbers = #tpu.dot_dimension_numbers<[1], [0], [0], [1], [0, 0, 1, 1], [], []>} : vector<16x32xf32>, vector<32x64xf32>, vector<16x64xf32> -> vector<16x64xf32>
    %190 = vector.shape_cast %184 : vector<64xf32> to vector<1x64xf32>
    %191 = vector.broadcast %190 : vector<1x64xf32> to vector<16x64xf32>
    %192 = arith.addf %189, %191 : vector<16x64xf32>
    %cst_77 = arith.constant 0.000000e+00 : f32
    %193 = vector.broadcast %cst_77 : f32 to vector<16x64xf32>
    %194 = arith.maximumf %192, %193 : vector<16x64xf32>
    %cst_78 = arith.constant dense<0.000000e+00> : vector<16x32xf32>
    %195 = tpu.matmul %194, %186, %cst_78 {dimension_numbers = #tpu.dot_dimension_numbers<[1], [0], [0], [1], [0, 0, 1, 1], [], []>} : vector<16x64xf32>, vector<64x32xf32>, vector<16x32xf32> -> vector<16x32xf32>
    %196 = vector.shape_cast %188 : vector<32xf32> to vector<1x32xf32>
    %197 = vector.broadcast %196 : vector<1x32xf32> to vector<16x32xf32>
    %198 = arith.addf %195, %197 : vector<16x32xf32>
    %199 = arith.addf %153, %198 : vector<16x32xf32>
    %c1 = arith.constant 1 : index
    %c0_79 = arith.constant 0 : index
    %200 = vector.load %arg4[%c1, %c0_79] : memref<2x32xf32, #tpu.memory_space<vmem>>, vector<1x32xf32>
    %201 = vector.shape_cast %200 : vector<1x32xf32> to vector<32xf32>
    %c1_80 = arith.constant 1 : index
    %c0_81 = arith.constant 0 : index
    %202 = vector.load %arg5[%c1_80, %c0_81] : memref<2x32xf32, #tpu.memory_space<vmem>>, vector<1x32xf32>
    %203 = vector.shape_cast %202 : vector<1x32xf32> to vector<32xf32>
    %cst_82 = arith.constant dense<0.000000e+00> : vector<16xf32>
    %204 = vector.multi_reduction <add>, %199, %cst_82 [1] : vector<16x32xf32> to vector<16xf32>
    %205 = vector.shape_cast %204 : vector<16xf32> to vector<16x1xf32>
    %cst_83 = arith.constant 3.200000e+01 : f32
    %206 = vector.broadcast %cst_83 : f32 to vector<16x1xf32>
    %207 = arith.divf %205, %206 : vector<16x1xf32>
    %208 = vector.broadcast %207 : vector<16x1xf32> to vector<16x32xf32>
    %209 = arith.subf %199, %208 : vector<16x32xf32>
    %210 = arith.mulf %209, %209 : vector<16x32xf32>
    %cst_84 = arith.constant dense<0.000000e+00> : vector<16xf32>
    %211 = vector.multi_reduction <add>, %210, %cst_84 [1] : vector<16x32xf32> to vector<16xf32>
    %212 = vector.shape_cast %211 : vector<16xf32> to vector<16x1xf32>
    %cst_85 = arith.constant 0.0322580636 : f32
    %213 = vector.broadcast %cst_85 : f32 to vector<16x1xf32>
    %214 = arith.mulf %212, %213 : vector<16x1xf32>
    %215 = math.sqrt %214 : vector<16x1xf32>
    %cst_86 = arith.constant 9.99999997E-7 : f32
    %216 = vector.broadcast %cst_86 : f32 to vector<16x1xf32>
    %217 = arith.addf %215, %216 : vector<16x1xf32>
    %218 = tpu.reciprocal %217 {approx = true} : vector<16x1xf32> -> vector<16x1xf32>
    %219 = vector.shape_cast %201 : vector<32xf32> to vector<1x32xf32>
    %220 = vector.broadcast %219 : vector<1x32xf32> to vector<16x32xf32>
    %221 = arith.mulf %220, %209 : vector<16x32xf32>
    %222 = vector.broadcast %218 : vector<16x1xf32> to vector<16x32xf32>
    %223 = arith.mulf %221, %222 : vector<16x32xf32>
    %224 = vector.shape_cast %203 : vector<32xf32> to vector<1x32xf32>
    %225 = vector.broadcast %224 : vector<1x32xf32> to vector<16x32xf32>
    %226 = arith.addf %223, %225 : vector<16x32xf32>
    %c1_87 = arith.constant 1 : index
    %c0_88 = arith.constant 0 : index
    %c0_89 = arith.constant 0 : index
    %227 = vector.load %arg6[%c1_87, %c0_88, %c0_89] : memref<2x32x96xf32, #tpu.memory_space<vmem>>, vector<1x32x96xf32>
    %228 = vector.shape_cast %227 : vector<1x32x96xf32> to vector<32x96xf32>
    %c1_90 = arith.constant 1 : index
    %c0_91 = arith.constant 0 : index
    %229 = vector.load %arg7[%c1_90, %c0_91] : memref<2x96xf32, #tpu.memory_space<vmem>>, vector<1x96xf32>
    %230 = vector.shape_cast %229 : vector<1x96xf32> to vector<96xf32>
    %c1_92 = arith.constant 1 : index
    %c0_93 = arith.constant 0 : index
    %c0_94 = arith.constant 0 : index
    %231 = vector.load %arg8[%c1_92, %c0_93, %c0_94] : memref<2x32x32xf32, #tpu.memory_space<vmem>>, vector<1x32x32xf32>
    %232 = vector.shape_cast %231 : vector<1x32x32xf32> to vector<32x32xf32>
    %c1_95 = arith.constant 1 : index
    %c0_96 = arith.constant 0 : index
    %233 = vector.load %arg9[%c1_95, %c0_96] : memref<2x32xf32, #tpu.memory_space<vmem>>, vector<1x32xf32>
    %234 = vector.shape_cast %233 : vector<1x32xf32> to vector<32xf32>
    %cst_97 = arith.constant dense<0.000000e+00> : vector<16x96xf32>
    %235 = tpu.matmul %226, %228, %cst_97 {dimension_numbers = #tpu.dot_dimension_numbers<[1], [0], [0], [1], [0, 0, 1, 1], [], []>} : vector<16x32xf32>, vector<32x96xf32>, vector<16x96xf32> -> vector<16x96xf32>
    %236 = vector.shape_cast %230 : vector<96xf32> to vector<1x96xf32>
    %237 = vector.broadcast %236 : vector<1x96xf32> to vector<16x96xf32>
    %238 = arith.addf %235, %237 : vector<16x96xf32>
    %239 = vector.extract_strided_slice %238 {offsets = [0, 0], sizes = [16, 32], strides = [1, 1]} : vector<16x96xf32> to vector<16x32xf32>
    %240 = vector.extract_strided_slice %238 {offsets = [0, 32], sizes = [16, 32], strides = [1, 1]} : vector<16x96xf32> to vector<16x32xf32>
    %241 = vector.extract_strided_slice %238 {offsets = [0, 64], sizes = [16, 32], strides = [1, 1]} : vector<16x96xf32> to vector<16x32xf32>
    %242 = vector.shape_cast %239 : vector<16x32xf32> to vector<2x8x32xf32>
    %243 = vector.shape_cast %240 : vector<16x32xf32> to vector<2x8x32xf32>
    %244 = vector.shape_cast %241 : vector<16x32xf32> to vector<2x8x32xf32>
    %245 = vector.shape_cast %234 : vector<32xf32> to vector<1x32xf32>
    %246 = vector.shape_cast %245 : vector<1x32xf32> to vector<1x32xf32>
    %247 = vector.broadcast %246 : vector<1x32xf32> to vector<16x32xf32>
    %248 = vector.extract_strided_slice %242 {offsets = [0, 0, 0], sizes = [2, 8, 8], strides = [1, 1, 1]} : vector<2x8x32xf32> to vector<2x8x8xf32>
    %249 = vector.extract_strided_slice %243 {offsets = [0, 0, 0], sizes = [2, 8, 8], strides = [1, 1, 1]} : vector<2x8x32xf32> to vector<2x8x8xf32>
    "tpu.trace_start"() <{level = 10 : i32, message = "bqd,bkd->bqk"}> : () -> ()
    %cst_98 = arith.constant dense<0.000000e+00> : vector<2x8x8xf32>
    %250 = tpu.matmul %248, %249, %cst_98 {dimension_numbers = #tpu.dot_dimension_numbers<[2], [2], [1], [1], [0, 0, 0, 1, 1, 1], [0], [0]>} : vector<2x8x8xf32>, vector<2x8x8xf32>, vector<2x8x8xf32> -> vector<2x8x8xf32>
    "tpu.trace_stop"() : () -> ()
    %cst_99 = arith.constant 0.353553385 : f32
    %251 = vector.broadcast %cst_99 : f32 to vector<2x8x8xf32>
    %252 = arith.mulf %250, %251 : vector<2x8x8xf32>
    %cst_100 = arith.constant -1.000000e+09 : f32
    %253 = vector.broadcast %cst_100 : f32 to vector<2x8x8xf32>
    %254 = arith.select %5, %252, %253 : vector<2x8x8xi1>, vector<2x8x8xf32>
    %cst_101 = arith.constant dense<0xFF800000> : vector<2x8xf32>
    %255 = vector.multi_reduction <maximumf>, %254, %cst_101 [2] : vector<2x8x8xf32> to vector<2x8xf32>
    %256 = vector.shape_cast %255 : vector<2x8xf32> to vector<2x8x1xf32>
    %257 = vector.broadcast %256 : vector<2x8x1xf32> to vector<2x8x8xf32>
    %258 = arith.subf %254, %257 : vector<2x8x8xf32>
    %259 = math.exp %258 : vector<2x8x8xf32>
    %cst_102 = arith.constant dense<0.000000e+00> : vector<2x8xf32>
    %260 = vector.multi_reduction <add>, %259, %cst_102 [2] : vector<2x8x8xf32> to vector<2x8xf32>
    %261 = vector.shape_cast %260 : vector<2x8xf32> to vector<2x8x1xf32>
    %262 = tpu.reciprocal %261 {approx = true} : vector<2x8x1xf32> -> vector<2x8x1xf32>
    %263 = vector.broadcast %262 : vector<2x8x1xf32> to vector<2x8x8xf32>
    %264 = arith.mulf %259, %263 : vector<2x8x8xf32>
    %265 = vector.extract_strided_slice %244 {offsets = [0, 0, 0], sizes = [2, 8, 8], strides = [1, 1, 1]} : vector<2x8x32xf32> to vector<2x8x8xf32>
    "tpu.trace_start"() <{level = 10 : i32, message = "bqk,bkd->bqd"}> : () -> ()
    %cst_103 = arith.constant dense<0.000000e+00> : vector<2x8x8xf32>
    %266 = tpu.matmul %264, %265, %cst_103 {dimension_numbers = #tpu.dot_dimension_numbers<[2], [1], [1], [2], [0, 0, 0, 1, 1, 2], [0], [0]>} : vector<2x8x8xf32>, vector<2x8x8xf32>, vector<2x8x8xf32> -> vector<2x8x8xf32>
    "tpu.trace_stop"() : () -> ()
    %267 = vector.shape_cast %266 : vector<2x8x8xf32> to vector<16x8xf32>
    %268 = vector.extract_strided_slice %232 {offsets = [0, 0], sizes = [8, 32], strides = [1, 1]} : vector<32x32xf32> to vector<8x32xf32>
    %cst_104 = arith.constant dense<0.000000e+00> : vector<16x32xf32>
    %269 = tpu.matmul %267, %268, %cst_104 {dimension_numbers = #tpu.dot_dimension_numbers<[1], [0], [0], [1], [0, 0, 1, 1], [], []>} : vector<16x8xf32>, vector<8x32xf32>, vector<16x32xf32> -> vector<16x32xf32>
    %270 = arith.addf %247, %269 : vector<16x32xf32>
    %271 = vector.extract_strided_slice %242 {offsets = [0, 0, 8], sizes = [2, 8, 8], strides = [1, 1, 1]} : vector<2x8x32xf32> to vector<2x8x8xf32>
    %272 = vector.extract_strided_slice %243 {offsets = [0, 0, 8], sizes = [2, 8, 8], strides = [1, 1, 1]} : vector<2x8x32xf32> to vector<2x8x8xf32>
    "tpu.trace_start"() <{level = 10 : i32, message = "bqd,bkd->bqk"}> : () -> ()
    %cst_105 = arith.constant dense<0.000000e+00> : vector<2x8x8xf32>
    %273 = tpu.matmul %271, %272, %cst_105 {dimension_numbers = #tpu.dot_dimension_numbers<[2], [2], [1], [1], [0, 0, 0, 1, 1, 1], [0], [0]>} : vector<2x8x8xf32>, vector<2x8x8xf32>, vector<2x8x8xf32> -> vector<2x8x8xf32>
    "tpu.trace_stop"() : () -> ()
    %cst_106 = arith.constant 0.353553385 : f32
    %274 = vector.broadcast %cst_106 : f32 to vector<2x8x8xf32>
    %275 = arith.mulf %273, %274 : vector<2x8x8xf32>
    %cst_107 = arith.constant -1.000000e+09 : f32
    %276 = vector.broadcast %cst_107 : f32 to vector<2x8x8xf32>
    %277 = arith.select %5, %275, %276 : vector<2x8x8xi1>, vector<2x8x8xf32>
    %cst_108 = arith.constant dense<0xFF800000> : vector<2x8xf32>
    %278 = vector.multi_reduction <maximumf>, %277, %cst_108 [2] : vector<2x8x8xf32> to vector<2x8xf32>
    %279 = vector.shape_cast %278 : vector<2x8xf32> to vector<2x8x1xf32>
    %280 = vector.broadcast %279 : vector<2x8x1xf32> to vector<2x8x8xf32>
    %281 = arith.subf %277, %280 : vector<2x8x8xf32>
    %282 = math.exp %281 : vector<2x8x8xf32>
    %cst_109 = arith.constant dense<0.000000e+00> : vector<2x8xf32>
    %283 = vector.multi_reduction <add>, %282, %cst_109 [2] : vector<2x8x8xf32> to vector<2x8xf32>
    %284 = vector.shape_cast %283 : vector<2x8xf32> to vector<2x8x1xf32>
    %285 = tpu.reciprocal %284 {approx = true} : vector<2x8x1xf32> -> vector<2x8x1xf32>
    %286 = vector.broadcast %285 : vector<2x8x1xf32> to vector<2x8x8xf32>
    %287 = arith.mulf %282, %286 : vector<2x8x8xf32>
    %288 = vector.extract_strided_slice %244 {offsets = [0, 0, 8], sizes = [2, 8, 8], strides = [1, 1, 1]} : vector<2x8x32xf32> to vector<2x8x8xf32>
    "tpu.trace_start"() <{level = 10 : i32, message = "bqk,bkd->bqd"}> : () -> ()
    %cst_110 = arith.constant dense<0.000000e+00> : vector<2x8x8xf32>
    %289 = tpu.matmul %287, %288, %cst_110 {dimension_numbers = #tpu.dot_dimension_numbers<[2], [1], [1], [2], [0, 0, 0, 1, 1, 2], [0], [0]>} : vector<2x8x8xf32>, vector<2x8x8xf32>, vector<2x8x8xf32> -> vector<2x8x8xf32>
    "tpu.trace_stop"() : () -> ()
    %290 = vector.shape_cast %289 : vector<2x8x8xf32> to vector<16x8xf32>
    %291 = vector.extract_strided_slice %232 {offsets = [8, 0], sizes = [8, 32], strides = [1, 1]} : vector<32x32xf32> to vector<8x32xf32>
    %cst_111 = arith.constant dense<0.000000e+00> : vector<16x32xf32>
    %292 = tpu.matmul %290, %291, %cst_111 {dimension_numbers = #tpu.dot_dimension_numbers<[1], [0], [0], [1], [0, 0, 1, 1], [], []>} : vector<16x8xf32>, vector<8x32xf32>, vector<16x32xf32> -> vector<16x32xf32>
    %293 = arith.addf %270, %292 : vector<16x32xf32>
    %294 = vector.extract_strided_slice %242 {offsets = [0, 0, 16], sizes = [2, 8, 8], strides = [1, 1, 1]} : vector<2x8x32xf32> to vector<2x8x8xf32>
    %295 = vector.extract_strided_slice %243 {offsets = [0, 0, 16], sizes = [2, 8, 8], strides = [1, 1, 1]} : vector<2x8x32xf32> to vector<2x8x8xf32>
    "tpu.trace_start"() <{level = 10 : i32, message = "bqd,bkd->bqk"}> : () -> ()
    %cst_112 = arith.constant dense<0.000000e+00> : vector<2x8x8xf32>
    %296 = tpu.matmul %294, %295, %cst_112 {dimension_numbers = #tpu.dot_dimension_numbers<[2], [2], [1], [1], [0, 0, 0, 1, 1, 1], [0], [0]>} : vector<2x8x8xf32>, vector<2x8x8xf32>, vector<2x8x8xf32> -> vector<2x8x8xf32>
    "tpu.trace_stop"() : () -> ()
    %cst_113 = arith.constant 0.353553385 : f32
    %297 = vector.broadcast %cst_113 : f32 to vector<2x8x8xf32>
    %298 = arith.mulf %296, %297 : vector<2x8x8xf32>
    %cst_114 = arith.constant -1.000000e+09 : f32
    %299 = vector.broadcast %cst_114 : f32 to vector<2x8x8xf32>
    %300 = arith.select %5, %298, %299 : vector<2x8x8xi1>, vector<2x8x8xf32>
    %cst_115 = arith.constant dense<0xFF800000> : vector<2x8xf32>
    %301 = vector.multi_reduction <maximumf>, %300, %cst_115 [2] : vector<2x8x8xf32> to vector<2x8xf32>
    %302 = vector.shape_cast %301 : vector<2x8xf32> to vector<2x8x1xf32>
    %303 = vector.broadcast %302 : vector<2x8x1xf32> to vector<2x8x8xf32>
    %304 = arith.subf %300, %303 : vector<2x8x8xf32>
    %305 = math.exp %304 : vector<2x8x8xf32>
    %cst_116 = arith.constant dense<0.000000e+00> : vector<2x8xf32>
    %306 = vector.multi_reduction <add>, %305, %cst_116 [2] : vector<2x8x8xf32> to vector<2x8xf32>
    %307 = vector.shape_cast %306 : vector<2x8xf32> to vector<2x8x1xf32>
    %308 = tpu.reciprocal %307 {approx = true} : vector<2x8x1xf32> -> vector<2x8x1xf32>
    %309 = vector.broadcast %308 : vector<2x8x1xf32> to vector<2x8x8xf32>
    %310 = arith.mulf %305, %309 : vector<2x8x8xf32>
    %311 = vector.extract_strided_slice %244 {offsets = [0, 0, 16], sizes = [2, 8, 8], strides = [1, 1, 1]} : vector<2x8x32xf32> to vector<2x8x8xf32>
    "tpu.trace_start"() <{level = 10 : i32, message = "bqk,bkd->bqd"}> : () -> ()
    %cst_117 = arith.constant dense<0.000000e+00> : vector<2x8x8xf32>
    %312 = tpu.matmul %310, %311, %cst_117 {dimension_numbers = #tpu.dot_dimension_numbers<[2], [1], [1], [2], [0, 0, 0, 1, 1, 2], [0], [0]>} : vector<2x8x8xf32>, vector<2x8x8xf32>, vector<2x8x8xf32> -> vector<2x8x8xf32>
    "tpu.trace_stop"() : () -> ()
    %313 = vector.shape_cast %312 : vector<2x8x8xf32> to vector<16x8xf32>
    %314 = vector.extract_strided_slice %232 {offsets = [16, 0], sizes = [8, 32], strides = [1, 1]} : vector<32x32xf32> to vector<8x32xf32>
    %cst_118 = arith.constant dense<0.000000e+00> : vector<16x32xf32>
    %315 = tpu.matmul %313, %314, %cst_118 {dimension_numbers = #tpu.dot_dimension_numbers<[1], [0], [0], [1], [0, 0, 1, 1], [], []>} : vector<16x8xf32>, vector<8x32xf32>, vector<16x32xf32> -> vector<16x32xf32>
    %316 = arith.addf %293, %315 : vector<16x32xf32>
    %317 = vector.extract_strided_slice %242 {offsets = [0, 0, 24], sizes = [2, 8, 8], strides = [1, 1, 1]} : vector<2x8x32xf32> to vector<2x8x8xf32>
    %318 = vector.extract_strided_slice %243 {offsets = [0, 0, 24], sizes = [2, 8, 8], strides = [1, 1, 1]} : vector<2x8x32xf32> to vector<2x8x8xf32>
    "tpu.trace_start"() <{level = 10 : i32, message = "bqd,bkd->bqk"}> : () -> ()
    %cst_119 = arith.constant dense<0.000000e+00> : vector<2x8x8xf32>
    %319 = tpu.matmul %317, %318, %cst_119 {dimension_numbers = #tpu.dot_dimension_numbers<[2], [2], [1], [1], [0, 0, 0, 1, 1, 1], [0], [0]>} : vector<2x8x8xf32>, vector<2x8x8xf32>, vector<2x8x8xf32> -> vector<2x8x8xf32>
    "tpu.trace_stop"() : () -> ()
    %cst_120 = arith.constant 0.353553385 : f32
    %320 = vector.broadcast %cst_120 : f32 to vector<2x8x8xf32>
    %321 = arith.mulf %319, %320 : vector<2x8x8xf32>
    %cst_121 = arith.constant -1.000000e+09 : f32
    %322 = vector.broadcast %cst_121 : f32 to vector<2x8x8xf32>
    %323 = arith.select %5, %321, %322 : vector<2x8x8xi1>, vector<2x8x8xf32>
    %cst_122 = arith.constant dense<0xFF800000> : vector<2x8xf32>
    %324 = vector.multi_reduction <maximumf>, %323, %cst_122 [2] : vector<2x8x8xf32> to vector<2x8xf32>
    %325 = vector.shape_cast %324 : vector<2x8xf32> to vector<2x8x1xf32>
    %326 = vector.broadcast %325 : vector<2x8x1xf32> to vector<2x8x8xf32>
    %327 = arith.subf %323, %326 : vector<2x8x8xf32>
    %328 = math.exp %327 : vector<2x8x8xf32>
    %cst_123 = arith.constant dense<0.000000e+00> : vector<2x8xf32>
    %329 = vector.multi_reduction <add>, %328, %cst_123 [2] : vector<2x8x8xf32> to vector<2x8xf32>
    %330 = vector.shape_cast %329 : vector<2x8xf32> to vector<2x8x1xf32>
    %331 = tpu.reciprocal %330 {approx = true} : vector<2x8x1xf32> -> vector<2x8x1xf32>
    %332 = vector.broadcast %331 : vector<2x8x1xf32> to vector<2x8x8xf32>
    %333 = arith.mulf %328, %332 : vector<2x8x8xf32>
    %334 = vector.extract_strided_slice %244 {offsets = [0, 0, 24], sizes = [2, 8, 8], strides = [1, 1, 1]} : vector<2x8x32xf32> to vector<2x8x8xf32>
    "tpu.trace_start"() <{level = 10 : i32, message = "bqk,bkd->bqd"}> : () -> ()
    %cst_124 = arith.constant dense<0.000000e+00> : vector<2x8x8xf32>
    %335 = tpu.matmul %333, %334, %cst_124 {dimension_numbers = #tpu.dot_dimension_numbers<[2], [1], [1], [2], [0, 0, 0, 1, 1, 2], [0], [0]>} : vector<2x8x8xf32>, vector<2x8x8xf32>, vector<2x8x8xf32> -> vector<2x8x8xf32>
    "tpu.trace_stop"() : () -> ()
    %336 = vector.shape_cast %335 : vector<2x8x8xf32> to vector<16x8xf32>
    %337 = vector.extract_strided_slice %232 {offsets = [24, 0], sizes = [8, 32], strides = [1, 1]} : vector<32x32xf32> to vector<8x32xf32>
    %cst_125 = arith.constant dense<0.000000e+00> : vector<16x32xf32>
    %338 = tpu.matmul %336, %337, %cst_125 {dimension_numbers = #tpu.dot_dimension_numbers<[1], [0], [0], [1], [0, 0, 1, 1], [], []>} : vector<16x8xf32>, vector<8x32xf32>, vector<16x32xf32> -> vector<16x32xf32>
    %339 = arith.addf %316, %338 : vector<16x32xf32>
    %340 = arith.addf %199, %339 : vector<16x32xf32>
    %c1_126 = arith.constant 1 : index
    %c0_127 = arith.constant 0 : index
    %341 = vector.load %arg10[%c1_126, %c0_127] : memref<2x32xf32, #tpu.memory_space<vmem>>, vector<1x32xf32>
    %342 = vector.shape_cast %341 : vector<1x32xf32> to vector<32xf32>
    %c1_128 = arith.constant 1 : index
    %c0_129 = arith.constant 0 : index
    %343 = vector.load %arg11[%c1_128, %c0_129] : memref<2x32xf32, #tpu.memory_space<vmem>>, vector<1x32xf32>
    %344 = vector.shape_cast %343 : vector<1x32xf32> to vector<32xf32>
    %cst_130 = arith.constant dense<0.000000e+00> : vector<16xf32>
    %345 = vector.multi_reduction <add>, %340, %cst_130 [1] : vector<16x32xf32> to vector<16xf32>
    %346 = vector.shape_cast %345 : vector<16xf32> to vector<16x1xf32>
    %cst_131 = arith.constant 3.200000e+01 : f32
    %347 = vector.broadcast %cst_131 : f32 to vector<16x1xf32>
    %348 = arith.divf %346, %347 : vector<16x1xf32>
    %349 = vector.broadcast %348 : vector<16x1xf32> to vector<16x32xf32>
    %350 = arith.subf %340, %349 : vector<16x32xf32>
    %351 = arith.mulf %350, %350 : vector<16x32xf32>
    %cst_132 = arith.constant dense<0.000000e+00> : vector<16xf32>
    %352 = vector.multi_reduction <add>, %351, %cst_132 [1] : vector<16x32xf32> to vector<16xf32>
    %353 = vector.shape_cast %352 : vector<16xf32> to vector<16x1xf32>
    %cst_133 = arith.constant 0.0322580636 : f32
    %354 = vector.broadcast %cst_133 : f32 to vector<16x1xf32>
    %355 = arith.mulf %353, %354 : vector<16x1xf32>
    %356 = math.sqrt %355 : vector<16x1xf32>
    %cst_134 = arith.constant 9.99999997E-7 : f32
    %357 = vector.broadcast %cst_134 : f32 to vector<16x1xf32>
    %358 = arith.addf %356, %357 : vector<16x1xf32>
    %359 = tpu.reciprocal %358 {approx = true} : vector<16x1xf32> -> vector<16x1xf32>
    %360 = vector.shape_cast %342 : vector<32xf32> to vector<1x32xf32>
    %361 = vector.broadcast %360 : vector<1x32xf32> to vector<16x32xf32>
    %362 = arith.mulf %361, %350 : vector<16x32xf32>
    %363 = vector.broadcast %359 : vector<16x1xf32> to vector<16x32xf32>
    %364 = arith.mulf %362, %363 : vector<16x32xf32>
    %365 = vector.shape_cast %344 : vector<32xf32> to vector<1x32xf32>
    %366 = vector.broadcast %365 : vector<1x32xf32> to vector<16x32xf32>
    %367 = arith.addf %364, %366 : vector<16x32xf32>
    %c1_135 = arith.constant 1 : index
    %c0_136 = arith.constant 0 : index
    %c0_137 = arith.constant 0 : index
    %368 = vector.load %arg12[%c1_135, %c0_136, %c0_137] : memref<2x32x64xf32, #tpu.memory_space<vmem>>, vector<1x32x64xf32>
    %369 = vector.shape_cast %368 : vector<1x32x64xf32> to vector<32x64xf32>
    %c1_138 = arith.constant 1 : index
    %c0_139 = arith.constant 0 : index
    %370 = vector.load %arg13[%c1_138, %c0_139] : memref<2x64xf32, #tpu.memory_space<vmem>>, vector<1x64xf32>
    %371 = vector.shape_cast %370 : vector<1x64xf32> to vector<64xf32>
    %c1_140 = arith.constant 1 : index
    %c0_141 = arith.constant 0 : index
    %c0_142 = arith.constant 0 : index
    %372 = vector.load %arg14[%c1_140, %c0_141, %c0_142] : memref<2x64x32xf32, #tpu.memory_space<vmem>>, vector<1x64x32xf32>
    %373 = vector.shape_cast %372 : vector<1x64x32xf32> to vector<64x32xf32>
    %c1_143 = arith.constant 1 : index
    %c0_144 = arith.constant 0 : index
    %374 = vector.load %arg15[%c1_143, %c0_144] : memref<2x32xf32, #tpu.memory_space<vmem>>, vector<1x32xf32>
    %375 = vector.shape_cast %374 : vector<1x32xf32> to vector<32xf32>
    %cst_145 = arith.constant dense<0.000000e+00> : vector<16x64xf32>
    %376 = tpu.matmul %367, %369, %cst_145 {dimension_numbers = #tpu.dot_dimension_numbers<[1], [0], [0], [1], [0, 0, 1, 1], [], []>} : vector<16x32xf32>, vector<32x64xf32>, vector<16x64xf32> -> vector<16x64xf32>
    %377 = vector.shape_cast %371 : vector<64xf32> to vector<1x64xf32>
    %378 = vector.broadcast %377 : vector<1x64xf32> to vector<16x64xf32>
    %379 = arith.addf %376, %378 : vector<16x64xf32>
    %cst_146 = arith.constant 0.000000e+00 : f32
    %380 = vector.broadcast %cst_146 : f32 to vector<16x64xf32>
    %381 = arith.maximumf %379, %380 : vector<16x64xf32>
    %cst_147 = arith.constant dense<0.000000e+00> : vector<16x32xf32>
    %382 = tpu.matmul %381, %373, %cst_147 {dimension_numbers = #tpu.dot_dimension_numbers<[1], [0], [0], [1], [0, 0, 1, 1], [], []>} : vector<16x64xf32>, vector<64x32xf32>, vector<16x32xf32> -> vector<16x32xf32>
    %383 = vector.shape_cast %375 : vector<32xf32> to vector<1x32xf32>
    %384 = vector.broadcast %383 : vector<1x32xf32> to vector<16x32xf32>
    %385 = arith.addf %382, %384 : vector<16x32xf32>
    %386 = arith.addf %340, %385 : vector<16x32xf32>
    %c0_148 = arith.constant 0 : index
    %c0_149 = arith.constant 0 : index
    %387 = vector.load %arg16[%c0_148, %c0_149] : memref<1x32xf32, #tpu.memory_space<vmem>>, vector<1x32xf32>
    %388 = vector.shape_cast %387 : vector<1x32xf32> to vector<32xf32>
    %c0_150 = arith.constant 0 : index
    %c0_151 = arith.constant 0 : index
    %389 = vector.load %arg17[%c0_150, %c0_151] : memref<1x32xf32, #tpu.memory_space<vmem>>, vector<1x32xf32>
    %390 = vector.shape_cast %389 : vector<1x32xf32> to vector<32xf32>
    %cst_152 = arith.constant dense<0.000000e+00> : vector<16xf32>
    %391 = vector.multi_reduction <add>, %386, %cst_152 [1] : vector<16x32xf32> to vector<16xf32>
    %392 = vector.shape_cast %391 : vector<16xf32> to vector<16x1xf32>
    %cst_153 = arith.constant 3.200000e+01 : f32
    %393 = vector.broadcast %cst_153 : f32 to vector<16x1xf32>
    %394 = arith.divf %392, %393 : vector<16x1xf32>
    %395 = vector.broadcast %394 : vector<16x1xf32> to vector<16x32xf32>
    %396 = arith.subf %386, %395 : vector<16x32xf32>
    %397 = arith.mulf %396, %396 : vector<16x32xf32>
    %cst_154 = arith.constant dense<0.000000e+00> : vector<16xf32>
    %398 = vector.multi_reduction <add>, %397, %cst_154 [1] : vector<16x32xf32> to vector<16xf32>
    %399 = vector.shape_cast %398 : vector<16xf32> to vector<16x1xf32>
    %cst_155 = arith.constant 0.0322580636 : f32
    %400 = vector.broadcast %cst_155 : f32 to vector<16x1xf32>
    %401 = arith.mulf %399, %400 : vector<16x1xf32>
    %402 = math.sqrt %401 : vector<16x1xf32>
    %cst_156 = arith.constant 9.99999997E-7 : f32
    %403 = vector.broadcast %cst_156 : f32 to vector<16x1xf32>
    %404 = arith.addf %402, %403 : vector<16x1xf32>
    %405 = tpu.reciprocal %404 {approx = true} : vector<16x1xf32> -> vector<16x1xf32>
    %406 = vector.shape_cast %388 : vector<32xf32> to vector<1x32xf32>
    %407 = vector.broadcast %406 : vector<1x32xf32> to vector<16x32xf32>
    %408 = arith.mulf %407, %396 : vector<16x32xf32>
    %409 = vector.broadcast %405 : vector<16x1xf32> to vector<16x32xf32>
    %410 = arith.mulf %408, %409 : vector<16x32xf32>
    %411 = vector.shape_cast %390 : vector<32xf32> to vector<1x32xf32>
    %412 = vector.broadcast %411 : vector<1x32xf32> to vector<16x32xf32>
    %413 = arith.addf %410, %412 : vector<16x32xf32>
    %c0_157 = arith.constant 0 : index
    %c0_158 = arith.constant 0 : index
    %414 = vector.load %arg1[%c0_157, %c0_158] : memref<16x32xf32, #tpu.memory_space<vmem>>, vector<16x32xf32>
    %c0_159 = arith.constant 0 : index
    %c0_160 = arith.constant 0 : index
    %415 = vector.load %arg18[%c0_159, %c0_160] : memref<2x32xf32, #tpu.memory_space<vmem>>, vector<1x32xf32>
    %416 = vector.shape_cast %415 : vector<1x32xf32> to vector<32xf32>
    %c0_161 = arith.constant 0 : index
    %c0_162 = arith.constant 0 : index
    %417 = vector.load %arg19[%c0_161, %c0_162] : memref<2x32xf32, #tpu.memory_space<vmem>>, vector<1x32xf32>
    %418 = vector.shape_cast %417 : vector<1x32xf32> to vector<32xf32>
    %cst_163 = arith.constant dense<0.000000e+00> : vector<16xf32>
    %419 = vector.multi_reduction <add>, %414, %cst_163 [1] : vector<16x32xf32> to vector<16xf32>
    %420 = vector.shape_cast %419 : vector<16xf32> to vector<16x1xf32>
    %cst_164 = arith.constant 3.200000e+01 : f32
    %421 = vector.broadcast %cst_164 : f32 to vector<16x1xf32>
    %422 = arith.divf %420, %421 : vector<16x1xf32>
    %423 = vector.broadcast %422 : vector<16x1xf32> to vector<16x32xf32>
    %424 = arith.subf %414, %423 : vector<16x32xf32>
    %425 = arith.mulf %424, %424 : vector<16x32xf32>
    %cst_165 = arith.constant dense<0.000000e+00> : vector<16xf32>
    %426 = vector.multi_reduction <add>, %425, %cst_165 [1] : vector<16x32xf32> to vector<16xf32>
    %427 = vector.shape_cast %426 : vector<16xf32> to vector<16x1xf32>
    %cst_166 = arith.constant 0.0322580636 : f32
    %428 = vector.broadcast %cst_166 : f32 to vector<16x1xf32>
    %429 = arith.mulf %427, %428 : vector<16x1xf32>
    %430 = math.sqrt %429 : vector<16x1xf32>
    %cst_167 = arith.constant 9.99999997E-7 : f32
    %431 = vector.broadcast %cst_167 : f32 to vector<16x1xf32>
    %432 = arith.addf %430, %431 : vector<16x1xf32>
    %433 = tpu.reciprocal %432 {approx = true} : vector<16x1xf32> -> vector<16x1xf32>
    %434 = vector.shape_cast %416 : vector<32xf32> to vector<1x32xf32>
    %435 = vector.broadcast %434 : vector<1x32xf32> to vector<16x32xf32>
    %436 = arith.mulf %435, %424 : vector<16x32xf32>
    %437 = vector.broadcast %433 : vector<16x1xf32> to vector<16x32xf32>
    %438 = arith.mulf %436, %437 : vector<16x32xf32>
    %439 = vector.shape_cast %418 : vector<32xf32> to vector<1x32xf32>
    %440 = vector.broadcast %439 : vector<1x32xf32> to vector<16x32xf32>
    %441 = arith.addf %438, %440 : vector<16x32xf32>
    %c0_168 = arith.constant 0 : index
    %c0_169 = arith.constant 0 : index
    %c0_170 = arith.constant 0 : index
    %442 = vector.load %arg20[%c0_168, %c0_169, %c0_170] : memref<2x32x96xf32, #tpu.memory_space<vmem>>, vector<1x32x96xf32>
    %443 = vector.shape_cast %442 : vector<1x32x96xf32> to vector<32x96xf32>
    %c0_171 = arith.constant 0 : index
    %c0_172 = arith.constant 0 : index
    %444 = vector.load %arg21[%c0_171, %c0_172] : memref<2x96xf32, #tpu.memory_space<vmem>>, vector<1x96xf32>
    %445 = vector.shape_cast %444 : vector<1x96xf32> to vector<96xf32>
    %c0_173 = arith.constant 0 : index
    %c0_174 = arith.constant 0 : index
    %c0_175 = arith.constant 0 : index
    %446 = vector.load %arg22[%c0_173, %c0_174, %c0_175] : memref<2x32x32xf32, #tpu.memory_space<vmem>>, vector<1x32x32xf32>
    %447 = vector.shape_cast %446 : vector<1x32x32xf32> to vector<32x32xf32>
    %c0_176 = arith.constant 0 : index
    %c0_177 = arith.constant 0 : index
    %448 = vector.load %arg23[%c0_176, %c0_177] : memref<2x32xf32, #tpu.memory_space<vmem>>, vector<1x32xf32>
    %449 = vector.shape_cast %448 : vector<1x32xf32> to vector<32xf32>
    %cst_178 = arith.constant dense<0.000000e+00> : vector<16x96xf32>
    %450 = tpu.matmul %441, %443, %cst_178 {dimension_numbers = #tpu.dot_dimension_numbers<[1], [0], [0], [1], [0, 0, 1, 1], [], []>} : vector<16x32xf32>, vector<32x96xf32>, vector<16x96xf32> -> vector<16x96xf32>
    %451 = vector.shape_cast %445 : vector<96xf32> to vector<1x96xf32>
    %452 = vector.broadcast %451 : vector<1x96xf32> to vector<16x96xf32>
    %453 = arith.addf %450, %452 : vector<16x96xf32>
    %454 = vector.extract_strided_slice %453 {offsets = [0, 0], sizes = [16, 32], strides = [1, 1]} : vector<16x96xf32> to vector<16x32xf32>
    %455 = vector.extract_strided_slice %453 {offsets = [0, 32], sizes = [16, 32], strides = [1, 1]} : vector<16x96xf32> to vector<16x32xf32>
    %456 = vector.extract_strided_slice %453 {offsets = [0, 64], sizes = [16, 32], strides = [1, 1]} : vector<16x96xf32> to vector<16x32xf32>
    %457 = vector.shape_cast %454 : vector<16x32xf32> to vector<2x8x32xf32>
    %458 = vector.shape_cast %455 : vector<16x32xf32> to vector<2x8x32xf32>
    %459 = vector.shape_cast %456 : vector<16x32xf32> to vector<2x8x32xf32>
    %460 = vector.shape_cast %449 : vector<32xf32> to vector<1x32xf32>
    %461 = vector.shape_cast %460 : vector<1x32xf32> to vector<1x32xf32>
    %462 = vector.broadcast %461 : vector<1x32xf32> to vector<16x32xf32>
    %463 = vector.extract_strided_slice %457 {offsets = [0, 0, 0], sizes = [2, 8, 8], strides = [1, 1, 1]} : vector<2x8x32xf32> to vector<2x8x8xf32>
    %464 = vector.extract_strided_slice %458 {offsets = [0, 0, 0], sizes = [2, 8, 8], strides = [1, 1, 1]} : vector<2x8x32xf32> to vector<2x8x8xf32>
    "tpu.trace_start"() <{level = 10 : i32, message = "bqd,bkd->bqk"}> : () -> ()
    %cst_179 = arith.constant dense<0.000000e+00> : vector<2x8x8xf32>
    %465 = tpu.matmul %463, %464, %cst_179 {dimension_numbers = #tpu.dot_dimension_numbers<[2], [2], [1], [1], [0, 0, 0, 1, 1, 1], [0], [0]>} : vector<2x8x8xf32>, vector<2x8x8xf32>, vector<2x8x8xf32> -> vector<2x8x8xf32>
    "tpu.trace_stop"() : () -> ()
    %cst_180 = arith.constant 0.353553385 : f32
    %466 = vector.broadcast %cst_180 : f32 to vector<2x8x8xf32>
    %467 = arith.mulf %465, %466 : vector<2x8x8xf32>
    %cst_181 = arith.constant -1.000000e+09 : f32
    %468 = vector.broadcast %cst_181 : f32 to vector<2x8x8xf32>
    %469 = arith.select %7, %467, %468 : vector<2x8x8xi1>, vector<2x8x8xf32>
    %cst_182 = arith.constant dense<0xFF800000> : vector<2x8xf32>
    %470 = vector.multi_reduction <maximumf>, %469, %cst_182 [2] : vector<2x8x8xf32> to vector<2x8xf32>
    %471 = vector.shape_cast %470 : vector<2x8xf32> to vector<2x8x1xf32>
    %472 = vector.broadcast %471 : vector<2x8x1xf32> to vector<2x8x8xf32>
    %473 = arith.subf %469, %472 : vector<2x8x8xf32>
    %474 = math.exp %473 : vector<2x8x8xf32>
    %cst_183 = arith.constant dense<0.000000e+00> : vector<2x8xf32>
    %475 = vector.multi_reduction <add>, %474, %cst_183 [2] : vector<2x8x8xf32> to vector<2x8xf32>
    %476 = vector.shape_cast %475 : vector<2x8xf32> to vector<2x8x1xf32>
    %477 = tpu.reciprocal %476 {approx = true} : vector<2x8x1xf32> -> vector<2x8x1xf32>
    %478 = vector.broadcast %477 : vector<2x8x1xf32> to vector<2x8x8xf32>
    %479 = arith.mulf %474, %478 : vector<2x8x8xf32>
    %480 = vector.extract_strided_slice %459 {offsets = [0, 0, 0], sizes = [2, 8, 8], strides = [1, 1, 1]} : vector<2x8x32xf32> to vector<2x8x8xf32>
    "tpu.trace_start"() <{level = 10 : i32, message = "bqk,bkd->bqd"}> : () -> ()
    %cst_184 = arith.constant dense<0.000000e+00> : vector<2x8x8xf32>
    %481 = tpu.matmul %479, %480, %cst_184 {dimension_numbers = #tpu.dot_dimension_numbers<[2], [1], [1], [2], [0, 0, 0, 1, 1, 2], [0], [0]>} : vector<2x8x8xf32>, vector<2x8x8xf32>, vector<2x8x8xf32> -> vector<2x8x8xf32>
    "tpu.trace_stop"() : () -> ()
    %482 = vector.shape_cast %481 : vector<2x8x8xf32> to vector<16x8xf32>
    %483 = vector.extract_strided_slice %447 {offsets = [0, 0], sizes = [8, 32], strides = [1, 1]} : vector<32x32xf32> to vector<8x32xf32>
    %cst_185 = arith.constant dense<0.000000e+00> : vector<16x32xf32>
    %484 = tpu.matmul %482, %483, %cst_185 {dimension_numbers = #tpu.dot_dimension_numbers<[1], [0], [0], [1], [0, 0, 1, 1], [], []>} : vector<16x8xf32>, vector<8x32xf32>, vector<16x32xf32> -> vector<16x32xf32>
    %485 = arith.addf %462, %484 : vector<16x32xf32>
    %486 = vector.extract_strided_slice %457 {offsets = [0, 0, 8], sizes = [2, 8, 8], strides = [1, 1, 1]} : vector<2x8x32xf32> to vector<2x8x8xf32>
    %487 = vector.extract_strided_slice %458 {offsets = [0, 0, 8], sizes = [2, 8, 8], strides = [1, 1, 1]} : vector<2x8x32xf32> to vector<2x8x8xf32>
    "tpu.trace_start"() <{level = 10 : i32, message = "bqd,bkd->bqk"}> : () -> ()
    %cst_186 = arith.constant dense<0.000000e+00> : vector<2x8x8xf32>
    %488 = tpu.matmul %486, %487, %cst_186 {dimension_numbers = #tpu.dot_dimension_numbers<[2], [2], [1], [1], [0, 0, 0, 1, 1, 1], [0], [0]>} : vector<2x8x8xf32>, vector<2x8x8xf32>, vector<2x8x8xf32> -> vector<2x8x8xf32>
    "tpu.trace_stop"() : () -> ()
    %cst_187 = arith.constant 0.353553385 : f32
    %489 = vector.broadcast %cst_187 : f32 to vector<2x8x8xf32>
    %490 = arith.mulf %488, %489 : vector<2x8x8xf32>
    %cst_188 = arith.constant -1.000000e+09 : f32
    %491 = vector.broadcast %cst_188 : f32 to vector<2x8x8xf32>
    %492 = arith.select %7, %490, %491 : vector<2x8x8xi1>, vector<2x8x8xf32>
    %cst_189 = arith.constant dense<0xFF800000> : vector<2x8xf32>
    %493 = vector.multi_reduction <maximumf>, %492, %cst_189 [2] : vector<2x8x8xf32> to vector<2x8xf32>
    %494 = vector.shape_cast %493 : vector<2x8xf32> to vector<2x8x1xf32>
    %495 = vector.broadcast %494 : vector<2x8x1xf32> to vector<2x8x8xf32>
    %496 = arith.subf %492, %495 : vector<2x8x8xf32>
    %497 = math.exp %496 : vector<2x8x8xf32>
    %cst_190 = arith.constant dense<0.000000e+00> : vector<2x8xf32>
    %498 = vector.multi_reduction <add>, %497, %cst_190 [2] : vector<2x8x8xf32> to vector<2x8xf32>
    %499 = vector.shape_cast %498 : vector<2x8xf32> to vector<2x8x1xf32>
    %500 = tpu.reciprocal %499 {approx = true} : vector<2x8x1xf32> -> vector<2x8x1xf32>
    %501 = vector.broadcast %500 : vector<2x8x1xf32> to vector<2x8x8xf32>
    %502 = arith.mulf %497, %501 : vector<2x8x8xf32>
    %503 = vector.extract_strided_slice %459 {offsets = [0, 0, 8], sizes = [2, 8, 8], strides = [1, 1, 1]} : vector<2x8x32xf32> to vector<2x8x8xf32>
    "tpu.trace_start"() <{level = 10 : i32, message = "bqk,bkd->bqd"}> : () -> ()
    %cst_191 = arith.constant dense<0.000000e+00> : vector<2x8x8xf32>
    %504 = tpu.matmul %502, %503, %cst_191 {dimension_numbers = #tpu.dot_dimension_numbers<[2], [1], [1], [2], [0, 0, 0, 1, 1, 2], [0], [0]>} : vector<2x8x8xf32>, vector<2x8x8xf32>, vector<2x8x8xf32> -> vector<2x8x8xf32>
    "tpu.trace_stop"() : () -> ()
    %505 = vector.shape_cast %504 : vector<2x8x8xf32> to vector<16x8xf32>
    %506 = vector.extract_strided_slice %447 {offsets = [8, 0], sizes = [8, 32], strides = [1, 1]} : vector<32x32xf32> to vector<8x32xf32>
    %cst_192 = arith.constant dense<0.000000e+00> : vector<16x32xf32>
    %507 = tpu.matmul %505, %506, %cst_192 {dimension_numbers = #tpu.dot_dimension_numbers<[1], [0], [0], [1], [0, 0, 1, 1], [], []>} : vector<16x8xf32>, vector<8x32xf32>, vector<16x32xf32> -> vector<16x32xf32>
    %508 = arith.addf %485, %507 : vector<16x32xf32>
    %509 = vector.extract_strided_slice %457 {offsets = [0, 0, 16], sizes = [2, 8, 8], strides = [1, 1, 1]} : vector<2x8x32xf32> to vector<2x8x8xf32>
    %510 = vector.extract_strided_slice %458 {offsets = [0, 0, 16], sizes = [2, 8, 8], strides = [1, 1, 1]} : vector<2x8x32xf32> to vector<2x8x8xf32>
    "tpu.trace_start"() <{level = 10 : i32, message = "bqd,bkd->bqk"}> : () -> ()
    %cst_193 = arith.constant dense<0.000000e+00> : vector<2x8x8xf32>
    %511 = tpu.matmul %509, %510, %cst_193 {dimension_numbers = #tpu.dot_dimension_numbers<[2], [2], [1], [1], [0, 0, 0, 1, 1, 1], [0], [0]>} : vector<2x8x8xf32>, vector<2x8x8xf32>, vector<2x8x8xf32> -> vector<2x8x8xf32>
    "tpu.trace_stop"() : () -> ()
    %cst_194 = arith.constant 0.353553385 : f32
    %512 = vector.broadcast %cst_194 : f32 to vector<2x8x8xf32>
    %513 = arith.mulf %511, %512 : vector<2x8x8xf32>
    %cst_195 = arith.constant -1.000000e+09 : f32
    %514 = vector.broadcast %cst_195 : f32 to vector<2x8x8xf32>
    %515 = arith.select %7, %513, %514 : vector<2x8x8xi1>, vector<2x8x8xf32>
    %cst_196 = arith.constant dense<0xFF800000> : vector<2x8xf32>
    %516 = vector.multi_reduction <maximumf>, %515, %cst_196 [2] : vector<2x8x8xf32> to vector<2x8xf32>
    %517 = vector.shape_cast %516 : vector<2x8xf32> to vector<2x8x1xf32>
    %518 = vector.broadcast %517 : vector<2x8x1xf32> to vector<2x8x8xf32>
    %519 = arith.subf %515, %518 : vector<2x8x8xf32>
    %520 = math.exp %519 : vector<2x8x8xf32>
    %cst_197 = arith.constant dense<0.000000e+00> : vector<2x8xf32>
    %521 = vector.multi_reduction <add>, %520, %cst_197 [2] : vector<2x8x8xf32> to vector<2x8xf32>
    %522 = vector.shape_cast %521 : vector<2x8xf32> to vector<2x8x1xf32>
    %523 = tpu.reciprocal %522 {approx = true} : vector<2x8x1xf32> -> vector<2x8x1xf32>
    %524 = vector.broadcast %523 : vector<2x8x1xf32> to vector<2x8x8xf32>
    %525 = arith.mulf %520, %524 : vector<2x8x8xf32>
    %526 = vector.extract_strided_slice %459 {offsets = [0, 0, 16], sizes = [2, 8, 8], strides = [1, 1, 1]} : vector<2x8x32xf32> to vector<2x8x8xf32>
    "tpu.trace_start"() <{level = 10 : i32, message = "bqk,bkd->bqd"}> : () -> ()
    %cst_198 = arith.constant dense<0.000000e+00> : vector<2x8x8xf32>
    %527 = tpu.matmul %525, %526, %cst_198 {dimension_numbers = #tpu.dot_dimension_numbers<[2], [1], [1], [2], [0, 0, 0, 1, 1, 2], [0], [0]>} : vector<2x8x8xf32>, vector<2x8x8xf32>, vector<2x8x8xf32> -> vector<2x8x8xf32>
    "tpu.trace_stop"() : () -> ()
    %528 = vector.shape_cast %527 : vector<2x8x8xf32> to vector<16x8xf32>
    %529 = vector.extract_strided_slice %447 {offsets = [16, 0], sizes = [8, 32], strides = [1, 1]} : vector<32x32xf32> to vector<8x32xf32>
    %cst_199 = arith.constant dense<0.000000e+00> : vector<16x32xf32>
    %530 = tpu.matmul %528, %529, %cst_199 {dimension_numbers = #tpu.dot_dimension_numbers<[1], [0], [0], [1], [0, 0, 1, 1], [], []>} : vector<16x8xf32>, vector<8x32xf32>, vector<16x32xf32> -> vector<16x32xf32>
    %531 = arith.addf %508, %530 : vector<16x32xf32>
    %532 = vector.extract_strided_slice %457 {offsets = [0, 0, 24], sizes = [2, 8, 8], strides = [1, 1, 1]} : vector<2x8x32xf32> to vector<2x8x8xf32>
    %533 = vector.extract_strided_slice %458 {offsets = [0, 0, 24], sizes = [2, 8, 8], strides = [1, 1, 1]} : vector<2x8x32xf32> to vector<2x8x8xf32>
    "tpu.trace_start"() <{level = 10 : i32, message = "bqd,bkd->bqk"}> : () -> ()
    %cst_200 = arith.constant dense<0.000000e+00> : vector<2x8x8xf32>
    %534 = tpu.matmul %532, %533, %cst_200 {dimension_numbers = #tpu.dot_dimension_numbers<[2], [2], [1], [1], [0, 0, 0, 1, 1, 1], [0], [0]>} : vector<2x8x8xf32>, vector<2x8x8xf32>, vector<2x8x8xf32> -> vector<2x8x8xf32>
    "tpu.trace_stop"() : () -> ()
    %cst_201 = arith.constant 0.353553385 : f32
    %535 = vector.broadcast %cst_201 : f32 to vector<2x8x8xf32>
    %536 = arith.mulf %534, %535 : vector<2x8x8xf32>
    %cst_202 = arith.constant -1.000000e+09 : f32
    %537 = vector.broadcast %cst_202 : f32 to vector<2x8x8xf32>
    %538 = arith.select %7, %536, %537 : vector<2x8x8xi1>, vector<2x8x8xf32>
    %cst_203 = arith.constant dense<0xFF800000> : vector<2x8xf32>
    %539 = vector.multi_reduction <maximumf>, %538, %cst_203 [2] : vector<2x8x8xf32> to vector<2x8xf32>
    %540 = vector.shape_cast %539 : vector<2x8xf32> to vector<2x8x1xf32>
    %541 = vector.broadcast %540 : vector<2x8x1xf32> to vector<2x8x8xf32>
    %542 = arith.subf %538, %541 : vector<2x8x8xf32>
    %543 = math.exp %542 : vector<2x8x8xf32>
    %cst_204 = arith.constant dense<0.000000e+00> : vector<2x8xf32>
    %544 = vector.multi_reduction <add>, %543, %cst_204 [2] : vector<2x8x8xf32> to vector<2x8xf32>
    %545 = vector.shape_cast %544 : vector<2x8xf32> to vector<2x8x1xf32>
    %546 = tpu.reciprocal %545 {approx = true} : vector<2x8x1xf32> -> vector<2x8x1xf32>
    %547 = vector.broadcast %546 : vector<2x8x1xf32> to vector<2x8x8xf32>
    %548 = arith.mulf %543, %547 : vector<2x8x8xf32>
    %549 = vector.extract_strided_slice %459 {offsets = [0, 0, 24], sizes = [2, 8, 8], strides = [1, 1, 1]} : vector<2x8x32xf32> to vector<2x8x8xf32>
    "tpu.trace_start"() <{level = 10 : i32, message = "bqk,bkd->bqd"}> : () -> ()
    %cst_205 = arith.constant dense<0.000000e+00> : vector<2x8x8xf32>
    %550 = tpu.matmul %548, %549, %cst_205 {dimension_numbers = #tpu.dot_dimension_numbers<[2], [1], [1], [2], [0, 0, 0, 1, 1, 2], [0], [0]>} : vector<2x8x8xf32>, vector<2x8x8xf32>, vector<2x8x8xf32> -> vector<2x8x8xf32>
    "tpu.trace_stop"() : () -> ()
    %551 = vector.shape_cast %550 : vector<2x8x8xf32> to vector<16x8xf32>
    %552 = vector.extract_strided_slice %447 {offsets = [24, 0], sizes = [8, 32], strides = [1, 1]} : vector<32x32xf32> to vector<8x32xf32>
    %cst_206 = arith.constant dense<0.000000e+00> : vector<16x32xf32>
    %553 = tpu.matmul %551, %552, %cst_206 {dimension_numbers = #tpu.dot_dimension_numbers<[1], [0], [0], [1], [0, 0, 1, 1], [], []>} : vector<16x8xf32>, vector<8x32xf32>, vector<16x32xf32> -> vector<16x32xf32>
    %554 = arith.addf %531, %553 : vector<16x32xf32>
    %555 = arith.addf %414, %554 : vector<16x32xf32>
    %c0_207 = arith.constant 0 : index
    %c0_208 = arith.constant 0 : index
    %556 = vector.load %arg24[%c0_207, %c0_208] : memref<2x32xf32, #tpu.memory_space<vmem>>, vector<1x32xf32>
    %557 = vector.shape_cast %556 : vector<1x32xf32> to vector<32xf32>
    %c0_209 = arith.constant 0 : index
    %c0_210 = arith.constant 0 : index
    %558 = vector.load %arg25[%c0_209, %c0_210] : memref<2x32xf32, #tpu.memory_space<vmem>>, vector<1x32xf32>
    %559 = vector.shape_cast %558 : vector<1x32xf32> to vector<32xf32>
    %cst_211 = arith.constant dense<0.000000e+00> : vector<16xf32>
    %560 = vector.multi_reduction <add>, %555, %cst_211 [1] : vector<16x32xf32> to vector<16xf32>
    %561 = vector.shape_cast %560 : vector<16xf32> to vector<16x1xf32>
    %cst_212 = arith.constant 3.200000e+01 : f32
    %562 = vector.broadcast %cst_212 : f32 to vector<16x1xf32>
    %563 = arith.divf %561, %562 : vector<16x1xf32>
    %564 = vector.broadcast %563 : vector<16x1xf32> to vector<16x32xf32>
    %565 = arith.subf %555, %564 : vector<16x32xf32>
    %566 = arith.mulf %565, %565 : vector<16x32xf32>
    %cst_213 = arith.constant dense<0.000000e+00> : vector<16xf32>
    %567 = vector.multi_reduction <add>, %566, %cst_213 [1] : vector<16x32xf32> to vector<16xf32>
    %568 = vector.shape_cast %567 : vector<16xf32> to vector<16x1xf32>
    %cst_214 = arith.constant 0.0322580636 : f32
    %569 = vector.broadcast %cst_214 : f32 to vector<16x1xf32>
    %570 = arith.mulf %568, %569 : vector<16x1xf32>
    %571 = math.sqrt %570 : vector<16x1xf32>
    %cst_215 = arith.constant 9.99999997E-7 : f32
    %572 = vector.broadcast %cst_215 : f32 to vector<16x1xf32>
    %573 = arith.addf %571, %572 : vector<16x1xf32>
    %574 = tpu.reciprocal %573 {approx = true} : vector<16x1xf32> -> vector<16x1xf32>
    %575 = vector.shape_cast %557 : vector<32xf32> to vector<1x32xf32>
    %576 = vector.broadcast %575 : vector<1x32xf32> to vector<16x32xf32>
    %577 = arith.mulf %576, %565 : vector<16x32xf32>
    %578 = vector.broadcast %574 : vector<16x1xf32> to vector<16x32xf32>
    %579 = arith.mulf %577, %578 : vector<16x32xf32>
    %580 = vector.shape_cast %559 : vector<32xf32> to vector<1x32xf32>
    %581 = vector.broadcast %580 : vector<1x32xf32> to vector<16x32xf32>
    %582 = arith.addf %579, %581 : vector<16x32xf32>
    %c0_216 = arith.constant 0 : index
    %c0_217 = arith.constant 0 : index
    %c0_218 = arith.constant 0 : index
    %583 = vector.load %arg26[%c0_216, %c0_217, %c0_218] : memref<2x32x96xf32, #tpu.memory_space<vmem>>, vector<1x32x96xf32>
    %584 = vector.shape_cast %583 : vector<1x32x96xf32> to vector<32x96xf32>
    %c0_219 = arith.constant 0 : index
    %c0_220 = arith.constant 0 : index
    %585 = vector.load %arg27[%c0_219, %c0_220] : memref<2x96xf32, #tpu.memory_space<vmem>>, vector<1x96xf32>
    %586 = vector.shape_cast %585 : vector<1x96xf32> to vector<96xf32>
    %c0_221 = arith.constant 0 : index
    %c0_222 = arith.constant 0 : index
    %c0_223 = arith.constant 0 : index
    %587 = vector.load %arg28[%c0_221, %c0_222, %c0_223] : memref<2x32x32xf32, #tpu.memory_space<vmem>>, vector<1x32x32xf32>
    %588 = vector.shape_cast %587 : vector<1x32x32xf32> to vector<32x32xf32>
    %c0_224 = arith.constant 0 : index
    %c0_225 = arith.constant 0 : index
    %589 = vector.load %arg29[%c0_224, %c0_225] : memref<2x32xf32, #tpu.memory_space<vmem>>, vector<1x32xf32>
    %590 = vector.shape_cast %589 : vector<1x32xf32> to vector<32xf32>
    %591 = vector.extract_strided_slice %584 {offsets = [0, 0], sizes = [32, 32], strides = [1, 1]} : vector<32x96xf32> to vector<32x32xf32>
    %cst_226 = arith.constant dense<0.000000e+00> : vector<16x32xf32>
    %592 = tpu.matmul %582, %591, %cst_226 {dimension_numbers = #tpu.dot_dimension_numbers<[1], [0], [0], [1], [0, 0, 1, 1], [], []>} : vector<16x32xf32>, vector<32x32xf32>, vector<16x32xf32> -> vector<16x32xf32>
    %593 = vector.extract_strided_slice %586 {offsets = [0], sizes = [32], strides = [1]} : vector<96xf32> to vector<32xf32>
    %594 = vector.shape_cast %593 : vector<32xf32> to vector<1x32xf32>
    %595 = vector.broadcast %594 : vector<1x32xf32> to vector<16x32xf32>
    %596 = arith.addf %592, %595 : vector<16x32xf32>
    %597 = vector.extract_strided_slice %584 {offsets = [0, 32], sizes = [32, 64], strides = [1, 1]} : vector<32x96xf32> to vector<32x64xf32>
    %cst_227 = arith.constant dense<0.000000e+00> : vector<16x64xf32>
    %598 = tpu.matmul %413, %597, %cst_227 {dimension_numbers = #tpu.dot_dimension_numbers<[1], [0], [0], [1], [0, 0, 1, 1], [], []>} : vector<16x32xf32>, vector<32x64xf32>, vector<16x64xf32> -> vector<16x64xf32>
    %599 = vector.extract_strided_slice %586 {offsets = [32], sizes = [64], strides = [1]} : vector<96xf32> to vector<64xf32>
    %600 = vector.shape_cast %599 : vector<64xf32> to vector<1x64xf32>
    %601 = vector.broadcast %600 : vector<1x64xf32> to vector<16x64xf32>
    %602 = arith.addf %598, %601 : vector<16x64xf32>
    %603 = vector.extract_strided_slice %602 {offsets = [0, 0], sizes = [16, 32], strides = [1, 1]} : vector<16x64xf32> to vector<16x32xf32>
    %604 = vector.extract_strided_slice %602 {offsets = [0, 32], sizes = [16, 32], strides = [1, 1]} : vector<16x64xf32> to vector<16x32xf32>
    %605 = vector.shape_cast %596 : vector<16x32xf32> to vector<2x8x32xf32>
    %606 = vector.shape_cast %603 : vector<16x32xf32> to vector<2x8x32xf32>
    %607 = vector.shape_cast %604 : vector<16x32xf32> to vector<2x8x32xf32>
    %608 = vector.shape_cast %590 : vector<32xf32> to vector<1x32xf32>
    %609 = vector.shape_cast %608 : vector<1x32xf32> to vector<1x32xf32>
    %610 = vector.broadcast %609 : vector<1x32xf32> to vector<16x32xf32>
    %611 = vector.extract_strided_slice %605 {offsets = [0, 0, 0], sizes = [2, 8, 8], strides = [1, 1, 1]} : vector<2x8x32xf32> to vector<2x8x8xf32>
    %612 = vector.extract_strided_slice %606 {offsets = [0, 0, 0], sizes = [2, 8, 8], strides = [1, 1, 1]} : vector<2x8x32xf32> to vector<2x8x8xf32>
    "tpu.trace_start"() <{level = 10 : i32, message = "bqd,bkd->bqk"}> : () -> ()
    %cst_228 = arith.constant dense<0.000000e+00> : vector<2x8x8xf32>
    %613 = tpu.matmul %611, %612, %cst_228 {dimension_numbers = #tpu.dot_dimension_numbers<[2], [2], [1], [1], [0, 0, 0, 1, 1, 1], [0], [0]>} : vector<2x8x8xf32>, vector<2x8x8xf32>, vector<2x8x8xf32> -> vector<2x8x8xf32>
    "tpu.trace_stop"() : () -> ()
    %cst_229 = arith.constant 0.353553385 : f32
    %614 = vector.broadcast %cst_229 : f32 to vector<2x8x8xf32>
    %615 = arith.mulf %613, %614 : vector<2x8x8xf32>
    %cst_230 = arith.constant -1.000000e+09 : f32
    %616 = vector.broadcast %cst_230 : f32 to vector<2x8x8xf32>
    %617 = arith.select %11, %615, %616 : vector<2x8x8xi1>, vector<2x8x8xf32>
    %cst_231 = arith.constant dense<0xFF800000> : vector<2x8xf32>
    %618 = vector.multi_reduction <maximumf>, %617, %cst_231 [2] : vector<2x8x8xf32> to vector<2x8xf32>
    %619 = vector.shape_cast %618 : vector<2x8xf32> to vector<2x8x1xf32>
    %620 = vector.broadcast %619 : vector<2x8x1xf32> to vector<2x8x8xf32>
    %621 = arith.subf %617, %620 : vector<2x8x8xf32>
    %622 = math.exp %621 : vector<2x8x8xf32>
    %cst_232 = arith.constant dense<0.000000e+00> : vector<2x8xf32>
    %623 = vector.multi_reduction <add>, %622, %cst_232 [2] : vector<2x8x8xf32> to vector<2x8xf32>
    %624 = vector.shape_cast %623 : vector<2x8xf32> to vector<2x8x1xf32>
    %625 = tpu.reciprocal %624 {approx = true} : vector<2x8x1xf32> -> vector<2x8x1xf32>
    %626 = vector.broadcast %625 : vector<2x8x1xf32> to vector<2x8x8xf32>
    %627 = arith.mulf %622, %626 : vector<2x8x8xf32>
    %628 = vector.extract_strided_slice %607 {offsets = [0, 0, 0], sizes = [2, 8, 8], strides = [1, 1, 1]} : vector<2x8x32xf32> to vector<2x8x8xf32>
    "tpu.trace_start"() <{level = 10 : i32, message = "bqk,bkd->bqd"}> : () -> ()
    %cst_233 = arith.constant dense<0.000000e+00> : vector<2x8x8xf32>
    %629 = tpu.matmul %627, %628, %cst_233 {dimension_numbers = #tpu.dot_dimension_numbers<[2], [1], [1], [2], [0, 0, 0, 1, 1, 2], [0], [0]>} : vector<2x8x8xf32>, vector<2x8x8xf32>, vector<2x8x8xf32> -> vector<2x8x8xf32>
    "tpu.trace_stop"() : () -> ()
    %630 = vector.shape_cast %629 : vector<2x8x8xf32> to vector<16x8xf32>
    %631 = vector.extract_strided_slice %588 {offsets = [0, 0], sizes = [8, 32], strides = [1, 1]} : vector<32x32xf32> to vector<8x32xf32>
    %cst_234 = arith.constant dense<0.000000e+00> : vector<16x32xf32>
    %632 = tpu.matmul %630, %631, %cst_234 {dimension_numbers = #tpu.dot_dimension_numbers<[1], [0], [0], [1], [0, 0, 1, 1], [], []>} : vector<16x8xf32>, vector<8x32xf32>, vector<16x32xf32> -> vector<16x32xf32>
    %633 = arith.addf %610, %632 : vector<16x32xf32>
    %634 = vector.extract_strided_slice %605 {offsets = [0, 0, 8], sizes = [2, 8, 8], strides = [1, 1, 1]} : vector<2x8x32xf32> to vector<2x8x8xf32>
    %635 = vector.extract_strided_slice %606 {offsets = [0, 0, 8], sizes = [2, 8, 8], strides = [1, 1, 1]} : vector<2x8x32xf32> to vector<2x8x8xf32>
    "tpu.trace_start"() <{level = 10 : i32, message = "bqd,bkd->bqk"}> : () -> ()
    %cst_235 = arith.constant dense<0.000000e+00> : vector<2x8x8xf32>
    %636 = tpu.matmul %634, %635, %cst_235 {dimension_numbers = #tpu.dot_dimension_numbers<[2], [2], [1], [1], [0, 0, 0, 1, 1, 1], [0], [0]>} : vector<2x8x8xf32>, vector<2x8x8xf32>, vector<2x8x8xf32> -> vector<2x8x8xf32>
    "tpu.trace_stop"() : () -> ()
    %cst_236 = arith.constant 0.353553385 : f32
    %637 = vector.broadcast %cst_236 : f32 to vector<2x8x8xf32>
    %638 = arith.mulf %636, %637 : vector<2x8x8xf32>
    %cst_237 = arith.constant -1.000000e+09 : f32
    %639 = vector.broadcast %cst_237 : f32 to vector<2x8x8xf32>
    %640 = arith.select %11, %638, %639 : vector<2x8x8xi1>, vector<2x8x8xf32>
    %cst_238 = arith.constant dense<0xFF800000> : vector<2x8xf32>
    %641 = vector.multi_reduction <maximumf>, %640, %cst_238 [2] : vector<2x8x8xf32> to vector<2x8xf32>
    %642 = vector.shape_cast %641 : vector<2x8xf32> to vector<2x8x1xf32>
    %643 = vector.broadcast %642 : vector<2x8x1xf32> to vector<2x8x8xf32>
    %644 = arith.subf %640, %643 : vector<2x8x8xf32>
    %645 = math.exp %644 : vector<2x8x8xf32>
    %cst_239 = arith.constant dense<0.000000e+00> : vector<2x8xf32>
    %646 = vector.multi_reduction <add>, %645, %cst_239 [2] : vector<2x8x8xf32> to vector<2x8xf32>
    %647 = vector.shape_cast %646 : vector<2x8xf32> to vector<2x8x1xf32>
    %648 = tpu.reciprocal %647 {approx = true} : vector<2x8x1xf32> -> vector<2x8x1xf32>
    %649 = vector.broadcast %648 : vector<2x8x1xf32> to vector<2x8x8xf32>
    %650 = arith.mulf %645, %649 : vector<2x8x8xf32>
    %651 = vector.extract_strided_slice %607 {offsets = [0, 0, 8], sizes = [2, 8, 8], strides = [1, 1, 1]} : vector<2x8x32xf32> to vector<2x8x8xf32>
    "tpu.trace_start"() <{level = 10 : i32, message = "bqk,bkd->bqd"}> : () -> ()
    %cst_240 = arith.constant dense<0.000000e+00> : vector<2x8x8xf32>
    %652 = tpu.matmul %650, %651, %cst_240 {dimension_numbers = #tpu.dot_dimension_numbers<[2], [1], [1], [2], [0, 0, 0, 1, 1, 2], [0], [0]>} : vector<2x8x8xf32>, vector<2x8x8xf32>, vector<2x8x8xf32> -> vector<2x8x8xf32>
    "tpu.trace_stop"() : () -> ()
    %653 = vector.shape_cast %652 : vector<2x8x8xf32> to vector<16x8xf32>
    %654 = vector.extract_strided_slice %588 {offsets = [8, 0], sizes = [8, 32], strides = [1, 1]} : vector<32x32xf32> to vector<8x32xf32>
    %cst_241 = arith.constant dense<0.000000e+00> : vector<16x32xf32>
    %655 = tpu.matmul %653, %654, %cst_241 {dimension_numbers = #tpu.dot_dimension_numbers<[1], [0], [0], [1], [0, 0, 1, 1], [], []>} : vector<16x8xf32>, vector<8x32xf32>, vector<16x32xf32> -> vector<16x32xf32>
    %656 = arith.addf %633, %655 : vector<16x32xf32>
    %657 = vector.extract_strided_slice %605 {offsets = [0, 0, 16], sizes = [2, 8, 8], strides = [1, 1, 1]} : vector<2x8x32xf32> to vector<2x8x8xf32>
    %658 = vector.extract_strided_slice %606 {offsets = [0, 0, 16], sizes = [2, 8, 8], strides = [1, 1, 1]} : vector<2x8x32xf32> to vector<2x8x8xf32>
    "tpu.trace_start"() <{level = 10 : i32, message = "bqd,bkd->bqk"}> : () -> ()
    %cst_242 = arith.constant dense<0.000000e+00> : vector<2x8x8xf32>
    %659 = tpu.matmul %657, %658, %cst_242 {dimension_numbers = #tpu.dot_dimension_numbers<[2], [2], [1], [1], [0, 0, 0, 1, 1, 1], [0], [0]>} : vector<2x8x8xf32>, vector<2x8x8xf32>, vector<2x8x8xf32> -> vector<2x8x8xf32>
    "tpu.trace_stop"() : () -> ()
    %cst_243 = arith.constant 0.353553385 : f32
    %660 = vector.broadcast %cst_243 : f32 to vector<2x8x8xf32>
    %661 = arith.mulf %659, %660 : vector<2x8x8xf32>
    %cst_244 = arith.constant -1.000000e+09 : f32
    %662 = vector.broadcast %cst_244 : f32 to vector<2x8x8xf32>
    %663 = arith.select %11, %661, %662 : vector<2x8x8xi1>, vector<2x8x8xf32>
    %cst_245 = arith.constant dense<0xFF800000> : vector<2x8xf32>
    %664 = vector.multi_reduction <maximumf>, %663, %cst_245 [2] : vector<2x8x8xf32> to vector<2x8xf32>
    %665 = vector.shape_cast %664 : vector<2x8xf32> to vector<2x8x1xf32>
    %666 = vector.broadcast %665 : vector<2x8x1xf32> to vector<2x8x8xf32>
    %667 = arith.subf %663, %666 : vector<2x8x8xf32>
    %668 = math.exp %667 : vector<2x8x8xf32>
    %cst_246 = arith.constant dense<0.000000e+00> : vector<2x8xf32>
    %669 = vector.multi_reduction <add>, %668, %cst_246 [2] : vector<2x8x8xf32> to vector<2x8xf32>
    %670 = vector.shape_cast %669 : vector<2x8xf32> to vector<2x8x1xf32>
    %671 = tpu.reciprocal %670 {approx = true} : vector<2x8x1xf32> -> vector<2x8x1xf32>
    %672 = vector.broadcast %671 : vector<2x8x1xf32> to vector<2x8x8xf32>
    %673 = arith.mulf %668, %672 : vector<2x8x8xf32>
    %674 = vector.extract_strided_slice %607 {offsets = [0, 0, 16], sizes = [2, 8, 8], strides = [1, 1, 1]} : vector<2x8x32xf32> to vector<2x8x8xf32>
    "tpu.trace_start"() <{level = 10 : i32, message = "bqk,bkd->bqd"}> : () -> ()
    %cst_247 = arith.constant dense<0.000000e+00> : vector<2x8x8xf32>
    %675 = tpu.matmul %673, %674, %cst_247 {dimension_numbers = #tpu.dot_dimension_numbers<[2], [1], [1], [2], [0, 0, 0, 1, 1, 2], [0], [0]>} : vector<2x8x8xf32>, vector<2x8x8xf32>, vector<2x8x8xf32> -> vector<2x8x8xf32>
    "tpu.trace_stop"() : () -> ()
    %676 = vector.shape_cast %675 : vector<2x8x8xf32> to vector<16x8xf32>
    %677 = vector.extract_strided_slice %588 {offsets = [16, 0], sizes = [8, 32], strides = [1, 1]} : vector<32x32xf32> to vector<8x32xf32>
    %cst_248 = arith.constant dense<0.000000e+00> : vector<16x32xf32>
    %678 = tpu.matmul %676, %677, %cst_248 {dimension_numbers = #tpu.dot_dimension_numbers<[1], [0], [0], [1], [0, 0, 1, 1], [], []>} : vector<16x8xf32>, vector<8x32xf32>, vector<16x32xf32> -> vector<16x32xf32>
    %679 = arith.addf %656, %678 : vector<16x32xf32>
    %680 = vector.extract_strided_slice %605 {offsets = [0, 0, 24], sizes = [2, 8, 8], strides = [1, 1, 1]} : vector<2x8x32xf32> to vector<2x8x8xf32>
    %681 = vector.extract_strided_slice %606 {offsets = [0, 0, 24], sizes = [2, 8, 8], strides = [1, 1, 1]} : vector<2x8x32xf32> to vector<2x8x8xf32>
    "tpu.trace_start"() <{level = 10 : i32, message = "bqd,bkd->bqk"}> : () -> ()
    %cst_249 = arith.constant dense<0.000000e+00> : vector<2x8x8xf32>
    %682 = tpu.matmul %680, %681, %cst_249 {dimension_numbers = #tpu.dot_dimension_numbers<[2], [2], [1], [1], [0, 0, 0, 1, 1, 1], [0], [0]>} : vector<2x8x8xf32>, vector<2x8x8xf32>, vector<2x8x8xf32> -> vector<2x8x8xf32>
    "tpu.trace_stop"() : () -> ()
    %cst_250 = arith.constant 0.353553385 : f32
    %683 = vector.broadcast %cst_250 : f32 to vector<2x8x8xf32>
    %684 = arith.mulf %682, %683 : vector<2x8x8xf32>
    %cst_251 = arith.constant -1.000000e+09 : f32
    %685 = vector.broadcast %cst_251 : f32 to vector<2x8x8xf32>
    %686 = arith.select %11, %684, %685 : vector<2x8x8xi1>, vector<2x8x8xf32>
    %cst_252 = arith.constant dense<0xFF800000> : vector<2x8xf32>
    %687 = vector.multi_reduction <maximumf>, %686, %cst_252 [2] : vector<2x8x8xf32> to vector<2x8xf32>
    %688 = vector.shape_cast %687 : vector<2x8xf32> to vector<2x8x1xf32>
    %689 = vector.broadcast %688 : vector<2x8x1xf32> to vector<2x8x8xf32>
    %690 = arith.subf %686, %689 : vector<2x8x8xf32>
    %691 = math.exp %690 : vector<2x8x8xf32>
    %cst_253 = arith.constant dense<0.000000e+00> : vector<2x8xf32>
    %692 = vector.multi_reduction <add>, %691, %cst_253 [2] : vector<2x8x8xf32> to vector<2x8xf32>
    %693 = vector.shape_cast %692 : vector<2x8xf32> to vector<2x8x1xf32>
    %694 = tpu.reciprocal %693 {approx = true} : vector<2x8x1xf32> -> vector<2x8x1xf32>
    %695 = vector.broadcast %694 : vector<2x8x1xf32> to vector<2x8x8xf32>
    %696 = arith.mulf %691, %695 : vector<2x8x8xf32>
    %697 = vector.extract_strided_slice %607 {offsets = [0, 0, 24], sizes = [2, 8, 8], strides = [1, 1, 1]} : vector<2x8x32xf32> to vector<2x8x8xf32>
    "tpu.trace_start"() <{level = 10 : i32, message = "bqk,bkd->bqd"}> : () -> ()
    %cst_254 = arith.constant dense<0.000000e+00> : vector<2x8x8xf32>
    %698 = tpu.matmul %696, %697, %cst_254 {dimension_numbers = #tpu.dot_dimension_numbers<[2], [1], [1], [2], [0, 0, 0, 1, 1, 2], [0], [0]>} : vector<2x8x8xf32>, vector<2x8x8xf32>, vector<2x8x8xf32> -> vector<2x8x8xf32>
    "tpu.trace_stop"() : () -> ()
    %699 = vector.shape_cast %698 : vector<2x8x8xf32> to vector<16x8xf32>
    %700 = vector.extract_strided_slice %588 {offsets = [24, 0], sizes = [8, 32], strides = [1, 1]} : vector<32x32xf32> to vector<8x32xf32>
    %cst_255 = arith.constant dense<0.000000e+00> : vector<16x32xf32>
    %701 = tpu.matmul %699, %700, %cst_255 {dimension_numbers = #tpu.dot_dimension_numbers<[1], [0], [0], [1], [0, 0, 1, 1], [], []>} : vector<16x8xf32>, vector<8x32xf32>, vector<16x32xf32> -> vector<16x32xf32>
    %702 = arith.addf %679, %701 : vector<16x32xf32>
    %703 = arith.addf %555, %702 : vector<16x32xf32>
    %c0_256 = arith.constant 0 : index
    %c0_257 = arith.constant 0 : index
    %704 = vector.load %arg30[%c0_256, %c0_257] : memref<2x32xf32, #tpu.memory_space<vmem>>, vector<1x32xf32>
    %705 = vector.shape_cast %704 : vector<1x32xf32> to vector<32xf32>
    %c0_258 = arith.constant 0 : index
    %c0_259 = arith.constant 0 : index
    %706 = vector.load %arg31[%c0_258, %c0_259] : memref<2x32xf32, #tpu.memory_space<vmem>>, vector<1x32xf32>
    %707 = vector.shape_cast %706 : vector<1x32xf32> to vector<32xf32>
    %cst_260 = arith.constant dense<0.000000e+00> : vector<16xf32>
    %708 = vector.multi_reduction <add>, %703, %cst_260 [1] : vector<16x32xf32> to vector<16xf32>
    %709 = vector.shape_cast %708 : vector<16xf32> to vector<16x1xf32>
    %cst_261 = arith.constant 3.200000e+01 : f32
    %710 = vector.broadcast %cst_261 : f32 to vector<16x1xf32>
    %711 = arith.divf %709, %710 : vector<16x1xf32>
    %712 = vector.broadcast %711 : vector<16x1xf32> to vector<16x32xf32>
    %713 = arith.subf %703, %712 : vector<16x32xf32>
    %714 = arith.mulf %713, %713 : vector<16x32xf32>
    %cst_262 = arith.constant dense<0.000000e+00> : vector<16xf32>
    %715 = vector.multi_reduction <add>, %714, %cst_262 [1] : vector<16x32xf32> to vector<16xf32>
    %716 = vector.shape_cast %715 : vector<16xf32> to vector<16x1xf32>
    %cst_263 = arith.constant 0.0322580636 : f32
    %717 = vector.broadcast %cst_263 : f32 to vector<16x1xf32>
    %718 = arith.mulf %716, %717 : vector<16x1xf32>
    %719 = math.sqrt %718 : vector<16x1xf32>
    %cst_264 = arith.constant 9.99999997E-7 : f32
    %720 = vector.broadcast %cst_264 : f32 to vector<16x1xf32>
    %721 = arith.addf %719, %720 : vector<16x1xf32>
    %722 = tpu.reciprocal %721 {approx = true} : vector<16x1xf32> -> vector<16x1xf32>
    %723 = vector.shape_cast %705 : vector<32xf32> to vector<1x32xf32>
    %724 = vector.broadcast %723 : vector<1x32xf32> to vector<16x32xf32>
    %725 = arith.mulf %724, %713 : vector<16x32xf32>
    %726 = vector.broadcast %722 : vector<16x1xf32> to vector<16x32xf32>
    %727 = arith.mulf %725, %726 : vector<16x32xf32>
    %728 = vector.shape_cast %707 : vector<32xf32> to vector<1x32xf32>
    %729 = vector.broadcast %728 : vector<1x32xf32> to vector<16x32xf32>
    %730 = arith.addf %727, %729 : vector<16x32xf32>
    %c0_265 = arith.constant 0 : index
    %c0_266 = arith.constant 0 : index
    %c0_267 = arith.constant 0 : index
    %731 = vector.load %arg32[%c0_265, %c0_266, %c0_267] : memref<2x32x64xf32, #tpu.memory_space<vmem>>, vector<1x32x64xf32>
    %732 = vector.shape_cast %731 : vector<1x32x64xf32> to vector<32x64xf32>
    %c0_268 = arith.constant 0 : index
    %c0_269 = arith.constant 0 : index
    %733 = vector.load %arg33[%c0_268, %c0_269] : memref<2x64xf32, #tpu.memory_space<vmem>>, vector<1x64xf32>
    %734 = vector.shape_cast %733 : vector<1x64xf32> to vector<64xf32>
    %c0_270 = arith.constant 0 : index
    %c0_271 = arith.constant 0 : index
    %c0_272 = arith.constant 0 : index
    %735 = vector.load %arg34[%c0_270, %c0_271, %c0_272] : memref<2x64x32xf32, #tpu.memory_space<vmem>>, vector<1x64x32xf32>
    %736 = vector.shape_cast %735 : vector<1x64x32xf32> to vector<64x32xf32>
    %c0_273 = arith.constant 0 : index
    %c0_274 = arith.constant 0 : index
    %737 = vector.load %arg35[%c0_273, %c0_274] : memref<2x32xf32, #tpu.memory_space<vmem>>, vector<1x32xf32>
    %738 = vector.shape_cast %737 : vector<1x32xf32> to vector<32xf32>
    %cst_275 = arith.constant dense<0.000000e+00> : vector<16x64xf32>
    %739 = tpu.matmul %730, %732, %cst_275 {dimension_numbers = #tpu.dot_dimension_numbers<[1], [0], [0], [1], [0, 0, 1, 1], [], []>} : vector<16x32xf32>, vector<32x64xf32>, vector<16x64xf32> -> vector<16x64xf32>
    %740 = vector.shape_cast %734 : vector<64xf32> to vector<1x64xf32>
    %741 = vector.broadcast %740 : vector<1x64xf32> to vector<16x64xf32>
    %742 = arith.addf %739, %741 : vector<16x64xf32>
    %cst_276 = arith.constant 0.000000e+00 : f32
    %743 = vector.broadcast %cst_276 : f32 to vector<16x64xf32>
    %744 = arith.maximumf %742, %743 : vector<16x64xf32>
    %cst_277 = arith.constant dense<0.000000e+00> : vector<16x32xf32>
    %745 = tpu.matmul %744, %736, %cst_277 {dimension_numbers = #tpu.dot_dimension_numbers<[1], [0], [0], [1], [0, 0, 1, 1], [], []>} : vector<16x64xf32>, vector<64x32xf32>, vector<16x32xf32> -> vector<16x32xf32>
    %746 = vector.shape_cast %738 : vector<32xf32> to vector<1x32xf32>
    %747 = vector.broadcast %746 : vector<1x32xf32> to vector<16x32xf32>
    %748 = arith.addf %745, %747 : vector<16x32xf32>
    %749 = arith.addf %703, %748 : vector<16x32xf32>
    %c1_278 = arith.constant 1 : index
    %c0_279 = arith.constant 0 : index
    %750 = vector.load %arg18[%c1_278, %c0_279] : memref<2x32xf32, #tpu.memory_space<vmem>>, vector<1x32xf32>
    %751 = vector.shape_cast %750 : vector<1x32xf32> to vector<32xf32>
    %c1_280 = arith.constant 1 : index
    %c0_281 = arith.constant 0 : index
    %752 = vector.load %arg19[%c1_280, %c0_281] : memref<2x32xf32, #tpu.memory_space<vmem>>, vector<1x32xf32>
    %753 = vector.shape_cast %752 : vector<1x32xf32> to vector<32xf32>
    %cst_282 = arith.constant dense<0.000000e+00> : vector<16xf32>
    %754 = vector.multi_reduction <add>, %749, %cst_282 [1] : vector<16x32xf32> to vector<16xf32>
    %755 = vector.shape_cast %754 : vector<16xf32> to vector<16x1xf32>
    %cst_283 = arith.constant 3.200000e+01 : f32
    %756 = vector.broadcast %cst_283 : f32 to vector<16x1xf32>
    %757 = arith.divf %755, %756 : vector<16x1xf32>
    %758 = vector.broadcast %757 : vector<16x1xf32> to vector<16x32xf32>
    %759 = arith.subf %749, %758 : vector<16x32xf32>
    %760 = arith.mulf %759, %759 : vector<16x32xf32>
    %cst_284 = arith.constant dense<0.000000e+00> : vector<16xf32>
    %761 = vector.multi_reduction <add>, %760, %cst_284 [1] : vector<16x32xf32> to vector<16xf32>
    %762 = vector.shape_cast %761 : vector<16xf32> to vector<16x1xf32>
    %cst_285 = arith.constant 0.0322580636 : f32
    %763 = vector.broadcast %cst_285 : f32 to vector<16x1xf32>
    %764 = arith.mulf %762, %763 : vector<16x1xf32>
    %765 = math.sqrt %764 : vector<16x1xf32>
    %cst_286 = arith.constant 9.99999997E-7 : f32
    %766 = vector.broadcast %cst_286 : f32 to vector<16x1xf32>
    %767 = arith.addf %765, %766 : vector<16x1xf32>
    %768 = tpu.reciprocal %767 {approx = true} : vector<16x1xf32> -> vector<16x1xf32>
    %769 = vector.shape_cast %751 : vector<32xf32> to vector<1x32xf32>
    %770 = vector.broadcast %769 : vector<1x32xf32> to vector<16x32xf32>
    %771 = arith.mulf %770, %759 : vector<16x32xf32>
    %772 = vector.broadcast %768 : vector<16x1xf32> to vector<16x32xf32>
    %773 = arith.mulf %771, %772 : vector<16x32xf32>
    %774 = vector.shape_cast %753 : vector<32xf32> to vector<1x32xf32>
    %775 = vector.broadcast %774 : vector<1x32xf32> to vector<16x32xf32>
    %776 = arith.addf %773, %775 : vector<16x32xf32>
    %c1_287 = arith.constant 1 : index
    %c0_288 = arith.constant 0 : index
    %c0_289 = arith.constant 0 : index
    %777 = vector.load %arg20[%c1_287, %c0_288, %c0_289] : memref<2x32x96xf32, #tpu.memory_space<vmem>>, vector<1x32x96xf32>
    %778 = vector.shape_cast %777 : vector<1x32x96xf32> to vector<32x96xf32>
    %c1_290 = arith.constant 1 : index
    %c0_291 = arith.constant 0 : index
    %779 = vector.load %arg21[%c1_290, %c0_291] : memref<2x96xf32, #tpu.memory_space<vmem>>, vector<1x96xf32>
    %780 = vector.shape_cast %779 : vector<1x96xf32> to vector<96xf32>
    %c1_292 = arith.constant 1 : index
    %c0_293 = arith.constant 0 : index
    %c0_294 = arith.constant 0 : index
    %781 = vector.load %arg22[%c1_292, %c0_293, %c0_294] : memref<2x32x32xf32, #tpu.memory_space<vmem>>, vector<1x32x32xf32>
    %782 = vector.shape_cast %781 : vector<1x32x32xf32> to vector<32x32xf32>
    %c1_295 = arith.constant 1 : index
    %c0_296 = arith.constant 0 : index
    %783 = vector.load %arg23[%c1_295, %c0_296] : memref<2x32xf32, #tpu.memory_space<vmem>>, vector<1x32xf32>
    %784 = vector.shape_cast %783 : vector<1x32xf32> to vector<32xf32>
    %cst_297 = arith.constant dense<0.000000e+00> : vector<16x96xf32>
    %785 = tpu.matmul %776, %778, %cst_297 {dimension_numbers = #tpu.dot_dimension_numbers<[1], [0], [0], [1], [0, 0, 1, 1], [], []>} : vector<16x32xf32>, vector<32x96xf32>, vector<16x96xf32> -> vector<16x96xf32>
    %786 = vector.shape_cast %780 : vector<96xf32> to vector<1x96xf32>
    %787 = vector.broadcast %786 : vector<1x96xf32> to vector<16x96xf32>
    %788 = arith.addf %785, %787 : vector<16x96xf32>
    %789 = vector.extract_strided_slice %788 {offsets = [0, 0], sizes = [16, 32], strides = [1, 1]} : vector<16x96xf32> to vector<16x32xf32>
    %790 = vector.extract_strided_slice %788 {offsets = [0, 32], sizes = [16, 32], strides = [1, 1]} : vector<16x96xf32> to vector<16x32xf32>
    %791 = vector.extract_strided_slice %788 {offsets = [0, 64], sizes = [16, 32], strides = [1, 1]} : vector<16x96xf32> to vector<16x32xf32>
    %792 = vector.shape_cast %789 : vector<16x32xf32> to vector<2x8x32xf32>
    %793 = vector.shape_cast %790 : vector<16x32xf32> to vector<2x8x32xf32>
    %794 = vector.shape_cast %791 : vector<16x32xf32> to vector<2x8x32xf32>
    %795 = vector.shape_cast %784 : vector<32xf32> to vector<1x32xf32>
    %796 = vector.shape_cast %795 : vector<1x32xf32> to vector<1x32xf32>
    %797 = vector.broadcast %796 : vector<1x32xf32> to vector<16x32xf32>
    %798 = vector.extract_strided_slice %792 {offsets = [0, 0, 0], sizes = [2, 8, 8], strides = [1, 1, 1]} : vector<2x8x32xf32> to vector<2x8x8xf32>
    %799 = vector.extract_strided_slice %793 {offsets = [0, 0, 0], sizes = [2, 8, 8], strides = [1, 1, 1]} : vector<2x8x32xf32> to vector<2x8x8xf32>
    "tpu.trace_start"() <{level = 10 : i32, message = "bqd,bkd->bqk"}> : () -> ()
    %cst_298 = arith.constant dense<0.000000e+00> : vector<2x8x8xf32>
    %800 = tpu.matmul %798, %799, %cst_298 {dimension_numbers = #tpu.dot_dimension_numbers<[2], [2], [1], [1], [0, 0, 0, 1, 1, 1], [0], [0]>} : vector<2x8x8xf32>, vector<2x8x8xf32>, vector<2x8x8xf32> -> vector<2x8x8xf32>
    "tpu.trace_stop"() : () -> ()
    %cst_299 = arith.constant 0.353553385 : f32
    %801 = vector.broadcast %cst_299 : f32 to vector<2x8x8xf32>
    %802 = arith.mulf %800, %801 : vector<2x8x8xf32>
    %cst_300 = arith.constant -1.000000e+09 : f32
    %803 = vector.broadcast %cst_300 : f32 to vector<2x8x8xf32>
    %804 = arith.select %7, %802, %803 : vector<2x8x8xi1>, vector<2x8x8xf32>
    %cst_301 = arith.constant dense<0xFF800000> : vector<2x8xf32>
    %805 = vector.multi_reduction <maximumf>, %804, %cst_301 [2] : vector<2x8x8xf32> to vector<2x8xf32>
    %806 = vector.shape_cast %805 : vector<2x8xf32> to vector<2x8x1xf32>
    %807 = vector.broadcast %806 : vector<2x8x1xf32> to vector<2x8x8xf32>
    %808 = arith.subf %804, %807 : vector<2x8x8xf32>
    %809 = math.exp %808 : vector<2x8x8xf32>
    %cst_302 = arith.constant dense<0.000000e+00> : vector<2x8xf32>
    %810 = vector.multi_reduction <add>, %809, %cst_302 [2] : vector<2x8x8xf32> to vector<2x8xf32>
    %811 = vector.shape_cast %810 : vector<2x8xf32> to vector<2x8x1xf32>
    %812 = tpu.reciprocal %811 {approx = true} : vector<2x8x1xf32> -> vector<2x8x1xf32>
    %813 = vector.broadcast %812 : vector<2x8x1xf32> to vector<2x8x8xf32>
    %814 = arith.mulf %809, %813 : vector<2x8x8xf32>
    %815 = vector.extract_strided_slice %794 {offsets = [0, 0, 0], sizes = [2, 8, 8], strides = [1, 1, 1]} : vector<2x8x32xf32> to vector<2x8x8xf32>
    "tpu.trace_start"() <{level = 10 : i32, message = "bqk,bkd->bqd"}> : () -> ()
    %cst_303 = arith.constant dense<0.000000e+00> : vector<2x8x8xf32>
    %816 = tpu.matmul %814, %815, %cst_303 {dimension_numbers = #tpu.dot_dimension_numbers<[2], [1], [1], [2], [0, 0, 0, 1, 1, 2], [0], [0]>} : vector<2x8x8xf32>, vector<2x8x8xf32>, vector<2x8x8xf32> -> vector<2x8x8xf32>
    "tpu.trace_stop"() : () -> ()
    %817 = vector.shape_cast %816 : vector<2x8x8xf32> to vector<16x8xf32>
    %818 = vector.extract_strided_slice %782 {offsets = [0, 0], sizes = [8, 32], strides = [1, 1]} : vector<32x32xf32> to vector<8x32xf32>
    %cst_304 = arith.constant dense<0.000000e+00> : vector<16x32xf32>
    %819 = tpu.matmul %817, %818, %cst_304 {dimension_numbers = #tpu.dot_dimension_numbers<[1], [0], [0], [1], [0, 0, 1, 1], [], []>} : vector<16x8xf32>, vector<8x32xf32>, vector<16x32xf32> -> vector<16x32xf32>
    %820 = arith.addf %797, %819 : vector<16x32xf32>
    %821 = vector.extract_strided_slice %792 {offsets = [0, 0, 8], sizes = [2, 8, 8], strides = [1, 1, 1]} : vector<2x8x32xf32> to vector<2x8x8xf32>
    %822 = vector.extract_strided_slice %793 {offsets = [0, 0, 8], sizes = [2, 8, 8], strides = [1, 1, 1]} : vector<2x8x32xf32> to vector<2x8x8xf32>
    "tpu.trace_start"() <{level = 10 : i32, message = "bqd,bkd->bqk"}> : () -> ()
    %cst_305 = arith.constant dense<0.000000e+00> : vector<2x8x8xf32>
    %823 = tpu.matmul %821, %822, %cst_305 {dimension_numbers = #tpu.dot_dimension_numbers<[2], [2], [1], [1], [0, 0, 0, 1, 1, 1], [0], [0]>} : vector<2x8x8xf32>, vector<2x8x8xf32>, vector<2x8x8xf32> -> vector<2x8x8xf32>
    "tpu.trace_stop"() : () -> ()
    %cst_306 = arith.constant 0.353553385 : f32
    %824 = vector.broadcast %cst_306 : f32 to vector<2x8x8xf32>
    %825 = arith.mulf %823, %824 : vector<2x8x8xf32>
    %cst_307 = arith.constant -1.000000e+09 : f32
    %826 = vector.broadcast %cst_307 : f32 to vector<2x8x8xf32>
    %827 = arith.select %7, %825, %826 : vector<2x8x8xi1>, vector<2x8x8xf32>
    %cst_308 = arith.constant dense<0xFF800000> : vector<2x8xf32>
    %828 = vector.multi_reduction <maximumf>, %827, %cst_308 [2] : vector<2x8x8xf32> to vector<2x8xf32>
    %829 = vector.shape_cast %828 : vector<2x8xf32> to vector<2x8x1xf32>
    %830 = vector.broadcast %829 : vector<2x8x1xf32> to vector<2x8x8xf32>
    %831 = arith.subf %827, %830 : vector<2x8x8xf32>
    %832 = math.exp %831 : vector<2x8x8xf32>
    %cst_309 = arith.constant dense<0.000000e+00> : vector<2x8xf32>
    %833 = vector.multi_reduction <add>, %832, %cst_309 [2] : vector<2x8x8xf32> to vector<2x8xf32>
    %834 = vector.shape_cast %833 : vector<2x8xf32> to vector<2x8x1xf32>
    %835 = tpu.reciprocal %834 {approx = true} : vector<2x8x1xf32> -> vector<2x8x1xf32>
    %836 = vector.broadcast %835 : vector<2x8x1xf32> to vector<2x8x8xf32>
    %837 = arith.mulf %832, %836 : vector<2x8x8xf32>
    %838 = vector.extract_strided_slice %794 {offsets = [0, 0, 8], sizes = [2, 8, 8], strides = [1, 1, 1]} : vector<2x8x32xf32> to vector<2x8x8xf32>
    "tpu.trace_start"() <{level = 10 : i32, message = "bqk,bkd->bqd"}> : () -> ()
    %cst_310 = arith.constant dense<0.000000e+00> : vector<2x8x8xf32>
    %839 = tpu.matmul %837, %838, %cst_310 {dimension_numbers = #tpu.dot_dimension_numbers<[2], [1], [1], [2], [0, 0, 0, 1, 1, 2], [0], [0]>} : vector<2x8x8xf32>, vector<2x8x8xf32>, vector<2x8x8xf32> -> vector<2x8x8xf32>
    "tpu.trace_stop"() : () -> ()
    %840 = vector.shape_cast %839 : vector<2x8x8xf32> to vector<16x8xf32>
    %841 = vector.extract_strided_slice %782 {offsets = [8, 0], sizes = [8, 32], strides = [1, 1]} : vector<32x32xf32> to vector<8x32xf32>
    %cst_311 = arith.constant dense<0.000000e+00> : vector<16x32xf32>
    %842 = tpu.matmul %840, %841, %cst_311 {dimension_numbers = #tpu.dot_dimension_numbers<[1], [0], [0], [1], [0, 0, 1, 1], [], []>} : vector<16x8xf32>, vector<8x32xf32>, vector<16x32xf32> -> vector<16x32xf32>
    %843 = arith.addf %820, %842 : vector<16x32xf32>
    %844 = vector.extract_strided_slice %792 {offsets = [0, 0, 16], sizes = [2, 8, 8], strides = [1, 1, 1]} : vector<2x8x32xf32> to vector<2x8x8xf32>
    %845 = vector.extract_strided_slice %793 {offsets = [0, 0, 16], sizes = [2, 8, 8], strides = [1, 1, 1]} : vector<2x8x32xf32> to vector<2x8x8xf32>
    "tpu.trace_start"() <{level = 10 : i32, message = "bqd,bkd->bqk"}> : () -> ()
    %cst_312 = arith.constant dense<0.000000e+00> : vector<2x8x8xf32>
    %846 = tpu.matmul %844, %845, %cst_312 {dimension_numbers = #tpu.dot_dimension_numbers<[2], [2], [1], [1], [0, 0, 0, 1, 1, 1], [0], [0]>} : vector<2x8x8xf32>, vector<2x8x8xf32>, vector<2x8x8xf32> -> vector<2x8x8xf32>
    "tpu.trace_stop"() : () -> ()
    %cst_313 = arith.constant 0.353553385 : f32
    %847 = vector.broadcast %cst_313 : f32 to vector<2x8x8xf32>
    %848 = arith.mulf %846, %847 : vector<2x8x8xf32>
    %cst_314 = arith.constant -1.000000e+09 : f32
    %849 = vector.broadcast %cst_314 : f32 to vector<2x8x8xf32>
    %850 = arith.select %7, %848, %849 : vector<2x8x8xi1>, vector<2x8x8xf32>
    %cst_315 = arith.constant dense<0xFF800000> : vector<2x8xf32>
    %851 = vector.multi_reduction <maximumf>, %850, %cst_315 [2] : vector<2x8x8xf32> to vector<2x8xf32>
    %852 = vector.shape_cast %851 : vector<2x8xf32> to vector<2x8x1xf32>
    %853 = vector.broadcast %852 : vector<2x8x1xf32> to vector<2x8x8xf32>
    %854 = arith.subf %850, %853 : vector<2x8x8xf32>
    %855 = math.exp %854 : vector<2x8x8xf32>
    %cst_316 = arith.constant dense<0.000000e+00> : vector<2x8xf32>
    %856 = vector.multi_reduction <add>, %855, %cst_316 [2] : vector<2x8x8xf32> to vector<2x8xf32>
    %857 = vector.shape_cast %856 : vector<2x8xf32> to vector<2x8x1xf32>
    %858 = tpu.reciprocal %857 {approx = true} : vector<2x8x1xf32> -> vector<2x8x1xf32>
    %859 = vector.broadcast %858 : vector<2x8x1xf32> to vector<2x8x8xf32>
    %860 = arith.mulf %855, %859 : vector<2x8x8xf32>
    %861 = vector.extract_strided_slice %794 {offsets = [0, 0, 16], sizes = [2, 8, 8], strides = [1, 1, 1]} : vector<2x8x32xf32> to vector<2x8x8xf32>
    "tpu.trace_start"() <{level = 10 : i32, message = "bqk,bkd->bqd"}> : () -> ()
    %cst_317 = arith.constant dense<0.000000e+00> : vector<2x8x8xf32>
    %862 = tpu.matmul %860, %861, %cst_317 {dimension_numbers = #tpu.dot_dimension_numbers<[2], [1], [1], [2], [0, 0, 0, 1, 1, 2], [0], [0]>} : vector<2x8x8xf32>, vector<2x8x8xf32>, vector<2x8x8xf32> -> vector<2x8x8xf32>
    "tpu.trace_stop"() : () -> ()
    %863 = vector.shape_cast %862 : vector<2x8x8xf32> to vector<16x8xf32>
    %864 = vector.extract_strided_slice %782 {offsets = [16, 0], sizes = [8, 32], strides = [1, 1]} : vector<32x32xf32> to vector<8x32xf32>
    %cst_318 = arith.constant dense<0.000000e+00> : vector<16x32xf32>
    %865 = tpu.matmul %863, %864, %cst_318 {dimension_numbers = #tpu.dot_dimension_numbers<[1], [0], [0], [1], [0, 0, 1, 1], [], []>} : vector<16x8xf32>, vector<8x32xf32>, vector<16x32xf32> -> vector<16x32xf32>
    %866 = arith.addf %843, %865 : vector<16x32xf32>
    %867 = vector.extract_strided_slice %792 {offsets = [0, 0, 24], sizes = [2, 8, 8], strides = [1, 1, 1]} : vector<2x8x32xf32> to vector<2x8x8xf32>
    %868 = vector.extract_strided_slice %793 {offsets = [0, 0, 24], sizes = [2, 8, 8], strides = [1, 1, 1]} : vector<2x8x32xf32> to vector<2x8x8xf32>
    "tpu.trace_start"() <{level = 10 : i32, message = "bqd,bkd->bqk"}> : () -> ()
    %cst_319 = arith.constant dense<0.000000e+00> : vector<2x8x8xf32>
    %869 = tpu.matmul %867, %868, %cst_319 {dimension_numbers = #tpu.dot_dimension_numbers<[2], [2], [1], [1], [0, 0, 0, 1, 1, 1], [0], [0]>} : vector<2x8x8xf32>, vector<2x8x8xf32>, vector<2x8x8xf32> -> vector<2x8x8xf32>
    "tpu.trace_stop"() : () -> ()
    %cst_320 = arith.constant 0.353553385 : f32
    %870 = vector.broadcast %cst_320 : f32 to vector<2x8x8xf32>
    %871 = arith.mulf %869, %870 : vector<2x8x8xf32>
    %cst_321 = arith.constant -1.000000e+09 : f32
    %872 = vector.broadcast %cst_321 : f32 to vector<2x8x8xf32>
    %873 = arith.select %7, %871, %872 : vector<2x8x8xi1>, vector<2x8x8xf32>
    %cst_322 = arith.constant dense<0xFF800000> : vector<2x8xf32>
    %874 = vector.multi_reduction <maximumf>, %873, %cst_322 [2] : vector<2x8x8xf32> to vector<2x8xf32>
    %875 = vector.shape_cast %874 : vector<2x8xf32> to vector<2x8x1xf32>
    %876 = vector.broadcast %875 : vector<2x8x1xf32> to vector<2x8x8xf32>
    %877 = arith.subf %873, %876 : vector<2x8x8xf32>
    %878 = math.exp %877 : vector<2x8x8xf32>
    %cst_323 = arith.constant dense<0.000000e+00> : vector<2x8xf32>
    %879 = vector.multi_reduction <add>, %878, %cst_323 [2] : vector<2x8x8xf32> to vector<2x8xf32>
    %880 = vector.shape_cast %879 : vector<2x8xf32> to vector<2x8x1xf32>
    %881 = tpu.reciprocal %880 {approx = true} : vector<2x8x1xf32> -> vector<2x8x1xf32>
    %882 = vector.broadcast %881 : vector<2x8x1xf32> to vector<2x8x8xf32>
    %883 = arith.mulf %878, %882 : vector<2x8x8xf32>
    %884 = vector.extract_strided_slice %794 {offsets = [0, 0, 24], sizes = [2, 8, 8], strides = [1, 1, 1]} : vector<2x8x32xf32> to vector<2x8x8xf32>
    "tpu.trace_start"() <{level = 10 : i32, message = "bqk,bkd->bqd"}> : () -> ()
    %cst_324 = arith.constant dense<0.000000e+00> : vector<2x8x8xf32>
    %885 = tpu.matmul %883, %884, %cst_324 {dimension_numbers = #tpu.dot_dimension_numbers<[2], [1], [1], [2], [0, 0, 0, 1, 1, 2], [0], [0]>} : vector<2x8x8xf32>, vector<2x8x8xf32>, vector<2x8x8xf32> -> vector<2x8x8xf32>
    "tpu.trace_stop"() : () -> ()
    %886 = vector.shape_cast %885 : vector<2x8x8xf32> to vector<16x8xf32>
    %887 = vector.extract_strided_slice %782 {offsets = [24, 0], sizes = [8, 32], strides = [1, 1]} : vector<32x32xf32> to vector<8x32xf32>
    %cst_325 = arith.constant dense<0.000000e+00> : vector<16x32xf32>
    %888 = tpu.matmul %886, %887, %cst_325 {dimension_numbers = #tpu.dot_dimension_numbers<[1], [0], [0], [1], [0, 0, 1, 1], [], []>} : vector<16x8xf32>, vector<8x32xf32>, vector<16x32xf32> -> vector<16x32xf32>
    %889 = arith.addf %866, %888 : vector<16x32xf32>
    %890 = arith.addf %749, %889 : vector<16x32xf32>
    %c1_326 = arith.constant 1 : index
    %c0_327 = arith.constant 0 : index
    %891 = vector.load %arg24[%c1_326, %c0_327] : memref<2x32xf32, #tpu.memory_space<vmem>>, vector<1x32xf32>
    %892 = vector.shape_cast %891 : vector<1x32xf32> to vector<32xf32>
    %c1_328 = arith.constant 1 : index
    %c0_329 = arith.constant 0 : index
    %893 = vector.load %arg25[%c1_328, %c0_329] : memref<2x32xf32, #tpu.memory_space<vmem>>, vector<1x32xf32>
    %894 = vector.shape_cast %893 : vector<1x32xf32> to vector<32xf32>
    %cst_330 = arith.constant dense<0.000000e+00> : vector<16xf32>
    %895 = vector.multi_reduction <add>, %890, %cst_330 [1] : vector<16x32xf32> to vector<16xf32>
    %896 = vector.shape_cast %895 : vector<16xf32> to vector<16x1xf32>
    %cst_331 = arith.constant 3.200000e+01 : f32
    %897 = vector.broadcast %cst_331 : f32 to vector<16x1xf32>
    %898 = arith.divf %896, %897 : vector<16x1xf32>
    %899 = vector.broadcast %898 : vector<16x1xf32> to vector<16x32xf32>
    %900 = arith.subf %890, %899 : vector<16x32xf32>
    %901 = arith.mulf %900, %900 : vector<16x32xf32>
    %cst_332 = arith.constant dense<0.000000e+00> : vector<16xf32>
    %902 = vector.multi_reduction <add>, %901, %cst_332 [1] : vector<16x32xf32> to vector<16xf32>
    %903 = vector.shape_cast %902 : vector<16xf32> to vector<16x1xf32>
    %cst_333 = arith.constant 0.0322580636 : f32
    %904 = vector.broadcast %cst_333 : f32 to vector<16x1xf32>
    %905 = arith.mulf %903, %904 : vector<16x1xf32>
    %906 = math.sqrt %905 : vector<16x1xf32>
    %cst_334 = arith.constant 9.99999997E-7 : f32
    %907 = vector.broadcast %cst_334 : f32 to vector<16x1xf32>
    %908 = arith.addf %906, %907 : vector<16x1xf32>
    %909 = tpu.reciprocal %908 {approx = true} : vector<16x1xf32> -> vector<16x1xf32>
    %910 = vector.shape_cast %892 : vector<32xf32> to vector<1x32xf32>
    %911 = vector.broadcast %910 : vector<1x32xf32> to vector<16x32xf32>
    %912 = arith.mulf %911, %900 : vector<16x32xf32>
    %913 = vector.broadcast %909 : vector<16x1xf32> to vector<16x32xf32>
    %914 = arith.mulf %912, %913 : vector<16x32xf32>
    %915 = vector.shape_cast %894 : vector<32xf32> to vector<1x32xf32>
    %916 = vector.broadcast %915 : vector<1x32xf32> to vector<16x32xf32>
    %917 = arith.addf %914, %916 : vector<16x32xf32>
    %c1_335 = arith.constant 1 : index
    %c0_336 = arith.constant 0 : index
    %c0_337 = arith.constant 0 : index
    %918 = vector.load %arg26[%c1_335, %c0_336, %c0_337] : memref<2x32x96xf32, #tpu.memory_space<vmem>>, vector<1x32x96xf32>
    %919 = vector.shape_cast %918 : vector<1x32x96xf32> to vector<32x96xf32>
    %c1_338 = arith.constant 1 : index
    %c0_339 = arith.constant 0 : index
    %920 = vector.load %arg27[%c1_338, %c0_339] : memref<2x96xf32, #tpu.memory_space<vmem>>, vector<1x96xf32>
    %921 = vector.shape_cast %920 : vector<1x96xf32> to vector<96xf32>
    %c1_340 = arith.constant 1 : index
    %c0_341 = arith.constant 0 : index
    %c0_342 = arith.constant 0 : index
    %922 = vector.load %arg28[%c1_340, %c0_341, %c0_342] : memref<2x32x32xf32, #tpu.memory_space<vmem>>, vector<1x32x32xf32>
    %923 = vector.shape_cast %922 : vector<1x32x32xf32> to vector<32x32xf32>
    %c1_343 = arith.constant 1 : index
    %c0_344 = arith.constant 0 : index
    %924 = vector.load %arg29[%c1_343, %c0_344] : memref<2x32xf32, #tpu.memory_space<vmem>>, vector<1x32xf32>
    %925 = vector.shape_cast %924 : vector<1x32xf32> to vector<32xf32>
    %926 = vector.extract_strided_slice %919 {offsets = [0, 0], sizes = [32, 32], strides = [1, 1]} : vector<32x96xf32> to vector<32x32xf32>
    %cst_345 = arith.constant dense<0.000000e+00> : vector<16x32xf32>
    %927 = tpu.matmul %917, %926, %cst_345 {dimension_numbers = #tpu.dot_dimension_numbers<[1], [0], [0], [1], [0, 0, 1, 1], [], []>} : vector<16x32xf32>, vector<32x32xf32>, vector<16x32xf32> -> vector<16x32xf32>
    %928 = vector.extract_strided_slice %921 {offsets = [0], sizes = [32], strides = [1]} : vector<96xf32> to vector<32xf32>
    %929 = vector.shape_cast %928 : vector<32xf32> to vector<1x32xf32>
    %930 = vector.broadcast %929 : vector<1x32xf32> to vector<16x32xf32>
    %931 = arith.addf %927, %930 : vector<16x32xf32>
    %932 = vector.extract_strided_slice %919 {offsets = [0, 32], sizes = [32, 64], strides = [1, 1]} : vector<32x96xf32> to vector<32x64xf32>
    %cst_346 = arith.constant dense<0.000000e+00> : vector<16x64xf32>
    %933 = tpu.matmul %413, %932, %cst_346 {dimension_numbers = #tpu.dot_dimension_numbers<[1], [0], [0], [1], [0, 0, 1, 1], [], []>} : vector<16x32xf32>, vector<32x64xf32>, vector<16x64xf32> -> vector<16x64xf32>
    %934 = vector.extract_strided_slice %921 {offsets = [32], sizes = [64], strides = [1]} : vector<96xf32> to vector<64xf32>
    %935 = vector.shape_cast %934 : vector<64xf32> to vector<1x64xf32>
    %936 = vector.broadcast %935 : vector<1x64xf32> to vector<16x64xf32>
    %937 = arith.addf %933, %936 : vector<16x64xf32>
    %938 = vector.extract_strided_slice %937 {offsets = [0, 0], sizes = [16, 32], strides = [1, 1]} : vector<16x64xf32> to vector<16x32xf32>
    %939 = vector.extract_strided_slice %937 {offsets = [0, 32], sizes = [16, 32], strides = [1, 1]} : vector<16x64xf32> to vector<16x32xf32>
    %940 = vector.shape_cast %931 : vector<16x32xf32> to vector<2x8x32xf32>
    %941 = vector.shape_cast %938 : vector<16x32xf32> to vector<2x8x32xf32>
    %942 = vector.shape_cast %939 : vector<16x32xf32> to vector<2x8x32xf32>
    %943 = vector.shape_cast %925 : vector<32xf32> to vector<1x32xf32>
    %944 = vector.shape_cast %943 : vector<1x32xf32> to vector<1x32xf32>
    %945 = vector.broadcast %944 : vector<1x32xf32> to vector<16x32xf32>
    %946 = vector.extract_strided_slice %940 {offsets = [0, 0, 0], sizes = [2, 8, 8], strides = [1, 1, 1]} : vector<2x8x32xf32> to vector<2x8x8xf32>
    %947 = vector.extract_strided_slice %941 {offsets = [0, 0, 0], sizes = [2, 8, 8], strides = [1, 1, 1]} : vector<2x8x32xf32> to vector<2x8x8xf32>
    "tpu.trace_start"() <{level = 10 : i32, message = "bqd,bkd->bqk"}> : () -> ()
    %cst_347 = arith.constant dense<0.000000e+00> : vector<2x8x8xf32>
    %948 = tpu.matmul %946, %947, %cst_347 {dimension_numbers = #tpu.dot_dimension_numbers<[2], [2], [1], [1], [0, 0, 0, 1, 1, 1], [0], [0]>} : vector<2x8x8xf32>, vector<2x8x8xf32>, vector<2x8x8xf32> -> vector<2x8x8xf32>
    "tpu.trace_stop"() : () -> ()
    %cst_348 = arith.constant 0.353553385 : f32
    %949 = vector.broadcast %cst_348 : f32 to vector<2x8x8xf32>
    %950 = arith.mulf %948, %949 : vector<2x8x8xf32>
    %cst_349 = arith.constant -1.000000e+09 : f32
    %951 = vector.broadcast %cst_349 : f32 to vector<2x8x8xf32>
    %952 = arith.select %11, %950, %951 : vector<2x8x8xi1>, vector<2x8x8xf32>
    %cst_350 = arith.constant dense<0xFF800000> : vector<2x8xf32>
    %953 = vector.multi_reduction <maximumf>, %952, %cst_350 [2] : vector<2x8x8xf32> to vector<2x8xf32>
    %954 = vector.shape_cast %953 : vector<2x8xf32> to vector<2x8x1xf32>
    %955 = vector.broadcast %954 : vector<2x8x1xf32> to vector<2x8x8xf32>
    %956 = arith.subf %952, %955 : vector<2x8x8xf32>
    %957 = math.exp %956 : vector<2x8x8xf32>
    %cst_351 = arith.constant dense<0.000000e+00> : vector<2x8xf32>
    %958 = vector.multi_reduction <add>, %957, %cst_351 [2] : vector<2x8x8xf32> to vector<2x8xf32>
    %959 = vector.shape_cast %958 : vector<2x8xf32> to vector<2x8x1xf32>
    %960 = tpu.reciprocal %959 {approx = true} : vector<2x8x1xf32> -> vector<2x8x1xf32>
    %961 = vector.broadcast %960 : vector<2x8x1xf32> to vector<2x8x8xf32>
    %962 = arith.mulf %957, %961 : vector<2x8x8xf32>
    %963 = vector.extract_strided_slice %942 {offsets = [0, 0, 0], sizes = [2, 8, 8], strides = [1, 1, 1]} : vector<2x8x32xf32> to vector<2x8x8xf32>
    "tpu.trace_start"() <{level = 10 : i32, message = "bqk,bkd->bqd"}> : () -> ()
    %cst_352 = arith.constant dense<0.000000e+00> : vector<2x8x8xf32>
    %964 = tpu.matmul %962, %963, %cst_352 {dimension_numbers = #tpu.dot_dimension_numbers<[2], [1], [1], [2], [0, 0, 0, 1, 1, 2], [0], [0]>} : vector<2x8x8xf32>, vector<2x8x8xf32>, vector<2x8x8xf32> -> vector<2x8x8xf32>
    "tpu.trace_stop"() : () -> ()
    %965 = vector.shape_cast %964 : vector<2x8x8xf32> to vector<16x8xf32>
    %966 = vector.extract_strided_slice %923 {offsets = [0, 0], sizes = [8, 32], strides = [1, 1]} : vector<32x32xf32> to vector<8x32xf32>
    %cst_353 = arith.constant dense<0.000000e+00> : vector<16x32xf32>
    %967 = tpu.matmul %965, %966, %cst_353 {dimension_numbers = #tpu.dot_dimension_numbers<[1], [0], [0], [1], [0, 0, 1, 1], [], []>} : vector<16x8xf32>, vector<8x32xf32>, vector<16x32xf32> -> vector<16x32xf32>
    %968 = arith.addf %945, %967 : vector<16x32xf32>
    %969 = vector.extract_strided_slice %940 {offsets = [0, 0, 8], sizes = [2, 8, 8], strides = [1, 1, 1]} : vector<2x8x32xf32> to vector<2x8x8xf32>
    %970 = vector.extract_strided_slice %941 {offsets = [0, 0, 8], sizes = [2, 8, 8], strides = [1, 1, 1]} : vector<2x8x32xf32> to vector<2x8x8xf32>
    "tpu.trace_start"() <{level = 10 : i32, message = "bqd,bkd->bqk"}> : () -> ()
    %cst_354 = arith.constant dense<0.000000e+00> : vector<2x8x8xf32>
    %971 = tpu.matmul %969, %970, %cst_354 {dimension_numbers = #tpu.dot_dimension_numbers<[2], [2], [1], [1], [0, 0, 0, 1, 1, 1], [0], [0]>} : vector<2x8x8xf32>, vector<2x8x8xf32>, vector<2x8x8xf32> -> vector<2x8x8xf32>
    "tpu.trace_stop"() : () -> ()
    %cst_355 = arith.constant 0.353553385 : f32
    %972 = vector.broadcast %cst_355 : f32 to vector<2x8x8xf32>
    %973 = arith.mulf %971, %972 : vector<2x8x8xf32>
    %cst_356 = arith.constant -1.000000e+09 : f32
    %974 = vector.broadcast %cst_356 : f32 to vector<2x8x8xf32>
    %975 = arith.select %11, %973, %974 : vector<2x8x8xi1>, vector<2x8x8xf32>
    %cst_357 = arith.constant dense<0xFF800000> : vector<2x8xf32>
    %976 = vector.multi_reduction <maximumf>, %975, %cst_357 [2] : vector<2x8x8xf32> to vector<2x8xf32>
    %977 = vector.shape_cast %976 : vector<2x8xf32> to vector<2x8x1xf32>
    %978 = vector.broadcast %977 : vector<2x8x1xf32> to vector<2x8x8xf32>
    %979 = arith.subf %975, %978 : vector<2x8x8xf32>
    %980 = math.exp %979 : vector<2x8x8xf32>
    %cst_358 = arith.constant dense<0.000000e+00> : vector<2x8xf32>
    %981 = vector.multi_reduction <add>, %980, %cst_358 [2] : vector<2x8x8xf32> to vector<2x8xf32>
    %982 = vector.shape_cast %981 : vector<2x8xf32> to vector<2x8x1xf32>
    %983 = tpu.reciprocal %982 {approx = true} : vector<2x8x1xf32> -> vector<2x8x1xf32>
    %984 = vector.broadcast %983 : vector<2x8x1xf32> to vector<2x8x8xf32>
    %985 = arith.mulf %980, %984 : vector<2x8x8xf32>
    %986 = vector.extract_strided_slice %942 {offsets = [0, 0, 8], sizes = [2, 8, 8], strides = [1, 1, 1]} : vector<2x8x32xf32> to vector<2x8x8xf32>
    "tpu.trace_start"() <{level = 10 : i32, message = "bqk,bkd->bqd"}> : () -> ()
    %cst_359 = arith.constant dense<0.000000e+00> : vector<2x8x8xf32>
    %987 = tpu.matmul %985, %986, %cst_359 {dimension_numbers = #tpu.dot_dimension_numbers<[2], [1], [1], [2], [0, 0, 0, 1, 1, 2], [0], [0]>} : vector<2x8x8xf32>, vector<2x8x8xf32>, vector<2x8x8xf32> -> vector<2x8x8xf32>
    "tpu.trace_stop"() : () -> ()
    %988 = vector.shape_cast %987 : vector<2x8x8xf32> to vector<16x8xf32>
    %989 = vector.extract_strided_slice %923 {offsets = [8, 0], sizes = [8, 32], strides = [1, 1]} : vector<32x32xf32> to vector<8x32xf32>
    %cst_360 = arith.constant dense<0.000000e+00> : vector<16x32xf32>
    %990 = tpu.matmul %988, %989, %cst_360 {dimension_numbers = #tpu.dot_dimension_numbers<[1], [0], [0], [1], [0, 0, 1, 1], [], []>} : vector<16x8xf32>, vector<8x32xf32>, vector<16x32xf32> -> vector<16x32xf32>
    %991 = arith.addf %968, %990 : vector<16x32xf32>
    %992 = vector.extract_strided_slice %940 {offsets = [0, 0, 16], sizes = [2, 8, 8], strides = [1, 1, 1]} : vector<2x8x32xf32> to vector<2x8x8xf32>
    %993 = vector.extract_strided_slice %941 {offsets = [0, 0, 16], sizes = [2, 8, 8], strides = [1, 1, 1]} : vector<2x8x32xf32> to vector<2x8x8xf32>
    "tpu.trace_start"() <{level = 10 : i32, message = "bqd,bkd->bqk"}> : () -> ()
    %cst_361 = arith.constant dense<0.000000e+00> : vector<2x8x8xf32>
    %994 = tpu.matmul %992, %993, %cst_361 {dimension_numbers = #tpu.dot_dimension_numbers<[2], [2], [1], [1], [0, 0, 0, 1, 1, 1], [0], [0]>} : vector<2x8x8xf32>, vector<2x8x8xf32>, vector<2x8x8xf32> -> vector<2x8x8xf32>
    "tpu.trace_stop"() : () -> ()
    %cst_362 = arith.constant 0.353553385 : f32
    %995 = vector.broadcast %cst_362 : f32 to vector<2x8x8xf32>
    %996 = arith.mulf %994, %995 : vector<2x8x8xf32>
    %cst_363 = arith.constant -1.000000e+09 : f32
    %997 = vector.broadcast %cst_363 : f32 to vector<2x8x8xf32>
    %998 = arith.select %11, %996, %997 : vector<2x8x8xi1>, vector<2x8x8xf32>
    %cst_364 = arith.constant dense<0xFF800000> : vector<2x8xf32>
    %999 = vector.multi_reduction <maximumf>, %998, %cst_364 [2] : vector<2x8x8xf32> to vector<2x8xf32>
    %1000 = vector.shape_cast %999 : vector<2x8xf32> to vector<2x8x1xf32>
    %1001 = vector.broadcast %1000 : vector<2x8x1xf32> to vector<2x8x8xf32>
    %1002 = arith.subf %998, %1001 : vector<2x8x8xf32>
    %1003 = math.exp %1002 : vector<2x8x8xf32>
    %cst_365 = arith.constant dense<0.000000e+00> : vector<2x8xf32>
    %1004 = vector.multi_reduction <add>, %1003, %cst_365 [2] : vector<2x8x8xf32> to vector<2x8xf32>
    %1005 = vector.shape_cast %1004 : vector<2x8xf32> to vector<2x8x1xf32>
    %1006 = tpu.reciprocal %1005 {approx = true} : vector<2x8x1xf32> -> vector<2x8x1xf32>
    %1007 = vector.broadcast %1006 : vector<2x8x1xf32> to vector<2x8x8xf32>
    %1008 = arith.mulf %1003, %1007 : vector<2x8x8xf32>
    %1009 = vector.extract_strided_slice %942 {offsets = [0, 0, 16], sizes = [2, 8, 8], strides = [1, 1, 1]} : vector<2x8x32xf32> to vector<2x8x8xf32>
    "tpu.trace_start"() <{level = 10 : i32, message = "bqk,bkd->bqd"}> : () -> ()
    %cst_366 = arith.constant dense<0.000000e+00> : vector<2x8x8xf32>
    %1010 = tpu.matmul %1008, %1009, %cst_366 {dimension_numbers = #tpu.dot_dimension_numbers<[2], [1], [1], [2], [0, 0, 0, 1, 1, 2], [0], [0]>} : vector<2x8x8xf32>, vector<2x8x8xf32>, vector<2x8x8xf32> -> vector<2x8x8xf32>
    "tpu.trace_stop"() : () -> ()
    %1011 = vector.shape_cast %1010 : vector<2x8x8xf32> to vector<16x8xf32>
    %1012 = vector.extract_strided_slice %923 {offsets = [16, 0], sizes = [8, 32], strides = [1, 1]} : vector<32x32xf32> to vector<8x32xf32>
    %cst_367 = arith.constant dense<0.000000e+00> : vector<16x32xf32>
    %1013 = tpu.matmul %1011, %1012, %cst_367 {dimension_numbers = #tpu.dot_dimension_numbers<[1], [0], [0], [1], [0, 0, 1, 1], [], []>} : vector<16x8xf32>, vector<8x32xf32>, vector<16x32xf32> -> vector<16x32xf32>
    %1014 = arith.addf %991, %1013 : vector<16x32xf32>
    %1015 = vector.extract_strided_slice %940 {offsets = [0, 0, 24], sizes = [2, 8, 8], strides = [1, 1, 1]} : vector<2x8x32xf32> to vector<2x8x8xf32>
    %1016 = vector.extract_strided_slice %941 {offsets = [0, 0, 24], sizes = [2, 8, 8], strides = [1, 1, 1]} : vector<2x8x32xf32> to vector<2x8x8xf32>
    "tpu.trace_start"() <{level = 10 : i32, message = "bqd,bkd->bqk"}> : () -> ()
    %cst_368 = arith.constant dense<0.000000e+00> : vector<2x8x8xf32>
    %1017 = tpu.matmul %1015, %1016, %cst_368 {dimension_numbers = #tpu.dot_dimension_numbers<[2], [2], [1], [1], [0, 0, 0, 1, 1, 1], [0], [0]>} : vector<2x8x8xf32>, vector<2x8x8xf32>, vector<2x8x8xf32> -> vector<2x8x8xf32>
    "tpu.trace_stop"() : () -> ()
    %cst_369 = arith.constant 0.353553385 : f32
    %1018 = vector.broadcast %cst_369 : f32 to vector<2x8x8xf32>
    %1019 = arith.mulf %1017, %1018 : vector<2x8x8xf32>
    %cst_370 = arith.constant -1.000000e+09 : f32
    %1020 = vector.broadcast %cst_370 : f32 to vector<2x8x8xf32>
    %1021 = arith.select %11, %1019, %1020 : vector<2x8x8xi1>, vector<2x8x8xf32>
    %cst_371 = arith.constant dense<0xFF800000> : vector<2x8xf32>
    %1022 = vector.multi_reduction <maximumf>, %1021, %cst_371 [2] : vector<2x8x8xf32> to vector<2x8xf32>
    %1023 = vector.shape_cast %1022 : vector<2x8xf32> to vector<2x8x1xf32>
    %1024 = vector.broadcast %1023 : vector<2x8x1xf32> to vector<2x8x8xf32>
    %1025 = arith.subf %1021, %1024 : vector<2x8x8xf32>
    %1026 = math.exp %1025 : vector<2x8x8xf32>
    %cst_372 = arith.constant dense<0.000000e+00> : vector<2x8xf32>
    %1027 = vector.multi_reduction <add>, %1026, %cst_372 [2] : vector<2x8x8xf32> to vector<2x8xf32>
    %1028 = vector.shape_cast %1027 : vector<2x8xf32> to vector<2x8x1xf32>
    %1029 = tpu.reciprocal %1028 {approx = true} : vector<2x8x1xf32> -> vector<2x8x1xf32>
    %1030 = vector.broadcast %1029 : vector<2x8x1xf32> to vector<2x8x8xf32>
    %1031 = arith.mulf %1026, %1030 : vector<2x8x8xf32>
    %1032 = vector.extract_strided_slice %942 {offsets = [0, 0, 24], sizes = [2, 8, 8], strides = [1, 1, 1]} : vector<2x8x32xf32> to vector<2x8x8xf32>
    "tpu.trace_start"() <{level = 10 : i32, message = "bqk,bkd->bqd"}> : () -> ()
    %cst_373 = arith.constant dense<0.000000e+00> : vector<2x8x8xf32>
    %1033 = tpu.matmul %1031, %1032, %cst_373 {dimension_numbers = #tpu.dot_dimension_numbers<[2], [1], [1], [2], [0, 0, 0, 1, 1, 2], [0], [0]>} : vector<2x8x8xf32>, vector<2x8x8xf32>, vector<2x8x8xf32> -> vector<2x8x8xf32>
    "tpu.trace_stop"() : () -> ()
    %1034 = vector.shape_cast %1033 : vector<2x8x8xf32> to vector<16x8xf32>
    %1035 = vector.extract_strided_slice %923 {offsets = [24, 0], sizes = [8, 32], strides = [1, 1]} : vector<32x32xf32> to vector<8x32xf32>
    %cst_374 = arith.constant dense<0.000000e+00> : vector<16x32xf32>
    %1036 = tpu.matmul %1034, %1035, %cst_374 {dimension_numbers = #tpu.dot_dimension_numbers<[1], [0], [0], [1], [0, 0, 1, 1], [], []>} : vector<16x8xf32>, vector<8x32xf32>, vector<16x32xf32> -> vector<16x32xf32>
    %1037 = arith.addf %1014, %1036 : vector<16x32xf32>
    %1038 = arith.addf %890, %1037 : vector<16x32xf32>
    %c1_375 = arith.constant 1 : index
    %c0_376 = arith.constant 0 : index
    %1039 = vector.load %arg30[%c1_375, %c0_376] : memref<2x32xf32, #tpu.memory_space<vmem>>, vector<1x32xf32>
    %1040 = vector.shape_cast %1039 : vector<1x32xf32> to vector<32xf32>
    %c1_377 = arith.constant 1 : index
    %c0_378 = arith.constant 0 : index
    %1041 = vector.load %arg31[%c1_377, %c0_378] : memref<2x32xf32, #tpu.memory_space<vmem>>, vector<1x32xf32>
    %1042 = vector.shape_cast %1041 : vector<1x32xf32> to vector<32xf32>
    %cst_379 = arith.constant dense<0.000000e+00> : vector<16xf32>
    %1043 = vector.multi_reduction <add>, %1038, %cst_379 [1] : vector<16x32xf32> to vector<16xf32>
    %1044 = vector.shape_cast %1043 : vector<16xf32> to vector<16x1xf32>
    %cst_380 = arith.constant 3.200000e+01 : f32
    %1045 = vector.broadcast %cst_380 : f32 to vector<16x1xf32>
    %1046 = arith.divf %1044, %1045 : vector<16x1xf32>
    %1047 = vector.broadcast %1046 : vector<16x1xf32> to vector<16x32xf32>
    %1048 = arith.subf %1038, %1047 : vector<16x32xf32>
    %1049 = arith.mulf %1048, %1048 : vector<16x32xf32>
    %cst_381 = arith.constant dense<0.000000e+00> : vector<16xf32>
    %1050 = vector.multi_reduction <add>, %1049, %cst_381 [1] : vector<16x32xf32> to vector<16xf32>
    %1051 = vector.shape_cast %1050 : vector<16xf32> to vector<16x1xf32>
    %cst_382 = arith.constant 0.0322580636 : f32
    %1052 = vector.broadcast %cst_382 : f32 to vector<16x1xf32>
    %1053 = arith.mulf %1051, %1052 : vector<16x1xf32>
    %1054 = math.sqrt %1053 : vector<16x1xf32>
    %cst_383 = arith.constant 9.99999997E-7 : f32
    %1055 = vector.broadcast %cst_383 : f32 to vector<16x1xf32>
    %1056 = arith.addf %1054, %1055 : vector<16x1xf32>
    %1057 = tpu.reciprocal %1056 {approx = true} : vector<16x1xf32> -> vector<16x1xf32>
    %1058 = vector.shape_cast %1040 : vector<32xf32> to vector<1x32xf32>
    %1059 = vector.broadcast %1058 : vector<1x32xf32> to vector<16x32xf32>
    %1060 = arith.mulf %1059, %1048 : vector<16x32xf32>
    %1061 = vector.broadcast %1057 : vector<16x1xf32> to vector<16x32xf32>
    %1062 = arith.mulf %1060, %1061 : vector<16x32xf32>
    %1063 = vector.shape_cast %1042 : vector<32xf32> to vector<1x32xf32>
    %1064 = vector.broadcast %1063 : vector<1x32xf32> to vector<16x32xf32>
    %1065 = arith.addf %1062, %1064 : vector<16x32xf32>
    %c1_384 = arith.constant 1 : index
    %c0_385 = arith.constant 0 : index
    %c0_386 = arith.constant 0 : index
    %1066 = vector.load %arg32[%c1_384, %c0_385, %c0_386] : memref<2x32x64xf32, #tpu.memory_space<vmem>>, vector<1x32x64xf32>
    %1067 = vector.shape_cast %1066 : vector<1x32x64xf32> to vector<32x64xf32>
    %c1_387 = arith.constant 1 : index
    %c0_388 = arith.constant 0 : index
    %1068 = vector.load %arg33[%c1_387, %c0_388] : memref<2x64xf32, #tpu.memory_space<vmem>>, vector<1x64xf32>
    %1069 = vector.shape_cast %1068 : vector<1x64xf32> to vector<64xf32>
    %c1_389 = arith.constant 1 : index
    %c0_390 = arith.constant 0 : index
    %c0_391 = arith.constant 0 : index
    %1070 = vector.load %arg34[%c1_389, %c0_390, %c0_391] : memref<2x64x32xf32, #tpu.memory_space<vmem>>, vector<1x64x32xf32>
    %1071 = vector.shape_cast %1070 : vector<1x64x32xf32> to vector<64x32xf32>
    %c1_392 = arith.constant 1 : index
    %c0_393 = arith.constant 0 : index
    %1072 = vector.load %arg35[%c1_392, %c0_393] : memref<2x32xf32, #tpu.memory_space<vmem>>, vector<1x32xf32>
    %1073 = vector.shape_cast %1072 : vector<1x32xf32> to vector<32xf32>
    %cst_394 = arith.constant dense<0.000000e+00> : vector<16x64xf32>
    %1074 = tpu.matmul %1065, %1067, %cst_394 {dimension_numbers = #tpu.dot_dimension_numbers<[1], [0], [0], [1], [0, 0, 1, 1], [], []>} : vector<16x32xf32>, vector<32x64xf32>, vector<16x64xf32> -> vector<16x64xf32>
    %1075 = vector.shape_cast %1069 : vector<64xf32> to vector<1x64xf32>
    %1076 = vector.broadcast %1075 : vector<1x64xf32> to vector<16x64xf32>
    %1077 = arith.addf %1074, %1076 : vector<16x64xf32>
    %cst_395 = arith.constant 0.000000e+00 : f32
    %1078 = vector.broadcast %cst_395 : f32 to vector<16x64xf32>
    %1079 = arith.maximumf %1077, %1078 : vector<16x64xf32>
    %cst_396 = arith.constant dense<0.000000e+00> : vector<16x32xf32>
    %1080 = tpu.matmul %1079, %1071, %cst_396 {dimension_numbers = #tpu.dot_dimension_numbers<[1], [0], [0], [1], [0, 0, 1, 1], [], []>} : vector<16x64xf32>, vector<64x32xf32>, vector<16x32xf32> -> vector<16x32xf32>
    %1081 = vector.shape_cast %1073 : vector<32xf32> to vector<1x32xf32>
    %1082 = vector.broadcast %1081 : vector<1x32xf32> to vector<16x32xf32>
    %1083 = arith.addf %1080, %1082 : vector<16x32xf32>
    %1084 = arith.addf %1038, %1083 : vector<16x32xf32>
    %c0_397 = arith.constant 0 : index
    %c0_398 = arith.constant 0 : index
    %1085 = vector.load %arg36[%c0_397, %c0_398] : memref<1x32xf32, #tpu.memory_space<vmem>>, vector<1x32xf32>
    %1086 = vector.shape_cast %1085 : vector<1x32xf32> to vector<32xf32>
    %c0_399 = arith.constant 0 : index
    %c0_400 = arith.constant 0 : index
    %1087 = vector.load %arg37[%c0_399, %c0_400] : memref<1x32xf32, #tpu.memory_space<vmem>>, vector<1x32xf32>
    %1088 = vector.shape_cast %1087 : vector<1x32xf32> to vector<32xf32>
    %cst_401 = arith.constant dense<0.000000e+00> : vector<16xf32>
    %1089 = vector.multi_reduction <add>, %1084, %cst_401 [1] : vector<16x32xf32> to vector<16xf32>
    %1090 = vector.shape_cast %1089 : vector<16xf32> to vector<16x1xf32>
    %cst_402 = arith.constant 3.200000e+01 : f32
    %1091 = vector.broadcast %cst_402 : f32 to vector<16x1xf32>
    %1092 = arith.divf %1090, %1091 : vector<16x1xf32>
    %1093 = vector.broadcast %1092 : vector<16x1xf32> to vector<16x32xf32>
    %1094 = arith.subf %1084, %1093 : vector<16x32xf32>
    %1095 = arith.mulf %1094, %1094 : vector<16x32xf32>
    %cst_403 = arith.constant dense<0.000000e+00> : vector<16xf32>
    %1096 = vector.multi_reduction <add>, %1095, %cst_403 [1] : vector<16x32xf32> to vector<16xf32>
    %1097 = vector.shape_cast %1096 : vector<16xf32> to vector<16x1xf32>
    %cst_404 = arith.constant 0.0322580636 : f32
    %1098 = vector.broadcast %cst_404 : f32 to vector<16x1xf32>
    %1099 = arith.mulf %1097, %1098 : vector<16x1xf32>
    %1100 = math.sqrt %1099 : vector<16x1xf32>
    %cst_405 = arith.constant 9.99999997E-7 : f32
    %1101 = vector.broadcast %cst_405 : f32 to vector<16x1xf32>
    %1102 = arith.addf %1100, %1101 : vector<16x1xf32>
    %1103 = tpu.reciprocal %1102 {approx = true} : vector<16x1xf32> -> vector<16x1xf32>
    %1104 = vector.shape_cast %1086 : vector<32xf32> to vector<1x32xf32>
    %1105 = vector.broadcast %1104 : vector<1x32xf32> to vector<16x32xf32>
    %1106 = arith.mulf %1105, %1094 : vector<16x32xf32>
    %1107 = vector.broadcast %1103 : vector<16x1xf32> to vector<16x32xf32>
    %1108 = arith.mulf %1106, %1107 : vector<16x32xf32>
    %1109 = vector.shape_cast %1088 : vector<32xf32> to vector<1x32xf32>
    %1110 = vector.broadcast %1109 : vector<1x32xf32> to vector<16x32xf32>
    %1111 = arith.addf %1108, %1110 : vector<16x32xf32>
    %c0_406 = arith.constant 0 : index
    %c0_407 = arith.constant 0 : index
    %1112 = vector.load %arg38[%c0_406, %c0_407] : memref<16x32xf32, #tpu.memory_space<vmem>>, vector<16x32xf32>
    tpu.vector_store %arg38[%c0_406, %c0_407], %1111 {strides = array<i32>} : memref<16x32xf32, #tpu.memory_space<vmem>>, vector<16x32xf32>,
    return
  }
}

</mosaic_0001>

<bundles_post_ra>
// kernel: forward.1
= control target key start
LH: loop header
LB: loop body
LE: loop exit
PB: predicated region body
PF: predicated region fallthrough
CT: control target
= control target key end

     0   :  { %s14321_s6 = smov 1   ;;  %s14322_s10 = smov 2   ;;  %s16052_s0 = inlined_call_operand.smem [shape: u32[39], index: -1, kind: input, shape index: {}] }
   0x1   :  { %s14383_s5 = sld [smem:[%s16052_s0]]   ;;  %s14323_s14 = smov 3  }
   0x2   :  { %s14388_s9 = sld [smem:[%s16052_s0 + %s14321_s6]]   ;;  %s14324_s18 = smov 4  }
   0x3   :  { %s14393_s13 = sld [smem:[%s16052_s0 + %s14322_s10]]   ;;  %s14325_s22 = smov 5  }
   0x4   :  { %s14398_s17 = sld [smem:[%s16052_s0 + %s14323_s14]]   ;;  %s14326_s26 = smov 6  }
   0x5   :  { %s14403_s21 = sld [smem:[%s16052_s0 + %s14324_s18]]   ;;  %s14327_s30 = smov 7  }
   0x6   :  { %s14408_s25 = sld [smem:[%s16052_s0 + %s14325_s22]]   ;;  %s14328_s4 = smov 8  }
   0x7   :  { %s14413_s29 = sld [smem:[%s16052_s0 + %s14326_s26]]   ;;  %s14329_s10 = smov 9  }
   0x8   :  { %16074 = sst [smem:[#allocation5_spill]] %s14388_s9  ;;  %s14330_s15 = smov 10  }
   0x9   :  { %s14418_s3 = sld [smem:[%s16052_s0 + %s14327_s30]]   ;;  %s14331_s20 = smov 11  }
   0xa   :  { %16075 = sst [smem:[#allocation6_spill]] %s14398_s17  ;;  %s14332_s26 = smov 12  }
   0xb   :  { %s14423_s8 = sld [smem:[%s16052_s0 + %s14328_s4]]   ;;  %s14333_s1 = smov 13  }
   0xc   :  { %s14428_s14 = sld [smem:[%s16052_s0 + %s14329_s10]]   ;;  %s14334_s7 = smov 14  }
   0xd   :  { %s14433_s19 = sld [smem:[%s16052_s0 + %s14330_s15]]   ;;  %s14335_s15 = smov 15  }
   0xe   :  { %s14438_s24 = sld [smem:[%s16052_s0 + %s14331_s20]]   ;;  %s14336_s22 = smov 16  }
   0xf   :  { %s14443_s30 = sld [smem:[%s16052_s0 + %s14332_s26]]   ;;  %s14337_s28 = smov 17  }
  0x10   :  { %s14448_s6 = sld [smem:[%s16052_s0 + %s14333_s1]]  }
  0x11   :  { %s14453_s12 = sld [smem:[%s16052_s0 + %s14334_s7]]   ;;  %s14338_s7 = smov 18  }
  0x12   :  { %s14458_s20 = sld [smem:[%s16052_s0 + %s14335_s15]]   ;;  %s14339_s15 = smov 19  }
  0x13   :  { %s14463_s27 = sld [smem:[%s16052_s0 + %s14336_s22]]   ;;  %s14340_s22 = smov 20  }
  0x14   :  { %s14468_s4 = sld [smem:[%s16052_s0 + %s14337_s28]]   ;;  %s14341_s28 = smov 21  }
  0x15   :  { %s14473_s17 = sld [smem:[%s16052_s0 + %s14338_s7]]   ;;  %s14342_s7 = smov 22  }
  0x16   :  { %s14478_s9 = sld [smem:[%s16052_s0 + %s14339_s15]]   ;;  %s14343_s15 = smov 23  }
  0x19   :  { %16076 = sst [smem:[#allocation7_spill]] %s14463_s27 }
  0x1a   :  { %16077 = sst [smem:[#allocation8_spill]] %s14468_s4 }
  0x1b   :  { %16078 = sst [smem:[#allocation9_spill]] %s14473_s17 }
  0x1c   :  { %16079 = sst [smem:[#allocation10_spill]] %s14478_s9 }
  0x1d   :  { %s14483_s27 = sld [smem:[%s16052_s0 + %s14340_s22]]   ;;  %s14344_s22 = smov 24  }
  0x1e   :  { %s14488_s4 = sld [smem:[%s16052_s0 + %s14341_s28]]   ;;  %s14345_s28 = smov 25  }
  0x1f   :  { %s14493_s17 = sld [smem:[%s16052_s0 + %s14342_s7]]   ;;  %s14346_s7 = smov 26  }
  0x20   :  { %s14498_s9 = sld [smem:[%s16052_s0 + %s14343_s15]]   ;;  %s14347_s15 = smov 27  }
  0x23   :  { %16080 = sst [smem:[#allocation11_spill]] %s14483_s27 }
  0x24   :  { %16081 = sst [smem:[#allocation12_spill]] %s14488_s4 }
  0x25   :  { %16082 = sst [smem:[#allocation13_spill]] %s14493_s17 }
  0x26   :  { %16083 = sst [smem:[#allocation14_spill]] %s14498_s9 }
  0x27   :  { %s14503_s27 = sld [smem:[%s16052_s0 + %s14344_s22]]   ;;  %s14348_s22 = smov 28  }
  0x28   :  { %s14508_s4 = sld [smem:[%s16052_s0 + %s14345_s28]]   ;;  %s14349_s28 = smov 29  }
  0x29   :  { %s14513_s17 = sld [smem:[%s16052_s0 + %s14346_s7]]   ;;  %s14350_s7 = smov 30  }
  0x2a   :  { %s14518_s9 = sld [smem:[%s16052_s0 + %s14347_s15]]   ;;  %s14351_s15 = smov 31  }
  0x2d   :  { %16084 = sst [smem:[#allocation15_spill]] %s14503_s27 }
  0x2e   :  { %16085 = sst [smem:[#allocation16_spill]] %s14508_s4 }
  0x2f   :  { %16086 = sst [smem:[#allocation17_spill]] %s14513_s17 }
  0x30   :  { %16087 = sst [smem:[#allocation18_spill]] %s14518_s9 }
  0x31   :  { %s14523_s27 = sld [smem:[%s16052_s0 + %s14348_s22]]   ;;  %s14352_s22 = smov 32  }
  0x32   :  { %s14528_s4 = sld [smem:[%s16052_s0 + %s14349_s28]]   ;;  %s14353_s28 = smov 33  }
  0x33   :  { %s14533_s17 = sld [smem:[%s16052_s0 + %s14350_s7]]   ;;  %s14354_s7 = smov 34  }
  0x34   :  { %s14538_s9 = sld [smem:[%s16052_s0 + %s14351_s15]]   ;;  %s14355_s15 = smov 35  }
  0x37   :  { %16088 = sst [smem:[#allocation19_spill]] %s14523_s27 }
  0x38   :  { %16089 = sst [smem:[#allocation20_spill]] %s14528_s4 }
  0x39   :  { %16090 = sst [smem:[#allocation21_spill]] %s14533_s17 }
  0x3a   :  { %16091 = sst [smem:[#allocation22_spill]] %s14538_s9 }
  0x3b   :  { %s14543_s27 = sld [smem:[%s16052_s0 + %s14352_s22]]   ;;  %s14356_s22 = smov 36  }
  0x3c   :  { %s14548_s4 = sld [smem:[%s16052_s0 + %s14353_s28]]   ;;  %s14357_s28 = smov 37  }
  0x3d   :  { %s14553_s17 = sld [smem:[%s16052_s0 + %s14354_s7]]   ;;  %s14358_s7 = smov 38  }
  0x3e   :  { %s14558_s9 = sld [smem:[%s16052_s0 + %s14355_s15]]  }
  0x41   :  { %16092 = sst [smem:[#allocation23_spill]] %s14543_s27 }
  0x42   :  { %16093 = sst [smem:[#allocation24_spill]] %s14548_s4 }
  0x43   :  { %16094 = sst [smem:[#allocation25_spill]] %s14553_s17 }
  0x44   :  { %s14563_s27 = sld [smem:[%s16052_s0 + %s14356_s22]]  }
  0x45   :  { %s14568_s4 = sld [smem:[%s16052_s0 + %s14357_s28]]  }
  0x46   :  { %s14573_s17 = sld [smem:[%s16052_s0 + %s14358_s7]]  }
  0x47   :  { %v14576_v0 = vld [vmem:[%s14383_s5] sm:$0xff]  ;;  %vm183_vm0 = vcmask 261120   ;;  %v14579_v1 = vld [vmem:[%s14383_s5 + $0x8] sm:$0xff] }
  0x48   :  { %82 = vsyncpa [#allocation3], 0  ;;  %v184_v2 = vsel %vm183_vm0, %v14576_v0, 0.0  ;;  %v187_v3 = vsel %vm183_vm0, %v14579_v1, 0.0  ;;  %v240_v14 = vld [vmem:[%s14413_s29 + $0x18] sm:$0xff]  ;;  %v239_v15 = vld [vmem:[%s14413_s29 + $0x10] sm:$0xff] }
  0x49   :  { %185 = vadd.xlane.f32.xlu0 %v184_v2  ;;  %13149 = vmatprep.subr.mxu0 %v240_v14  ;;  %v238_v16 = vld [vmem:[%s14413_s29 + $0x8] sm:$0xff]  ;;  %v237_v17 = vld [vmem:[%s14413_s29] sm:$0xff]  ;;  %v14359_v44 = vmov 0.0   ;;  %vm14360_vm5 = vmmov 0   ;;  %s14361_s0 = smov 96   ;;  %vm339_vm6 = vcmask 64512  }
  0x4a   :  { %13150 = vmatpush3.msra.mxu0 %v240_v14  ;;  %v12457_v34 = vld [vmem:[%s14403_s21] ss:$0 sm:$0xff]  ;;  %13165 = vmatprep.subr.mxu1 %v14359_v44  ;;  %v14625_v52 = vld [vmem:[%s14393_s13 + $0x1] ss:$0 sm:$0xff]  ;;  %s14362_s5 = smov 64   ;;  %s14364_s15 = smov 120  }
  0x4b   :  { %13151 = vmatprep.subr.mxu0 %v239_v15  ;;  %v12458_v37 = vld [vmem:[%s14408_s25] ss:$0 sm:$0xff]  ;;  %13167 = vmatprep.mubr.msk.f32.mxu1 %vm14360_vm5, %v14359_v44  ;;  %vm176_vm7 = vcmp.gt.f32.partialorder %v14625_v52, 0.0  ;;  %s14365_s16 = smov 56   ;;  %s14366_s18 = smov 80   ;;  %vm2164_vm13 = vcmask 523264  }
  0x4c   :  { %13152 = vmatpush3.msra.mxu0 %v239_v15  ;;  %v12459_v45 = vld [vmem:[%s14418_s3] ss:$0 sm:$0xff]  ;;  %s14367_s22 = smov 112   ;;  %s14368_s23 = smov 48  }
  0x4d   :  { %188 = vadd.xlane.f32.xlu0 %v187_v3  ;;  %13153 = vmatprep.subr.mxu0 %v238_v16  ;;  %v14628_v53 = vld [vmem:[%s14393_s13] ss:$0 sm:$0xff]  ;;  %s14363_s13 = smov 88   ;;  %s14369_s26 = smov 72  }
  0x4e   :  { %13154 = vmatpush3.msra.mxu0 %v238_v16  ;;  %vm175_vm8 = vcmp.gt.f32.partialorder %v14628_v53, 0.0  ;;  %s14370_s28 = smov 104   ;;  %s16072_s1 = smov 40  }
  0x4f   :  { %13155 = vmatprep.subr.mxu0 %v237_v17  ;;  %s16107_s2 = sld [smem:[#allocation15_spill]] }
  0x50   :  { %13156 = vmatpush3.msra.mxu0 %v237_v17  ;;  %s16108_s7 = sld [smem:[#allocation16_spill]] }
  0x51   :  { %13160 = vmatprep.subr.mxu0 %v14359_v44  ;;  %s16109_s10 = sld [smem:[#allocation19_spill]] }
  0x52   :  { %s16110_s11 = sld [smem:[#allocation20_spill]] }
  0xd2   :  { %v186_v4 = vpop.xlane.xlu0 %185 }
  0xd3   :  { %v191_v5 = vmul.f32 0.03125, %v186_v4 }
  0xd5   :  { %v193_v6 = vsub.f32 %v14576_v0, %v191_v5 }
  0xd6   :  { %v189_v7 = vpop.xlane.xlu0 %188 }
  0xd7   :  { %v192_v8 = vmul.f32 0.03125, %v189_v7  ;;  %v195_v9 = vmul.f32 %v193_v6, %v193_v6  ;;  %v227_v35 = vmul.f32 %v12457_v34, %v193_v6 }
  0xd9   :  { %v194_v10 = vsub.f32 %v14579_v1, %v192_v8  ;;  %v197_v11 = vsel %vm183_vm0, %v195_v9, 0.0 }
  0xda   :  { %198 = vadd.xlane.f32.xlu1 %v197_v11 }
  0xdb   :  { %v196_v12 = vmul.f32 %v194_v10, %v194_v10  ;;  %v228_v39 = vmul.f32 %v12457_v34, %v194_v10 }
  0xdd   :  { %v200_v13 = vsel %vm183_vm0, %v196_v12, 0.0 }
  0xde   :  { %201 = vadd.xlane.f32.xlu1 %v200_v13 }
 0x163   :  { %v199_v18 = vpop.xlane.xlu1 %198 }
 0x164   :  { %v203_v19 = vmul.f32 0.032258064, %v199_v18 }
 0x166   :  { %14011 = vrsqrt.f32 %v203_v19  ;;  %vm207_vm1 = vcmp.eq.f32.partialorder %v203_v19, inf  ;;  %v210_v24 = vand.u32 2147483648, %v203_v19  ;;  %vm209_vm2 = vcmp.eq.f32.partialorder %v203_v19, 0.0 }
 0x167   :  { %v202_v20 = vpop.xlane.xlu1 %201 }
 0x168   :  { %v204_v21 = vmul.f32 0.032258064, %v202_v20 }
 0x16a   :  { %14013 = vrsqrt.f32 %v204_v21  ;;  %vm214_vm3 = vcmp.eq.f32.partialorder %v204_v21, inf  ;;  %v217_v30 = vand.u32 2147483648, %v204_v21  ;;  %vm216_vm4 = vcmp.eq.f32.partialorder %v204_v21, 0.0 }
 0x173   :  { %v14012_v22 = vpop.eup %14011 }
 0x174   :  { %v206_v23 = vmul.f32 %v14012_v22, %v203_v19  ;;  %v242_v22 = vld [vmem:[%s14423_s8] sm:$0xff] }
 0x176   :  { %v208_v25 = vsel %vm207_vm1, %v203_v19, %v206_v23 }
 0x177   :  { %v14014_v26 = vpop.eup %14013  ;;  %v211_v27 = vsel %vm209_vm2, %v210_v24, %v208_v25 }
 0x178   :  { %v213_v28 = vmul.f32 %v14014_v26, %v204_v21  ;;  %v219_v29 = vadd.f32 1e-06, %v211_v27 }
 0x17a   :  { %v215_v31 = vsel %vm214_vm3, %v204_v21, %v213_v28  ;;  %14015 = vrcp.f32 %v219_v29 }
 0x17b   :  { %v218_v32 = vsel %vm216_vm4, %v217_v30, %v215_v31 }
 0x17c   :  { %v220_v33 = vadd.f32 1e-06, %v218_v32 }
 0x17e   :  { %14017 = vrcp.f32 %v220_v33 }
 0x187   :  { %v14016_v36 = vpop.eup %14015 }
 0x188   :  { %v229_v38 = vmul.f32 %v14016_v36, %v227_v35 }
 0x18a   :  { %v235_v40 = vadd.f32 %v12458_v37, %v229_v38 }
 0x18b   :  { %v14018_v41 = vpop.eup %14017 }
 0x18c   :  { %v230_v42 = vmul.f32 %v14018_v41, %v228_v39  ;;  %13157 = vmatprep.mubr.msk.f32.mxu0 %vm183_vm0, %v235_v40 }
 0x18e   :  { %v236_v43 = vadd.f32 %v12458_v37, %v230_v42 }
 0x190   :  { %13158 = vmatmul.mubr.msk.f32.vlgmr.msra.gmra.mxu0 %vm183_vm0, %v236_v43 }
 0x191   :  { %13162 = vmatprep.mubr.msk.f32.mxu0 %vm14360_vm5, %v14359_v44 }
 0x250   :  { %v13159_v46 = vpop.f32.mrf.mxu0 }
 0x251   :  { %v14604_v47 = vadd.f32 %v13159_v46, %v12459_v45 }
 0x252   :  { %v323_v48 = vpop.f32.mrf.mxu0 }
 0x253   :  { %v14606_v49 = vadd.f32 %v12459_v45, %v323_v48  ;;  %415 = vrot.lane.b32.xlu1 %v14604_v47, %s14361_s0 }
 0x255   :  { %337 = vrot.lane.b32.xlu0 %v14606_v49, %s14361_s0 }
 0x2c5   :  { %v416_v50 = vpop.permute.xlu1 %415 }
 0x2c6   :  { %13166 = vmatpush3.xpose.msk.msra.mxu1 %vm339_vm6, %v416_v50 }
 0x2c7   :  { %v338_v51 = vpop.permute.xlu0 %337  ;;  %13175 = vmatprep.subr.mxu1 %v14359_v44 }
 0x2c8   :  { %13161 = vmatpush3.xpose.msk.msra.mxu0 %vm339_vm6, %v338_v51 }
 0x2c9   :  { %13168 = vmatmul.mubr.msk.f32.vlgmr.msra.gmra.mxu1 %vm339_vm6, %v14604_v47  ;;  %13170 = vmatprep.subr.mxu0 %v14359_v44 }
 0x2ca   :  { %13177 = vmatprep.mubr.msk.f32.mxu1 %vm14360_vm5, %v14359_v44 }
 0x2cb   :  { %13163 = vmatmul.mubr.msk.f32.vlgmr.msra.gmra.mxu0 %vm339_vm6, %v14606_v49 }
 0x2cc   :  { %13172 = vmatprep.mubr.msk.f32.mxu0 %vm14360_vm5, %v14359_v44 }
 0x389   :  { %v487_v54 = vpop.f32.mrf.mxu1 }
 0x38a   :  { %v492_v55 = vmul.f32 0.35355338, %v487_v54 }
 0x38b   :  { %v410_v56 = vpop.f32.mrf.mxu0  ;;  %v13169_v57 = vpop.f32.mrf.mxu1 }
 0x38c   :  { %v491_v58 = vmul.f32 0.35355338, %v410_v56  ;;  %v494_v59 = vsel %vm176_vm7, %v492_v55, -1e+09 }
 0x38d   :  { %v13164_v60 = vpop.f32.mrf.mxu0  ;;  %v498_v61 = vsel %vm339_vm6, %v494_v59, -inf }
 0x38e   :  { %499 = vmax.xlane.f32.xlu0 %v498_v61  ;;  %v493_v62 = vsel %vm175_vm8, %v491_v58, -1e+09 }
 0x38f   :  { %v495_v63 = vsel %vm339_vm6, %v493_v62, -inf }
 0x390   :  { %496 = vmax.xlane.f32.xlu1 %v495_v63 }
 0x417   :  { %v500_v2 = vpop.xlane.xlu0 %499 }
 0x418   :  { %v502_v3 = vsub.f32 %v494_v59, %v500_v2 }
 0x419   :  { %v497_v4 = vpop.xlane.xlu1 %496 }
 0x41a   :  { %v505_v5 = vmul.f32 1.442695, %v502_v3  ;;  %v501_v6 = vsub.f32 %v493_v62, %v497_v4  ;;  %v243_v4 = vld [vmem:[%s14423_s8 + $0x8] sm:$0xff] }
 0x41c   :  { %14019 = vpow2.f32 %v505_v5  ;;  %v503_v7 = vmul.f32 1.442695, %v501_v6 }
 0x41e   :  { %14021 = vpow2.f32 %v503_v7 }
 0x429   :  { %v14020_v8 = vpop.eup %14019 }
 0x42a   :  { %v510_v9 = vsel %vm339_vm6, %v14020_v8, 0.0 }
 0x42b   :  { %v14022_v10 = vpop.eup %14021  ;;  %511 = vadd.xlane.f32.xlu1 %v510_v9 }
 0x42c   :  { %v507_v11 = vsel %vm339_vm6, %v14022_v10, 0.0 }
 0x42d   :  { %508 = vadd.xlane.f32.xlu0 %v507_v11 }
 0x43c   :  { %593 = vrot.lane.b32.xlu1 %v14604_v47, %s14362_s5 }
 0x440   :  { %754 = vrot.lane.b32.xlu1 %v14606_v49, %s14363_s13 }
 0x443   :  { %517 = vrot.lane.b32.xlu0 %v14606_v49, %s14362_s5 }
 0x444   :  { %832 = vrot.lane.b32.xlu1 %v14604_v47, %s14363_s13 }
 0x447   :  { %752 = vrot.lane.b32.xlu0 %v14606_v49, %s14364_s15 }
 0x448   :  { %830 = vrot.lane.b32.xlu1 %v14604_v47, %s14364_s15 }
 0x4b4   :  { %v512_v12 = vpop.xlane.xlu1 %511 }
 0x4b5   :  { %14023 = vrcp.f32 %v512_v12 }
 0x4b6   :  { %v509_v13 = vpop.xlane.xlu0 %508 }
 0x4b7   :  { %14025 = vrcp.f32 %v509_v13 }
 0x4b8   :  { %v594_v14 = vpop.permute.xlu1 %593 }
 0x4b9   :  { %13176 = vmatpush3.msra.mxu1 %v594_v14 }
 0x4ba   :  { %v518_v15 = vpop.permute.xlu0 %517  ;;  %13185 = vmatprep.subr.mxu1 %v14359_v44 }
 0x4bb   :  { %13171 = vmatpush3.msra.mxu0 %v518_v15 }
 0x4bc   :  { %v755_v19 = vpop.permute.xlu1 %754  ;;  %13180 = vmatprep.subr.mxu0 %v242_v22 }
 0x4be   :  { %v753_v21 = vpop.permute.xlu0 %752 }
 0x4c0   :  { %v833_v24 = vpop.permute.xlu1 %832 }
 0x4c2   :  { %v14024_v16 = vpop.eup %14023 }
 0x4c3   :  { %v516_v17 = vmul.f32 %v14024_v16, %v14020_v8 }
 0x4c4   :  { %v14026_v18 = vpop.eup %14025  ;;  %v831_v31 = vpop.permute.xlu1 %830 }
 0x4c5   :  { %13178 = vmatmul.mubr.msk.f32.vlgmr.msra.gmra.mxu1 %vm339_vm6, %v516_v17  ;;  %v515_v20 = vmul.f32 %v14026_v18, %v14022_v10 }
 0x4c6   :  { %13186 = vmatpush3.xpose.msk.msra.mxu1 %vm339_vm6, %v755_v19  ;;  %13187 = vmatprep.mubr.msk.f32.mxu1 %vm14360_vm5, %v14359_v44 }
 0x4c7   :  { %13173 = vmatmul.mubr.msk.f32.vlgmr.msra.gmra.mxu0 %vm339_vm6, %v515_v20  ;;  %13195 = vmatprep.subr.mxu1 %v14359_v44 }
 0x4c8   :  { %13181 = vmatpush3.msra.mxu0 %v242_v22 }
 0x4c9   :  { %13188 = vmatmul.mubr.msk.f32.vlgmr.msra.gmra.mxu1 %vm339_vm6, %v753_v21  ;;  %13190 = vmatprep.subr.mxu0 %v14359_v44  ;;  %v14723_v21 = vld [vmem:[%s14428_s14] ss:$0 sm:$0xff] }
 0x4ca   :  { %13197 = vmatprep.mubr.msk.f32.mxu1 %vm14360_vm5, %v14359_v44 }
 0x585   :  { %v665_v23 = vpop.f32.mrf.mxu1 }
 0x587   :  { %v589_v25 = vpop.f32.mrf.mxu0  ;;  %v13179_v26 = vpop.f32.mrf.mxu1 }
 0x588   :  { %13182 = vmatprep.mubr.msk.f32.mxu0 %vm339_vm6, %v589_v25 }
 0x589   :  { %v13174_v27 = vpop.f32.mrf.mxu0  ;;  %13183 = vmatmul.mubr.msk.f32.vlgmr.msra.gmra.mxu0 %vm339_vm6, %v665_v23  ;;  %v826_v28 = vpop.f32.mrf.mxu1 }
 0x58a   :  { %v908_v29 = vmul.f32 0.35355338, %v826_v28  ;;  %13191 = vmatpush3.xpose.msk.msra.mxu0 %vm339_vm6, %v833_v24  ;;  %13192 = vmatprep.mubr.msk.f32.mxu0 %vm14360_vm5, %v14359_v44 }
 0x58b   :  { %v13189_v30 = vpop.f32.mrf.mxu1  ;;  %13200 = vmatprep.subr.mxu0 %v14359_v44 }
 0x58c   :  { %v910_v32 = vsel %vm175_vm8, %v908_v29, -1e+09 }
 0x58d   :  { %13193 = vmatmul.mubr.msk.f32.vlgmr.msra.gmra.mxu0 %vm339_vm6, %v831_v31  ;;  %v912_v33 = vsel %vm339_vm6, %v910_v32, -inf }
 0x58e   :  { %913 = vmax.xlane.f32.xlu0 %v912_v33  ;;  %13202 = vmatprep.mubr.msk.f32.mxu0 %vm14360_vm5, %v14359_v44 }
 0x617   :  { %v914_v34 = vpop.xlane.xlu0 %913 }
 0x618   :  { %v918_v35 = vsub.f32 %v910_v32, %v914_v34 }
 0x61a   :  { %v920_v36 = vmul.f32 1.442695, %v918_v35 }
 0x61c   :  { %14027 = vpow2.f32 %v920_v36 }
 0x629   :  { %v14028_v37 = vpop.eup %14027 }
 0x62a   :  { %v924_v38 = vsel %vm339_vm6, %v14028_v37, 0.0 }
 0x62b   :  { %925 = vadd.xlane.f32.xlu0 %v924_v38 }
 0x649   :  { %v14677_v39 = vpop.f32.mrf.mxu0 }
 0x64a   :  { %v751_v22 = vadd.f32 %v14677_v39, %v14723_v21 }
 0x64b   :  { %v14679_v40 = vpop.f32.mrf.mxu0 }
 0x64d   :  { %v904_v41 = vpop.f32.mrf.mxu0 }
 0x64e   :  { %v909_v42 = vmul.f32 0.35355338, %v904_v41 }
 0x64f   :  { %v13194_v43 = vpop.f32.mrf.mxu0 }
 0x650   :  { %v911_v45 = vsel %vm176_vm7, %v909_v42, -1e+09 }
 0x651   :  { %v915_v46 = vsel %vm339_vm6, %v911_v45, -inf }
 0x652   :  { %916 = vmax.xlane.f32.xlu1 %v915_v46 }
 0x663   :  { %1010 = vrot.lane.b32.xlu1 %v14604_v47, %s14365_s16 }
 0x667   :  { %1171 = vrot.lane.b32.xlu1 %v14606_v49, %s14366_s18 }
 0x66b   :  { %1249 = vrot.lane.b32.xlu1 %v14604_v47, %s14366_s18 }
 0x66f   :  { %1247 = vrot.lane.b32.xlu1 %v14604_v47, %s14367_s22 }
 0x6b4   :  { %v926_v57 = vpop.xlane.xlu0 %925 }
 0x6db   :  { %v917_v48 = vpop.xlane.xlu1 %916 }
 0x6dc   :  { %v919_v50 = vsub.f32 %v911_v45, %v917_v48 }
 0x6de   :  { %v922_v51 = vmul.f32 1.442695, %v919_v50  ;;  %v244_v50 = vld [vmem:[%s14423_s8 + $0x10] sm:$0xff] }
 0x6df   :  { %v1011_v54 = vpop.permute.xlu1 %1010 }
 0x6e0   :  { %14029 = vpow2.f32 %v922_v51  ;;  %13201 = vmatpush3.msra.mxu0 %v1011_v54 }
 0x6e1   :  { %13210 = vmatprep.subr.mxu0 %v14359_v44  ;;  %14031 = vrcp.f32 %v926_v57 }
 0x6e3   :  { %v1172_v2 = vpop.permute.xlu1 %1171 }
 0x6e7   :  { %v1250_v7 = vpop.permute.xlu1 %1249 }
 0x6eb   :  { %v1248_v10 = vpop.permute.xlu1 %1247 }
 0x6ed   :  { %v14030_v55 = vpop.eup %14029 }
 0x6ee   :  { %v927_v56 = vsel %vm339_vm6, %v14030_v55, 0.0  ;;  %v14032_v59 = vpop.eup %14031 }
 0x6ef   :  { %928 = vadd.xlane.f32.xlu0 %v927_v56  ;;  %v932_v61 = vmul.f32 %v14032_v59, %v14028_v37 }
 0x705   :  { %934 = vrot.lane.b32.xlu0 %v14606_v49, %s14365_s16 }
 0x709   :  { %1169 = vrot.lane.b32.xlu0 %v14606_v49, %s14367_s22 }
 0x778   :  { %v929_v58 = vpop.xlane.xlu0 %928 }
 0x779   :  { %14033 = vrcp.f32 %v929_v58 }
 0x77c   :  { %v935_v60 = vpop.permute.xlu0 %934 }
 0x77d   :  { %13196 = vmatpush3.msra.mxu1 %v935_v60 }
 0x77e   :  { %13198 = vmatmul.mubr.msk.f32.vlgmr.msra.gmra.mxu1 %vm339_vm6, %v932_v61  ;;  %13205 = vmatprep.subr.mxu1 %v243_v4 }
 0x77f   :  { %13206 = vmatpush3.msra.mxu1 %v243_v4 }
 0x780   :  { %v1170_v3 = vpop.permute.xlu0 %1169  ;;  %13215 = vmatprep.subr.mxu1 %v14359_v44 }
 0x786   :  { %v14034_v62 = vpop.eup %14033 }
 0x787   :  { %v933_v63 = vmul.f32 %v14034_v62, %v14030_v55 }
 0x789   :  { %13203 = vmatmul.mubr.msk.f32.vlgmr.msra.gmra.mxu0 %vm339_vm6, %v933_v63 }
 0x78a   :  { %13211 = vmatpush3.xpose.msk.msra.mxu0 %vm339_vm6, %v1172_v2  ;;  %13212 = vmatprep.mubr.msk.f32.mxu0 %vm14360_vm5, %v14359_v44 }
 0x78b   :  { %13220 = vmatprep.subr.mxu0 %v14359_v44 }
 0x78d   :  { %13213 = vmatmul.mubr.msk.f32.vlgmr.msra.gmra.mxu0 %vm339_vm6, %v1170_v3 }
 0x78e   :  { %13222 = vmatprep.mubr.msk.f32.mxu0 %vm14360_vm5, %v14359_v44 }
 0x83e   :  { %v1006_v5 = vpop.f32.mrf.mxu1 }
 0x83f   :  { %13207 = vmatprep.mubr.msk.f32.mxu1 %vm339_vm6, %v1006_v5 }
 0x840   :  { %v13199_v6 = vpop.f32.mrf.mxu1 }
 0x849   :  { %v1082_v8 = vpop.f32.mrf.mxu0 }
 0x84a   :  { %13208 = vmatmul.mubr.msk.f32.vlgmr.msra.gmra.mxu1 %vm339_vm6, %v1082_v8 }
 0x84b   :  { %13216 = vmatpush3.xpose.msk.msra.mxu1 %vm339_vm6, %v1250_v7  ;;  %v13204_v9 = vpop.f32.mrf.mxu0  ;;  %13217 = vmatprep.mubr.msk.f32.mxu1 %vm14360_vm5, %v14359_v44 }
 0x84c   :  { %13225 = vmatprep.subr.mxu1 %v14359_v44 }
 0x84d   :  { %v1243_v11 = vpop.f32.mrf.mxu0 }
 0x84e   :  { %v1325_v12 = vmul.f32 0.35355338, %v1243_v11  ;;  %13218 = vmatmul.mubr.msk.f32.vlgmr.msra.gmra.mxu1 %vm339_vm6, %v1248_v10 }
 0x84f   :  { %v13214_v13 = vpop.f32.mrf.mxu0  ;;  %13227 = vmatprep.mubr.msk.f32.mxu1 %vm14360_vm5, %v14359_v44 }
 0x850   :  { %v1327_v14 = vsel %vm175_vm8, %v1325_v12, -1e+09 }
 0x851   :  { %v1329_v15 = vsel %vm339_vm6, %v1327_v14, -inf }
 0x852   :  { %1330 = vmax.xlane.f32.xlu0 %v1329_v15 }
 0x8db   :  { %v1331_v16 = vpop.xlane.xlu0 %1330 }
 0x8dc   :  { %v1335_v17 = vsub.f32 %v1327_v14, %v1331_v16 }
 0x8de   :  { %v1337_v18 = vmul.f32 1.442695, %v1335_v17 }
 0x8e0   :  { %14035 = vpow2.f32 %v1337_v18 }
 0x8ed   :  { %v14036_v19 = vpop.eup %14035 }
 0x8ee   :  { %v1341_v20 = vsel %vm339_vm6, %v14036_v19, 0.0 }
 0x8ef   :  { %1342 = vadd.xlane.f32.xlu0 %v1341_v20 }
 0x90a   :  { %v13209_v23 = vpop.f32.mrf.mxu1 }
 0x90b   :  { %v14727_v24 = vadd.f32 %v13209_v23, %v751_v22 }
 0x90c   :  { %v14729_v25 = vpop.f32.mrf.mxu1 }
 0x90e   :  { %v1321_v26 = vpop.f32.mrf.mxu1 }
 0x90f   :  { %v1326_v27 = vmul.f32 0.35355338, %v1321_v26 }
 0x910   :  { %v13219_v28 = vpop.f32.mrf.mxu1 }
 0x911   :  { %v1328_v29 = vsel %vm176_vm7, %v1326_v27, -1e+09 }
 0x912   :  { %v1332_v30 = vsel %vm339_vm6, %v1328_v29, -inf }
 0x913   :  { %1333 = vmax.xlane.f32.xlu1 %v1332_v30 }
 0x924   :  { %1427 = vrot.lane.b32.xlu1 %v14604_v47, %s14368_s23 }
 0x928   :  { %1588 = vrot.lane.b32.xlu1 %v14606_v49, %s14369_s26 }
 0x92c   :  { %1666 = vrot.lane.b32.xlu1 %v14604_v47, %s14369_s26 }
 0x930   :  { %1664 = vrot.lane.b32.xlu1 %v14604_v47, %s14370_s28 }
 0x978   :  { %v1343_v37 = vpop.xlane.xlu0 %1342 }
 0x99c   :  { %v1334_v31 = vpop.xlane.xlu1 %1333 }
 0x99d   :  { %v1336_v32 = vsub.f32 %v1328_v29, %v1334_v31  ;;  %v245_v29 = vld [vmem:[%s14423_s8 + $0x18] sm:$0xff] }
 0x99f   :  { %v1339_v33 = vmul.f32 1.442695, %v1336_v32 }
 0x9a0   :  { %v1428_v34 = vpop.permute.xlu1 %1427 }
 0x9a1   :  { %14037 = vpow2.f32 %v1339_v33  ;;  %13226 = vmatpush3.msra.mxu1 %v1428_v34  ;;  %v750_v33 = vadd.f32 %v14723_v21, %v14679_v40 }
 0x9a2   :  { %13235 = vmatprep.subr.mxu1 %v14359_v44  ;;  %14039 = vrcp.f32 %v1343_v37 }
 0x9a3   :  { %v1167_v34 = vadd.f32 %v14729_v25, %v750_v33 }
 0x9a4   :  { %v1589_v46 = vpop.permute.xlu1 %1588 }
 0x9a8   :  { %v1667_v55 = vpop.permute.xlu1 %1666 }
 0x9ac   :  { %v1665_v58 = vpop.permute.xlu1 %1664 }
 0x9ae   :  { %v14038_v35 = vpop.eup %14037 }
 0x9af   :  { %v1344_v36 = vsel %vm339_vm6, %v14038_v35, 0.0  ;;  %v14040_v39 = vpop.eup %14039 }
 0x9b0   :  { %1345 = vadd.xlane.f32.xlu0 %v1344_v36  ;;  %v1349_v42 = vmul.f32 %v14040_v39, %v14036_v19 }
 0x9c6   :  { %1351 = vrot.lane.b32.xlu0 %v14606_v49, %s14368_s23 }
 0x9ca   :  { %1586 = vrot.lane.b32.xlu0 %v14606_v49, %s14370_s28 }
 0xa39   :  { %v1346_v38 = vpop.xlane.xlu0 %1345 }
 0xa3a   :  { %14041 = vrcp.f32 %v1346_v38 }
 0xa3d   :  { %v1352_v41 = vpop.permute.xlu0 %1351 }
 0xa3e   :  { %13221 = vmatpush3.msra.mxu0 %v1352_v41 }
 0xa3f   :  { %13223 = vmatmul.mubr.msk.f32.vlgmr.msra.gmra.mxu0 %vm339_vm6, %v1349_v42  ;;  %13230 = vmatprep.subr.mxu0 %v244_v50 }
 0xa40   :  { %13231 = vmatpush3.msra.mxu0 %v244_v50 }
 0xa41   :  { %v1587_v48 = vpop.permute.xlu0 %1586  ;;  %13240 = vmatprep.subr.mxu0 %v14359_v44 }
 0xa47   :  { %v14042_v43 = vpop.eup %14041 }
 0xa48   :  { %v1350_v45 = vmul.f32 %v14042_v43, %v14038_v35 }
 0xa4a   :  { %13228 = vmatmul.mubr.msk.f32.vlgmr.msra.gmra.mxu1 %vm339_vm6, %v1350_v45 }
 0xa4b   :  { %13236 = vmatpush3.xpose.msk.msra.mxu1 %vm339_vm6, %v1589_v46  ;;  %13237 = vmatprep.mubr.msk.f32.mxu1 %vm14360_vm5, %v14359_v44 }
 0xa4c   :  { %13245 = vmatprep.subr.mxu1 %v14359_v44 }
 0xa4e   :  { %13238 = vmatmul.mubr.msk.f32.vlgmr.msra.gmra.mxu1 %vm339_vm6, %v1587_v48 }
 0xa4f   :  { %13247 = vmatprep.mubr.msk.f32.mxu1 %vm14360_vm5, %v14359_v44 }
 0xaff   :  { %v1423_v51 = vpop.f32.mrf.mxu0 }
 0xb00   :  { %13232 = vmatprep.mubr.msk.f32.mxu0 %vm339_vm6, %v1423_v51 }
 0xb01   :  { %v13224_v54 = vpop.f32.mrf.mxu0 }
 0xb0a   :  { %v1499_v56 = vpop.f32.mrf.mxu1 }
 0xb0b   :  { %13233 = vmatmul.mubr.msk.f32.vlgmr.msra.gmra.mxu0 %vm339_vm6, %v1499_v56  ;;  %v2061_v56 = vld [vmem:[%s14443_s30 + $0x10] sm:$0xff] }
 0xb0c   :  { %13241 = vmatpush3.xpose.msk.msra.mxu0 %vm339_vm6, %v1667_v55  ;;  %v13229_v57 = vpop.f32.mrf.mxu1  ;;  %13242 = vmatprep.mubr.msk.f32.mxu0 %vm14360_vm5, %v14359_v44  ;;  %v2062_v55 = vld [vmem:[%s14443_s30 + $0x18] sm:$0xff] }
 0xb0d   :  { %13250 = vmatprep.subr.mxu0 %v14359_v44  ;;  %v2060_v57 = vld [vmem:[%s14443_s30 + $0x8] sm:$0xff] }
 0xb0e   :  { %v1660_v59 = vpop.f32.mrf.mxu1 }
 0xb0f   :  { %v1742_v60 = vmul.f32 0.35355338, %v1660_v59  ;;  %13243 = vmatmul.mubr.msk.f32.vlgmr.msra.gmra.mxu0 %vm339_vm6, %v1665_v58  ;;  %v2059_v58 = vld [vmem:[%s14443_s30] sm:$0xff]  ;;  %v2071_v59 = vld [vmem:[%s14453_s12 + $0x38] sm:$0xff] }
 0xb10   :  { %v13239_v61 = vpop.f32.mrf.mxu1  ;;  %13252 = vmatprep.mubr.msk.f32.mxu0 %vm14360_vm5, %v14359_v44 }
 0xb11   :  { %v1744_v62 = vsel %vm175_vm8, %v1742_v60, -1e+09  ;;  %v2070_v60 = vld [vmem:[%s14453_s12 + $0x30] sm:$0xff]  ;;  %v2069_v61 = vld [vmem:[%s14453_s12 + $0x28] sm:$0xff] }
 0xb12   :  { %v1746_v63 = vsel %vm339_vm6, %v1744_v62, -inf }
 0xb13   :  { %1747 = vmax.xlane.f32.xlu0 %v1746_v63 }
 0xb9c   :  { %v1748_v2 = vpop.xlane.xlu0 %1747 }
 0xb9d   :  { %v1752_v3 = vsub.f32 %v1744_v62, %v1748_v2  ;;  %v2068_v62 = vld [vmem:[%s14453_s12 + $0x20] sm:$0xff] }
 0xb9f   :  { %v1754_v4 = vmul.f32 1.442695, %v1752_v3 }
 0xba1   :  { %14043 = vpow2.f32 %v1754_v4 }
 0xbae   :  { %v14044_v5 = vpop.eup %14043 }
 0xbaf   :  { %v1758_v6 = vsel %vm339_vm6, %v14044_v5, 0.0 }
 0xbb0   :  { %1759 = vadd.xlane.f32.xlu0 %v1758_v6 }
 0xbcb   :  { %v13234_v7 = vpop.f32.mrf.mxu0 }
 0xbcc   :  { %v1585_v8 = vadd.f32 %v13234_v7, %v14727_v24 }
 0xbcd   :  { %v1575_v9 = vpop.f32.mrf.mxu0 }
 0xbce   :  { %v1584_v36 = vadd.f32 %v1575_v9, %v1167_v34 }
 0xbcf   :  { %v1738_v10 = vpop.f32.mrf.mxu0 }
 0xbd0   :  { %v1743_v11 = vmul.f32 0.35355338, %v1738_v10 }
 0xbd1   :  { %v13244_v12 = vpop.f32.mrf.mxu0 }
 0xbd2   :  { %v1745_v13 = vsel %vm176_vm7, %v1743_v11, -1e+09 }
 0xbd3   :  { %v1749_v14 = vsel %vm339_vm6, %v1745_v13, -inf }
 0xbd4   :  { %1750 = vmax.xlane.f32.xlu1 %v1749_v14 }
 0xbe5   :  { %1844 = vrot.lane.b32.xlu1 %v14604_v47, %s16072_s1 }
 0xc39   :  { %v1760_v22 = vpop.xlane.xlu0 %1759 }
 0xc5d   :  { %v1751_v15 = vpop.xlane.xlu1 %1750 }
 0xc5e   :  { %v1753_v16 = vsub.f32 %v1745_v13, %v1751_v15 }
 0xc60   :  { %v1756_v17 = vmul.f32 1.442695, %v1753_v16 }
 0xc61   :  { %v1845_v18 = vpop.permute.xlu1 %1844 }
 0xc62   :  { %14045 = vpow2.f32 %v1756_v17  ;;  %13251 = vmatpush3.msra.mxu0 %v1845_v18  ;;  %v12495_v17 = vld [vmem:[%s14433_s19] ss:$0 sm:$0xff] }
 0xc63   :  { %14047 = vrcp.f32 %v1760_v22  ;;  %13260 = vmatprep.subr.mxu0 %v2062_v55 }
 0xc6f   :  { %v14046_v19 = vpop.eup %14045 }
 0xc70   :  { %v1761_v20 = vsel %vm339_vm6, %v14046_v19, 0.0  ;;  %v14048_v24 = vpop.eup %14047 }
 0xc71   :  { %1762 = vadd.xlane.f32.xlu0 %v1761_v20  ;;  %v1766_v26 = vmul.f32 %v14048_v24, %v14044_v5  ;;  %v12496_v24 = vld [vmem:[%s14438_s24] ss:$0 sm:$0xff] }
 0xc87   :  { %1768 = vrot.lane.b32.xlu0 %v14606_v49, %s16072_s1 }
 0xcfa   :  { %v1763_v23 = vpop.xlane.xlu0 %1762 }
 0xcfb   :  { %14049 = vrcp.f32 %v1763_v23 }
 0xcfe   :  { %v1769_v47 = vpop.permute.xlu0 %1768 }
 0xcff   :  { %13246 = vmatpush3.msra.mxu1 %v1769_v47 }
 0xd00   :  { %13248 = vmatmul.mubr.msk.f32.vlgmr.msra.gmra.mxu1 %vm339_vm6, %v1766_v26  ;;  %13255 = vmatprep.subr.mxu1 %v245_v29 }
 0xd01   :  { %13256 = vmatpush3.msra.mxu1 %v245_v29  ;;  %v2066_v29 = vld [vmem:[%s14453_s12 + $0x10] sm:$0xff] }
 0xd02   :  { %13271 = vmatprep.subr.mxu1 %v2071_v59 }
 0xd08   :  { %v14050_v27 = vpop.eup %14049 }
 0xd09   :  { %v1767_v28 = vmul.f32 %v14050_v27, %v14046_v19 }
 0xd0b   :  { %13253 = vmatmul.mubr.msk.f32.vlgmr.msra.gmra.mxu0 %vm339_vm6, %v1767_v28  ;;  %v2067_v28 = vld [vmem:[%s14453_s12 + $0x18] sm:$0xff] }
 0xd0c   :  { %13261 = vmatpush3.msra.mxu0 %v2062_v55 }
 0xd0d   :  { %13262 = vmatprep.subr.mxu0 %v2061_v56 }
 0xd0e   :  { %13263 = vmatpush3.msra.mxu0 %v2061_v56 }
 0xd0f   :  { %13264 = vmatprep.subr.mxu0 %v2060_v57 }
 0xd10   :  { %13265 = vmatpush3.msra.mxu0 %v2060_v57 }
 0xd11   :  { %13266 = vmatprep.subr.mxu0 %v2059_v58 }
 0xd12   :  { %13267 = vmatpush3.msra.mxu0 %v2059_v58  ;;  %v12508_v58 = vld [vmem:[%s14413_s29 + $0x38] sm:$0xff] }
 0xd13   :  { %13290 = vmatprep.subr.mxu0 %v12508_v58 }
 0xdc0   :  { %v1840_v30 = vpop.f32.mrf.mxu1 }
 0xdc1   :  { %13257 = vmatprep.mubr.msk.f32.mxu1 %vm339_vm6, %v1840_v30  ;;  %v2065_v30 = vld [vmem:[%s14453_s12 + $0x8] sm:$0xff] }
 0xdc2   :  { %v13249_v49 = vpop.f32.mrf.mxu1 }
 0xdc3   :  { %v2064_v49 = vld [vmem:[%s14453_s12] sm:$0xff] }
 0xdcb   :  { %v1916_v31 = vpop.f32.mrf.mxu0 }
 0xdcc   :  { %13258 = vmatmul.mubr.msk.f32.vlgmr.msra.gmra.mxu1 %vm339_vm6, %v1916_v31  ;;  %v12497_v31 = vld [vmem:[%s14448_s6] ss:$0 sm:$0xff] }
 0xdcd   :  { %v13254_v32 = vpop.f32.mrf.mxu0  ;;  %13272 = vmatpush3.msra.mxu1 %v2071_v59  ;;  %v12507_v59 = vld [vmem:[%s14413_s29 + $0x30] sm:$0xff] }
 0xdce   :  { %13273 = vmatprep.subr.mxu1 %v2070_v60 }
 0xdcf   :  { %13274 = vmatpush3.msra.mxu1 %v2070_v60  ;;  %v12506_v60 = vld [vmem:[%s14413_s29 + $0x28] sm:$0xff] }
 0xdd0   :  { %13275 = vmatprep.subr.mxu1 %v2069_v61 }
 0xdd1   :  { %13276 = vmatpush3.msra.mxu1 %v2069_v61  ;;  %v12505_v61 = vld [vmem:[%s14413_s29 + $0x20] sm:$0xff]  ;;  %s16097_s29 = sld [smem:[#allocation9_spill]] }
 0xdd2   :  { %13277 = vmatprep.subr.mxu1 %v2068_v62 }
 0xdd3   :  { %13278 = vmatpush3.msra.mxu1 %v2068_v62 }
 0xdd4   :  { %13279 = vmatprep.subr.mxu1 %v2067_v28 }
 0xdd5   :  { %13280 = vmatpush3.msra.mxu1 %v2067_v28 }
 0xdd6   :  { %13281 = vmatprep.subr.mxu1 %v2066_v29 }
 0xdd7   :  { %13282 = vmatpush3.msra.mxu1 %v2066_v29 }
 0xdd8   :  { %13283 = vmatprep.subr.mxu1 %v2065_v30 }
 0xdd9   :  { %13284 = vmatpush3.msra.mxu1 %v2065_v30 }
 0xdda   :  { %13285 = vmatprep.subr.mxu1 %v2064_v49 }
 0xddb   :  { %13286 = vmatpush3.msra.mxu1 %v2064_v49 }
 0xddc   :  { %13306 = vmatprep.subr.mxu1 %v14359_v44 }
 0xe8c   :  { %v13259_v35 = vpop.f32.mrf.mxu1 }
 0xe8d   :  { %v2002_v37 = vadd.f32 %v13259_v35, %v1585_v8 }
 0xe8e   :  { %v1992_v38 = vpop.f32.mrf.mxu1 }
 0xe8f   :  { %v14790_v39 = vadd.f32 %v2002_v37, %v14579_v1  ;;  %v2001_v41 = vadd.f32 %v1992_v38, %v1584_v36  ;;  %v12500_v38 = vld [vmem:[%s14458_s20] ss:$0 sm:$0xff] }
 0xe91   :  { %v14793_v42 = vadd.f32 %v2001_v41, %v14576_v0  ;;  %v2010_v43 = vsel %vm183_vm0, %v14790_v39, 0.0 }
 0xe92   :  { %2011 = vadd.xlane.f32.xlu0 %v2010_v43 }
 0xe93   :  { %v2007_v40 = vsel %vm183_vm0, %v14793_v42, 0.0 }
 0xe94   :  { %2008 = vadd.xlane.f32.xlu1 %v2007_v40 }
 0xf1b   :  { %v2012_v21 = vpop.xlane.xlu0 %2011 }
 0xf1c   :  { %v2014_v25 = vmul.f32 0.03125, %v2012_v21 }
 0xf1d   :  { %v2009_v45 = vpop.xlane.xlu1 %2008 }
 0xf1e   :  { %v2016_v1 = vsub.f32 %v14790_v39, %v2014_v25  ;;  %v2013_v46 = vmul.f32 0.03125, %v2009_v45 }
 0xf20   :  { %v2015_v0 = vsub.f32 %v14793_v42, %v2013_v46  ;;  %v2018_v48 = vmul.f32 %v2016_v1, %v2016_v1  ;;  %v2050_v19 = vmul.f32 %v12495_v17, %v2016_v1 }
 0xf22   :  { %v2022_v50 = vsel %vm183_vm0, %v2018_v48, 0.0  ;;  %v2017_v51 = vmul.f32 %v2015_v0, %v2015_v0  ;;  %v2049_v20 = vmul.f32 %v12495_v17, %v2015_v0 }
 0xf23   :  { %2023 = vadd.xlane.f32.xlu1 %v2022_v50 }
 0xf24   :  { %v2019_v54 = vsel %vm183_vm0, %v2017_v51, 0.0 }
 0xf25   :  { %2020 = vadd.xlane.f32.xlu0 %v2019_v54 }
 0xfac   :  { %v2024_v63 = vpop.xlane.xlu1 %2023 }
 0xfad   :  { %v2026_v2 = vmul.f32 0.032258064, %v2024_v63 }
 0xfae   :  { %v2021_v3 = vpop.xlane.xlu0 %2020 }
 0xfaf   :  { %14051 = vrsqrt.f32 %v2026_v2  ;;  %v2025_v4 = vmul.f32 0.032258064, %v2021_v3  ;;  %vm2036_vm9 = vcmp.eq.f32.partialorder %v2026_v2, inf  ;;  %v2039_v7 = vand.u32 2147483648, %v2026_v2 }
 0xfb0   :  { %vm2038_vm10 = vcmp.eq.f32.partialorder %v2026_v2, 0.0 }
 0xfb1   :  { %14053 = vrsqrt.f32 %v2025_v4  ;;  %vm2029_vm11 = vcmp.eq.f32.partialorder %v2025_v4, inf  ;;  %v2032_v13 = vand.u32 2147483648, %v2025_v4  ;;  %vm2031_vm12 = vcmp.eq.f32.partialorder %v2025_v4, 0.0 }
 0xfbc   :  { %v14052_v5 = vpop.eup %14051 }
 0xfbd   :  { %v2035_v6 = vmul.f32 %v14052_v5, %v2026_v2 }
 0xfbe   :  { %v14054_v8 = vpop.eup %14053 }
 0xfbf   :  { %v2037_v9 = vsel %vm2036_vm9, %v2026_v2, %v2035_v6  ;;  %v2028_v11 = vmul.f32 %v14054_v8, %v2025_v4 }
 0xfc0   :  { %v2040_v10 = vsel %vm2038_vm10, %v2039_v7, %v2037_v9 }
 0xfc1   :  { %v2042_v12 = vadd.f32 1e-06, %v2040_v10  ;;  %v2030_v14 = vsel %vm2029_vm11, %v2025_v4, %v2028_v11 }
 0xfc2   :  { %v2033_v15 = vsel %vm2031_vm12, %v2032_v13, %v2030_v14 }
 0xfc3   :  { %14055 = vrcp.f32 %v2042_v12  ;;  %v2041_v16 = vadd.f32 1e-06, %v2033_v15 }
 0xfc5   :  { %14057 = vrcp.f32 %v2041_v16  ;;  %v12503_v16 = vld [vmem:[%s14403_s21 + $0x1] ss:$0 sm:$0xff]  ;;  %s16095_s21 = sld [smem:[#allocation5_spill]] }
 0xfd0   :  { %v14056_v18 = vpop.eup %14055 }
 0xfd1   :  { %v2052_v23 = vmul.f32 %v14056_v18, %v2050_v19 }
 0xfd2   :  { %v14058_v22 = vpop.eup %14057 }
 0xfd3   :  { %v2051_v47 = vmul.f32 %v14058_v22, %v2049_v20  ;;  %v2058_v27 = vadd.f32 %v12496_v24, %v2052_v23  ;;  %v12504_v23 = vld [vmem:[%s14408_s25 + $0x1] ss:$0 sm:$0xff]  ;;  %s16096_s25 = sld [smem:[#allocation11_spill]] }
 0xfd5   :  { %v2057_v26 = vadd.f32 %v12496_v24, %v2051_v47 }
 0xfd7   :  { %13268 = vmatprep.mubr.msk.f32.mxu0 %vm183_vm0, %v2057_v26 }
 0xfd8   :  { %13269 = vmatmul.mubr.msk.f32.vlgmr.msra.gmra.mxu0 %vm183_vm0, %v2058_v27  ;;  %v12513_v27 = vld [vmem:[%s14418_s3 + $0x1] ss:$0 sm:$0xff]  ;;  %s16098_s3 = sld [smem:[#allocation10_spill]] }
 0xfd9   :  { %13291 = vmatpush3.msra.mxu0 %v12508_v58 }
 0xfda   :  { %13292 = vmatprep.subr.mxu0 %v12507_v59 }
 0xfdb   :  { %13293 = vmatpush3.msra.mxu0 %v12507_v59 }
 0xfdc   :  { %13294 = vmatprep.subr.mxu0 %v12506_v60 }
 0xfdd   :  { %13295 = vmatpush3.msra.mxu0 %v12506_v60 }
 0xfde   :  { %13296 = vmatprep.subr.mxu0 %v12505_v61 }
 0xfdf   :  { %13297 = vmatpush3.msra.mxu0 %v12505_v61 }
 0xfe0   :  { %13301 = vmatprep.subr.mxu0 %v14359_v44 }
0x1098   :  { %v13270_v32 = vpop.f32.mrf.mxu0 }
0x1099   :  { %v2155_v33 = vadd.f32 %v13270_v32, %v12497_v31 }
0x109a   :  { %v2149_v34 = vpop.f32.mrf.mxu0 }
0x109b   :  { %v2150_v35 = vadd.f32 %v12497_v31, %v2149_v34  ;;  %v2159_v37 = vmax.f32 %v2155_v33, 0.0 }
0x109d   :  { %v2158_v36 = vmax.f32 %v2150_v35, 0.0 }
0x109f   :  { %13287 = vmatprep.mubr.msk.f32.mxu1 %vm2164_vm13, %v2158_v36 }
0x10a0   :  { %13288 = vmatmul.mubr.msk.f32.vlgmr.msra.gmra.mxu1 %vm2164_vm13, %v2159_v37 }
0x10a1   :  { %13308 = vmatprep.mubr.msk.f32.mxu1 %vm14360_vm5, %v14359_v44 }
0x1160   :  { %v13289_v41 = vpop.f32.mrf.mxu1 }
0x1161   :  { %v2243_v43 = vadd.f32 %v13289_v41, %v12500_v38 }
0x1162   :  { %v2237_v40 = vpop.f32.mrf.mxu1 }
0x1163   :  { %v14827_v21 = vadd.f32 %v2243_v43, %v14790_v39  ;;  %v2238_v25 = vadd.f32 %v12500_v38, %v2237_v40 }
0x1165   :  { %v14830_v45 = vadd.f32 %v2238_v25, %v14793_v42  ;;  %v2253_v1 = vsel %vm183_vm0, %v14827_v21, 0.0 }
0x1166   :  { %2254 = vadd.xlane.f32.xlu1 %v2253_v1 }
0x1167   :  { %v2250_v46 = vsel %vm183_vm0, %v14830_v45, 0.0 }
0x1168   :  { %2251 = vadd.xlane.f32.xlu0 %v2250_v46 }
0x11ef   :  { %v2255_v0 = vpop.xlane.xlu1 %2254 }
0x11f0   :  { %v2257_v48 = vmul.f32 0.03125, %v2255_v0 }
0x11f1   :  { %v2252_v50 = vpop.xlane.xlu0 %2251 }
0x11f2   :  { %v2259_v39 = vsub.f32 %v14827_v21, %v2257_v48  ;;  %v2256_v51 = vmul.f32 0.03125, %v2252_v50 }
0x11f4   :  { %v2258_v42 = vsub.f32 %v14830_v45, %v2256_v51  ;;  %v2261_v54 = vmul.f32 %v2259_v39, %v2259_v39  ;;  %v2293_v18 = vmul.f32 %v12503_v16, %v2259_v39 }
0x11f6   :  { %v2265_v55 = vsel %vm183_vm0, %v2261_v54, 0.0  ;;  %v2260_v56 = vmul.f32 %v2258_v42, %v2258_v42  ;;  %v2292_v19 = vmul.f32 %v12503_v16, %v2258_v42 }
0x11f7   :  { %2266 = vadd.xlane.f32.xlu1 %v2265_v55 }
0x11f8   :  { %v2262_v57 = vsel %vm183_vm0, %v2260_v56, 0.0 }
0x11f9   :  { %2263 = vadd.xlane.f32.xlu0 %v2262_v57 }
0x1280   :  { %v2267_v62 = vpop.xlane.xlu1 %2266 }
0x1281   :  { %v2269_v63 = vmul.f32 0.032258064, %v2267_v62 }
0x1282   :  { %v2264_v2 = vpop.xlane.xlu0 %2263 }
0x1283   :  { %14059 = vrsqrt.f32 %v2269_v63  ;;  %v2268_v3 = vmul.f32 0.032258064, %v2264_v2  ;;  %vm2279_vm14 = vcmp.eq.f32.partialorder %v2269_v63, inf  ;;  %v2282_v6 = vand.u32 2147483648, %v2269_v63 }
0x1284   :  { %vm2281_vm15 = vcmp.eq.f32.partialorder %v2269_v63, 0.0 }
0x1285   :  { %14061 = vrsqrt.f32 %v2268_v3  ;;  %vm2272_vm1 = vcmp.eq.f32.partialorder %v2268_v3, inf  ;;  %v2275_v12 = vand.u32 2147483648, %v2268_v3  ;;  %vm2274_vm2 = vcmp.eq.f32.partialorder %v2268_v3, 0.0 }
0x1290   :  { %v14060_v4 = vpop.eup %14059 }
0x1291   :  { %v2278_v5 = vmul.f32 %v14060_v4, %v2269_v63  ;;  %v12509_v4 = vld [vmem:[%s14423_s8 + $0x20] sm:$0xff] }
0x1292   :  { %v14062_v7 = vpop.eup %14061 }
0x1293   :  { %v2280_v8 = vsel %vm2279_vm14, %v2269_v63, %v2278_v5  ;;  %v2271_v10 = vmul.f32 %v14062_v7, %v2268_v3 }
0x1294   :  { %v2283_v9 = vsel %vm2281_vm15, %v2282_v6, %v2280_v8 }
0x1295   :  { %v2285_v11 = vadd.f32 1e-06, %v2283_v9  ;;  %v2273_v13 = vsel %vm2272_vm1, %v2268_v3, %v2271_v10 }
0x1296   :  { %v2276_v14 = vsel %vm2274_vm2, %v2275_v12, %v2273_v13 }
0x1297   :  { %14063 = vrcp.f32 %v2285_v11  ;;  %v2284_v15 = vadd.f32 1e-06, %v2276_v14 }
0x1299   :  { %14065 = vrcp.f32 %v2284_v15 }
0x12a4   :  { %v14064_v17 = vpop.eup %14063 }
0x12a5   :  { %v2295_v22 = vmul.f32 %v14064_v17, %v2293_v18 }
0x12a6   :  { %v14066_v20 = vpop.eup %14065 }
0x12a7   :  { %v2294_v24 = vmul.f32 %v14066_v20, %v2292_v19  ;;  %v2301_v26 = vadd.f32 %v12504_v23, %v2295_v22 }
0x12a9   :  { %v2300_v47 = vadd.f32 %v12504_v23, %v2294_v24 }
0x12ab   :  { %13298 = vmatprep.mubr.msk.f32.mxu0 %vm183_vm0, %v2300_v47 }
0x12ac   :  { %13299 = vmatmul.mubr.msk.f32.vlgmr.msra.gmra.mxu0 %vm183_vm0, %v2301_v26 }
0x12ad   :  { %13303 = vmatprep.mubr.msk.f32.mxu0 %vm14360_vm5, %v14359_v44 }
0x136c   :  { %v13300_v28 = vpop.f32.mrf.mxu0 }
0x136d   :  { %v14852_v29 = vadd.f32 %v13300_v28, %v12513_v27 }
0x136e   :  { %v2390_v30 = vpop.f32.mrf.mxu0 }
0x136f   :  { %v14854_v49 = vadd.f32 %v12513_v27, %v2390_v30  ;;  %2481 = vrot.lane.b32.xlu1 %v14852_v29, %s14361_s0 }
0x1371   :  { %2404 = vrot.lane.b32.xlu0 %v14854_v49, %s14361_s0 }
0x13e1   :  { %v2482_v31 = vpop.permute.xlu1 %2481 }
0x13e2   :  { %13307 = vmatpush3.xpose.msk.msra.mxu1 %vm339_vm6, %v2482_v31 }
0x13e3   :  { %v2405_v32 = vpop.permute.xlu0 %2404  ;;  %13316 = vmatprep.subr.mxu1 %v14359_v44 }
0x13e4   :  { %13302 = vmatpush3.xpose.msk.msra.mxu0 %vm339_vm6, %v2405_v32 }
0x13e5   :  { %13309 = vmatmul.mubr.msk.f32.vlgmr.msra.gmra.mxu1 %vm339_vm6, %v14852_v29  ;;  %13311 = vmatprep.subr.mxu0 %v14359_v44 }
0x13e6   :  { %13318 = vmatprep.mubr.msk.f32.mxu1 %vm14360_vm5, %v14359_v44 }
0x13e7   :  { %13304 = vmatmul.mubr.msk.f32.vlgmr.msra.gmra.mxu0 %vm339_vm6, %v14854_v49 }
0x13e8   :  { %13313 = vmatprep.mubr.msk.f32.mxu0 %vm14360_vm5, %v14359_v44 }
0x14a5   :  { %v2553_v33 = vpop.f32.mrf.mxu1 }
0x14a6   :  { %v2558_v34 = vmul.f32 0.35355338, %v2553_v33 }
0x14a7   :  { %v2476_v35 = vpop.f32.mrf.mxu0  ;;  %v13310_v36 = vpop.f32.mrf.mxu1 }
0x14a8   :  { %v2557_v37 = vmul.f32 0.35355338, %v2476_v35  ;;  %v2560_v38 = vsel %vm176_vm7, %v2558_v34, -1e+09 }
0x14a9   :  { %v13305_v41 = vpop.f32.mrf.mxu0  ;;  %v2564_v43 = vsel %vm339_vm6, %v2560_v38, -inf }
0x14aa   :  { %2565 = vmax.xlane.f32.xlu0 %v2564_v43  ;;  %v2559_v40 = vsel %vm175_vm8, %v2557_v37, -1e+09 }
0x14ab   :  { %v2561_v25 = vsel %vm339_vm6, %v2559_v40, -inf }
0x14ac   :  { %2562 = vmax.xlane.f32.xlu1 %v2561_v25 }
0x1533   :  { %v2566_v1 = vpop.xlane.xlu0 %2565 }
0x1534   :  { %v2568_v46 = vsub.f32 %v2560_v38, %v2566_v1 }
0x1535   :  { %v2563_v0 = vpop.xlane.xlu1 %2562 }
0x1536   :  { %v2571_v48 = vmul.f32 1.442695, %v2568_v46  ;;  %v2567_v50 = vsub.f32 %v2559_v40, %v2563_v0  ;;  %v12510_v0 = vld [vmem:[%s14423_s8 + $0x28] sm:$0xff] }
0x1538   :  { %14067 = vpow2.f32 %v2571_v48  ;;  %v2569_v39 = vmul.f32 1.442695, %v2567_v50 }
0x153a   :  { %14069 = vpow2.f32 %v2569_v39 }
0x1545   :  { %v14068_v51 = vpop.eup %14067 }
0x1546   :  { %v2576_v42 = vsel %vm339_vm6, %v14068_v51, 0.0 }
0x1547   :  { %v14070_v54 = vpop.eup %14069  ;;  %2577 = vadd.xlane.f32.xlu1 %v2576_v42 }
0x1548   :  { %v2573_v55 = vsel %vm339_vm6, %v14070_v54, 0.0 }
0x1549   :  { %2574 = vadd.xlane.f32.xlu0 %v2573_v55 }
0x1558   :  { %2659 = vrot.lane.b32.xlu1 %v14852_v29, %s14362_s5 }
0x155c   :  { %2820 = vrot.lane.b32.xlu1 %v14854_v49, %s14363_s13 }
0x155f   :  { %2583 = vrot.lane.b32.xlu0 %v14854_v49, %s14362_s5 }
0x1560   :  { %2898 = vrot.lane.b32.xlu1 %v14852_v29, %s14363_s13 }
0x1563   :  { %2818 = vrot.lane.b32.xlu0 %v14854_v49, %s14364_s15 }
0x1564   :  { %2896 = vrot.lane.b32.xlu1 %v14852_v29, %s14364_s15 }
0x15d0   :  { %v2578_v56 = vpop.xlane.xlu1 %2577 }
0x15d1   :  { %14071 = vrcp.f32 %v2578_v56 }
0x15d2   :  { %v2575_v57 = vpop.xlane.xlu0 %2574 }
0x15d3   :  { %14073 = vrcp.f32 %v2575_v57 }
0x15d4   :  { %v2660_v58 = vpop.permute.xlu1 %2659 }
0x15d5   :  { %13317 = vmatpush3.msra.mxu1 %v2660_v58 }
0x15d6   :  { %v2584_v59 = vpop.permute.xlu0 %2583  ;;  %13326 = vmatprep.subr.mxu1 %v14359_v44 }
0x15d7   :  { %13312 = vmatpush3.msra.mxu0 %v2584_v59 }
0x15d8   :  { %v2821_v63 = vpop.permute.xlu1 %2820  ;;  %13321 = vmatprep.subr.mxu0 %v12509_v4 }
0x15da   :  { %v2819_v3 = vpop.permute.xlu0 %2818 }
0x15dc   :  { %v2899_v6 = vpop.permute.xlu1 %2898 }
0x15de   :  { %v14072_v60 = vpop.eup %14071 }
0x15df   :  { %v2582_v61 = vmul.f32 %v14072_v60, %v14068_v51 }
0x15e0   :  { %v14074_v62 = vpop.eup %14073  ;;  %v2897_v13 = vpop.permute.xlu1 %2896 }
0x15e1   :  { %13319 = vmatmul.mubr.msk.f32.vlgmr.msra.gmra.mxu1 %vm339_vm6, %v2582_v61  ;;  %v2581_v2 = vmul.f32 %v14074_v62, %v14070_v54 }
0x15e2   :  { %13327 = vmatpush3.xpose.msk.msra.mxu1 %vm339_vm6, %v2821_v63  ;;  %13328 = vmatprep.mubr.msk.f32.mxu1 %vm14360_vm5, %v14359_v44 }
0x15e3   :  { %13314 = vmatmul.mubr.msk.f32.vlgmr.msra.gmra.mxu0 %vm339_vm6, %v2581_v2  ;;  %13336 = vmatprep.subr.mxu1 %v14359_v44 }
0x15e4   :  { %13322 = vmatpush3.msra.mxu0 %v12509_v4 }
0x15e5   :  { %13329 = vmatmul.mubr.msk.f32.vlgmr.msra.gmra.mxu1 %vm339_vm6, %v2819_v3  ;;  %13331 = vmatprep.subr.mxu0 %v14359_v44  ;;  %v12516_v3 = vld [vmem:[%s14428_s14 + $0x1] ss:$0 sm:$0xff]  ;;  %s16100_s14 = sld [smem:[#allocation6_spill]] }
0x15e6   :  { %13338 = vmatprep.mubr.msk.f32.mxu1 %vm14360_vm5, %v14359_v44 }
0x16a1   :  { %v2731_v5 = vpop.f32.mrf.mxu1 }
0x16a3   :  { %v2655_v7 = vpop.f32.mrf.mxu0  ;;  %v13320_v8 = vpop.f32.mrf.mxu1 }
0x16a4   :  { %13323 = vmatprep.mubr.msk.f32.mxu0 %vm339_vm6, %v2655_v7 }
0x16a5   :  { %v13315_v9 = vpop.f32.mrf.mxu0  ;;  %13324 = vmatmul.mubr.msk.f32.vlgmr.msra.gmra.mxu0 %vm339_vm6, %v2731_v5  ;;  %v2892_v10 = vpop.f32.mrf.mxu1 }
0x16a6   :  { %v2974_v11 = vmul.f32 0.35355338, %v2892_v10  ;;  %13332 = vmatpush3.xpose.msk.msra.mxu0 %vm339_vm6, %v2899_v6  ;;  %13333 = vmatprep.mubr.msk.f32.mxu0 %vm14360_vm5, %v14359_v44 }
0x16a7   :  { %v13330_v12 = vpop.f32.mrf.mxu1  ;;  %13341 = vmatprep.subr.mxu0 %v14359_v44 }
0x16a8   :  { %v2976_v14 = vsel %vm175_vm8, %v2974_v11, -1e+09 }
0x16a9   :  { %13334 = vmatmul.mubr.msk.f32.vlgmr.msra.gmra.mxu0 %vm339_vm6, %v2897_v13  ;;  %v2978_v15 = vsel %vm339_vm6, %v2976_v14, -inf }
0x16aa   :  { %2979 = vmax.xlane.f32.xlu0 %v2978_v15  ;;  %13343 = vmatprep.mubr.msk.f32.mxu0 %vm14360_vm5, %v14359_v44 }
0x1733   :  { %v2980_v16 = vpop.xlane.xlu0 %2979 }
0x1734   :  { %v2984_v17 = vsub.f32 %v2976_v14, %v2980_v16 }
0x1736   :  { %v2986_v18 = vmul.f32 1.442695, %v2984_v17 }
0x1738   :  { %14075 = vpow2.f32 %v2986_v18 }
0x1745   :  { %v14076_v19 = vpop.eup %14075 }
0x1746   :  { %v2990_v20 = vsel %vm339_vm6, %v14076_v19, 0.0 }
0x1747   :  { %2991 = vadd.xlane.f32.xlu0 %v2990_v20 }
0x1765   :  { %v14917_v22 = vpop.f32.mrf.mxu0 }
0x1766   :  { %v2817_v4 = vadd.f32 %v14917_v22, %v12516_v3 }
0x1767   :  { %v14919_v23 = vpop.f32.mrf.mxu0 }
0x1768   :  { %v2816_v6 = vadd.f32 %v12516_v3, %v14919_v23 }
0x1769   :  { %v2970_v24 = vpop.f32.mrf.mxu0 }
0x176a   :  { %v2975_v47 = vmul.f32 0.35355338, %v2970_v24 }
0x176b   :  { %v13335_v26 = vpop.f32.mrf.mxu0 }
0x176c   :  { %v2977_v27 = vsel %vm176_vm7, %v2975_v47, -1e+09 }
0x176d   :  { %v2981_v28 = vsel %vm339_vm6, %v2977_v27, -inf }
0x176e   :  { %2982 = vmax.xlane.f32.xlu1 %v2981_v28 }
0x177f   :  { %3076 = vrot.lane.b32.xlu1 %v14852_v29, %s14365_s16 }
0x1783   :  { %3237 = vrot.lane.b32.xlu1 %v14854_v49, %s14366_s18 }
0x1787   :  { %3315 = vrot.lane.b32.xlu1 %v14852_v29, %s14366_s18 }
0x178b   :  { %3313 = vrot.lane.b32.xlu1 %v14852_v29, %s14367_s22 }
0x17d0   :  { %v2992_v36 = vpop.xlane.xlu0 %2991 }
0x17f7   :  { %v2983_v30 = vpop.xlane.xlu1 %2982 }
0x17f8   :  { %v2985_v31 = vsub.f32 %v2977_v27, %v2983_v30 }
0x17fa   :  { %v2988_v32 = vmul.f32 1.442695, %v2985_v31 }
0x17fb   :  { %v3077_v33 = vpop.permute.xlu1 %3076 }
0x17fc   :  { %14077 = vpow2.f32 %v2988_v32  ;;  %13342 = vmatpush3.msra.mxu0 %v3077_v33  ;;  %v12511_v32 = vld [vmem:[%s14423_s8 + $0x30] sm:$0xff] }
0x17fd   :  { %13351 = vmatprep.subr.mxu0 %v14359_v44  ;;  %14079 = vrcp.f32 %v2992_v36 }
0x17ff   :  { %v3238_v1 = vpop.permute.xlu1 %3237 }
0x1803   :  { %v3316_v39 = vpop.permute.xlu1 %3315 }
0x1807   :  { %v3314_v54 = vpop.permute.xlu1 %3313 }
0x1809   :  { %v14078_v34 = vpop.eup %14077 }
0x180a   :  { %v2993_v35 = vsel %vm339_vm6, %v14078_v34, 0.0  ;;  %v14080_v38 = vpop.eup %14079 }
0x180b   :  { %2994 = vadd.xlane.f32.xlu0 %v2993_v35  ;;  %v2998_v43 = vmul.f32 %v14080_v38, %v14076_v19 }
0x1821   :  { %3000 = vrot.lane.b32.xlu0 %v14854_v49, %s14365_s16 }
0x1825   :  { %3235 = vrot.lane.b32.xlu0 %v14854_v49, %s14367_s22 }
0x1894   :  { %v2995_v37 = vpop.xlane.xlu0 %2994 }
0x1895   :  { %14081 = vrcp.f32 %v2995_v37 }
0x1898   :  { %v3001_v41 = vpop.permute.xlu0 %3000 }
0x1899   :  { %13337 = vmatpush3.msra.mxu1 %v3001_v41 }
0x189a   :  { %13339 = vmatmul.mubr.msk.f32.vlgmr.msra.gmra.mxu1 %vm339_vm6, %v2998_v43  ;;  %13346 = vmatprep.subr.mxu1 %v12510_v0 }
0x189b   :  { %13347 = vmatpush3.msra.mxu1 %v12510_v0 }
0x189c   :  { %v3236_v46 = vpop.permute.xlu0 %3235  ;;  %13356 = vmatprep.subr.mxu1 %v14359_v44 }
0x18a2   :  { %v14082_v40 = vpop.eup %14081 }
0x18a3   :  { %v2999_v25 = vmul.f32 %v14082_v40, %v14078_v34 }
0x18a5   :  { %13344 = vmatmul.mubr.msk.f32.vlgmr.msra.gmra.mxu0 %vm339_vm6, %v2999_v25 }
0x18a6   :  { %13352 = vmatpush3.xpose.msk.msra.mxu0 %vm339_vm6, %v3238_v1  ;;  %13353 = vmatprep.mubr.msk.f32.mxu0 %vm14360_vm5, %v14359_v44 }
0x18a7   :  { %13361 = vmatprep.subr.mxu0 %v14359_v44 }
0x18a9   :  { %13354 = vmatmul.mubr.msk.f32.vlgmr.msra.gmra.mxu0 %vm339_vm6, %v3236_v46 }
0x18aa   :  { %13363 = vmatprep.mubr.msk.f32.mxu0 %vm14360_vm5, %v14359_v44 }
0x195a   :  { %v3072_v48 = vpop.f32.mrf.mxu1 }
0x195b   :  { %13348 = vmatprep.mubr.msk.f32.mxu1 %vm339_vm6, %v3072_v48 }
0x195c   :  { %v13340_v50 = vpop.f32.mrf.mxu1 }
0x1965   :  { %v3148_v51 = vpop.f32.mrf.mxu0 }
0x1966   :  { %13349 = vmatmul.mubr.msk.f32.vlgmr.msra.gmra.mxu1 %vm339_vm6, %v3148_v51 }
0x1967   :  { %13357 = vmatpush3.xpose.msk.msra.mxu1 %vm339_vm6, %v3316_v39  ;;  %v13345_v42 = vpop.f32.mrf.mxu0  ;;  %13358 = vmatprep.mubr.msk.f32.mxu1 %vm14360_vm5, %v14359_v44 }
0x1968   :  { %13366 = vmatprep.subr.mxu1 %v14359_v44 }
0x1969   :  { %v3309_v55 = vpop.f32.mrf.mxu0 }
0x196a   :  { %v3391_v56 = vmul.f32 0.35355338, %v3309_v55  ;;  %13359 = vmatmul.mubr.msk.f32.vlgmr.msra.gmra.mxu1 %vm339_vm6, %v3314_v54 }
0x196b   :  { %v13355_v57 = vpop.f32.mrf.mxu0  ;;  %13368 = vmatprep.mubr.msk.f32.mxu1 %vm14360_vm5, %v14359_v44 }
0x196c   :  { %v3393_v58 = vsel %vm175_vm8, %v3391_v56, -1e+09 }
0x196d   :  { %v3395_v59 = vsel %vm339_vm6, %v3393_v58, -inf }
0x196e   :  { %3396 = vmax.xlane.f32.xlu0 %v3395_v59 }
0x19f7   :  { %v3397_v60 = vpop.xlane.xlu0 %3396 }
0x19f8   :  { %v3401_v61 = vsub.f32 %v3393_v58, %v3397_v60 }
0x19fa   :  { %v3403_v62 = vmul.f32 1.442695, %v3401_v61 }
0x19fc   :  { %14083 = vpow2.f32 %v3403_v62 }
0x1a09   :  { %v14084_v63 = vpop.eup %14083 }
0x1a0a   :  { %v3407_v2 = vsel %vm339_vm6, %v14084_v63, 0.0 }
0x1a0b   :  { %3408 = vadd.xlane.f32.xlu0 %v3407_v2 }
0x1a26   :  { %v13350_v5 = vpop.f32.mrf.mxu1 }
0x1a27   :  { %v14965_v7 = vadd.f32 %v13350_v5, %v2817_v4 }
0x1a28   :  { %v3224_v8 = vpop.f32.mrf.mxu1 }
0x1a29   :  { %v14967_v9 = vadd.f32 %v3224_v8, %v2816_v6 }
0x1a2a   :  { %v3387_v10 = vpop.f32.mrf.mxu1 }
0x1a2b   :  { %v3392_v11 = vmul.f32 0.35355338, %v3387_v10 }
0x1a2c   :  { %v13360_v12 = vpop.f32.mrf.mxu1 }
0x1a2d   :  { %v3394_v13 = vsel %vm176_vm7, %v3392_v11, -1e+09  ;;  %v12512_v11 = vld [vmem:[%s14423_s8 + $0x38] sm:$0xff]  ;;  %s16099_s8 = sld [smem:[#allocation12_spill]] }
0x1a2e   :  { %v3398_v14 = vsel %vm339_vm6, %v3394_v13, -inf }
0x1a2f   :  { %3399 = vmax.xlane.f32.xlu1 %v3398_v14 }
0x1a40   :  { %3493 = vrot.lane.b32.xlu1 %v14852_v29, %s14368_s23 }
0x1a44   :  { %3654 = vrot.lane.b32.xlu1 %v14854_v49, %s14369_s26 }
0x1a48   :  { %3732 = vrot.lane.b32.xlu1 %v14852_v29, %s14369_s26 }
0x1a4c   :  { %3730 = vrot.lane.b32.xlu1 %v14852_v29, %s14370_s28 }
0x1a94   :  { %v3409_v22 = vpop.xlane.xlu0 %3408 }
0x1ab8   :  { %v3400_v15 = vpop.xlane.xlu1 %3399 }
0x1ab9   :  { %v3402_v16 = vsub.f32 %v3394_v13, %v3400_v15 }
0x1abb   :  { %v3405_v17 = vmul.f32 1.442695, %v3402_v16 }
0x1abc   :  { %v3494_v18 = vpop.permute.xlu1 %3493 }
0x1abd   :  { %14085 = vpow2.f32 %v3405_v17  ;;  %13367 = vmatpush3.msra.mxu1 %v3494_v18 }
0x1abe   :  { %13376 = vmatprep.subr.mxu1 %v14359_v44  ;;  %14087 = vrcp.f32 %v3409_v22 }
0x1ac0   :  { %v3655_v30 = vpop.permute.xlu1 %3654 }
0x1ac4   :  { %v3733_v35 = vpop.permute.xlu1 %3732 }
0x1ac8   :  { %v3731_v38 = vpop.permute.xlu1 %3730 }
0x1aca   :  { %v14086_v19 = vpop.eup %14085 }
0x1acb   :  { %v3410_v20 = vsel %vm339_vm6, %v14086_v19, 0.0  ;;  %v14088_v24 = vpop.eup %14087 }
0x1acc   :  { %3411 = vadd.xlane.f32.xlu0 %v3410_v20  ;;  %v3415_v26 = vmul.f32 %v14088_v24, %v14084_v63  ;;  %v15029_v20 = vld [vmem:[%s16095_s21] sm:$0xff]  ;;  %v15037_v24 = vld [vmem:[%s16095_s21 + $0x8] sm:$0xff]  ;;  %s16111_s21 = sld [smem:[#allocation23_spill]] }
0x1ae2   :  { %3417 = vrot.lane.b32.xlu0 %v14854_v49, %s14368_s23 }
0x1ae6   :  { %3652 = vrot.lane.b32.xlu0 %v14854_v49, %s14370_s28 }
0x1b55   :  { %v3412_v23 = vpop.xlane.xlu0 %3411 }
0x1b56   :  { %14089 = vrcp.f32 %v3412_v23 }
0x1b59   :  { %v3418_v47 = vpop.permute.xlu0 %3417 }
0x1b5a   :  { %13362 = vmatpush3.msra.mxu0 %v3418_v47 }
0x1b5b   :  { %13364 = vmatmul.mubr.msk.f32.vlgmr.msra.gmra.mxu0 %vm339_vm6, %v3415_v26  ;;  %13371 = vmatprep.subr.mxu0 %v12511_v32  ;;  %v4377_v26 = vsel %vm183_vm0, %v15029_v20, 0.0 }
0x1b5c   :  { %13372 = vmatpush3.msra.mxu0 %v12511_v32 }
0x1b5d   :  { %v3653_v31 = vpop.permute.xlu0 %3652  ;;  %13381 = vmatprep.subr.mxu0 %v14359_v44 }
0x1b63   :  { %v14090_v27 = vpop.eup %14089 }
0x1b64   :  { %v3416_v28 = vmul.f32 %v14090_v27, %v14086_v19 }
0x1b66   :  { %13369 = vmatmul.mubr.msk.f32.vlgmr.msra.gmra.mxu1 %vm339_vm6, %v3416_v28 }
0x1b67   :  { %13377 = vmatpush3.xpose.msk.msra.mxu1 %vm339_vm6, %v3655_v30  ;;  %13378 = vmatprep.mubr.msk.f32.mxu1 %vm14360_vm5, %v14359_v44 }
0x1b68   :  { %13386 = vmatprep.subr.mxu1 %v14359_v44 }
0x1b6a   :  { %13379 = vmatmul.mubr.msk.f32.vlgmr.msra.gmra.mxu1 %vm339_vm6, %v3653_v31 }
0x1b6b   :  { %13388 = vmatprep.mubr.msk.f32.mxu1 %vm14360_vm5, %v14359_v44 }
0x1c1b   :  { %v3489_v33 = vpop.f32.mrf.mxu0 }
0x1c1c   :  { %13373 = vmatprep.mubr.msk.f32.mxu0 %vm339_vm6, %v3489_v33 }
0x1c1d   :  { %v13365_v34 = vpop.f32.mrf.mxu0 }
0x1c26   :  { %v3565_v36 = vpop.f32.mrf.mxu1 }
0x1c27   :  { %13374 = vmatmul.mubr.msk.f32.vlgmr.msra.gmra.mxu0 %vm339_vm6, %v3565_v36 }
0x1c28   :  { %13382 = vmatpush3.xpose.msk.msra.mxu0 %vm339_vm6, %v3733_v35  ;;  %v13370_v37 = vpop.f32.mrf.mxu1  ;;  %13383 = vmatprep.mubr.msk.f32.mxu0 %vm14360_vm5, %v14359_v44 }
0x1c29   :  { %13391 = vmatprep.subr.mxu0 %v14359_v44 }
0x1c2a   :  { %v3726_v41 = vpop.f32.mrf.mxu1 }
0x1c2b   :  { %v3808_v43 = vmul.f32 0.35355338, %v3726_v41  ;;  %13384 = vmatmul.mubr.msk.f32.vlgmr.msra.gmra.mxu0 %vm339_vm6, %v3731_v38 }
0x1c2c   :  { %v13380_v40 = vpop.f32.mrf.mxu1  ;;  %13393 = vmatprep.mubr.msk.f32.mxu0 %vm14360_vm5, %v14359_v44 }
0x1c2d   :  { %v3810_v25 = vsel %vm175_vm8, %v3808_v43, -1e+09 }
0x1c2e   :  { %v3812_v1 = vsel %vm339_vm6, %v3810_v25, -inf }
0x1c2f   :  { %3813 = vmax.xlane.f32.xlu0 %v3812_v1 }
0x1cb8   :  { %v3814_v46 = vpop.xlane.xlu0 %3813 }
0x1cb9   :  { %v3818_v0 = vsub.f32 %v3810_v25, %v3814_v46 }
0x1cbb   :  { %v3820_v48 = vmul.f32 1.442695, %v3818_v0 }
0x1cbd   :  { %14091 = vpow2.f32 %v3820_v48 }
0x1cca   :  { %v14092_v50 = vpop.eup %14091 }
0x1ccb   :  { %v3824_v39 = vsel %vm339_vm6, %v14092_v50, 0.0 }
0x1ccc   :  { %3825 = vadd.xlane.f32.xlu0 %v3824_v39  ;;  %v12553_v39 = vld [vmem:[%s14443_s30 + $0x30] sm:$0xff] }
0x1ce7   :  { %v13375_v51 = vpop.f32.mrf.mxu0 }
0x1ce8   :  { %v3651_v42 = vadd.f32 %v13375_v51, %v14965_v7  ;;  %v12552_v51 = vld [vmem:[%s14443_s30 + $0x28] sm:$0xff] }
0x1ce9   :  { %v3641_v54 = vpop.f32.mrf.mxu0 }
0x1cea   :  { %v3650_v55 = vadd.f32 %v3641_v54, %v14967_v9  ;;  %v15074_v54 = vld [vmem:[%s16096_s25 + $0x18] sm:$0xff] }
0x1ceb   :  { %v3804_v56 = vpop.f32.mrf.mxu0 }
0x1cec   :  { %v3809_v57 = vmul.f32 0.35355338, %v3804_v56  ;;  %v12561_v56 = vld [vmem:[%s14453_s12 + $0x70] sm:$0xff] }
0x1ced   :  { %v13385_v58 = vpop.f32.mrf.mxu0 }
0x1cee   :  { %v3811_v59 = vsel %vm176_vm7, %v3809_v57, -1e+09  ;;  %v12560_v57 = vld [vmem:[%s14453_s12 + $0x68] sm:$0xff]  ;;  %v12559_v58 = vld [vmem:[%s14453_s12 + $0x60] sm:$0xff] }
0x1cef   :  { %v3815_v60 = vsel %vm339_vm6, %v3811_v59, -inf }
0x1cf0   :  { %3816 = vmax.xlane.f32.xlu1 %v3815_v60 }
0x1d01   :  { %3910 = vrot.lane.b32.xlu1 %v14852_v29, %s16072_s1 }
0x1d55   :  { %v3826_v5 = vpop.xlane.xlu0 %3825 }
0x1d79   :  { %v3817_v61 = vpop.xlane.xlu1 %3816 }
0x1d7a   :  { %v3819_v62 = vsub.f32 %v3811_v59, %v3817_v61 }
0x1d7c   :  { %v3822_v63 = vmul.f32 1.442695, %v3819_v62 }
0x1d7d   :  { %v3911_v2 = vpop.permute.xlu1 %3910 }
0x1d7e   :  { %14093 = vpow2.f32 %v3822_v63  ;;  %13392 = vmatpush3.msra.mxu0 %v3911_v2 }
0x1d7f   :  { %14095 = vrcp.f32 %v3826_v5 }
0x1d8b   :  { %v14094_v3 = vpop.eup %14093 }
0x1d8c   :  { %v3827_v4 = vsel %vm339_vm6, %v14094_v3, 0.0  ;;  %v14096_v7 = vpop.eup %14095 }
0x1d8d   :  { %3828 = vadd.xlane.f32.xlu0 %v3827_v4  ;;  %v3832_v8 = vmul.f32 %v14096_v7, %v14092_v50  ;;  %v12554_v50 = vld [vmem:[%s14443_s30 + $0x38] sm:$0xff] }
0x1d8e   :  { %13401 = vmatprep.subr.mxu0 %v12554_v50 }
0x1da3   :  { %3834 = vrot.lane.b32.xlu0 %v14854_v49, %s16072_s1 }
0x1e16   :  { %v3829_v6 = vpop.xlane.xlu0 %3828 }
0x1e17   :  { %14097 = vrcp.f32 %v3829_v6 }
0x1e1a   :  { %v3835_v29 = vpop.permute.xlu0 %3834 }
0x1e1b   :  { %13387 = vmatpush3.msra.mxu1 %v3835_v29 }
0x1e1c   :  { %13389 = vmatmul.mubr.msk.f32.vlgmr.msra.gmra.mxu1 %vm339_vm6, %v3832_v8  ;;  %13396 = vmatprep.subr.mxu1 %v12512_v11 }
0x1e1d   :  { %13397 = vmatpush3.msra.mxu1 %v12512_v11 }
0x1e24   :  { %v14098_v9 = vpop.eup %14097 }
0x1e25   :  { %v3833_v10 = vmul.f32 %v14098_v9, %v14094_v3 }
0x1e27   :  { %13394 = vmatmul.mubr.msk.f32.vlgmr.msra.gmra.mxu0 %vm339_vm6, %v3833_v10 }
0x1e28   :  { %13402 = vmatpush3.msra.mxu0 %v12554_v50 }
0x1e29   :  { %13403 = vmatprep.subr.mxu0 %v12553_v39 }
0x1e2a   :  { %13404 = vmatpush3.msra.mxu0 %v12553_v39  ;;  %v12572_v39 = vld [vmem:[%s16098_s3] ss:$0 sm:$0xff] }
0x1e2b   :  { %13405 = vmatprep.subr.mxu0 %v12552_v51 }
0x1e2c   :  { %13406 = vmatpush3.msra.mxu0 %v12552_v51 }
0x1edc   :  { %v3906_v49 = vpop.f32.mrf.mxu1 }
0x1edd   :  { %13398 = vmatprep.mubr.msk.f32.mxu1 %vm339_vm6, %v3906_v49 }
0x1ede   :  { %v13390_v12 = vpop.f32.mrf.mxu1 }
0x1ee7   :  { %v3982_v13 = vpop.f32.mrf.mxu0 }
0x1ee8   :  { %13399 = vmatmul.mubr.msk.f32.vlgmr.msra.gmra.mxu1 %vm339_vm6, %v3982_v13 }
0x1ee9   :  { %v13395_v14 = vpop.f32.mrf.mxu0 }
0x1fa8   :  { %v13400_v15 = vpop.f32.mrf.mxu1 }
0x1fa9   :  { %v4068_v16 = vadd.f32 %v13400_v15, %v3651_v42  ;;  %v12551_v42 = vld [vmem:[%s14443_s30 + $0x20] sm:$0xff]  ;;  %s16103_s30 = sld [smem:[#allocation17_spill]] }
0x1faa   :  { %v4058_v17 = vpop.f32.mrf.mxu1  ;;  %13407 = vmatprep.subr.mxu0 %v12551_v42 }
0x1fab   :  { %v15026_v18 = vadd.f32 %v4068_v16, %v14827_v21  ;;  %v4067_v19 = vadd.f32 %v4058_v17, %v3650_v55  ;;  %v4380_v21 = vsel %vm183_vm0, %v15037_v24, 0.0  ;;  %13408 = vmatpush3.msra.mxu0 %v12551_v42  ;;  %v12562_v55 = vld [vmem:[%s14453_s12 + $0x78] sm:$0xff]  ;;  %v4431_v42 = vld [vmem:[%s16096_s25 + $0x10] sm:$0xff] }
0x1fac   :  { %13431 = vmatprep.subr.mxu0 %v15074_v54  ;;  %13412 = vmatprep.subr.mxu1 %v12562_v55 }
0x1fad   :  { %v15032_v22 = vadd.f32 %v4067_v19, %v14830_v45  ;;  %v4076_v23 = vsel %vm183_vm0, %v15026_v18, 0.0  ;;  %13413 = vmatpush3.msra.mxu1 %v12562_v55  ;;  %v4430_v55 = vld [vmem:[%s16096_s25 + $0x8] sm:$0xff] }
0x1fae   :  { %4077 = vadd.xlane.f32.xlu0 %v4076_v23  ;;  %13414 = vmatprep.subr.mxu1 %v12561_v56 }
0x1faf   :  { %v4073_v47 = vsel %vm183_vm0, %v15032_v22, 0.0  ;;  %13415 = vmatpush3.msra.mxu1 %v12561_v56 }
0x1fb0   :  { %4074 = vadd.xlane.f32.xlu1 %v4073_v47  ;;  %13416 = vmatprep.subr.mxu1 %v12560_v57 }
0x1fb1   :  { %13417 = vmatpush3.msra.mxu1 %v12560_v57  ;;  %v4429_v57 = vld [vmem:[%s16096_s25] sm:$0xff] }
0x1fb2   :  { %4378 = vadd.xlane.f32.xlu0 %v4377_v26  ;;  %13418 = vmatprep.subr.mxu1 %v12559_v58 }
0x1fb3   :  { %13419 = vmatpush3.msra.mxu1 %v12559_v58 }
0x1fb4   :  { %4381 = vadd.xlane.f32.xlu1 %v4380_v21 }
0x2037   :  { %v4078_v45 = vpop.xlane.xlu0 %4077 }
0x2038   :  { %v4080_v27 = vmul.f32 0.03125, %v4078_v45 }
0x2039   :  { %v4075_v28 = vpop.xlane.xlu1 %4074 }
0x203a   :  { %v15046_v30 = vsub.f32 %v15026_v18, %v4080_v27  ;;  %v4079_v31 = vmul.f32 0.03125, %v4075_v28 }
0x203b   :  { %v4379_v32 = vpop.xlane.xlu0 %4378 }
0x203c   :  { %v15049_v33 = vsub.f32 %v15032_v22, %v4079_v31  ;;  %v4383_v34 = vmul.f32 0.03125, %v4379_v32  ;;  %v4084_v35 = vmul.f32 %v15046_v30, %v15046_v30  ;;  %v12549_v32 = vld [vmem:[%s14433_s19 + $0x1] ss:$0 sm:$0xff]  ;;  %s16101_s19 = sld [smem:[#allocation13_spill]] }
0x203d   :  { %v4382_v36 = vpop.xlane.xlu1 %4381 }
0x203e   :  { %v15054_v37 = vsub.f32 %v15029_v20, %v4383_v34  ;;  %v4384_v38 = vmul.f32 0.03125, %v4382_v36  ;;  %v4088_v41 = vsel %vm183_vm0, %v4084_v35, 0.0  ;;  %v4083_v43 = vmul.f32 %v15049_v33, %v15049_v33 }
0x203f   :  { %4089 = vadd.xlane.f32.xlu1 %v4088_v41  ;;  %v4116_v35 = vmul.f32 %v12549_v32, %v15046_v30  ;;  %v4115_v36 = vmul.f32 %v12549_v32, %v15049_v33  ;;  %v12571_v41 = vld [vmem:[%s16097_s29] ss:$0 sm:$0xff] }
0x2040   :  { %v15060_v40 = vsub.f32 %v15037_v24, %v4384_v38  ;;  %v4387_v25 = vmul.f32 %v15054_v37, %v15054_v37  ;;  %v4085_v1 = vsel %vm183_vm0, %v4083_v43, 0.0 }
0x2041   :  { %4086 = vadd.xlane.f32.xlu0 %v4085_v1 }
0x2042   :  { %v4388_v46 = vmul.f32 %v15060_v40, %v15060_v40  ;;  %v4389_v0 = vsel %vm183_vm0, %v4387_v25, 0.0  ;;  %v12550_v25 = vld [vmem:[%s14438_s24 + $0x1] ss:$0 sm:$0xff]  ;;  %v4420_v33 = vmul.f32 %v12571_v41, %v15060_v40  ;;  %v12558_v40 = vld [vmem:[%s14453_s12 + $0x58] sm:$0xff]  ;;  %s16102_s24 = sld [smem:[#allocation14_spill]] }
0x2043   :  { %13420 = vmatprep.subr.mxu1 %v12558_v40 }
0x2044   :  { %v4392_v48 = vsel %vm183_vm0, %v4388_v46, 0.0  ;;  %v4419_v46 = vmul.f32 %v12571_v41, %v15054_v37  ;;  %13421 = vmatpush3.msra.mxu1 %v12558_v40 }
0x2045   :  { %4393 = vadd.xlane.f32.xlu1 %v4392_v48  ;;  %4390 = vadd.xlane.f32.xlu0 %v4389_v0 }
0x20c8   :  { %v4090_v59 = vpop.xlane.xlu1 %4089 }
0x20c9   :  { %v4092_v60 = vmul.f32 0.032258064, %v4090_v59  ;;  %v12556_v59 = vld [vmem:[%s14453_s12 + $0x48] sm:$0xff] }
0x20ca   :  { %v4087_v61 = vpop.xlane.xlu0 %4086 }
0x20cb   :  { %14099 = vrsqrt.f32 %v4092_v60  ;;  %v4091_v62 = vmul.f32 0.032258064, %v4087_v61  ;;  %vm4102_vm3 = vcmp.eq.f32.partialorder %v4092_v60, inf  ;;  %v4105_v7 = vand.u32 2147483648, %v4092_v60  ;;  %v12563_v61 = vld [vmem:[%s14448_s6 + $0x1] ss:$0 sm:$0xff] }
0x20cc   :  { %vm4104_vm4 = vcmp.eq.f32.partialorder %v4092_v60, 0.0  ;;  %s16104_s6 = sld [smem:[#allocation7_spill]] }
0x20cd   :  { %14101 = vrsqrt.f32 %v4091_v62  ;;  %vm4095_vm9 = vcmp.eq.f32.partialorder %v4091_v62, inf  ;;  %v4098_v49 = vand.u32 2147483648, %v4091_v62  ;;  %vm4097_vm10 = vcmp.eq.f32.partialorder %v4091_v62, 0.0 }
0x20ce   :  { %v4394_v63 = vpop.xlane.xlu1 %4393  ;;  %v4391_v2 = vpop.xlane.xlu0 %4390 }
0x20cf   :  { %v4396_v3 = vmul.f32 0.032258064, %v4394_v63  ;;  %v4395_v4 = vmul.f32 0.032258064, %v4391_v2 }
0x20d1   :  { %14103 = vrsqrt.f32 %v4396_v3  ;;  %vm4406_vm11 = vcmp.eq.f32.partialorder %v4396_v3, inf  ;;  %v4409_v23 = vand.u32 2147483648, %v4396_v3  ;;  %vm4399_vm12 = vcmp.eq.f32.partialorder %v4395_v4, inf }
0x20d2   :  { %14105 = vrsqrt.f32 %v4395_v4  ;;  %v4402_v47 = vand.u32 2147483648, %v4395_v4  ;;  %vm4408_vm14 = vcmp.eq.f32.partialorder %v4396_v3, 0.0  ;;  %vm4401_vm15 = vcmp.eq.f32.partialorder %v4395_v4, 0.0 }
0x20d8   :  { %v14100_v5 = vpop.eup %14099 }
0x20d9   :  { %v4101_v6 = vmul.f32 %v14100_v5, %v4092_v60 }
0x20da   :  { %v14102_v29 = vpop.eup %14101 }
0x20db   :  { %v4103_v8 = vsel %vm4102_vm3, %v4092_v60, %v4101_v6  ;;  %v4094_v10 = vmul.f32 %v14102_v29, %v4091_v62  ;;  %v12555_v60 = vld [vmem:[%s14453_s12 + $0x40] sm:$0xff] }
0x20dc   :  { %v4106_v9 = vsel %vm4104_vm4, %v4105_v7, %v4103_v8  ;;  %v12573_v6 = vld [vmem:[%s16099_s8] ss:$0 sm:$0xff] }
0x20dd   :  { %v4108_v11 = vadd.f32 1e-06, %v4106_v9  ;;  %v4096_v13 = vsel %vm4095_vm9, %v4091_v62, %v4094_v10 }
0x20de   :  { %v14104_v12 = vpop.eup %14103  ;;  %v4099_v15 = vsel %vm4097_vm10, %v4098_v49, %v4096_v13  ;;  %v15132_v49 = vld [vmem:[%s14458_s20 + $0x1] ss:$0 sm:$0xff]  ;;  %s16106_s20 = sld [smem:[#allocation18_spill]] }
0x20df   :  { %v14106_v14 = vpop.eup %14105  ;;  %14107 = vrcp.f32 %v4108_v11  ;;  %v4405_v16 = vmul.f32 %v14104_v12, %v4396_v3  ;;  %v4107_v17 = vadd.f32 1e-06, %v4099_v15 }
0x20e0   :  { %v4398_v19 = vmul.f32 %v14106_v14, %v4395_v4  ;;  %v15138_v14 = vld [vmem:[%s16100_s14 + $0x8] sm:$0xff] }
0x20e1   :  { %v4407_v26 = vsel %vm4406_vm11, %v4396_v3, %v4405_v16  ;;  %14109 = vrcp.f32 %v4107_v17  ;;  %v15143_v16 = vld [vmem:[%s16100_s14] sm:$0xff]  ;;  %vm178_vm1 = vcmp.gt.f32.partialorder %v15138_v14, 0.0  ;;  %s16112_s14 = sld [smem:[#allocation25_spill]] }
0x20e2   :  { %v4400_v21 = vsel %vm4399_vm12, %v4395_v4, %v4398_v19  ;;  %v4410_v45 = vsel %vm4408_vm14, %v4409_v23, %v4407_v26  ;;  %vm177_vm2 = vcmp.gt.f32.partialorder %v15143_v16, 0.0 }
0x20e3   :  { %v4403_v27 = vsel %vm4401_vm15, %v4402_v47, %v4400_v21  ;;  %v4412_v28 = vadd.f32 1e-06, %v4410_v45 }
0x20e4   :  { %v4411_v31 = vadd.f32 1e-06, %v4403_v27 }
0x20e6   :  { %14111 = vrcp.f32 %v4411_v31 }
0x20e7   :  { %14113 = vrcp.f32 %v4412_v28 }
0x20ec   :  { %v14108_v34 = vpop.eup %14107 }
0x20ed   :  { %v4118_v43 = vmul.f32 %v14108_v34, %v4116_v35 }
0x20ee   :  { %v14110_v38 = vpop.eup %14109 }
0x20ef   :  { %v4117_v1 = vmul.f32 %v14110_v38, %v4115_v36  ;;  %v4124_v50 = vadd.f32 %v12550_v25, %v4118_v43 }
0x20f1   :  { %v4123_v0 = vadd.f32 %v12550_v25, %v4117_v1 }
0x20f3   :  { %v14112_v48 = vpop.eup %14111  ;;  %13409 = vmatprep.mubr.msk.f32.mxu0 %vm183_vm0, %v4123_v0 }
0x20f4   :  { %v14114_v51 = vpop.eup %14113  ;;  %v4421_v30 = vmul.f32 %v14112_v48, %v4419_v46  ;;  %13410 = vmatmul.mubr.msk.f32.vlgmr.msra.gmra.mxu0 %vm183_vm0, %v4124_v50 }
0x20f5   :  { %13432 = vmatpush3.msra.mxu0 %v15074_v54  ;;  %v4422_v37 = vmul.f32 %v14114_v51, %v4420_v33  ;;  %v12557_v54 = vld [vmem:[%s14453_s12 + $0x50] sm:$0xff]  ;;  %s16105_s12 = sld [smem:[#allocation8_spill]] }
0x20f6   :  { %v4427_v56 = vadd.f32 %v12572_v39, %v4421_v30  ;;  %13433 = vmatprep.subr.mxu0 %v4431_v42  ;;  %13422 = vmatprep.subr.mxu1 %v12557_v54 }
0x20f7   :  { %13434 = vmatpush3.msra.mxu0 %v4431_v42  ;;  %v4428_v58 = vadd.f32 %v12572_v39, %v4422_v37  ;;  %13423 = vmatpush3.msra.mxu1 %v12557_v54  ;;  %v4434_v37 = vld [vmem:[%s16101_s19] sm:$0xff] }
0x20f8   :  { %13439 = vmatprep.mubr.msk.f32.mxu0 %vm183_vm0, %v4427_v56  ;;  %13435 = vmatprep.subr.mxu0 %v4430_v55 }
0x20f9   :  { %13436 = vmatpush3.msra.mxu0 %v4430_v55  ;;  %13424 = vmatprep.subr.mxu1 %v12556_v59 }
0x20fa   :  { %13437 = vmatprep.subr.mxu0 %v4429_v57  ;;  %13425 = vmatpush3.msra.mxu1 %v12556_v59 }
0x20fb   :  { %13438 = vmatpush3.msra.mxu0 %v4429_v57  ;;  %13426 = vmatprep.subr.mxu1 %v12555_v60 }
0x20fc   :  { %13440 = vmatmul.mubr.msk.f32.vlgmr.msra.gmra.mxu0 %vm183_vm0, %v4428_v58  ;;  %13442 = vmatprep.subr.mxu0 %v14359_v44 }
0x20fd   :  { %13444 = vmatprep.mubr.msk.f32.mxu0 %vm14360_vm5, %v14359_v44  ;;  %13427 = vmatpush3.msra.mxu1 %v12555_v60 }
0x20fe   :  { %13447 = vmatprep.subr.mxu1 %v14359_v44 }
0x21b4   :  { %v13411_v62 = vpop.f32.mrf.mxu0 }
0x21b5   :  { %v4223_v63 = vadd.f32 %v13411_v62, %v12563_v61 }
0x21b6   :  { %v4217_v2 = vpop.f32.mrf.mxu0 }
0x21b7   :  { %v4218_v3 = vadd.f32 %v12563_v61, %v4217_v2  ;;  %v4227_v5 = vmax.f32 %v4223_v63, 0.0 }
0x21b9   :  { %v4226_v4 = vmax.f32 %v4218_v3, 0.0 }
0x21bb   :  { %13428 = vmatprep.mubr.msk.f32.mxu1 %vm2164_vm13, %v4226_v4 }
0x21bc   :  { %v13441_v7 = vpop.f32.mrf.mxu0  ;;  %13429 = vmatmul.mubr.msk.f32.vlgmr.msra.gmra.mxu1 %vm2164_vm13, %v4227_v5 }
0x21bd   :  { %v15109_v29 = vadd.f32 %v13441_v7, %v12573_v6  ;;  %13449 = vmatprep.mubr.msk.f32.mxu1 %vm14360_vm5, %v14359_v44 }
0x21be   :  { %v4515_v8 = vpop.f32.mrf.mxu0 }
0x21bf   :  { %v15113_v9 = vadd.f32 %v12573_v6, %v4515_v8  ;;  %4606 = vrot.lane.b32.xlu1 %v15109_v29, %s14361_s0 }
0x21c1   :  { %4529 = vrot.lane.b32.xlu0 %v15113_v9, %s14361_s0 }
0x2231   :  { %v4607_v10 = vpop.permute.xlu1 %4606 }
0x2232   :  { %13448 = vmatpush3.xpose.msk.msra.mxu1 %vm339_vm6, %v4607_v10 }
0x2233   :  { %v4530_v11 = vpop.permute.xlu0 %4529  ;;  %13457 = vmatprep.subr.mxu1 %v14359_v44 }
0x2234   :  { %13443 = vmatpush3.xpose.msk.msra.mxu0 %vm339_vm6, %v4530_v11 }
0x2235   :  { %13450 = vmatmul.mubr.msk.f32.vlgmr.msra.gmra.mxu1 %vm339_vm6, %v15109_v29  ;;  %13452 = vmatprep.subr.mxu0 %v14359_v44 }
0x2236   :  { %13459 = vmatprep.mubr.msk.f32.mxu1 %vm14360_vm5, %v14359_v44 }
0x2237   :  { %13445 = vmatmul.mubr.msk.f32.vlgmr.msra.gmra.mxu0 %vm339_vm6, %v15113_v9 }
0x2238   :  { %13454 = vmatprep.mubr.msk.f32.mxu0 %vm14360_vm5, %v14359_v44 }
0x227c   :  { %v13430_v12 = vpop.f32.mrf.mxu1 }
0x227d   :  { %v15135_v13 = vadd.f32 %v13430_v12, %v15132_v49 }
0x227e   :  { %v15140_v15 = vpop.f32.mrf.mxu1 }
0x22f5   :  { %v4678_v17 = vpop.f32.mrf.mxu1 }
0x22f6   :  { %v4683_v19 = vmul.f32 0.35355338, %v4678_v17 }
0x22f7   :  { %v4601_v23 = vpop.f32.mrf.mxu0  ;;  %v13451_v47 = vpop.f32.mrf.mxu1 }
0x22f8   :  { %v4685_v26 = vsel %vm178_vm1, %v4683_v19, -1e+09  ;;  %v4682_v21 = vmul.f32 0.35355338, %v4601_v23 }
0x22f9   :  { %v13446_v45 = vpop.f32.mrf.mxu0  ;;  %v4689_v27 = vsel %vm339_vm6, %v4685_v26, -inf }
0x22fa   :  { %v4684_v28 = vsel %vm177_vm2, %v4682_v21, -1e+09  ;;  %4690 = vmax.xlane.f32.xlu0 %v4689_v27 }
0x22fb   :  { %v4686_v31 = vsel %vm339_vm6, %v4684_v28, -inf }
0x22fc   :  { %4687 = vmax.xlane.f32.xlu1 %v4686_v31 }
0x2383   :  { %v4691_v32 = vpop.xlane.xlu0 %4690 }
0x2384   :  { %v4693_v34 = vsub.f32 %v4685_v26, %v4691_v32 }
0x2385   :  { %v4688_v35 = vpop.xlane.xlu1 %4687 }
0x2386   :  { %v4696_v36 = vmul.f32 1.442695, %v4693_v34  ;;  %v4692_v38 = vsub.f32 %v4684_v28, %v4688_v35 }
0x2388   :  { %14115 = vpow2.f32 %v4696_v36  ;;  %v4694_v41 = vmul.f32 1.442695, %v4692_v38 }
0x238a   :  { %14117 = vpow2.f32 %v4694_v41 }
0x2395   :  { %v14116_v43 = vpop.eup %14115 }
0x2396   :  { %v4701_v25 = vsel %vm339_vm6, %v14116_v43, 0.0 }
0x2397   :  { %v14118_v1 = vpop.eup %14117  ;;  %4702 = vadd.xlane.f32.xlu1 %v4701_v25 }
0x2398   :  { %v4698_v46 = vsel %vm339_vm6, %v14118_v1, 0.0 }
0x2399   :  { %4699 = vadd.xlane.f32.xlu0 %v4698_v46  ;;  %v4435_v46 = vld [vmem:[%s16101_s19 + $0x8] sm:$0xff] }
0x23a8   :  { %4784 = vrot.lane.b32.xlu1 %v15109_v29, %s14362_s5 }
0x23ac   :  { %4945 = vrot.lane.b32.xlu1 %v15113_v9, %s14363_s13 }
0x23af   :  { %4708 = vrot.lane.b32.xlu0 %v15113_v9, %s14362_s5 }
0x23b0   :  { %5023 = vrot.lane.b32.xlu1 %v15109_v29, %s14363_s13 }
0x23b3   :  { %4943 = vrot.lane.b32.xlu0 %v15113_v9, %s14364_s15 }
0x23b4   :  { %5021 = vrot.lane.b32.xlu1 %v15109_v29, %s14364_s15 }
0x2420   :  { %v4703_v0 = vpop.xlane.xlu1 %4702 }
0x2421   :  { %14119 = vrcp.f32 %v4703_v0 }
0x2422   :  { %v4700_v48 = vpop.xlane.xlu0 %4699 }
0x2423   :  { %14121 = vrcp.f32 %v4700_v48 }
0x2424   :  { %v4785_v50 = vpop.permute.xlu1 %4784 }
0x2425   :  { %13458 = vmatpush3.msra.mxu1 %v4785_v50 }
0x2426   :  { %v4709_v39 = vpop.permute.xlu0 %4708  ;;  %13467 = vmatprep.subr.mxu1 %v14359_v44 }
0x2427   :  { %13453 = vmatpush3.msra.mxu0 %v4709_v39 }
0x2428   :  { %v4946_v33 = vpop.permute.xlu1 %4945  ;;  %13462 = vmatprep.subr.mxu0 %v4434_v37 }
0x242a   :  { %v4944_v56 = vpop.permute.xlu0 %4943 }
0x242c   :  { %v5024_v58 = vpop.permute.xlu1 %5023 }
0x242e   :  { %v14120_v51 = vpop.eup %14119 }
0x242f   :  { %v4707_v42 = vmul.f32 %v14120_v51, %v14116_v43 }
0x2430   :  { %v14122_v30 = vpop.eup %14121  ;;  %v5022_v63 = vpop.permute.xlu1 %5021 }
0x2431   :  { %13460 = vmatmul.mubr.msk.f32.vlgmr.msra.gmra.mxu1 %vm339_vm6, %v4707_v42  ;;  %v4706_v55 = vmul.f32 %v14122_v30, %v14118_v1 }
0x2432   :  { %13468 = vmatpush3.xpose.msk.msra.mxu1 %vm339_vm6, %v4946_v33  ;;  %13469 = vmatprep.mubr.msk.f32.mxu1 %vm14360_vm5, %v14359_v44 }
0x2433   :  { %13455 = vmatmul.mubr.msk.f32.vlgmr.msra.gmra.mxu0 %vm339_vm6, %v4706_v55  ;;  %13477 = vmatprep.subr.mxu1 %v14359_v44 }
0x2434   :  { %13463 = vmatpush3.msra.mxu0 %v4434_v37 }
0x2435   :  { %13470 = vmatmul.mubr.msk.f32.vlgmr.msra.gmra.mxu1 %vm339_vm6, %v4944_v56  ;;  %13472 = vmatprep.subr.mxu0 %v14359_v44 }
0x2436   :  { %13479 = vmatprep.mubr.msk.f32.mxu1 %vm14360_vm5, %v14359_v44 }
0x24f1   :  { %v4856_v57 = vpop.f32.mrf.mxu1 }
0x24f3   :  { %v4780_v40 = vpop.f32.mrf.mxu0  ;;  %v13461_v54 = vpop.f32.mrf.mxu1 }
0x24f4   :  { %13464 = vmatprep.mubr.msk.f32.mxu0 %vm339_vm6, %v4780_v40 }
0x24f5   :  { %v13456_v59 = vpop.f32.mrf.mxu0  ;;  %13465 = vmatmul.mubr.msk.f32.vlgmr.msra.gmra.mxu0 %vm339_vm6, %v4856_v57  ;;  %v5017_v60 = vpop.f32.mrf.mxu1 }
0x24f6   :  { %v5099_v61 = vmul.f32 0.35355338, %v5017_v60  ;;  %13473 = vmatpush3.xpose.msk.msra.mxu0 %vm339_vm6, %v5024_v58  ;;  %13474 = vmatprep.mubr.msk.f32.mxu0 %vm14360_vm5, %v14359_v44  ;;  %v12576_v60 = vld [vmem:[%s16102_s24] ss:$0 sm:$0xff] }
0x24f7   :  { %v13471_v62 = vpop.f32.mrf.mxu1  ;;  %13482 = vmatprep.subr.mxu0 %v14359_v44 }
0x24f8   :  { %v5101_v2 = vsel %vm177_vm2, %v5099_v61, -1e+09 }
0x24f9   :  { %13475 = vmatmul.mubr.msk.f32.vlgmr.msra.gmra.mxu0 %vm339_vm6, %v5022_v63  ;;  %v5103_v3 = vsel %vm339_vm6, %v5101_v2, -inf }
0x24fa   :  { %5104 = vmax.xlane.f32.xlu0 %v5103_v3  ;;  %13484 = vmatprep.mubr.msk.f32.mxu0 %vm14360_vm5, %v14359_v44 }
0x2583   :  { %v5105_v4 = vpop.xlane.xlu0 %5104 }
0x2584   :  { %v5109_v5 = vsub.f32 %v5101_v2, %v5105_v4 }
0x2586   :  { %v5111_v6 = vmul.f32 1.442695, %v5109_v5 }
0x2588   :  { %14123 = vpow2.f32 %v5111_v6 }
0x2595   :  { %v14124_v7 = vpop.eup %14123 }
0x2596   :  { %v5115_v8 = vsel %vm339_vm6, %v14124_v7, 0.0 }
0x2597   :  { %5116 = vadd.xlane.f32.xlu0 %v5115_v8 }
0x25b5   :  { %v15192_v10 = vpop.f32.mrf.mxu0 }
0x25b6   :  { %v4942_v61 = vadd.f32 %v15192_v10, %v12576_v60 }
0x25b7   :  { %v15194_v11 = vpop.f32.mrf.mxu0 }
0x25b8   :  { %v4941_v63 = vadd.f32 %v12576_v60, %v15194_v11 }
0x25b9   :  { %v5095_v12 = vpop.f32.mrf.mxu0 }
0x25ba   :  { %v5100_v17 = vmul.f32 0.35355338, %v5095_v12 }
0x25bb   :  { %v13476_v19 = vpop.f32.mrf.mxu0 }
0x25bc   :  { %v5102_v23 = vsel %vm178_vm1, %v5100_v17, -1e+09 }
0x25bd   :  { %v5106_v47 = vsel %vm339_vm6, %v5102_v23, -inf }
0x25be   :  { %5107 = vmax.xlane.f32.xlu1 %v5106_v47 }
0x25cf   :  { %5201 = vrot.lane.b32.xlu1 %v15109_v29, %s14365_s16 }
0x25d3   :  { %5362 = vrot.lane.b32.xlu1 %v15113_v9, %s14366_s18 }
0x25d7   :  { %5440 = vrot.lane.b32.xlu1 %v15109_v29, %s14366_s18 }
0x25db   :  { %5438 = vrot.lane.b32.xlu1 %v15109_v29, %s14367_s22 }
0x2620   :  { %v5117_v32 = vpop.xlane.xlu0 %5116 }
0x2647   :  { %v5108_v26 = vpop.xlane.xlu1 %5107 }
0x2648   :  { %v5110_v21 = vsub.f32 %v5102_v23, %v5108_v26 }
0x264a   :  { %v5113_v45 = vmul.f32 1.442695, %v5110_v21 }
0x264b   :  { %v5202_v27 = vpop.permute.xlu1 %5201 }
0x264c   :  { %14125 = vpow2.f32 %v5113_v45  ;;  %13483 = vmatpush3.msra.mxu0 %v5202_v27 }
0x264d   :  { %13492 = vmatprep.subr.mxu0 %v14359_v44  ;;  %14127 = vrcp.f32 %v5117_v32 }
0x264f   :  { %v5363_v25 = vpop.permute.xlu1 %5362 }
0x2653   :  { %v5441_v50 = vpop.permute.xlu1 %5440 }
0x2657   :  { %v5439_v42 = vpop.permute.xlu1 %5438 }
0x2659   :  { %v14126_v28 = vpop.eup %14125 }
0x265a   :  { %v5118_v31 = vsel %vm339_vm6, %v14126_v28, 0.0  ;;  %v14128_v35 = vpop.eup %14127 }
0x265b   :  { %5119 = vadd.xlane.f32.xlu0 %v5118_v31  ;;  %v5123_v38 = vmul.f32 %v14128_v35, %v14124_v7 }
0x2671   :  { %5125 = vrot.lane.b32.xlu0 %v15113_v9, %s14365_s16 }
0x2675   :  { %5360 = vrot.lane.b32.xlu0 %v15113_v9, %s14367_s22 }
0x26e4   :  { %v5120_v34 = vpop.xlane.xlu0 %5119 }
0x26e5   :  { %14129 = vrcp.f32 %v5120_v34 }
0x26e8   :  { %v5126_v36 = vpop.permute.xlu0 %5125 }
0x26e9   :  { %13478 = vmatpush3.msra.mxu1 %v5126_v36  ;;  %v4436_v36 = vld [vmem:[%s16101_s19 + $0x10] sm:$0xff] }
0x26ea   :  { %13480 = vmatmul.mubr.msk.f32.vlgmr.msra.gmra.mxu1 %vm339_vm6, %v5123_v38  ;;  %13487 = vmatprep.subr.mxu1 %v4435_v46 }
0x26eb   :  { %13488 = vmatpush3.msra.mxu1 %v4435_v46 }
0x26ec   :  { %v5361_v1 = vpop.permute.xlu0 %5360  ;;  %13497 = vmatprep.subr.mxu1 %v14359_v44 }
0x26f2   :  { %v14130_v41 = vpop.eup %14129 }
0x26f3   :  { %v5124_v43 = vmul.f32 %v14130_v41, %v14126_v28 }
0x26f5   :  { %13485 = vmatmul.mubr.msk.f32.vlgmr.msra.gmra.mxu0 %vm339_vm6, %v5124_v43 }
0x26f6   :  { %13493 = vmatpush3.xpose.msk.msra.mxu0 %vm339_vm6, %v5363_v25  ;;  %13494 = vmatprep.mubr.msk.f32.mxu0 %vm14360_vm5, %v14359_v44 }
0x26f7   :  { %13502 = vmatprep.subr.mxu0 %v14359_v44 }
0x26f9   :  { %13495 = vmatmul.mubr.msk.f32.vlgmr.msra.gmra.mxu0 %vm339_vm6, %v5361_v1 }
0x26fa   :  { %13504 = vmatprep.mubr.msk.f32.mxu0 %vm14360_vm5, %v14359_v44 }
0x27aa   :  { %v5197_v0 = vpop.f32.mrf.mxu1 }
0x27ab   :  { %13489 = vmatprep.mubr.msk.f32.mxu1 %vm339_vm6, %v5197_v0 }
0x27ac   :  { %v13481_v48 = vpop.f32.mrf.mxu1 }
0x27b5   :  { %v5273_v39 = vpop.f32.mrf.mxu0 }
0x27b6   :  { %13490 = vmatmul.mubr.msk.f32.vlgmr.msra.gmra.mxu1 %vm339_vm6, %v5273_v39 }
0x27b7   :  { %13498 = vmatpush3.xpose.msk.msra.mxu1 %vm339_vm6, %v5441_v50  ;;  %v13486_v51 = vpop.f32.mrf.mxu0  ;;  %13499 = vmatprep.mubr.msk.f32.mxu1 %vm14360_vm5, %v14359_v44 }
0x27b8   :  { %13507 = vmatprep.subr.mxu1 %v14359_v44 }
0x27b9   :  { %v5434_v30 = vpop.f32.mrf.mxu0 }
0x27ba   :  { %v5516_v33 = vmul.f32 0.35355338, %v5434_v30  ;;  %13500 = vmatmul.mubr.msk.f32.vlgmr.msra.gmra.mxu1 %vm339_vm6, %v5439_v42 }
0x27bb   :  { %v13496_v55 = vpop.f32.mrf.mxu0  ;;  %13509 = vmatprep.mubr.msk.f32.mxu1 %vm14360_vm5, %v14359_v44 }
0x27bc   :  { %v5518_v56 = vsel %vm177_vm2, %v5516_v33, -1e+09 }
0x27bd   :  { %v5520_v37 = vsel %vm339_vm6, %v5518_v56, -inf }
0x27be   :  { %5521 = vmax.xlane.f32.xlu0 %v5520_v37 }
0x2847   :  { %v5522_v57 = vpop.xlane.xlu0 %5521 }
0x2848   :  { %v5526_v58 = vsub.f32 %v5518_v56, %v5522_v57 }
0x284a   :  { %v5528_v40 = vmul.f32 1.442695, %v5526_v58 }
0x284c   :  { %14131 = vpow2.f32 %v5528_v40 }
0x2859   :  { %v14132_v54 = vpop.eup %14131 }
0x285a   :  { %v5532_v59 = vsel %vm339_vm6, %v14132_v54, 0.0 }
0x285b   :  { %5533 = vadd.xlane.f32.xlu0 %v5532_v59 }
0x2876   :  { %v13491_v62 = vpop.f32.mrf.mxu1 }
0x2877   :  { %v15240_v2 = vadd.f32 %v13491_v62, %v4942_v61 }
0x2878   :  { %v5349_v3 = vpop.f32.mrf.mxu1 }
0x2879   :  { %v15242_v4 = vadd.f32 %v5349_v3, %v4941_v63  ;;  %v4305_v63 = vadd.f32 %v15132_v49, %v15140_v15 }
0x287a   :  { %v5512_v5 = vpop.f32.mrf.mxu1 }
0x287b   :  { %v5517_v6 = vmul.f32 0.35355338, %v5512_v5 }
0x287c   :  { %v13501_v7 = vpop.f32.mrf.mxu1 }
0x287d   :  { %v5519_v8 = vsel %vm178_vm1, %v5517_v6, -1e+09 }
0x287e   :  { %v5523_v12 = vsel %vm339_vm6, %v5519_v8, -inf }
0x287f   :  { %5524 = vmax.xlane.f32.xlu1 %v5523_v12 }
0x2890   :  { %5618 = vrot.lane.b32.xlu1 %v15109_v29, %s14368_s23 }
0x2894   :  { %5779 = vrot.lane.b32.xlu1 %v15113_v9, %s14369_s26 }
0x2898   :  { %5857 = vrot.lane.b32.xlu1 %v15109_v29, %s14369_s26 }
0x289c   :  { %5855 = vrot.lane.b32.xlu1 %v15109_v29, %s14370_s28 }
0x28e4   :  { %v5534_v26 = vpop.xlane.xlu0 %5533 }
0x2908   :  { %v5525_v10 = vpop.xlane.xlu1 %5524 }
0x2909   :  { %v5527_v11 = vsub.f32 %v5519_v8, %v5525_v10 }
0x290b   :  { %v5530_v17 = vmul.f32 1.442695, %v5527_v11 }
0x290c   :  { %v5619_v19 = vpop.permute.xlu1 %5618 }
0x290d   :  { %14133 = vpow2.f32 %v5530_v17  ;;  %13508 = vmatpush3.msra.mxu1 %v5619_v19 }
0x290e   :  { %13517 = vmatprep.subr.mxu1 %v14359_v44  ;;  %14135 = vrcp.f32 %v5534_v26 }
0x2910   :  { %v5780_v34 = vpop.permute.xlu1 %5779 }
0x2914   :  { %v5858_v43 = vpop.permute.xlu1 %5857 }
0x2918   :  { %v5856_v46 = vpop.permute.xlu1 %5855 }
0x291a   :  { %v14134_v23 = vpop.eup %14133 }
0x291b   :  { %v5535_v47 = vsel %vm339_vm6, %v14134_v23, 0.0  ;;  %v14136_v45 = vpop.eup %14135 }
0x291c   :  { %5536 = vadd.xlane.f32.xlu0 %v5535_v47  ;;  %v5540_v28 = vmul.f32 %v14136_v45, %v14132_v54 }
0x2932   :  { %5542 = vrot.lane.b32.xlu0 %v15113_v9, %s14368_s23 }
0x2936   :  { %5777 = vrot.lane.b32.xlu0 %v15113_v9, %s14370_s28 }
0x29a5   :  { %v5537_v21 = vpop.xlane.xlu0 %5536 }
0x29a6   :  { %14137 = vrcp.f32 %v5537_v21 }
0x29a9   :  { %v5543_v27 = vpop.permute.xlu0 %5542 }
0x29aa   :  { %13503 = vmatpush3.msra.mxu0 %v5543_v27 }
0x29ab   :  { %13505 = vmatmul.mubr.msk.f32.vlgmr.msra.gmra.mxu0 %vm339_vm6, %v5540_v28  ;;  %13512 = vmatprep.subr.mxu0 %v4436_v36 }
0x29ac   :  { %13513 = vmatpush3.msra.mxu0 %v4436_v36 }
0x29ad   :  { %v5778_v35 = vpop.permute.xlu0 %5777  ;;  %13522 = vmatprep.subr.mxu0 %v14359_v44 }
0x29b3   :  { %v14138_v31 = vpop.eup %14137 }
0x29b4   :  { %v5541_v32 = vmul.f32 %v14138_v31, %v14134_v23 }
0x29b6   :  { %13510 = vmatmul.mubr.msk.f32.vlgmr.msra.gmra.mxu1 %vm339_vm6, %v5541_v32 }
0x29b7   :  { %13518 = vmatpush3.xpose.msk.msra.mxu1 %vm339_vm6, %v5780_v34  ;;  %13519 = vmatprep.mubr.msk.f32.mxu1 %vm14360_vm5, %v14359_v44 }
0x29b8   :  { %13527 = vmatprep.subr.mxu1 %v14359_v44 }
0x29ba   :  { %13520 = vmatmul.mubr.msk.f32.vlgmr.msra.gmra.mxu1 %vm339_vm6, %v5778_v35 }
0x29bb   :  { %13529 = vmatprep.mubr.msk.f32.mxu1 %vm14360_vm5, %v14359_v44 }
0x2a6b   :  { %v5614_v38 = vpop.f32.mrf.mxu0 }
0x2a6c   :  { %13514 = vmatprep.mubr.msk.f32.mxu0 %vm339_vm6, %v5614_v38 }
0x2a6d   :  { %v13506_v41 = vpop.f32.mrf.mxu0 }
0x2a76   :  { %v5690_v25 = vpop.f32.mrf.mxu1 }
0x2a77   :  { %13515 = vmatmul.mubr.msk.f32.vlgmr.msra.gmra.mxu0 %vm339_vm6, %v5690_v25 }
0x2a78   :  { %13523 = vmatpush3.xpose.msk.msra.mxu0 %vm339_vm6, %v5858_v43  ;;  %v13511_v1 = vpop.f32.mrf.mxu1  ;;  %13524 = vmatprep.mubr.msk.f32.mxu0 %vm14360_vm5, %v14359_v44 }
0x2a79   :  { %13532 = vmatprep.subr.mxu0 %v14359_v44 }
0x2a7a   :  { %v5851_v0 = vpop.f32.mrf.mxu1 }
0x2a7b   :  { %v5933_v48 = vmul.f32 0.35355338, %v5851_v0  ;;  %13525 = vmatmul.mubr.msk.f32.vlgmr.msra.gmra.mxu0 %vm339_vm6, %v5856_v46 }
0x2a7c   :  { %v13521_v50 = vpop.f32.mrf.mxu1  ;;  %13534 = vmatprep.mubr.msk.f32.mxu0 %vm14360_vm5, %v14359_v44 }
0x2a7d   :  { %v5935_v39 = vsel %vm177_vm2, %v5933_v48, -1e+09  ;;  %v6253_v48 = vld [vmem:[%s16103_s30 + $0x18] sm:$0xff]  ;;  %v6252_v50 = vld [vmem:[%s16103_s30 + $0x10] sm:$0xff] }
0x2a7e   :  { %v5937_v51 = vsel %vm339_vm6, %v5935_v39, -inf }
0x2a7f   :  { %5938 = vmax.xlane.f32.xlu0 %v5937_v51  ;;  %v6250_v51 = vld [vmem:[%s16103_s30] sm:$0xff] }
0x2b08   :  { %v5939_v42 = vpop.xlane.xlu0 %5938 }
0x2b09   :  { %v5943_v30 = vsub.f32 %v5935_v39, %v5939_v42  ;;  %v6251_v39 = vld [vmem:[%s16103_s30 + $0x8] sm:$0xff] }
0x2b0b   :  { %v5945_v33 = vmul.f32 1.442695, %v5943_v30 }
0x2b0d   :  { %14139 = vpow2.f32 %v5945_v33 }
0x2b1a   :  { %v14140_v55 = vpop.eup %14139 }
0x2b1b   :  { %v5949_v56 = vsel %vm339_vm6, %v14140_v55, 0.0 }
0x2b1c   :  { %5950 = vadd.xlane.f32.xlu0 %v5949_v56 }
0x2b37   :  { %v13516_v37 = vpop.f32.mrf.mxu0 }
0x2b38   :  { %v5776_v57 = vadd.f32 %v13516_v37, %v15240_v2  ;;  %v4313_v2 = vadd.f32 %v4305_v63, %v15032_v22  ;;  %v4314_v22 = vadd.f32 %v15135_v13, %v15026_v18 }
0x2b39   :  { %v5766_v58 = vpop.f32.mrf.mxu0 }
0x2b3a   :  { %v5775_v40 = vadd.f32 %v5766_v58, %v15242_v4  ;;  %v4317_v3 = vsel %vm183_vm0, %v4313_v2, 0.0 }
0x2b3b   :  { %v5929_v54 = vpop.f32.mrf.mxu0 }
0x2b3c   :  { %v5934_v59 = vmul.f32 0.35355338, %v5929_v54 }
0x2b3d   :  { %v13526_v60 = vpop.f32.mrf.mxu0 }
0x2b3e   :  { %v5936_v61 = vsel %vm178_vm1, %v5934_v59, -1e+09 }
0x2b3f   :  { %v5940_v62 = vsel %vm339_vm6, %v5936_v61, -inf }
0x2b40   :  { %5941 = vmax.xlane.f32.xlu1 %v5940_v62 }
0x2b51   :  { %6035 = vrot.lane.b32.xlu1 %v15109_v29, %s16072_s1  ;;  %v4320_v29 = vsel %vm183_vm0, %v4314_v22, 0.0 }
0x2b75   :  { %4318 = vadd.xlane.f32.xlu1 %v4317_v3 }
0x2ba5   :  { %v5951_v49 = vpop.xlane.xlu0 %5950 }
0x2bc9   :  { %v5942_v4 = vpop.xlane.xlu1 %5941 }
0x2bca   :  { %v5944_v5 = vsub.f32 %v5936_v61, %v5942_v4 }
0x2bcc   :  { %v5947_v6 = vmul.f32 1.442695, %v5944_v5 }
0x2bcd   :  { %v6036_v7 = vpop.permute.xlu1 %6035 }
0x2bce   :  { %14141 = vpow2.f32 %v5947_v6  ;;  %13533 = vmatpush3.msra.mxu0 %v6036_v7 }
0x2bcf   :  { %14143 = vrcp.f32 %v5951_v49  ;;  %13542 = vmatprep.subr.mxu0 %v6253_v48 }
0x2bdb   :  { %v14142_v8 = vpop.eup %14141 }
0x2bdc   :  { %v5952_v12 = vsel %vm339_vm6, %v14142_v8, 0.0  ;;  %v14144_v10 = vpop.eup %14143 }
0x2bdd   :  { %5953 = vadd.xlane.f32.xlu0 %v5952_v12  ;;  %v5957_v17 = vmul.f32 %v14144_v10, %v14140_v55 }
0x2bf3   :  { %5959 = vrot.lane.b32.xlu0 %v15113_v9, %s16072_s1  ;;  %v4437_v9 = vld [vmem:[%s16101_s19 + $0x18] sm:$0xff]  ;;  %s16115_s1 = sld [smem:[#allocation24_spill]] }
0x2bfe   :  { %v4319_v45 = vpop.xlane.xlu1 %4318 }
0x2bff   :  { %v4323_v28 = vmul.f32 0.03125, %v4319_v45 }
0x2c01   :  { %v15309_v36 = vsub.f32 %v4313_v2, %v4323_v28 }
0x2c12   :  { %4321 = vadd.xlane.f32.xlu0 %v4320_v29 }
0x2c66   :  { %v5954_v15 = vpop.xlane.xlu0 %5953 }
0x2c67   :  { %14145 = vrcp.f32 %v5954_v15  ;;  %v12569_v15 = vld [vmem:[%s16104_s6] ss:$0 sm:$0xff]  ;;  %s16113_s6 = sld [smem:[#allocation21_spill]] }
0x2c6a   :  { %v5960_v11 = vpop.permute.xlu0 %5959 }
0x2c6b   :  { %13528 = vmatpush3.msra.mxu1 %v5960_v11 }
0x2c6c   :  { %13530 = vmatmul.mubr.msk.f32.vlgmr.msra.gmra.mxu1 %vm339_vm6, %v5957_v17  ;;  %13537 = vmatprep.subr.mxu1 %v4437_v9  ;;  %v12570_v17 = vld [vmem:[%s16105_s12] ss:$0 sm:$0xff]  ;;  %s16114_s12 = sld [smem:[#allocation22_spill]] }
0x2c6d   :  { %13538 = vmatpush3.msra.mxu1 %v4437_v9 }
0x2c74   :  { %v14146_v19 = vpop.eup %14145 }
0x2c75   :  { %v5958_v23 = vmul.f32 %v14146_v19, %v14142_v8 }
0x2c77   :  { %13535 = vmatmul.mubr.msk.f32.vlgmr.msra.gmra.mxu0 %vm339_vm6, %v5958_v23  ;;  %v4361_v23 = vmul.f32 %v12569_v15, %v15309_v36 }
0x2c78   :  { %13543 = vmatpush3.msra.mxu0 %v6253_v48 }
0x2c79   :  { %13544 = vmatprep.subr.mxu0 %v6252_v50 }
0x2c7a   :  { %13545 = vmatpush3.msra.mxu0 %v6252_v50 }
0x2c7b   :  { %13546 = vmatprep.subr.mxu0 %v6251_v39 }
0x2c7c   :  { %13547 = vmatpush3.msra.mxu0 %v6251_v39 }
0x2c7d   :  { %13548 = vmatprep.subr.mxu0 %v6250_v51 }
0x2c7e   :  { %13549 = vmatpush3.msra.mxu0 %v6250_v51 }
0x2c7f   :  { %13564 = vmatprep.subr.mxu0 %v14359_v44 }
0x2c9b   :  { %v4322_v21 = vpop.xlane.xlu0 %4321 }
0x2c9c   :  { %v4324_v27 = vmul.f32 0.03125, %v4322_v21 }
0x2c9e   :  { %v15307_v32 = vsub.f32 %v4314_v22, %v4324_v27 }
0x2ca0   :  { %v4328_v1 = vmul.f32 %v15307_v32, %v15307_v32  ;;  %v4362_v10 = vmul.f32 %v12569_v15, %v15307_v32 }
0x2ca2   :  { %v4332_v0 = vsel %vm183_vm0, %v4328_v1, 0.0 }
0x2d2c   :  { %v6031_v18 = vpop.f32.mrf.mxu1 }
0x2d2d   :  { %13539 = vmatprep.mubr.msk.f32.mxu1 %vm339_vm6, %v6031_v18 }
0x2d2e   :  { %v13531_v13 = vpop.f32.mrf.mxu1 }
0x2d37   :  { %v6107_v47 = vpop.f32.mrf.mxu0 }
0x2d38   :  { %13540 = vmatmul.mubr.msk.f32.vlgmr.msra.gmra.mxu1 %vm339_vm6, %v6107_v47 }
0x2d39   :  { %v13536_v26 = vpop.f32.mrf.mxu0 }
0x2d3a   :  { %v15359_v26 = vld [vmem:[%s16106_s20] ss:$0 sm:$0xff] }
0x2df8   :  { %v13541_v31 = vpop.f32.mrf.mxu1 }
0x2df9   :  { %v6193_v34 = vadd.f32 %v13541_v31, %v5776_v57 }
0x2dfa   :  { %v6183_v35 = vpop.f32.mrf.mxu1 }
0x2dfb   :  { %v15312_v38 = vadd.f32 %v6193_v34, %v15037_v24  ;;  %v6192_v41 = vadd.f32 %v6183_v35, %v5775_v40  ;;  %v4327_v24 = vmul.f32 %v15309_v36, %v15309_v36 }
0x2dfd   :  { %v15315_v43 = vadd.f32 %v6192_v41, %v15029_v20  ;;  %v6201_v25 = vsel %vm183_vm0, %v15312_v38, 0.0  ;;  %v4329_v20 = vsel %vm183_vm0, %v4327_v24, 0.0 }
0x2dfe   :  { %6202 = vadd.xlane.f32.xlu1 %v6201_v25 }
0x2dff   :  { %v6198_v46 = vsel %vm183_vm0, %v15315_v43, 0.0 }
0x2e00   :  { %6199 = vadd.xlane.f32.xlu0 %v6198_v46 }
0x2e02   :  { %4333 = vadd.xlane.f32.xlu1 %v4332_v0 }
0x2e04   :  { %4330 = vadd.xlane.f32.xlu0 %v4329_v20 }
0x2e87   :  { %v6203_v42 = vpop.xlane.xlu1 %6202 }
0x2e88   :  { %v6205_v30 = vmul.f32 0.03125, %v6203_v42  ;;  %v12609_v42 = vld [vmem:[%s16107_s2] ss:$0 sm:$0xff] }
0x2e89   :  { %v6200_v33 = vpop.xlane.xlu0 %6199 }
0x2e8a   :  { %v15333_v55 = vsub.f32 %v15312_v38, %v6205_v30  ;;  %v6204_v56 = vmul.f32 0.03125, %v6200_v33 }
0x2e8b   :  { %v4334_v37 = vpop.xlane.xlu1 %4333 }
0x2e8c   :  { %v15336_v57 = vsub.f32 %v15315_v43, %v6204_v56  ;;  %v4336_v58 = vmul.f32 0.032258064, %v4334_v37  ;;  %v6209_v40 = vmul.f32 %v15333_v55, %v15333_v55  ;;  %v6241_v33 = vmul.f32 %v12609_v42, %v15333_v55 }
0x2e8d   :  { %v4331_v54 = vpop.xlane.xlu0 %4330 }
0x2e8e   :  { %14147 = vrsqrt.f32 %v4336_v58  ;;  %v4335_v59 = vmul.f32 0.032258064, %v4331_v54  ;;  %v6213_v60 = vsel %vm183_vm0, %v6209_v40, 0.0  ;;  %v6208_v61 = vmul.f32 %v15336_v57, %v15336_v57  ;;  %v12610_v40 = vld [vmem:[%s16108_s7] ss:$0 sm:$0xff] }
0x2e8f   :  { %6214 = vadd.xlane.f32.xlu1 %v6213_v60  ;;  %vm4346_vm3 = vcmp.eq.f32.partialorder %v4336_v58, inf  ;;  %v4349_v3 = vand.u32 2147483648, %v4336_v58  ;;  %vm4348_vm4 = vcmp.eq.f32.partialorder %v4336_v58, 0.0  ;;  %v6240_v56 = vmul.f32 %v12609_v42, %v15336_v57 }
0x2e90   :  { %14149 = vrsqrt.f32 %v4335_v59  ;;  %v6210_v62 = vsel %vm183_vm0, %v6208_v61, 0.0  ;;  %vm4339_vm9 = vcmp.eq.f32.partialorder %v4335_v59, inf  ;;  %v4342_v12 = vand.u32 2147483648, %v4335_v59 }
0x2e91   :  { %6211 = vadd.xlane.f32.xlu0 %v6210_v62  ;;  %vm4341_vm10 = vcmp.eq.f32.partialorder %v4335_v59, 0.0 }
0x2e9b   :  { %v14148_v63 = vpop.eup %14147 }
0x2e9c   :  { %v4345_v2 = vmul.f32 %v14148_v63, %v4336_v58 }
0x2e9d   :  { %v14150_v4 = vpop.eup %14149 }
0x2e9e   :  { %v4347_v5 = vsel %vm4346_vm3, %v4336_v58, %v4345_v2  ;;  %v4338_v7 = vmul.f32 %v14150_v4, %v4335_v59 }
0x2e9f   :  { %v4350_v6 = vsel %vm4348_vm4, %v4349_v3, %v4347_v5 }
0x2ea0   :  { %v4352_v8 = vadd.f32 1e-06, %v4350_v6  ;;  %v4340_v22 = vsel %vm4339_vm9, %v4335_v59, %v4338_v7  ;;  %6353 = vrot.lane.b32.xlu1 %v6252_v50, %s14361_s0 }
0x2ea1   :  { %v4343_v29 = vsel %vm4341_vm10, %v4342_v12, %v4340_v22 }
0x2ea2   :  { %14151 = vrcp.f32 %v4352_v8  ;;  %v4351_v49 = vadd.f32 1e-06, %v4343_v29 }
0x2ea4   :  { %14153 = vrcp.f32 %v4351_v49  ;;  %6351 = vrot.lane.b32.xlu1 %v6251_v39, %s14361_s0 }
0x2ea7   :  { %6355 = vrot.lane.b32.xlu0 %v6253_v48, %s14361_s0 }
0x2ea8   :  { %6349 = vrot.lane.b32.xlu1 %v6250_v51, %s14361_s0 }
0x2eab   :  { %6362 = vrot.lane.b32.xlu0 %v15359_v26, %s14361_s0 }
0x2eaf   :  { %v14152_v11 = vpop.eup %14151 }
0x2eb0   :  { %v4364_v19 = vmul.f32 %v14152_v11, %v4362_v10 }
0x2eb1   :  { %v14154_v9 = vpop.eup %14153 }
0x2eb2   :  { %v15352_v18 = vadd.f32 %v12570_v17, %v4364_v19  ;;  %v4363_v13 = vmul.f32 %v14154_v9, %v4361_v23 }
0x2eb4   :  { %v15354_v47 = vadd.f32 %v12570_v17, %v4363_v13 }
0x2eb6   :  { %13561 = vmatprep.mubr.msk.f32.mxu1 %vm183_vm0, %v15354_v47 }
0x2f18   :  { %v6215_v21 = vpop.xlane.xlu1 %6214 }
0x2f19   :  { %v6217_v45 = vmul.f32 0.032258064, %v6215_v21 }
0x2f1a   :  { %v6212_v27 = vpop.xlane.xlu0 %6211 }
0x2f1b   :  { %14155 = vrsqrt.f32 %v6217_v45  ;;  %v6216_v28 = vmul.f32 0.032258064, %v6212_v27  ;;  %vm6227_vm11 = vcmp.eq.f32.partialorder %v6217_v45, inf  ;;  %v6230_v25 = vand.u32 2147483648, %v6217_v45 }
0x2f1c   :  { %v6354_v31 = vpop.permute.xlu1 %6353  ;;  %vm6229_vm12 = vcmp.eq.f32.partialorder %v6217_v45, 0.0 }
0x2f1d   :  { %14157 = vrsqrt.f32 %v6216_v28  ;;  %vm6220_vm14 = vcmp.eq.f32.partialorder %v6216_v28, inf  ;;  %v6223_v48 = vand.u32 2147483648, %v6216_v28  ;;  %vm6222_vm15 = vcmp.eq.f32.partialorder %v6216_v28, 0.0 }
0x2f1e   :  { %v6356_v32 = vpop.permute.xlu0 %6355 }
0x2f1f   :  { %13553 = vmatprep.subr.mxu1 %v6356_v32 }
0x2f20   :  { %v6352_v34 = vpop.permute.xlu1 %6351  ;;  %13554 = vmatpush3.msra.mxu1 %v6356_v32 }
0x2f21   :  { %13555 = vmatprep.subr.mxu1 %v6354_v31 }
0x2f22   :  { %13556 = vmatpush3.msra.mxu1 %v6354_v31  ;;  %v6363_v61 = vpop.permute.xlu0 %6362 }
0x2f23   :  { %13557 = vmatprep.subr.mxu1 %v6352_v34 }
0x2f24   :  { %v6350_v35 = vpop.permute.xlu1 %6349  ;;  %13558 = vmatpush3.msra.mxu1 %v6352_v34 }
0x2f25   :  { %13559 = vmatprep.subr.mxu1 %v6350_v35 }
0x2f26   :  { %13560 = vmatpush3.msra.mxu1 %v6350_v35 }
0x2f27   :  { %13562 = vmatmul.mubr.msk.f32.vlgmr.msra.gmra.mxu1 %vm183_vm0, %v15352_v18  ;;  %13569 = vmatprep.subr.mxu1 %v14359_v44 }
0x2f28   :  { %v14156_v36 = vpop.eup %14155  ;;  %13571 = vmatprep.mubr.msk.f32.mxu1 %vm14360_vm5, %v14359_v44 }
0x2f29   :  { %v6226_v41 = vmul.f32 %v14156_v36, %v6217_v45 }
0x2f2a   :  { %v14158_v1 = vpop.eup %14157 }
0x2f2b   :  { %v6228_v46 = vsel %vm6227_vm11, %v6217_v45, %v6226_v41  ;;  %v6219_v0 = vmul.f32 %v14158_v1, %v6216_v28 }
0x2f2c   :  { %v6231_v24 = vsel %vm6229_vm12, %v6230_v25, %v6228_v46 }
0x2f2d   :  { %v6233_v20 = vadd.f32 1e-06, %v6231_v24  ;;  %v6221_v50 = vsel %vm6220_vm14, %v6216_v28, %v6219_v0 }
0x2f2e   :  { %v6224_v39 = vsel %vm6222_vm15, %v6223_v48, %v6221_v50 }
0x2f2f   :  { %14159 = vrcp.f32 %v6233_v20  ;;  %v6232_v51 = vadd.f32 1e-06, %v6224_v39  ;;  %v6255_v20 = vld [vmem:[%s16109_s10] sm:$0xff] }
0x2f31   :  { %14161 = vrcp.f32 %v6232_v51 }
0x2f3c   :  { %v14160_v30 = vpop.eup %14159 }
0x2f3d   :  { %v6243_v58 = vmul.f32 %v14160_v30, %v6241_v33 }
0x2f3e   :  { %v14162_v37 = vpop.eup %14161 }
0x2f3f   :  { %v6242_v54 = vmul.f32 %v14162_v37, %v6240_v56  ;;  %v6249_v60 = vadd.f32 %v12610_v40, %v6243_v58 }
0x2f41   :  { %v6248_v59 = vadd.f32 %v12610_v40, %v6242_v54 }
0x2f43   :  { %13550 = vmatprep.mubr.msk.f32.mxu0 %vm183_vm0, %v6248_v59 }
0x2f44   :  { %13551 = vmatmul.mubr.msk.f32.vlgmr.msra.gmra.mxu0 %vm183_vm0, %v6249_v60 }
0x2f45   :  { %13566 = vmatprep.mubr.msk.f32.mxu0 %vm14360_vm5, %v14359_v44 }
0x2fe7   :  { %v13563_v62 = vpop.f32.mrf.mxu1 }
0x2fe8   :  { %v15376_v63 = vadd.f32 %v13563_v62, %v6363_v61 }
0x2fe9   :  { %v6437_v55 = vpop.f32.mrf.mxu1 }
0x2fea   :  { %v15378_v2 = vadd.f32 %v6437_v55, %v6363_v61  ;;  %13570 = vmatpush3.xpose.msk.msra.mxu1 %vm339_vm6, %v15376_v63 }
0x2feb   :  { %13579 = vmatprep.subr.mxu1 %v14359_v44 }
0x2fec   :  { %13565 = vmatpush3.xpose.msk.msra.mxu0 %vm339_vm6, %v15378_v2 }
0x2fed   :  { %13574 = vmatprep.subr.mxu0 %v14359_v44 }
0x3004   :  { %v13552_v57 = vpop.f32.mrf.mxu0 }
0x3005   :  { %v15387_v3 = vadd.f32 %v13552_v57, %v15359_v26 }
0x3006   :  { %v6336_v4 = vpop.f32.mrf.mxu0 }
0x3007   :  { %v15390_v5 = vadd.f32 %v15359_v26, %v6336_v4  ;;  %13572 = vmatmul.mubr.msk.f32.vlgmr.msra.gmra.mxu1 %vm339_vm6, %v15387_v3 }
0x3008   :  { %13581 = vmatprep.mubr.msk.f32.mxu1 %vm14360_vm5, %v14359_v44 }
0x3009   :  { %13567 = vmatmul.mubr.msk.f32.vlgmr.msra.gmra.mxu0 %vm339_vm6, %v15390_v5 }
0x300a   :  { %13576 = vmatprep.mubr.msk.f32.mxu0 %vm14360_vm5, %v14359_v44 }
0x30c7   :  { %v6598_v6 = vpop.f32.mrf.mxu1 }
0x30c8   :  { %v6603_v7 = vmul.f32 0.35355338, %v6598_v6 }
0x30c9   :  { %v6522_v8 = vpop.f32.mrf.mxu0  ;;  %v13573_v12 = vpop.f32.mrf.mxu1 }
0x30ca   :  { %v6605_v22 = vsel %vm176_vm7, %v6603_v7, -1e+09  ;;  %v6602_v29 = vmul.f32 0.35355338, %v6522_v8 }
0x30cb   :  { %v13568_v49 = vpop.f32.mrf.mxu0  ;;  %v6609_v15 = vsel %vm339_vm6, %v6605_v22, -inf }
0x30cc   :  { %v6604_v10 = vsel %vm175_vm8, %v6602_v29, -1e+09  ;;  %6610 = vmax.xlane.f32.xlu0 %v6609_v15 }
0x30cd   :  { %v6606_v11 = vsel %vm339_vm6, %v6604_v10, -inf }
0x30ce   :  { %6607 = vmax.xlane.f32.xlu1 %v6606_v11 }
0x30df   :  { %6628 = vrot.lane.b32.xlu1 %v15378_v2, %s14361_s0 }
0x30e3   :  { %6865 = vrot.lane.b32.xlu1 %v15378_v2, %s14364_s15 }
0x30e7   :  { %6943 = vrot.lane.b32.xlu1 %v15376_v63, %s14364_s15 }
0x30eb   :  { %6863 = vrot.lane.b32.xlu1 %v15390_v5, %s14364_s15 }
0x3155   :  { %v6611_v17 = vpop.xlane.xlu0 %6610 }
0x3156   :  { %v6613_v19 = vsub.f32 %v6605_v22, %v6611_v17 }
0x3157   :  { %v6608_v23 = vpop.xlane.xlu1 %6607 }
0x3158   :  { %v6616_v9 = vmul.f32 1.442695, %v6613_v19  ;;  %v6612_v13 = vsub.f32 %v6604_v10, %v6608_v23  ;;  %v6256_v23 = vld [vmem:[%s16109_s10 + $0x8] sm:$0xff] }
0x315a   :  { %14163 = vpow2.f32 %v6616_v9  ;;  %v6614_v26 = vmul.f32 1.442695, %v6612_v13 }
0x315b   :  { %v6629_v21 = vpop.permute.xlu1 %6628 }
0x315c   :  { %14165 = vpow2.f32 %v6614_v26  ;;  %13575 = vmatpush3.msra.mxu0 %v6629_v21 }
0x315d   :  { %13584 = vmatprep.subr.mxu0 %v6255_v20 }
0x315f   :  { %v6866_v35 = vpop.permute.xlu1 %6865 }
0x3163   :  { %v6944_v25 = vpop.permute.xlu1 %6943 }
0x3167   :  { %v14164_v45 = vpop.eup %14163  ;;  %v6864_v0 = vpop.permute.xlu1 %6863 }
0x3168   :  { %v6621_v27 = vsel %vm339_vm6, %v14164_v45, 0.0 }
0x3169   :  { %v14166_v28 = vpop.eup %14165  ;;  %6622 = vadd.xlane.f32.xlu0 %v6621_v27 }
0x316a   :  { %v6618_v31 = vsel %vm339_vm6, %v14166_v28, 0.0 }
0x316d   :  { %6619 = vadd.xlane.f32.xlu0 %v6618_v31 }
0x3183   :  { %6704 = vrot.lane.b32.xlu0 %v15376_v63, %s14361_s0 }
0x3187   :  { %6941 = vrot.lane.b32.xlu0 %v15387_v3, %s14364_s15 }
0x31f2   :  { %v6623_v32 = vpop.xlane.xlu0 %6622 }
0x31f3   :  { %14167 = vrcp.f32 %v6623_v32 }
0x31f6   :  { %v6620_v34 = vpop.xlane.xlu0 %6619 }
0x31f7   :  { %14169 = vrcp.f32 %v6620_v34 }
0x31fa   :  { %v6705_v36 = vpop.permute.xlu0 %6704 }
0x31fb   :  { %13580 = vmatpush3.msra.mxu1 %v6705_v36 }
0x31fc   :  { %13589 = vmatprep.subr.mxu1 %v14359_v44 }
0x31fe   :  { %v6942_v58 = vpop.permute.xlu0 %6941 }
0x3200   :  { %v14168_v41 = vpop.eup %14167 }
0x3201   :  { %v6627_v1 = vmul.f32 %v14168_v41, %v14164_v45 }
0x3203   :  { %13582 = vmatmul.mubr.msk.f32.vlgmr.msra.gmra.mxu1 %vm339_vm6, %v6627_v1 }
0x3204   :  { %v14170_v46 = vpop.eup %14169  ;;  %13590 = vmatpush3.xpose.msk.msra.mxu1 %vm339_vm6, %v6866_v35  ;;  %13591 = vmatprep.mubr.msk.f32.mxu1 %vm14360_vm5, %v14359_v44 }
0x3205   :  { %v6626_v24 = vmul.f32 %v14170_v46, %v14166_v28  ;;  %13599 = vmatprep.subr.mxu1 %v14359_v44 }
0x3207   :  { %13577 = vmatmul.mubr.msk.f32.vlgmr.msra.gmra.mxu0 %vm339_vm6, %v6626_v24  ;;  %13592 = vmatmul.mubr.msk.f32.vlgmr.msra.gmra.mxu1 %vm339_vm6, %v6864_v0 }
0x3208   :  { %13601 = vmatprep.mubr.msk.f32.mxu1 %vm14360_vm5, %v14359_v44  ;;  %13585 = vmatpush3.msra.mxu0 %v6255_v20 }
0x3209   :  { %13594 = vmatprep.subr.mxu0 %v14359_v44 }
0x32c3   :  { %v6776_v48 = vpop.f32.mrf.mxu1 }
0x32c5   :  { %v13583_v50 = vpop.f32.mrf.mxu1 }
0x32c7   :  { %v6700_v39 = vpop.f32.mrf.mxu0  ;;  %v6937_v51 = vpop.f32.mrf.mxu1 }
0x32c8   :  { %v7019_v42 = vmul.f32 0.35355338, %v6937_v51  ;;  %13586 = vmatprep.mubr.msk.f32.mxu0 %vm339_vm6, %v6700_v39  ;;  %v12616_v39 = vld [vmem:[%s16110_s11] ss:$0 sm:$0xff] }
0x32c9   :  { %v13578_v30 = vpop.f32.mrf.mxu0  ;;  %13587 = vmatmul.mubr.msk.f32.vlgmr.msra.gmra.mxu0 %vm339_vm6, %v6776_v48  ;;  %v13593_v33 = vpop.f32.mrf.mxu1 }
0x32ca   :  { %v7021_v56 = vsel %vm175_vm8, %v7019_v42, -1e+09  ;;  %13595 = vmatpush3.xpose.msk.msra.mxu0 %vm339_vm6, %v6944_v25  ;;  %13596 = vmatprep.mubr.msk.f32.mxu0 %vm14360_vm5, %v14359_v44 }
0x32cb   :  { %v7023_v37 = vsel %vm339_vm6, %v7021_v56, -inf  ;;  %13604 = vmatprep.subr.mxu0 %v14359_v44 }
0x32cc   :  { %7024 = vmax.xlane.f32.xlu1 %v7023_v37 }
0x32cd   :  { %13597 = vmatmul.mubr.msk.f32.vlgmr.msra.gmra.mxu0 %vm339_vm6, %v6942_v58 }
0x32ce   :  { %13606 = vmatprep.mubr.msk.f32.mxu0 %vm14360_vm5, %v14359_v44 }
0x32dd   :  { %7045 = vrot.lane.b32.xlu1 %v15378_v2, %s14363_s13 }
0x32e1   :  { %7282 = vrot.lane.b32.xlu1 %v15378_v2, %s14367_s22 }
0x32e5   :  { %7360 = vrot.lane.b32.xlu1 %v15376_v63, %s14367_s22 }
0x32e9   :  { %7280 = vrot.lane.b32.xlu1 %v15390_v5, %s14367_s22 }
0x3355   :  { %v7025_v40 = vpop.xlane.xlu1 %7024 }
0x3356   :  { %v7029_v59 = vsub.f32 %v7021_v56, %v7025_v40 }
0x3358   :  { %v7031_v60 = vmul.f32 1.442695, %v7029_v59 }
0x3359   :  { %v7046_v54 = vpop.permute.xlu1 %7045 }
0x335a   :  { %13600 = vmatpush3.msra.mxu1 %v7046_v54  ;;  %14171 = vpow2.f32 %v7031_v60 }
0x335b   :  { %13609 = vmatprep.subr.mxu1 %v6256_v23 }
0x335d   :  { %v7283_v26 = vpop.permute.xlu1 %7282 }
0x3361   :  { %v7361_v45 = vpop.permute.xlu1 %7360 }
0x3365   :  { %v7281_v28 = vpop.permute.xlu1 %7280 }
0x3367   :  { %v14172_v8 = vpop.eup %14171 }
0x3368   :  { %v7035_v12 = vsel %vm339_vm6, %v14172_v8, 0.0 }
0x3389   :  { %v15452_v61 = vpop.f32.mrf.mxu0 }
0x338a   :  { %v6862_v51 = vadd.f32 %v15452_v61, %v12616_v39 }
0x338b   :  { %v15454_v62 = vpop.f32.mrf.mxu0 }
0x338c   :  { %v6861_v30 = vadd.f32 %v12616_v39, %v15454_v62 }
0x338d   :  { %v7015_v55 = vpop.f32.mrf.mxu0 }
0x338e   :  { %v7020_v57 = vmul.f32 0.35355338, %v7015_v55 }
0x338f   :  { %v13598_v4 = vpop.f32.mrf.mxu0 }
0x3390   :  { %v7022_v6 = vsel %vm176_vm7, %v7020_v57, -1e+09 }
0x3391   :  { %v7026_v7 = vsel %vm339_vm6, %v7022_v6, -inf }
0x3392   :  { %7027 = vmax.xlane.f32.xlu0 %v7026_v7 }
0x3396   :  { %7036 = vadd.xlane.f32.xlu0 %v7035_v12 }
0x341b   :  { %v7028_v22 = vpop.xlane.xlu0 %7027 }
0x341c   :  { %v7030_v29 = vsub.f32 %v7022_v6, %v7028_v22  ;;  %v6257_v22 = vld [vmem:[%s16109_s10 + $0x10] sm:$0xff] }
0x341e   :  { %v7033_v49 = vmul.f32 1.442695, %v7030_v29 }
0x341f   :  { %v7037_v15 = vpop.xlane.xlu0 %7036 }
0x3420   :  { %14173 = vpow2.f32 %v7033_v49 }
0x3421   :  { %14175 = vrcp.f32 %v7037_v15 }
0x342d   :  { %v14174_v10 = vpop.eup %14173 }
0x342e   :  { %v14176_v11 = vpop.eup %14175  ;;  %v7038_v17 = vsel %vm339_vm6, %v14174_v10, 0.0 }
0x342f   :  { %7039 = vadd.xlane.f32.xlu0 %v7038_v17  ;;  %v7043_v19 = vmul.f32 %v14176_v11, %v14172_v8 }
0x3431   :  { %13602 = vmatmul.mubr.msk.f32.vlgmr.msra.gmra.mxu1 %vm339_vm6, %v7043_v19 }
0x3432   :  { %13610 = vmatpush3.msra.mxu1 %v6256_v23 }
0x3433   :  { %13619 = vmatprep.subr.mxu1 %v14359_v44 }
0x3445   :  { %7121 = vrot.lane.b32.xlu0 %v15376_v63, %s14363_s13 }
0x3449   :  { %7358 = vrot.lane.b32.xlu0 %v15387_v3, %s14367_s22 }
0x34b8   :  { %v7040_v9 = vpop.xlane.xlu0 %7039 }
0x34b9   :  { %14177 = vrcp.f32 %v7040_v9 }
0x34bc   :  { %v7122_v13 = vpop.permute.xlu0 %7121 }
0x34bd   :  { %13605 = vmatpush3.msra.mxu0 %v7122_v13 }
0x34be   :  { %13614 = vmatprep.subr.mxu0 %v14359_v44 }
0x34c0   :  { %v7359_v36 = vpop.permute.xlu0 %7358 }
0x34c6   :  { %v14178_v21 = vpop.eup %14177 }
0x34c7   :  { %v7044_v27 = vmul.f32 %v14178_v21, %v14174_v10 }
0x34c9   :  { %13607 = vmatmul.mubr.msk.f32.vlgmr.msra.gmra.mxu0 %vm339_vm6, %v7044_v27 }
0x34ca   :  { %13615 = vmatpush3.xpose.msk.msra.mxu0 %vm339_vm6, %v7283_v26  ;;  %13616 = vmatprep.mubr.msk.f32.mxu0 %vm14360_vm5, %v14359_v44 }
0x34cb   :  { %13624 = vmatprep.subr.mxu0 %v14359_v44 }
0x34cd   :  { %13617 = vmatmul.mubr.msk.f32.vlgmr.msra.gmra.mxu0 %vm339_vm6, %v7281_v28 }
0x34ce   :  { %13626 = vmatprep.mubr.msk.f32.mxu0 %vm14360_vm5, %v14359_v44 }
0x34f1   :  { %v7117_v31 = vpop.f32.mrf.mxu1 }
0x34f2   :  { %13611 = vmatprep.mubr.msk.f32.mxu1 %vm339_vm6, %v7117_v31 }
0x34f3   :  { %v13603_v32 = vpop.f32.mrf.mxu1 }
0x3589   :  { %v7193_v34 = vpop.f32.mrf.mxu0 }
0x358a   :  { %13612 = vmatmul.mubr.msk.f32.vlgmr.msra.gmra.mxu1 %vm339_vm6, %v7193_v34 }
0x358b   :  { %13620 = vmatpush3.xpose.msk.msra.mxu1 %vm339_vm6, %v7361_v45  ;;  %v13608_v35 = vpop.f32.mrf.mxu0  ;;  %13621 = vmatprep.mubr.msk.f32.mxu1 %vm14360_vm5, %v14359_v44 }
0x358c   :  { %13629 = vmatprep.subr.mxu1 %v14359_v44 }
0x358d   :  { %v7354_v41 = vpop.f32.mrf.mxu0 }
0x358e   :  { %v7436_v25 = vmul.f32 0.35355338, %v7354_v41  ;;  %13622 = vmatmul.mubr.msk.f32.vlgmr.msra.gmra.mxu1 %vm339_vm6, %v7359_v36 }
0x358f   :  { %v13618_v1 = vpop.f32.mrf.mxu0  ;;  %13631 = vmatprep.mubr.msk.f32.mxu1 %vm14360_vm5, %v14359_v44 }
0x3590   :  { %v7438_v46 = vsel %vm175_vm8, %v7436_v25, -1e+09 }
0x3591   :  { %v7440_v24 = vsel %vm339_vm6, %v7438_v46, -inf }
0x3592   :  { %7441 = vmax.xlane.f32.xlu1 %v7440_v24 }
0x35a3   :  { %7462 = vrot.lane.b32.xlu1 %v15378_v2, %s14366_s18 }
0x35a7   :  { %7699 = vrot.lane.b32.xlu1 %v15378_v2, %s14370_s28 }
0x35ab   :  { %7777 = vrot.lane.b32.xlu1 %v15376_v63, %s14370_s28 }
0x35af   :  { %7697 = vrot.lane.b32.xlu1 %v15390_v5, %s14370_s28 }
0x361b   :  { %v7442_v0 = vpop.xlane.xlu1 %7441 }
0x361c   :  { %v7446_v48 = vsub.f32 %v7438_v46, %v7442_v0 }
0x361e   :  { %v7448_v50 = vmul.f32 1.442695, %v7446_v48 }
0x361f   :  { %v7463_v20 = vpop.permute.xlu1 %7462 }
0x3620   :  { %13625 = vmatpush3.msra.mxu0 %v7463_v20  ;;  %14179 = vpow2.f32 %v7448_v50 }
0x3621   :  { %13634 = vmatprep.subr.mxu0 %v6257_v22 }
0x3623   :  { %v7700_v15 = vpop.permute.xlu1 %7699 }
0x3627   :  { %v7778_v11 = vpop.permute.xlu1 %7777 }
0x362d   :  { %v14180_v60 = vpop.eup %14179 }
0x362e   :  { %v7452_v61 = vsel %vm339_vm6, %v14180_v60, 0.0 }
0x364a   :  { %v13613_v42 = vpop.f32.mrf.mxu1 }
0x364b   :  { %v15500_v33 = vadd.f32 %v13613_v42, %v6862_v51 }
0x364c   :  { %v7269_v56 = vpop.f32.mrf.mxu1 }
0x364d   :  { %v15502_v37 = vadd.f32 %v7269_v56, %v6861_v30 }
0x364e   :  { %v7432_v58 = vpop.f32.mrf.mxu1 }
0x364f   :  { %v7437_v40 = vmul.f32 0.35355338, %v7432_v58 }
0x3650   :  { %v13623_v5 = vpop.f32.mrf.mxu1 }
0x3651   :  { %v7439_v54 = vsel %vm176_vm7, %v7437_v40, -1e+09  ;;  %v6258_v5 = vld [vmem:[%s16109_s10 + $0x18] sm:$0xff] }
0x3652   :  { %v7443_v59 = vsel %vm339_vm6, %v7439_v54, -inf }
0x3653   :  { %7444 = vmax.xlane.f32.xlu0 %v7443_v59 }
0x3657   :  { %7453 = vadd.xlane.f32.xlu0 %v7452_v61 }
0x36dc   :  { %v7445_v62 = vpop.xlane.xlu0 %7444 }
0x36dd   :  { %v7447_v55 = vsub.f32 %v7439_v54, %v7445_v62 }
0x36df   :  { %v7450_v57 = vmul.f32 1.442695, %v7447_v55 }
0x36e0   :  { %v7454_v4 = vpop.xlane.xlu0 %7453 }
0x36e1   :  { %14181 = vpow2.f32 %v7450_v57 }
0x36e2   :  { %14183 = vrcp.f32 %v7454_v4 }
0x36ee   :  { %v14182_v6 = vpop.eup %14181 }
0x36ef   :  { %v14184_v7 = vpop.eup %14183  ;;  %v7455_v8 = vsel %vm339_vm6, %v14182_v6, 0.0 }
0x36f0   :  { %7456 = vadd.xlane.f32.xlu0 %v7455_v8  ;;  %v7460_v12 = vmul.f32 %v14184_v7, %v14180_v60 }
0x36f2   :  { %13627 = vmatmul.mubr.msk.f32.vlgmr.msra.gmra.mxu0 %vm339_vm6, %v7460_v12 }
0x36f3   :  { %13635 = vmatpush3.msra.mxu0 %v6257_v22 }
0x36f4   :  { %13644 = vmatprep.subr.mxu0 %v14359_v44 }
0x3706   :  { %7538 = vrot.lane.b32.xlu0 %v15376_v63, %s14366_s18 }
0x370a   :  { %7775 = vrot.lane.b32.xlu0 %v15387_v3, %s14370_s28  ;;  %v7698_v3 = vpop.permute.xlu1 %7697 }
0x3779   :  { %v7457_v29 = vpop.xlane.xlu0 %7456 }
0x377a   :  { %14185 = vrcp.f32 %v7457_v29 }
0x377d   :  { %v7539_v49 = vpop.permute.xlu0 %7538 }
0x377e   :  { %13630 = vmatpush3.msra.mxu1 %v7539_v49 }
0x377f   :  { %13639 = vmatprep.subr.mxu1 %v14359_v44 }
0x3781   :  { %v7776_v26 = vpop.permute.xlu0 %7775 }
0x3787   :  { %v14186_v10 = vpop.eup %14185 }
0x3788   :  { %v7461_v17 = vmul.f32 %v14186_v10, %v14182_v6 }
0x378a   :  { %13632 = vmatmul.mubr.msk.f32.vlgmr.msra.gmra.mxu1 %vm339_vm6, %v7461_v17 }
0x378b   :  { %13640 = vmatpush3.xpose.msk.msra.mxu1 %vm339_vm6, %v7700_v15  ;;  %13641 = vmatprep.mubr.msk.f32.mxu1 %vm14360_vm5, %v14359_v44 }
0x378c   :  { %13649 = vmatprep.subr.mxu1 %v14359_v44 }
0x378e   :  { %13642 = vmatmul.mubr.msk.f32.vlgmr.msra.gmra.mxu1 %vm339_vm6, %v7698_v3 }
0x378f   :  { %13651 = vmatprep.mubr.msk.f32.mxu1 %vm14360_vm5, %v14359_v44 }
0x37b2   :  { %v7534_v19 = vpop.f32.mrf.mxu0 }
0x37b3   :  { %13636 = vmatprep.mubr.msk.f32.mxu0 %vm339_vm6, %v7534_v19 }
0x37b4   :  { %v13628_v23 = vpop.f32.mrf.mxu0 }
0x384a   :  { %v7610_v9 = vpop.f32.mrf.mxu1 }
0x384b   :  { %13637 = vmatmul.mubr.msk.f32.vlgmr.msra.gmra.mxu0 %vm339_vm6, %v7610_v9 }
0x384c   :  { %13645 = vmatpush3.xpose.msk.msra.mxu0 %vm339_vm6, %v7778_v11  ;;  %v13633_v13 = vpop.f32.mrf.mxu1  ;;  %13646 = vmatprep.mubr.msk.f32.mxu0 %vm14360_vm5, %v14359_v44 }
0x384d   :  { %13654 = vmatprep.subr.mxu0 %v14359_v44  ;;  %v8173_v13 = vld [vmem:[%s16111_s21 + $0x18] sm:$0xff] }
0x384e   :  { %v7771_v21 = vpop.f32.mrf.mxu1 }
0x384f   :  { %v7853_v45 = vmul.f32 0.35355338, %v7771_v21  ;;  %13647 = vmatmul.mubr.msk.f32.vlgmr.msra.gmra.mxu0 %vm339_vm6, %v7776_v26  ;;  %v8172_v26 = vld [vmem:[%s16111_s21 + $0x10] sm:$0xff]  ;;  %v8171_v21 = vld [vmem:[%s16111_s21 + $0x8] sm:$0xff] }
0x3850   :  { %v13643_v27 = vpop.f32.mrf.mxu1  ;;  %13656 = vmatprep.mubr.msk.f32.mxu0 %vm14360_vm5, %v14359_v44 }
0x3851   :  { %v7855_v28 = vsel %vm175_vm8, %v7853_v45, -1e+09  ;;  %v8170_v45 = vld [vmem:[%s16111_s21] sm:$0xff]  ;;  %v8182_v27 = vld [vmem:[%s16112_s14 + $0x38] sm:$0xff] }
0x3852   :  { %v7857_v31 = vsel %vm339_vm6, %v7855_v28, -inf }
0x3853   :  { %7858 = vmax.xlane.f32.xlu1 %v7857_v31  ;;  %v8180_v31 = vld [vmem:[%s16112_s14 + $0x28] sm:$0xff] }
0x3864   :  { %7879 = vrot.lane.b32.xlu1 %v15378_v2, %s14369_s26 }
0x38dc   :  { %v7859_v32 = vpop.xlane.xlu1 %7858 }
0x38dd   :  { %v7863_v35 = vsub.f32 %v7855_v28, %v7859_v32  ;;  %v8181_v28 = vld [vmem:[%s16112_s14 + $0x30] sm:$0xff]  ;;  %v8179_v32 = vld [vmem:[%s16112_s14 + $0x20] sm:$0xff] }
0x38df   :  { %v7865_v36 = vmul.f32 1.442695, %v7863_v35 }
0x38e0   :  { %v7880_v34 = vpop.permute.xlu1 %7879 }
0x38e1   :  { %13650 = vmatpush3.msra.mxu1 %v7880_v34  ;;  %14187 = vpow2.f32 %v7865_v36 }
0x38e2   :  { %13659 = vmatprep.subr.mxu1 %v6258_v5 }
0x38ee   :  { %v14188_v50 = vpop.eup %14187 }
0x38ef   :  { %v7869_v39 = vsel %vm339_vm6, %v14188_v50, 0.0 }
0x390b   :  { %v13638_v41 = vpop.f32.mrf.mxu0 }
0x390c   :  { %v7696_v25 = vadd.f32 %v13638_v41, %v15500_v33 }
0x390d   :  { %v7686_v1 = vpop.f32.mrf.mxu0 }
0x390e   :  { %v7695_v46 = vadd.f32 %v7686_v1, %v15502_v37 }
0x390f   :  { %v7849_v24 = vpop.f32.mrf.mxu0 }
0x3910   :  { %v7854_v0 = vmul.f32 0.35355338, %v7849_v24 }
0x3911   :  { %v13648_v20 = vpop.f32.mrf.mxu0 }
0x3912   :  { %v7856_v48 = vsel %vm176_vm7, %v7854_v0, -1e+09 }
0x3913   :  { %v7860_v2 = vsel %vm339_vm6, %v7856_v48, -inf }
0x3914   :  { %7861 = vmax.xlane.f32.xlu0 %v7860_v2 }
0x3918   :  { %7870 = vadd.xlane.f32.xlu0 %v7869_v39 }
0x399d   :  { %v7862_v51 = vpop.xlane.xlu0 %7861 }
0x399e   :  { %v7864_v42 = vsub.f32 %v7856_v48, %v7862_v51 }
0x39a0   :  { %v7867_v30 = vmul.f32 1.442695, %v7864_v42 }
0x39a1   :  { %v7871_v33 = vpop.xlane.xlu0 %7870 }
0x39a2   :  { %14189 = vpow2.f32 %v7867_v30  ;;  %v12649_v30 = vld [vmem:[%s16113_s6] ss:$0 sm:$0xff] }
0x39a3   :  { %14191 = vrcp.f32 %v7871_v33 }
0x39af   :  { %v14190_v56 = vpop.eup %14189 }
0x39b0   :  { %v14192_v37 = vpop.eup %14191  ;;  %v7872_v58 = vsel %vm339_vm6, %v14190_v56, 0.0 }
0x39b1   :  { %7873 = vadd.xlane.f32.xlu0 %v7872_v58  ;;  %v7877_v40 = vmul.f32 %v14192_v37, %v14188_v50 }
0x39b3   :  { %13652 = vmatmul.mubr.msk.f32.vlgmr.msra.gmra.mxu1 %vm339_vm6, %v7877_v40 }
0x39b4   :  { %13660 = vmatpush3.msra.mxu1 %v6258_v5  ;;  %v12650_v5 = vld [vmem:[%s16114_s12] ss:$0 sm:$0xff] }
0x39b5   :  { %13675 = vmatprep.subr.mxu1 %v8182_v27 }
0x39c7   :  { %7955 = vrot.lane.b32.xlu0 %v15376_v63, %s14369_s26 }
0x3a3a   :  { %v7874_v54 = vpop.xlane.xlu0 %7873 }
0x3a3b   :  { %14193 = vrcp.f32 %v7874_v54 }
0x3a3e   :  { %v7956_v59 = vpop.permute.xlu0 %7955 }
0x3a3f   :  { %13655 = vmatpush3.msra.mxu0 %v7956_v59 }
0x3a40   :  { %13664 = vmatprep.subr.mxu0 %v8173_v13 }
0x3a48   :  { %v14194_v60 = vpop.eup %14193 }
0x3a49   :  { %v7878_v61 = vmul.f32 %v14194_v60, %v14190_v56 }
0x3a4b   :  { %13657 = vmatmul.mubr.msk.f32.vlgmr.msra.gmra.mxu0 %vm339_vm6, %v7878_v61  ;;  %v8178_v61 = vld [vmem:[%s16112_s14 + $0x18] sm:$0xff] }
0x3a4c   :  { %13665 = vmatpush3.msra.mxu0 %v8173_v13 }
0x3a4d   :  { %13666 = vmatprep.subr.mxu0 %v8172_v26 }
0x3a4e   :  { %13667 = vmatpush3.msra.mxu0 %v8172_v26 }
0x3a4f   :  { %13668 = vmatprep.subr.mxu0 %v8171_v21 }
0x3a50   :  { %13669 = vmatpush3.msra.mxu0 %v8171_v21 }
0x3a51   :  { %13670 = vmatprep.subr.mxu0 %v8170_v45 }
0x3a52   :  { %13671 = vmatpush3.msra.mxu0 %v8170_v45 }
0x3a73   :  { %v7951_v62 = vpop.f32.mrf.mxu1 }
0x3a74   :  { %13661 = vmatprep.mubr.msk.f32.mxu1 %vm339_vm6, %v7951_v62  ;;  %v8177_v62 = vld [vmem:[%s16112_s14 + $0x10] sm:$0xff] }
0x3a75   :  { %v13653_v55 = vpop.f32.mrf.mxu1 }
0x3a76   :  { %v8176_v55 = vld [vmem:[%s16112_s14 + $0x8] sm:$0xff] }
0x3b0b   :  { %v8027_v57 = vpop.f32.mrf.mxu0 }
0x3b0c   :  { %13662 = vmatmul.mubr.msk.f32.vlgmr.msra.gmra.mxu1 %vm339_vm6, %v8027_v57  ;;  %v8175_v57 = vld [vmem:[%s16112_s14] sm:$0xff] }
0x3b0d   :  { %v13658_v4 = vpop.f32.mrf.mxu0  ;;  %13676 = vmatpush3.msra.mxu1 %v8182_v27 }
0x3b0e   :  { %13677 = vmatprep.subr.mxu1 %v8181_v28  ;;  %v12651_v4 = vld [vmem:[%s16115_s1] ss:$0 sm:$0xff] }
0x3b0f   :  { %13678 = vmatpush3.msra.mxu1 %v8181_v28 }
0x3b10   :  { %13679 = vmatprep.subr.mxu1 %v8180_v31 }
0x3b11   :  { %13680 = vmatpush3.msra.mxu1 %v8180_v31 }
0x3b12   :  { %13681 = vmatprep.subr.mxu1 %v8179_v32 }
0x3b13   :  { %13682 = vmatpush3.msra.mxu1 %v8179_v32  ;;  %v12662_v32 = vld [vmem:[%s16096_s25 + $0x38] sm:$0xff] }
0x3b14   :  { %13683 = vmatprep.subr.mxu1 %v8178_v61  ;;  %13694 = vmatprep.subr.mxu0 %v12662_v32 }
0x3b15   :  { %13684 = vmatpush3.msra.mxu1 %v8178_v61 }
0x3b16   :  { %13685 = vmatprep.subr.mxu1 %v8177_v62 }
0x3b17   :  { %13686 = vmatpush3.msra.mxu1 %v8177_v62 }
0x3b18   :  { %13687 = vmatprep.subr.mxu1 %v8176_v55 }
0x3b19   :  { %13688 = vmatpush3.msra.mxu1 %v8176_v55 }
0x3b1a   :  { %13689 = vmatprep.subr.mxu1 %v8175_v57 }
0x3b1b   :  { %13690 = vmatpush3.msra.mxu1 %v8175_v57  ;;  %v12667_v57 = vld [vmem:[%s16099_s8 + $0x1] ss:$0 sm:$0xff] }
0x3b1c   :  { %13710 = vmatprep.subr.mxu1 %v14359_v44 }
0x3bcc   :  { %v13663_v63 = vpop.f32.mrf.mxu1 }
0x3bcd   :  { %v8113_v6 = vadd.f32 %v13663_v63, %v7696_v25 }
0x3bce   :  { %v8103_v7 = vpop.f32.mrf.mxu1 }
0x3bcf   :  { %v15554_v8 = vadd.f32 %v8113_v6, %v15312_v38  ;;  %v8112_v12 = vadd.f32 %v8103_v7, %v7695_v46 }
0x3bd1   :  { %v15557_v22 = vadd.f32 %v8112_v12, %v15315_v43  ;;  %v8121_v29 = vsel %vm183_vm0, %v15554_v8, 0.0 }
0x3bd2   :  { %8122 = vadd.xlane.f32.xlu0 %v8121_v29 }
0x3bd3   :  { %v8118_v49 = vsel %vm183_vm0, %v15557_v22, 0.0 }
0x3bd4   :  { %8119 = vadd.xlane.f32.xlu1 %v8118_v49 }
0x3c5b   :  { %v8123_v15 = vpop.xlane.xlu0 %8122 }
0x3c5c   :  { %v8125_v10 = vmul.f32 0.03125, %v8123_v15  ;;  %v12654_v15 = vld [vmem:[%s14558_s9] ss:$0 sm:$0xff] }
0x3c5d   :  { %v8120_v11 = vpop.xlane.xlu1 %8119 }
0x3c5e   :  { %v8127_v38 = vsub.f32 %v15554_v8, %v8125_v10  ;;  %v8124_v17 = vmul.f32 0.03125, %v8120_v11 }
0x3c60   :  { %v8126_v43 = vsub.f32 %v15557_v22, %v8124_v17  ;;  %v8129_v3 = vmul.f32 %v8127_v38, %v8127_v38  ;;  %v8161_v56 = vmul.f32 %v12649_v30, %v8127_v38 }
0x3c62   :  { %v8133_v19 = vsel %vm183_vm0, %v8129_v3, 0.0  ;;  %v8128_v23 = vmul.f32 %v8126_v43, %v8126_v43  ;;  %v8160_v37 = vmul.f32 %v12649_v30, %v8126_v43 }
0x3c63   :  { %8134 = vadd.xlane.f32.xlu0 %v8133_v19 }
0x3c64   :  { %v8130_v9 = vsel %vm183_vm0, %v8128_v23, 0.0 }
0x3c65   :  { %8131 = vadd.xlane.f32.xlu1 %v8130_v9 }
0x3cec   :  { %v8135_v34 = vpop.xlane.xlu0 %8134 }
0x3ced   :  { %v8137_v35 = vmul.f32 0.032258064, %v8135_v34  ;;  %v12661_v34 = vld [vmem:[%s16096_s25 + $0x30] sm:$0xff] }
0x3cee   :  { %v8132_v36 = vpop.xlane.xlu1 %8131 }
0x3cef   :  { %14195 = vrsqrt.f32 %v8137_v35  ;;  %v8136_v41 = vmul.f32 0.032258064, %v8132_v36  ;;  %vm8147_vm3 = vcmp.eq.f32.partialorder %v8137_v35, inf  ;;  %v8150_v46 = vand.u32 2147483648, %v8137_v35  ;;  %v12659_v36 = vld [vmem:[%s16096_s25 + $0x20] sm:$0xff] }
0x3cf0   :  { %vm8149_vm4 = vcmp.eq.f32.partialorder %v8137_v35, 0.0 }
0x3cf1   :  { %14197 = vrsqrt.f32 %v8136_v41  ;;  %vm8140_vm9 = vcmp.eq.f32.partialorder %v8136_v41, inf  ;;  %v8143_v50 = vand.u32 2147483648, %v8136_v41  ;;  %vm8142_vm10 = vcmp.eq.f32.partialorder %v8136_v41, 0.0 }
0x3cfc   :  { %v14196_v25 = vpop.eup %14195 }
0x3cfd   :  { %v8146_v1 = vmul.f32 %v14196_v25, %v8137_v35 }
0x3cfe   :  { %v14198_v24 = vpop.eup %14197 }
0x3cff   :  { %v8148_v0 = vsel %vm8147_vm3, %v8137_v35, %v8146_v1  ;;  %v8139_v48 = vmul.f32 %v14198_v24, %v8136_v41  ;;  %v12660_v35 = vld [vmem:[%s16096_s25 + $0x28] sm:$0xff] }
0x3d00   :  { %v8151_v20 = vsel %vm8149_vm4, %v8150_v46, %v8148_v0 }
0x3d01   :  { %v8153_v2 = vadd.f32 1e-06, %v8151_v20  ;;  %v8141_v39 = vsel %vm8140_vm9, %v8136_v41, %v8139_v48 }
0x3d02   :  { %v8144_v51 = vsel %vm8142_vm10, %v8143_v50, %v8141_v39 }
0x3d03   :  { %14199 = vrcp.f32 %v8153_v2  ;;  %v8152_v42 = vadd.f32 1e-06, %v8144_v51 }
0x3d05   :  { %14201 = vrcp.f32 %v8152_v42 }
0x3d10   :  { %v14200_v33 = vpop.eup %14199 }
0x3d11   :  { %v8163_v40 = vmul.f32 %v14200_v33, %v8161_v56 }
0x3d12   :  { %v14202_v58 = vpop.eup %14201 }
0x3d13   :  { %v8162_v54 = vmul.f32 %v14202_v58, %v8160_v37  ;;  %v8169_v60 = vadd.f32 %v12650_v5, %v8163_v40  ;;  %v12657_v37 = vld [vmem:[%s16097_s29 + $0x1] ss:$0 sm:$0xff] }
0x3d15   :  { %v8168_v59 = vadd.f32 %v12650_v5, %v8162_v54 }
0x3d17   :  { %13672 = vmatprep.mubr.msk.f32.mxu0 %vm183_vm0, %v8168_v59 }
0x3d18   :  { %13673 = vmatmul.mubr.msk.f32.vlgmr.msra.gmra.mxu0 %vm183_vm0, %v8169_v60  ;;  %v12658_v60 = vld [vmem:[%s16098_s3 + $0x1] ss:$0 sm:$0xff] }
0x3d19   :  { %13695 = vmatpush3.msra.mxu0 %v12662_v32 }
0x3d1a   :  { %13696 = vmatprep.subr.mxu0 %v12661_v34 }
0x3d1b   :  { %13697 = vmatpush3.msra.mxu0 %v12661_v34 }
0x3d1c   :  { %13698 = vmatprep.subr.mxu0 %v12660_v35 }
0x3d1d   :  { %13699 = vmatpush3.msra.mxu0 %v12660_v35 }
0x3d1e   :  { %13700 = vmatprep.subr.mxu0 %v12659_v36 }
0x3d1f   :  { %13701 = vmatpush3.msra.mxu0 %v12659_v36 }
0x3d20   :  { %13705 = vmatprep.subr.mxu0 %v14359_v44 }
0x3dd8   :  { %v13674_v63 = vpop.f32.mrf.mxu0 }
0x3dd9   :  { %v8266_v6 = vadd.f32 %v13674_v63, %v12651_v4 }
0x3dda   :  { %v8260_v7 = vpop.f32.mrf.mxu0 }
0x3ddb   :  { %v8261_v12 = vadd.f32 %v12651_v4, %v8260_v7  ;;  %v8270_v49 = vmax.f32 %v8266_v6, 0.0 }
0x3ddd   :  { %v8269_v29 = vmax.f32 %v8261_v12, 0.0 }
0x3ddf   :  { %13691 = vmatprep.mubr.msk.f32.mxu1 %vm2164_vm13, %v8269_v29 }
0x3de0   :  { %13692 = vmatmul.mubr.msk.f32.vlgmr.msra.gmra.mxu1 %vm2164_vm13, %v8270_v49 }
0x3de1   :  { %13712 = vmatprep.mubr.msk.f32.mxu1 %vm14360_vm5, %v14359_v44 }
0x3ea0   :  { %v13693_v10 = vpop.f32.mrf.mxu1 }
0x3ea1   :  { %v8353_v11 = vadd.f32 %v13693_v10, %v12654_v15 }
0x3ea2   :  { %v8347_v38 = vpop.f32.mrf.mxu1 }
0x3ea3   :  { %v15591_v17 = vadd.f32 %v8353_v11, %v15554_v8  ;;  %v8348_v43 = vadd.f32 %v12654_v15, %v8347_v38 }
0x3ea5   :  { %v15594_v3 = vadd.f32 %v8348_v43, %v15557_v22  ;;  %v8363_v19 = vsel %vm183_vm0, %v15591_v17, 0.0 }
0x3ea6   :  { %8364 = vadd.xlane.f32.xlu0 %v8363_v19 }
0x3ea7   :  { %v8360_v23 = vsel %vm183_vm0, %v15594_v3, 0.0 }
0x3ea8   :  { %8361 = vadd.xlane.f32.xlu1 %v8360_v23 }
0x3f2f   :  { %v8365_v9 = vpop.xlane.xlu0 %8364 }
0x3f30   :  { %v8367_v13 = vmul.f32 0.03125, %v8365_v9 }
0x3f31   :  { %v8362_v26 = vpop.xlane.xlu1 %8361 }
0x3f32   :  { %v8369_v8 = vsub.f32 %v15591_v17, %v8367_v13  ;;  %v8366_v21 = vmul.f32 0.03125, %v8362_v26 }
0x3f34   :  { %v8368_v22 = vsub.f32 %v15594_v3, %v8366_v21  ;;  %v8371_v45 = vmul.f32 %v8369_v8, %v8369_v8  ;;  %v8403_v40 = vmul.f32 %v12657_v37, %v8369_v8 }
0x3f36   :  { %v8375_v27 = vsel %vm183_vm0, %v8371_v45, 0.0  ;;  %v8370_v28 = vmul.f32 %v8368_v22, %v8368_v22  ;;  %v8402_v5 = vmul.f32 %v12657_v37, %v8368_v22 }
0x3f37   :  { %8376 = vadd.xlane.f32.xlu0 %v8375_v27 }
0x3f38   :  { %v8372_v31 = vsel %vm183_vm0, %v8370_v28, 0.0 }
0x3f39   :  { %8373 = vadd.xlane.f32.xlu1 %v8372_v31 }
0x3fc0   :  { %v8377_v41 = vpop.xlane.xlu0 %8376 }
0x3fc1   :  { %v8379_v25 = vmul.f32 0.032258064, %v8377_v41 }
0x3fc2   :  { %v8374_v1 = vpop.xlane.xlu1 %8373 }
0x3fc3   :  { %14203 = vrsqrt.f32 %v8379_v25  ;;  %v8378_v46 = vmul.f32 0.032258064, %v8374_v1  ;;  %vm8389_vm11 = vcmp.eq.f32.partialorder %v8379_v25, inf  ;;  %v8392_v20 = vand.u32 2147483648, %v8379_v25 }
0x3fc4   :  { %vm8391_vm12 = vcmp.eq.f32.partialorder %v8379_v25, 0.0 }
0x3fc5   :  { %14205 = vrsqrt.f32 %v8378_v46  ;;  %vm8382_vm14 = vcmp.eq.f32.partialorder %v8378_v46, inf  ;;  %v8385_v42 = vand.u32 2147483648, %v8378_v46  ;;  %vm8384_vm15 = vcmp.eq.f32.partialorder %v8378_v46, 0.0 }
0x3fd0   :  { %v14204_v24 = vpop.eup %14203 }
0x3fd1   :  { %v8388_v0 = vmul.f32 %v14204_v24, %v8379_v25 }
0x3fd2   :  { %v14206_v48 = vpop.eup %14205 }
0x3fd3   :  { %v8390_v2 = vsel %vm8389_vm11, %v8379_v25, %v8388_v0  ;;  %v8381_v39 = vmul.f32 %v14206_v48, %v8378_v46 }
0x3fd4   :  { %v8393_v50 = vsel %vm8391_vm12, %v8392_v20, %v8390_v2 }
0x3fd5   :  { %v8395_v51 = vadd.f32 1e-06, %v8393_v50  ;;  %v8383_v30 = vsel %vm8382_vm14, %v8378_v46, %v8381_v39  ;;  %v12663_v50 = vld [vmem:[%s16101_s19 + $0x20] sm:$0xff] }
0x3fd6   :  { %v8386_v33 = vsel %vm8384_vm15, %v8385_v42, %v8383_v30 }
0x3fd7   :  { %14207 = vrcp.f32 %v8395_v51  ;;  %v8394_v56 = vadd.f32 1e-06, %v8386_v33 }
0x3fd9   :  { %14209 = vrcp.f32 %v8394_v56 }
0x3fe4   :  { %v14208_v58 = vpop.eup %14207 }
0x3fe5   :  { %v8405_v59 = vmul.f32 %v14208_v58, %v8403_v40 }
0x3fe6   :  { %v14210_v54 = vpop.eup %14209 }
0x3fe7   :  { %v8404_v61 = vmul.f32 %v14210_v54, %v8402_v5  ;;  %v8411_v55 = vadd.f32 %v12658_v60, %v8405_v59 }
0x3fe9   :  { %v8410_v62 = vadd.f32 %v12658_v60, %v8404_v61 }
0x3feb   :  { %13702 = vmatprep.mubr.msk.f32.mxu0 %vm183_vm0, %v8410_v62 }
0x3fec   :  { %13703 = vmatmul.mubr.msk.f32.vlgmr.msra.gmra.mxu0 %vm183_vm0, %v8411_v55 }
0x3fed   :  { %13707 = vmatprep.mubr.msk.f32.mxu0 %vm14360_vm5, %v14359_v44 }
0x40ac   :  { %v13704_v4 = vpop.f32.mrf.mxu0 }
0x40ad   :  { %v15616_v63 = vadd.f32 %v13704_v4, %v12667_v57 }
0x40ae   :  { %v8500_v6 = vpop.f32.mrf.mxu0 }
0x40af   :  { %v15618_v7 = vadd.f32 %v12667_v57, %v8500_v6  ;;  %8591 = vrot.lane.b32.xlu0 %v15616_v63, %s14361_s0 }
0x40b1   :  { %8514 = vrot.lane.b32.xlu1 %v15618_v7, %s14361_s0 }
0x4121   :  { %v8592_v12 = vpop.permute.xlu0 %8591 }
0x4122   :  { %13711 = vmatpush3.xpose.msk.msra.mxu1 %vm339_vm6, %v8592_v12 }
0x4123   :  { %v8515_v29 = vpop.permute.xlu1 %8514  ;;  %13720 = vmatprep.subr.mxu1 %v14359_v44 }
0x4124   :  { %13706 = vmatpush3.xpose.msk.msra.mxu0 %vm339_vm6, %v8515_v29 }
0x4125   :  { %13713 = vmatmul.mubr.msk.f32.vlgmr.msra.gmra.mxu1 %vm339_vm6, %v15616_v63  ;;  %13715 = vmatprep.subr.mxu0 %v14359_v44 }
0x4126   :  { %13722 = vmatprep.mubr.msk.f32.mxu1 %vm14360_vm5, %v14359_v44 }
0x4127   :  { %13708 = vmatmul.mubr.msk.f32.vlgmr.msra.gmra.mxu0 %vm339_vm6, %v15618_v7 }
0x4128   :  { %13717 = vmatprep.mubr.msk.f32.mxu0 %vm14360_vm5, %v14359_v44 }
0x41e5   :  { %v8663_v49 = vpop.f32.mrf.mxu1 }
0x41e6   :  { %v8668_v15 = vmul.f32 0.35355338, %v8663_v49 }
0x41e7   :  { %v8586_v10 = vpop.f32.mrf.mxu0  ;;  %v13714_v11 = vpop.f32.mrf.mxu1 }
0x41e8   :  { %v8670_v38 = vsel %vm178_vm1, %v8668_v15, -1e+09  ;;  %v8667_v43 = vmul.f32 0.35355338, %v8586_v10 }
0x41e9   :  { %v13709_v19 = vpop.f32.mrf.mxu0  ;;  %v8674_v23 = vsel %vm339_vm6, %v8670_v38, -inf }
0x41ea   :  { %v8669_v9 = vsel %vm177_vm2, %v8667_v43, -1e+09  ;;  %8675 = vmax.xlane.f32.xlu0 %v8674_v23 }
0x41eb   :  { %v8671_v13 = vsel %vm339_vm6, %v8669_v9, -inf }
0x41ec   :  { %8672 = vmax.xlane.f32.xlu1 %v8671_v13 }
0x4273   :  { %v8676_v26 = vpop.xlane.xlu0 %8675 }
0x4274   :  { %v8678_v8 = vsub.f32 %v8670_v38, %v8676_v26  ;;  %v12664_v26 = vld [vmem:[%s16101_s19 + $0x28] sm:$0xff] }
0x4275   :  { %v8673_v21 = vpop.xlane.xlu1 %8672 }
0x4276   :  { %v8681_v22 = vmul.f32 1.442695, %v8678_v8  ;;  %v8677_v45 = vsub.f32 %v8669_v9, %v8673_v21 }
0x4278   :  { %14211 = vpow2.f32 %v8681_v22  ;;  %v8679_v27 = vmul.f32 1.442695, %v8677_v45 }
0x427a   :  { %14213 = vpow2.f32 %v8679_v27 }
0x4285   :  { %v14212_v28 = vpop.eup %14211 }
0x4286   :  { %v8686_v31 = vsel %vm339_vm6, %v14212_v28, 0.0 }
0x4287   :  { %v14214_v32 = vpop.eup %14213  ;;  %8687 = vadd.xlane.f32.xlu0 %v8686_v31 }
0x4288   :  { %v8683_v34 = vsel %vm339_vm6, %v14214_v32, 0.0 }
0x4289   :  { %8684 = vadd.xlane.f32.xlu1 %v8683_v34 }
0x429a   :  { %8693 = vrot.lane.b32.xlu1 %v15618_v7, %s14362_s5 }
0x429d   :  { %8769 = vrot.lane.b32.xlu0 %v15616_v63, %s14362_s5  ;;  %s16116_s5 = smov 40  }
0x429e   :  { %8930 = vrot.lane.b32.xlu1 %v15618_v7, %s14363_s13 }
0x42a1   :  { %9006 = vrot.lane.b32.xlu0 %v15616_v63, %s14364_s15 }
0x42a2   :  { %9008 = vrot.lane.b32.xlu1 %v15616_v63, %s14363_s13 }
0x42a6   :  { %8928 = vrot.lane.b32.xlu1 %v15618_v7, %s14364_s15 }
0x4310   :  { %v8688_v35 = vpop.xlane.xlu0 %8687 }
0x4311   :  { %14215 = vrcp.f32 %v8688_v35 }
0x4312   :  { %v8685_v36 = vpop.xlane.xlu1 %8684 }
0x4313   :  { %14217 = vrcp.f32 %v8685_v36 }
0x4314   :  { %v8770_v41 = vpop.permute.xlu0 %8769 }
0x4315   :  { %13721 = vmatpush3.msra.mxu1 %v8770_v41 }
0x4316   :  { %v8694_v25 = vpop.permute.xlu1 %8693  ;;  %13730 = vmatprep.subr.mxu1 %v14359_v44 }
0x4317   :  { %13716 = vmatpush3.msra.mxu0 %v8694_v25 }
0x4318   :  { %13725 = vmatprep.subr.mxu0 %v12663_v50  ;;  %v9007_v58 = vpop.permute.xlu0 %9006 }
0x431a   :  { %v8931_v1 = vpop.permute.xlu1 %8930 }
0x431e   :  { %v14216_v46 = vpop.eup %14215  ;;  %v9009_v24 = vpop.permute.xlu1 %9008 }
0x431f   :  { %v8692_v0 = vmul.f32 %v14216_v46, %v14212_v28 }
0x4320   :  { %v14218_v20 = vpop.eup %14217 }
0x4321   :  { %13723 = vmatmul.mubr.msk.f32.vlgmr.msra.gmra.mxu1 %vm339_vm6, %v8692_v0  ;;  %v8691_v48 = vmul.f32 %v14218_v20, %v14214_v32 }
0x4322   :  { %13731 = vmatpush3.xpose.msk.msra.mxu1 %vm339_vm6, %v8931_v1  ;;  %13732 = vmatprep.mubr.msk.f32.mxu1 %vm14360_vm5, %v14359_v44  ;;  %v8929_v2 = vpop.permute.xlu1 %8928 }
0x4323   :  { %13718 = vmatmul.mubr.msk.f32.vlgmr.msra.gmra.mxu0 %vm339_vm6, %v8691_v48  ;;  %13740 = vmatprep.subr.mxu1 %v14359_v44 }
0x4324   :  { %13726 = vmatpush3.msra.mxu0 %v12663_v50 }
0x4325   :  { %13733 = vmatmul.mubr.msk.f32.vlgmr.msra.gmra.mxu1 %vm339_vm6, %v8929_v2  ;;  %13735 = vmatprep.subr.mxu0 %v14359_v44 }
0x4326   :  { %13742 = vmatprep.mubr.msk.f32.mxu1 %vm14360_vm5, %v14359_v44 }
0x43e1   :  { %v8841_v39 = vpop.f32.mrf.mxu1 }
0x43e3   :  { %v8765_v51 = vpop.f32.mrf.mxu0  ;;  %v13724_v42 = vpop.f32.mrf.mxu1 }
0x43e4   :  { %13727 = vmatprep.mubr.msk.f32.mxu0 %vm339_vm6, %v8765_v51 }
0x43e5   :  { %v13719_v30 = vpop.f32.mrf.mxu0  ;;  %13728 = vmatmul.mubr.msk.f32.vlgmr.msra.gmra.mxu0 %vm339_vm6, %v8841_v39  ;;  %v9002_v33 = vpop.f32.mrf.mxu1  ;;  %v12670_v39 = vld [vmem:[%s16102_s24 + $0x1] ss:$0 sm:$0xff] }
0x43e6   :  { %v9084_v56 = vmul.f32 0.35355338, %v9002_v33  ;;  %13736 = vmatpush3.xpose.msk.msra.mxu0 %vm339_vm6, %v9009_v24  ;;  %13737 = vmatprep.mubr.msk.f32.mxu0 %vm14360_vm5, %v14359_v44 }
0x43e7   :  { %v13734_v37 = vpop.f32.mrf.mxu1  ;;  %13745 = vmatprep.subr.mxu0 %v14359_v44 }
0x43e8   :  { %v9086_v40 = vsel %vm177_vm2, %v9084_v56, -1e+09 }
0x43e9   :  { %13738 = vmatmul.mubr.msk.f32.vlgmr.msra.gmra.mxu0 %vm339_vm6, %v9007_v58  ;;  %v9088_v5 = vsel %vm339_vm6, %v9086_v40, -inf }
0x43ea   :  { %9089 = vmax.xlane.f32.xlu1 %v9088_v5  ;;  %13747 = vmatprep.mubr.msk.f32.mxu0 %vm14360_vm5, %v14359_v44 }
0x43fb   :  { %9110 = vrot.lane.b32.xlu1 %v15618_v7, %s14365_s16 }
0x43ff   :  { %9347 = vrot.lane.b32.xlu1 %v15618_v7, %s14366_s18 }
0x4403   :  { %9425 = vrot.lane.b32.xlu1 %v15616_v63, %s14366_s18 }
0x4407   :  { %9345 = vrot.lane.b32.xlu1 %v15618_v7, %s14367_s22 }
0x4473   :  { %v9090_v54 = vpop.xlane.xlu1 %9089 }
0x4474   :  { %v9094_v60 = vsub.f32 %v9086_v40, %v9090_v54 }
0x4476   :  { %v9096_v61 = vmul.f32 1.442695, %v9094_v60 }
0x4477   :  { %v9111_v59 = vpop.permute.xlu1 %9110 }
0x4478   :  { %13741 = vmatpush3.msra.mxu1 %v9111_v59  ;;  %14219 = vpow2.f32 %v9096_v61 }
0x4479   :  { %13750 = vmatprep.subr.mxu1 %v12664_v26 }
0x447b   :  { %v9348_v22 = vpop.permute.xlu1 %9347 }
0x447f   :  { %v9426_v27 = vpop.permute.xlu1 %9425 }
0x4483   :  { %v9346_v31 = vpop.permute.xlu1 %9345 }
0x4485   :  { %v14220_v49 = vpop.eup %14219 }
0x4486   :  { %v9100_v15 = vsel %vm339_vm6, %v14220_v49, 0.0 }
0x44a5   :  { %v15688_v62 = vpop.f32.mrf.mxu0 }
0x44a6   :  { %v8927_v51 = vadd.f32 %v15688_v62, %v12670_v39 }
0x44a7   :  { %v15690_v55 = vpop.f32.mrf.mxu0 }
0x44a8   :  { %v8926_v30 = vadd.f32 %v12670_v39, %v15690_v55 }
0x44a9   :  { %v9080_v57 = vpop.f32.mrf.mxu0 }
0x44aa   :  { %v9085_v4 = vmul.f32 0.35355338, %v9080_v57 }
0x44ab   :  { %v13739_v6 = vpop.f32.mrf.mxu0 }
0x44ac   :  { %v9087_v12 = vsel %vm178_vm1, %v9085_v4, -1e+09 }
0x44ad   :  { %v9091_v29 = vsel %vm339_vm6, %v9087_v12, -inf }
0x44ae   :  { %9092 = vmax.xlane.f32.xlu0 %v9091_v29 }
0x44b2   :  { %9101 = vadd.xlane.f32.xlu0 %v9100_v15  ;;  %v12665_v15 = vld [vmem:[%s16101_s19 + $0x30] sm:$0xff] }
0x4537   :  { %v9093_v10 = vpop.xlane.xlu0 %9092 }
0x4538   :  { %v9095_v11 = vsub.f32 %v9087_v12, %v9093_v10 }
0x453a   :  { %v9098_v38 = vmul.f32 1.442695, %v9095_v11 }
0x453b   :  { %v9102_v43 = vpop.xlane.xlu0 %9101 }
0x453c   :  { %14221 = vpow2.f32 %v9098_v38 }
0x453d   :  { %14223 = vrcp.f32 %v9102_v43 }
0x4549   :  { %v14222_v19 = vpop.eup %14221 }
0x454a   :  { %v14224_v23 = vpop.eup %14223  ;;  %v9103_v9 = vsel %vm339_vm6, %v14222_v19, 0.0 }
0x454b   :  { %9104 = vadd.xlane.f32.xlu0 %v9103_v9  ;;  %v9108_v13 = vmul.f32 %v14224_v23, %v14220_v49 }
0x454d   :  { %13743 = vmatmul.mubr.msk.f32.vlgmr.msra.gmra.mxu1 %vm339_vm6, %v9108_v13 }
0x454e   :  { %13751 = vmatpush3.msra.mxu1 %v12664_v26 }
0x454f   :  { %13760 = vmatprep.subr.mxu1 %v14359_v44 }
0x4561   :  { %9186 = vrot.lane.b32.xlu0 %v15616_v63, %s14365_s16 }
0x4565   :  { %9423 = vrot.lane.b32.xlu0 %v15616_v63, %s14367_s22 }
0x45d4   :  { %v9105_v8 = vpop.xlane.xlu0 %9104 }
0x45d5   :  { %14225 = vrcp.f32 %v9105_v8 }
0x45d8   :  { %v9187_v21 = vpop.permute.xlu0 %9186 }
0x45d9   :  { %13746 = vmatpush3.msra.mxu0 %v9187_v21 }
0x45da   :  { %13755 = vmatprep.subr.mxu0 %v14359_v44 }
0x45dc   :  { %v9424_v41 = vpop.permute.xlu0 %9423 }
0x45e2   :  { %v14226_v45 = vpop.eup %14225 }
0x45e3   :  { %v9109_v28 = vmul.f32 %v14226_v45, %v14222_v19 }
0x45e5   :  { %13748 = vmatmul.mubr.msk.f32.vlgmr.msra.gmra.mxu0 %vm339_vm6, %v9109_v28 }
0x45e6   :  { %13756 = vmatpush3.xpose.msk.msra.mxu0 %vm339_vm6, %v9348_v22  ;;  %13757 = vmatprep.mubr.msk.f32.mxu0 %vm14360_vm5, %v14359_v44 }
0x45e7   :  { %13765 = vmatprep.subr.mxu0 %v14359_v44 }
0x45e9   :  { %13758 = vmatmul.mubr.msk.f32.vlgmr.msra.gmra.mxu0 %vm339_vm6, %v9346_v31 }
0x45ea   :  { %13767 = vmatprep.mubr.msk.f32.mxu0 %vm14360_vm5, %v14359_v44 }
0x460d   :  { %v9182_v32 = vpop.f32.mrf.mxu1 }
0x460e   :  { %13752 = vmatprep.mubr.msk.f32.mxu1 %vm339_vm6, %v9182_v32 }
0x460f   :  { %v13744_v34 = vpop.f32.mrf.mxu1 }
0x46a5   :  { %v9258_v35 = vpop.f32.mrf.mxu0 }
0x46a6   :  { %13753 = vmatmul.mubr.msk.f32.vlgmr.msra.gmra.mxu1 %vm339_vm6, %v9258_v35 }
0x46a7   :  { %13761 = vmatpush3.xpose.msk.msra.mxu1 %vm339_vm6, %v9426_v27  ;;  %v13749_v36 = vpop.f32.mrf.mxu0  ;;  %13762 = vmatprep.mubr.msk.f32.mxu1 %vm14360_vm5, %v14359_v44 }
0x46a8   :  { %13770 = vmatprep.subr.mxu1 %v14359_v44 }
0x46a9   :  { %v9419_v25 = vpop.f32.mrf.mxu0 }
0x46aa   :  { %v9501_v1 = vmul.f32 0.35355338, %v9419_v25  ;;  %13763 = vmatmul.mubr.msk.f32.vlgmr.msra.gmra.mxu1 %vm339_vm6, %v9424_v41 }
0x46ab   :  { %v13759_v46 = vpop.f32.mrf.mxu0  ;;  %13772 = vmatprep.mubr.msk.f32.mxu1 %vm14360_vm5, %v14359_v44 }
0x46ac   :  { %v9503_v24 = vsel %vm177_vm2, %v9501_v1, -1e+09 }
0x46ad   :  { %v9505_v0 = vsel %vm339_vm6, %v9503_v24, -inf }
0x46ae   :  { %9506 = vmax.xlane.f32.xlu1 %v9505_v0 }
0x46bf   :  { %9527 = vrot.lane.b32.xlu1 %v15618_v7, %s14368_s23 }
0x46c3   :  { %9764 = vrot.lane.b32.xlu1 %v15618_v7, %s14369_s26 }
0x46c7   :  { %9842 = vrot.lane.b32.xlu1 %v15616_v63, %s14369_s26 }
0x46cb   :  { %9762 = vrot.lane.b32.xlu1 %v15618_v7, %s14370_s28 }
0x4737   :  { %v9507_v20 = vpop.xlane.xlu1 %9506 }
0x4738   :  { %v9511_v2 = vsub.f32 %v9503_v24, %v9507_v20 }
0x473a   :  { %v9513_v50 = vmul.f32 1.442695, %v9511_v2 }
0x473b   :  { %v9528_v48 = vpop.permute.xlu1 %9527 }
0x473c   :  { %13766 = vmatpush3.msra.mxu0 %v9528_v48  ;;  %14227 = vpow2.f32 %v9513_v50 }
0x473d   :  { %13775 = vmatprep.subr.mxu0 %v12665_v15 }
0x473f   :  { %v9765_v38 = vpop.permute.xlu1 %9764 }
0x4743   :  { %v9843_v19 = vpop.permute.xlu1 %9842 }
0x4747   :  { %v9763_v9 = vpop.permute.xlu1 %9762 }
0x4749   :  { %v14228_v60 = vpop.eup %14227 }
0x474a   :  { %v9517_v61 = vsel %vm339_vm6, %v14228_v60, 0.0 }
0x4766   :  { %v13754_v42 = vpop.f32.mrf.mxu1 }
0x4767   :  { %v15736_v33 = vadd.f32 %v13754_v42, %v8927_v51 }
0x4768   :  { %v9334_v56 = vpop.f32.mrf.mxu1 }
0x4769   :  { %v15738_v37 = vadd.f32 %v9334_v56, %v8926_v30 }
0x476a   :  { %v9497_v58 = vpop.f32.mrf.mxu1 }
0x476b   :  { %v9502_v40 = vmul.f32 0.35355338, %v9497_v58  ;;  %v12666_v58 = vld [vmem:[%s16101_s19 + $0x38] sm:$0xff] }
0x476c   :  { %v13764_v5 = vpop.f32.mrf.mxu1 }
0x476d   :  { %v9504_v54 = vsel %vm178_vm1, %v9502_v40, -1e+09 }
0x476e   :  { %v9508_v59 = vsel %vm339_vm6, %v9504_v54, -inf }
0x476f   :  { %9509 = vmax.xlane.f32.xlu0 %v9508_v59 }
0x4773   :  { %9518 = vadd.xlane.f32.xlu0 %v9517_v61 }
0x47f8   :  { %v9510_v62 = vpop.xlane.xlu0 %9509 }
0x47f9   :  { %v9512_v55 = vsub.f32 %v9504_v54, %v9510_v62 }
0x47fb   :  { %v9515_v57 = vmul.f32 1.442695, %v9512_v55 }
0x47fc   :  { %v9519_v4 = vpop.xlane.xlu0 %9518 }
0x47fd   :  { %14229 = vpow2.f32 %v9515_v57 }
0x47fe   :  { %14231 = vrcp.f32 %v9519_v4 }
0x480a   :  { %v14230_v6 = vpop.eup %14229 }
0x480b   :  { %v14232_v12 = vpop.eup %14231  ;;  %v9520_v29 = vsel %vm339_vm6, %v14230_v6, 0.0 }
0x480c   :  { %9521 = vadd.xlane.f32.xlu0 %v9520_v29  ;;  %v9525_v49 = vmul.f32 %v14232_v12, %v14228_v60 }
0x480e   :  { %13768 = vmatmul.mubr.msk.f32.vlgmr.msra.gmra.mxu0 %vm339_vm6, %v9525_v49 }
0x480f   :  { %13776 = vmatpush3.msra.mxu0 %v12665_v15 }
0x4810   :  { %13785 = vmatprep.subr.mxu0 %v14359_v44 }
0x4822   :  { %9603 = vrot.lane.b32.xlu0 %v15616_v63, %s14368_s23 }
0x4826   :  { %9840 = vrot.lane.b32.xlu0 %v15616_v63, %s14370_s28 }
0x4895   :  { %v9522_v10 = vpop.xlane.xlu0 %9521 }
0x4896   :  { %14233 = vrcp.f32 %v9522_v10  ;;  %v12707_v10 = vld [vmem:[%s16103_s30 + $0x30] sm:$0xff] }
0x4899   :  { %v9604_v11 = vpop.permute.xlu0 %9603 }
0x489a   :  { %13771 = vmatpush3.msra.mxu1 %v9604_v11  ;;  %v12705_v11 = vld [vmem:[%s16103_s30 + $0x20] sm:$0xff] }
0x489b   :  { %13780 = vmatprep.subr.mxu1 %v14359_v44 }
0x489d   :  { %v9841_v22 = vpop.permute.xlu0 %9840 }
0x48a3   :  { %v14234_v43 = vpop.eup %14233 }
0x48a4   :  { %v9526_v23 = vmul.f32 %v14234_v43, %v14230_v6 }
0x48a6   :  { %13773 = vmatmul.mubr.msk.f32.vlgmr.msra.gmra.mxu1 %vm339_vm6, %v9526_v23 }
0x48a7   :  { %13781 = vmatpush3.xpose.msk.msra.mxu1 %vm339_vm6, %v9765_v38  ;;  %13782 = vmatprep.mubr.msk.f32.mxu1 %vm14360_vm5, %v14359_v44 }
0x48a8   :  { %13790 = vmatprep.subr.mxu1 %v14359_v44 }
0x48aa   :  { %13783 = vmatmul.mubr.msk.f32.vlgmr.msra.gmra.mxu1 %vm339_vm6, %v9763_v9 }
0x48ab   :  { %13792 = vmatprep.mubr.msk.f32.mxu1 %vm14360_vm5, %v14359_v44 }
0x48ce   :  { %v9599_v13 = vpop.f32.mrf.mxu0 }
0x48cf   :  { %13777 = vmatprep.mubr.msk.f32.mxu0 %vm339_vm6, %v9599_v13 }
0x48d0   :  { %v13769_v26 = vpop.f32.mrf.mxu0 }
0x4966   :  { %v9675_v8 = vpop.f32.mrf.mxu1 }
0x4967   :  { %13778 = vmatmul.mubr.msk.f32.vlgmr.msra.gmra.mxu0 %vm339_vm6, %v9675_v8 }
0x4968   :  { %13786 = vmatpush3.xpose.msk.msra.mxu0 %vm339_vm6, %v9843_v19  ;;  %v13774_v21 = vpop.f32.mrf.mxu1  ;;  %13787 = vmatprep.mubr.msk.f32.mxu0 %vm14360_vm5, %v14359_v44 }
0x4969   :  { %13795 = vmatprep.subr.mxu0 %v14359_v44 }
0x496a   :  { %v9836_v45 = vpop.f32.mrf.mxu1 }
0x496b   :  { %v9918_v27 = vmul.f32 0.35355338, %v9836_v45  ;;  %13788 = vmatmul.mubr.msk.f32.vlgmr.msra.gmra.mxu0 %vm339_vm6, %v9841_v22  ;;  %v15815_v22 = vld [vmem:[%s16106_s20 + $0x1] ss:$0 sm:$0xff] }
0x496c   :  { %v13784_v28 = vpop.f32.mrf.mxu1  ;;  %13797 = vmatprep.mubr.msk.f32.mxu0 %vm14360_vm5, %v14359_v44 }
0x496d   :  { %v9920_v31 = vsel %vm177_vm2, %v9918_v27, -1e+09 }
0x496e   :  { %v9922_v32 = vsel %vm339_vm6, %v9920_v31, -inf }
0x496f   :  { %9923 = vmax.xlane.f32.xlu1 %v9922_v32 }
0x4980   :  { %9944 = vrot.lane.b32.xlu1 %v15618_v7, %s16116_s5 }
0x49f8   :  { %v9924_v34 = vpop.xlane.xlu1 %9923 }
0x49f9   :  { %v9928_v36 = vsub.f32 %v9920_v31, %v9924_v34 }
0x49fb   :  { %v9930_v41 = vmul.f32 1.442695, %v9928_v36 }
0x49fc   :  { %v9945_v35 = vpop.permute.xlu1 %9944 }
0x49fd   :  { %13791 = vmatpush3.msra.mxu1 %v9945_v35  ;;  %14235 = vpow2.f32 %v9930_v41 }
0x49fe   :  { %13800 = vmatprep.subr.mxu1 %v12666_v58 }
0x4a0a   :  { %v14236_v2 = vpop.eup %14235 }
0x4a0b   :  { %v9934_v50 = vsel %vm339_vm6, %v14236_v2, 0.0 }
0x4a27   :  { %v13779_v25 = vpop.f32.mrf.mxu0 }
0x4a28   :  { %v9761_v1 = vadd.f32 %v13779_v25, %v15736_v33 }
0x4a29   :  { %v9751_v46 = vpop.f32.mrf.mxu0 }
0x4a2a   :  { %v9760_v24 = vadd.f32 %v9751_v46, %v15738_v37 }
0x4a2b   :  { %v9914_v16 = vpop.f32.mrf.mxu0 }
0x4a2c   :  { %v9919_v0 = vmul.f32 0.35355338, %v9914_v16 }
0x4a2d   :  { %v13789_v20 = vpop.f32.mrf.mxu0 }
0x4a2e   :  { %v9921_v48 = vsel %vm178_vm1, %v9919_v0, -1e+09 }
0x4a2f   :  { %v9925_v7 = vsel %vm339_vm6, %v9921_v48, -inf }
0x4a30   :  { %9926 = vmax.xlane.f32.xlu0 %v9925_v7 }
0x4a34   :  { %9935 = vadd.xlane.f32.xlu0 %v9934_v50  ;;  %v12703_v50 = vld [vmem:[%s16107_s2 + $0x1] ss:$0 sm:$0xff] }
0x4ab9   :  { %v9927_v39 = vpop.xlane.xlu0 %9926 }
0x4aba   :  { %v9929_v51 = vsub.f32 %v9921_v48, %v9927_v39 }
0x4abc   :  { %v9932_v42 = vmul.f32 1.442695, %v9929_v51 }
0x4abd   :  { %v9936_v30 = vpop.xlane.xlu0 %9935 }
0x4abe   :  { %14237 = vpow2.f32 %v9932_v42 }
0x4abf   :  { %14239 = vrcp.f32 %v9936_v30 }
0x4acb   :  { %v14238_v33 = vpop.eup %14237 }
0x4acc   :  { %v14240_v56 = vpop.eup %14239  ;;  %v9937_v37 = vsel %vm339_vm6, %v14238_v33, 0.0 }
0x4acd   :  { %9938 = vadd.xlane.f32.xlu0 %v9937_v37  ;;  %v9942_v14 = vmul.f32 %v14240_v56, %v14236_v2  ;;  %v12704_v56 = vld [vmem:[%s16108_s7 + $0x1] ss:$0 sm:$0xff] }
0x4acf   :  { %13793 = vmatmul.mubr.msk.f32.vlgmr.msra.gmra.mxu1 %vm339_vm6, %v9942_v14 }
0x4ad0   :  { %13801 = vmatpush3.msra.mxu1 %v12666_v58 }
0x4ae3   :  { %10020 = vrot.lane.b32.xlu0 %v15616_v63, %s16116_s5 }
0x4b56   :  { %v9939_v40 = vpop.xlane.xlu0 %9938 }
0x4b57   :  { %14241 = vrcp.f32 %v9939_v40 }
0x4b5a   :  { %v10021_v5 = vpop.permute.xlu0 %10020 }
0x4b5b   :  { %13796 = vmatpush3.msra.mxu0 %v10021_v5 }
0x4b64   :  { %v14242_v54 = vpop.eup %14241 }
0x4b65   :  { %v9943_v59 = vmul.f32 %v14242_v54, %v14238_v33 }
0x4b67   :  { %13798 = vmatmul.mubr.msk.f32.vlgmr.msra.gmra.mxu0 %vm339_vm6, %v9943_v59 }
0x4b8f   :  { %v10016_v60 = vpop.f32.mrf.mxu1 }
0x4b90   :  { %13802 = vmatprep.mubr.msk.f32.mxu1 %vm339_vm6, %v10016_v60 }
0x4b91   :  { %v13794_v61 = vpop.f32.mrf.mxu1 }
0x4c27   :  { %v10092_v62 = vpop.f32.mrf.mxu0 }
0x4c28   :  { %13803 = vmatmul.mubr.msk.f32.vlgmr.msra.gmra.mxu1 %vm339_vm6, %v10092_v62 }
0x4c29   :  { %v13799_v63 = vpop.f32.mrf.mxu0  ;;  %13824 = vmatprep.mubr.msk.f32.mxu1 %vm183_vm0, %v15354_v47  ;;  %v12708_v47 = vld [vmem:[%s16103_s30 + $0x38] sm:$0xff] }
0x4c2a   :  { %13805 = vmatprep.subr.mxu0 %v12708_v47 }
0x4c2b   :  { %13806 = vmatpush3.msra.mxu0 %v12708_v47 }
0x4c2c   :  { %13807 = vmatprep.subr.mxu0 %v12707_v10 }
0x4c2d   :  { %13808 = vmatpush3.msra.mxu0 %v12707_v10 }
0x4ce8   :  { %v13804_v55 = vpop.f32.mrf.mxu1 }
0x4ce9   :  { %v10178_v57 = vadd.f32 %v13804_v55, %v9761_v1 }
0x4cea   :  { %v10168_v4 = vpop.f32.mrf.mxu1 }
0x4ceb   :  { %v15792_v6 = vadd.f32 %v10178_v57, %v15591_v17  ;;  %v10177_v12 = vadd.f32 %v10168_v4, %v9760_v24  ;;  %v12706_v17 = vld [vmem:[%s16103_s30 + $0x28] sm:$0xff] }
0x4cec   :  { %13809 = vmatprep.subr.mxu0 %v12706_v17 }
0x4ced   :  { %v15795_v29 = vadd.f32 %v10177_v12, %v15594_v3  ;;  %v10186_v49 = vsel %vm183_vm0, %v15792_v6, 0.0  ;;  %13810 = vmatpush3.msra.mxu0 %v12706_v17 }
0x4cee   :  { %10187 = vadd.xlane.f32.xlu0 %v10186_v49  ;;  %13811 = vmatprep.subr.mxu0 %v12705_v11 }
0x4cef   :  { %v10183_v15 = vsel %vm183_vm0, %v15795_v29, 0.0  ;;  %13812 = vmatpush3.msra.mxu0 %v12705_v11 }
0x4cf0   :  { %10184 = vadd.xlane.f32.xlu1 %v10183_v15  ;;  %13827 = vmatprep.subr.mxu0 %v14359_v44 }
0x4d77   :  { %v10188_v3 = vpop.xlane.xlu0 %10187 }
0x4d78   :  { %v10190_v38 = vmul.f32 0.03125, %v10188_v3 }
0x4d79   :  { %v10185_v43 = vpop.xlane.xlu1 %10184 }
0x4d7a   :  { %v10192_v19 = vsub.f32 %v15792_v6, %v10190_v38  ;;  %v10189_v23 = vmul.f32 0.03125, %v10185_v43 }
0x4d7c   :  { %v10191_v9 = vsub.f32 %v15795_v29, %v10189_v23  ;;  %v10194_v13 = vmul.f32 %v10192_v19, %v10192_v19  ;;  %v10226_v51 = vmul.f32 %v12703_v50, %v10192_v19 }
0x4d7e   :  { %v10198_v26 = vsel %vm183_vm0, %v10194_v13, 0.0  ;;  %v10193_v8 = vmul.f32 %v10191_v9, %v10191_v9  ;;  %v10225_v42 = vmul.f32 %v12703_v50, %v10191_v9 }
0x4d7f   :  { %10199 = vadd.xlane.f32.xlu0 %v10198_v26 }
0x4d80   :  { %v10195_v21 = vsel %vm183_vm0, %v10193_v8, 0.0 }
0x4d81   :  { %10196 = vadd.xlane.f32.xlu1 %v10195_v21 }
0x4d92   :  { %10342 = vrot.lane.b32.xlu1 %v12708_v47, %s14361_s0 }
0x4d95   :  { %10340 = vrot.lane.b32.xlu0 %v12707_v10, %s14361_s0 }
0x4d96   :  { %10338 = vrot.lane.b32.xlu1 %v12706_v17, %s14361_s0 }
0x4d9a   :  { %10336 = vrot.lane.b32.xlu1 %v12705_v11, %s14361_s0 }
0x4d9e   :  { %10349 = vrot.lane.b32.xlu1 %v15815_v22, %s14361_s0 }
0x4e08   :  { %v10200_v45 = vpop.xlane.xlu0 %10199 }
0x4e09   :  { %v10202_v27 = vmul.f32 0.032258064, %v10200_v45 }
0x4e0a   :  { %v10197_v28 = vpop.xlane.xlu1 %10196 }
0x4e0b   :  { %14243 = vrsqrt.f32 %v10202_v27  ;;  %v10201_v31 = vmul.f32 0.032258064, %v10197_v28  ;;  %vm10212_vm1 = vcmp.eq.f32.partialorder %v10202_v27, inf  ;;  %v10215_v1 = vand.u32 2147483648, %v10202_v27 }
0x4e0c   :  { %v10341_v34 = vpop.permute.xlu0 %10340  ;;  %vm10214_vm2 = vcmp.eq.f32.partialorder %v10202_v27, 0.0 }
0x4e0d   :  { %14245 = vrsqrt.f32 %v10201_v31  ;;  %vm10205_vm3 = vcmp.eq.f32.partialorder %v10201_v31, inf  ;;  %v10208_v48 = vand.u32 2147483648, %v10201_v31  ;;  %vm10207_vm4 = vcmp.eq.f32.partialorder %v10201_v31, 0.0 }
0x4e0e   :  { %v10343_v32 = vpop.permute.xlu1 %10342 }
0x4e0f   :  { %13816 = vmatprep.subr.mxu1 %v10343_v32 }
0x4e10   :  { %13817 = vmatpush3.msra.mxu1 %v10343_v32 }
0x4e11   :  { %13818 = vmatprep.subr.mxu1 %v10341_v34 }
0x4e12   :  { %v10339_v35 = vpop.permute.xlu1 %10338  ;;  %13819 = vmatpush3.msra.mxu1 %v10341_v34 }
0x4e13   :  { %13820 = vmatprep.subr.mxu1 %v10339_v35 }
0x4e14   :  { %13821 = vmatpush3.msra.mxu1 %v10339_v35 }
0x4e16   :  { %v10337_v36 = vpop.permute.xlu1 %10336 }
0x4e17   :  { %13822 = vmatprep.subr.mxu1 %v10337_v36 }
0x4e18   :  { %v14244_v41 = vpop.eup %14243  ;;  %13823 = vmatpush3.msra.mxu1 %v10337_v36 }
0x4e19   :  { %v10211_v25 = vmul.f32 %v14244_v41, %v10202_v27  ;;  %13825 = vmatmul.mubr.msk.f32.vlgmr.msra.gmra.mxu1 %vm183_vm0, %v15352_v18  ;;  %13832 = vmatprep.subr.mxu1 %v14359_v44 }
0x4e1a   :  { %13834 = vmatprep.mubr.msk.f32.mxu1 %vm14360_vm5, %v14359_v44  ;;  %v14246_v46 = vpop.eup %14245  ;;  %v10350_v40 = vpop.permute.xlu1 %10349 }
0x4e1b   :  { %v10213_v24 = vsel %vm10212_vm1, %v10202_v27, %v10211_v25  ;;  %v10204_v0 = vmul.f32 %v14246_v46, %v10201_v31 }
0x4e1c   :  { %v10216_v16 = vsel %vm10214_vm2, %v10215_v1, %v10213_v24  ;;  %v12709_v1 = vld [vmem:[%s16109_s10 + $0x20] sm:$0xff] }
0x4e1d   :  { %v10218_v20 = vadd.f32 1e-06, %v10216_v16  ;;  %v10206_v7 = vsel %vm10205_vm3, %v10201_v31, %v10204_v0 }
0x4e1e   :  { %v10209_v18 = vsel %vm10207_vm4, %v10208_v48, %v10206_v7 }
0x4e1f   :  { %14247 = vrcp.f32 %v10218_v20  ;;  %v10217_v2 = vadd.f32 1e-06, %v10209_v18 }
0x4e21   :  { %14249 = vrcp.f32 %v10217_v2 }
0x4e2c   :  { %v14248_v39 = vpop.eup %14247 }
0x4e2d   :  { %v10228_v33 = vmul.f32 %v14248_v39, %v10226_v51 }
0x4e2e   :  { %v14250_v30 = vpop.eup %14249 }
0x4e2f   :  { %v10227_v37 = vmul.f32 %v14250_v30, %v10225_v42  ;;  %v10234_v58 = vadd.f32 %v12704_v56, %v10228_v33 }
0x4e31   :  { %v10233_v14 = vadd.f32 %v12704_v56, %v10227_v37 }
0x4e33   :  { %13813 = vmatprep.mubr.msk.f32.mxu0 %vm183_vm0, %v10233_v14 }
0x4e34   :  { %13814 = vmatmul.mubr.msk.f32.vlgmr.msra.gmra.mxu0 %vm183_vm0, %v10234_v58 }
0x4e35   :  { %13829 = vmatprep.mubr.msk.f32.mxu0 %vm14360_vm5, %v14359_v44 }
0x4ed9   :  { %v13826_v5 = vpop.f32.mrf.mxu1 }
0x4eda   :  { %v15830_v54 = vadd.f32 %v13826_v5, %v10350_v40 }
0x4edb   :  { %v10418_v59 = vpop.f32.mrf.mxu1 }
0x4edc   :  { %v15832_v60 = vadd.f32 %v10418_v59, %v10350_v40  ;;  %13833 = vmatpush3.xpose.msk.msra.mxu1 %vm339_vm6, %v15830_v54 }
0x4edd   :  { %13842 = vmatprep.subr.mxu1 %v14359_v44 }
0x4ede   :  { %13828 = vmatpush3.xpose.msk.msra.mxu0 %vm339_vm6, %v15832_v60 }
0x4edf   :  { %13837 = vmatprep.subr.mxu0 %v14359_v44 }
0x4ef4   :  { %v13815_v61 = vpop.f32.mrf.mxu0 }
0x4ef5   :  { %v15841_v62 = vadd.f32 %v13815_v61, %v15815_v22 }
0x4ef6   :  { %v10323_v63 = vpop.f32.mrf.mxu0 }
0x4ef7   :  { %v15844_v55 = vadd.f32 %v15815_v22, %v10323_v63  ;;  %13835 = vmatmul.mubr.msk.f32.vlgmr.msra.gmra.mxu1 %vm339_vm6, %v15841_v62 }
0x4ef8   :  { %13844 = vmatprep.mubr.msk.f32.mxu1 %vm14360_vm5, %v14359_v44 }
0x4ef9   :  { %13830 = vmatmul.mubr.msk.f32.vlgmr.msra.gmra.mxu0 %vm339_vm6, %v15844_v55 }
0x4efa   :  { %13839 = vmatprep.mubr.msk.f32.mxu0 %vm14360_vm5, %v14359_v44 }
0x4fb7   :  { %v10579_v57 = vpop.f32.mrf.mxu1 }
0x4fb8   :  { %v10584_v4 = vmul.f32 0.35355338, %v10579_v57 }
0x4fb9   :  { %v10503_v12 = vpop.f32.mrf.mxu0  ;;  %v13836_v49 = vpop.f32.mrf.mxu1 }
0x4fba   :  { %v10586_v15 = vsel %vm176_vm7, %v10584_v4, -1e+09  ;;  %v10583_v47 = vmul.f32 0.35355338, %v10503_v12 }
0x4fbb   :  { %v13831_v10 = vpop.f32.mrf.mxu0  ;;  %v10590_v17 = vsel %vm339_vm6, %v10586_v15, -inf }
0x4fbc   :  { %v10585_v11 = vsel %vm175_vm8, %v10583_v47, -1e+09  ;;  %10591 = vmax.xlane.f32.xlu1 %v10590_v17 }
0x4fbd   :  { %v10587_v3 = vsel %vm339_vm6, %v10585_v11, -inf }
0x4fbe   :  { %10588 = vmax.xlane.f32.xlu0 %v10587_v3 }
0x4fcd   :  { %10685 = vrot.lane.b32.xlu1 %v15830_v54, %s14361_s0 }
0x4fd1   :  { %10846 = vrot.lane.b32.xlu1 %v15832_v60, %s14364_s15 }
0x4fd5   :  { %10924 = vrot.lane.b32.xlu1 %v15830_v54, %s14364_s15 }
0x4fd9   :  { %10922 = vrot.lane.b32.xlu1 %v15841_v62, %s14364_s15 }
0x5045   :  { %v10592_v38 = vpop.xlane.xlu1 %10591 }
0x5046   :  { %v10594_v43 = vsub.f32 %v10586_v15, %v10592_v38 }
0x5047   :  { %v10589_v19 = vpop.xlane.xlu0 %10588 }
0x5048   :  { %v10597_v23 = vmul.f32 1.442695, %v10594_v43  ;;  %v10593_v9 = vsub.f32 %v10585_v11, %v10589_v19 }
0x5049   :  { %v10686_v13 = vpop.permute.xlu1 %10685 }
0x504a   :  { %14251 = vpow2.f32 %v10597_v23  ;;  %v10595_v26 = vmul.f32 1.442695, %v10593_v9  ;;  %13843 = vmatpush3.msra.mxu1 %v10686_v13  ;;  %v12710_v9 = vld [vmem:[%s16109_s10 + $0x28] sm:$0xff] }
0x504b   :  { %13852 = vmatprep.subr.mxu1 %v14359_v44 }
0x504c   :  { %14253 = vpow2.f32 %v10595_v26 }
0x504d   :  { %v10847_v35 = vpop.permute.xlu1 %10846 }
0x5051   :  { %v10925_v16 = vpop.permute.xlu1 %10924 }
0x5055   :  { %v10923_v39 = vpop.permute.xlu1 %10922 }
0x5057   :  { %v14252_v8 = vpop.eup %14251 }
0x5058   :  { %v10602_v21 = vsel %vm339_vm6, %v14252_v8, 0.0 }
0x5059   :  { %v14254_v22 = vpop.eup %14253  ;;  %10603 = vadd.xlane.f32.xlu0 %v10602_v21 }
0x505a   :  { %v10599_v45 = vsel %vm339_vm6, %v14254_v22, 0.0 }
0x505d   :  { %10600 = vadd.xlane.f32.xlu0 %v10599_v45 }
0x5073   :  { %10609 = vrot.lane.b32.xlu0 %v15832_v60, %s14361_s0 }
0x5077   :  { %10844 = vrot.lane.b32.xlu0 %v15844_v55, %s14364_s15 }
0x50e2   :  { %v10604_v27 = vpop.xlane.xlu0 %10603 }
0x50e3   :  { %14255 = vrcp.f32 %v10604_v27 }
0x50e6   :  { %v10601_v28 = vpop.xlane.xlu0 %10600 }
0x50e7   :  { %14257 = vrcp.f32 %v10601_v28 }
0x50ea   :  { %v10610_v31 = vpop.permute.xlu0 %10609 }
0x50eb   :  { %13838 = vmatpush3.msra.mxu0 %v10610_v31 }
0x50ec   :  { %13847 = vmatprep.subr.mxu0 %v12709_v1 }
0x50ee   :  { %v10845_v25 = vpop.permute.xlu0 %10844 }
0x50f0   :  { %v14256_v32 = vpop.eup %14255 }
0x50f1   :  { %v10608_v34 = vmul.f32 %v14256_v32, %v14252_v8 }
0x50f3   :  { %13845 = vmatmul.mubr.msk.f32.vlgmr.msra.gmra.mxu1 %vm339_vm6, %v10608_v34 }
0x50f4   :  { %v14258_v36 = vpop.eup %14257  ;;  %13853 = vmatpush3.xpose.msk.msra.mxu1 %vm339_vm6, %v10847_v35  ;;  %13854 = vmatprep.mubr.msk.f32.mxu1 %vm14360_vm5, %v14359_v44 }
0x50f5   :  { %v10607_v41 = vmul.f32 %v14258_v36, %v14254_v22  ;;  %13862 = vmatprep.subr.mxu1 %v14359_v44 }
0x50f7   :  { %13840 = vmatmul.mubr.msk.f32.vlgmr.msra.gmra.mxu0 %vm339_vm6, %v10607_v41  ;;  %13855 = vmatmul.mubr.msk.f32.vlgmr.msra.gmra.mxu1 %vm339_vm6, %v10845_v25 }
0x50f8   :  { %13864 = vmatprep.mubr.msk.f32.mxu1 %vm14360_vm5, %v14359_v44  ;;  %13848 = vmatpush3.msra.mxu0 %v12709_v1 }
0x50f9   :  { %13857 = vmatprep.subr.mxu0 %v14359_v44 }
0x51b3   :  { %v10757_v46 = vpop.f32.mrf.mxu1 }
0x51b5   :  { %v13846_v24 = vpop.f32.mrf.mxu1 }
0x51b7   :  { %v10681_v0 = vpop.f32.mrf.mxu0  ;;  %v10918_v20 = vpop.f32.mrf.mxu1 }
0x51b8   :  { %v11000_v48 = vmul.f32 0.35355338, %v10918_v20  ;;  %13849 = vmatprep.mubr.msk.f32.mxu0 %vm339_vm6, %v10681_v0 }
0x51b9   :  { %v13841_v7 = vpop.f32.mrf.mxu0  ;;  %13850 = vmatmul.mubr.msk.f32.vlgmr.msra.gmra.mxu0 %vm339_vm6, %v10757_v46  ;;  %v13856_v18 = vpop.f32.mrf.mxu1  ;;  %v12718_v46 = vld [vmem:[%s16110_s11 + $0x1] ss:$0 sm:$0xff] }
0x51ba   :  { %v11002_v2 = vsel %vm175_vm8, %v11000_v48, -1e+09  ;;  %13858 = vmatpush3.xpose.msk.msra.mxu0 %vm339_vm6, %v10925_v16  ;;  %13859 = vmatprep.mubr.msk.f32.mxu0 %vm14360_vm5, %v14359_v44 }
0x51bb   :  { %v11004_v50 = vsel %vm339_vm6, %v11002_v2, -inf  ;;  %13867 = vmatprep.subr.mxu0 %v14359_v44 }
0x51bc   :  { %11005 = vmax.xlane.f32.xlu0 %v11004_v50 }
0x51bd   :  { %13860 = vmatmul.mubr.msk.f32.vlgmr.msra.gmra.mxu0 %vm339_vm6, %v10923_v39 }
0x51be   :  { %13869 = vmatprep.mubr.msk.f32.mxu0 %vm14360_vm5, %v14359_v44 }
0x5245   :  { %v11006_v51 = vpop.xlane.xlu0 %11005 }
0x5246   :  { %v11010_v42 = vsub.f32 %v11002_v2, %v11006_v51 }
0x5248   :  { %v11012_v30 = vmul.f32 1.442695, %v11010_v42 }
0x524a   :  { %14259 = vpow2.f32 %v11012_v30 }
0x5257   :  { %v14260_v33 = vpop.eup %14259 }
0x5258   :  { %v11016_v56 = vsel %vm339_vm6, %v14260_v33, 0.0 }
0x5259   :  { %11017 = vadd.xlane.f32.xlu0 %v11016_v56 }
0x5279   :  { %v15899_v37 = vpop.f32.mrf.mxu0 }
0x527a   :  { %v10843_v24 = vadd.f32 %v15899_v37, %v12718_v46 }
0x527b   :  { %v15901_v14 = vpop.f32.mrf.mxu0 }
0x527c   :  { %v10842_v0 = vadd.f32 %v12718_v46, %v15901_v14 }
0x527d   :  { %v10996_v58 = vpop.f32.mrf.mxu0 }
0x527e   :  { %v11001_v40 = vmul.f32 0.35355338, %v10996_v58 }
0x527f   :  { %v13861_v5 = vpop.f32.mrf.mxu0 }
0x5280   :  { %v11003_v59 = vsel %vm176_vm7, %v11001_v40, -1e+09 }
0x5281   :  { %v11007_v61 = vsel %vm339_vm6, %v11003_v59, -inf }
0x5282   :  { %11008 = vmax.xlane.f32.xlu1 %v11007_v61 }
0x5293   :  { %11102 = vrot.lane.b32.xlu1 %v15830_v54, %s14363_s13 }
0x5297   :  { %11263 = vrot.lane.b32.xlu1 %v15832_v60, %s14367_s22 }
0x529b   :  { %11341 = vrot.lane.b32.xlu1 %v15830_v54, %s14367_s22 }
0x529f   :  { %11339 = vrot.lane.b32.xlu1 %v15841_v62, %s14367_s22 }
0x52e2   :  { %v11018_v47 = vpop.xlane.xlu0 %11017 }
0x530b   :  { %v11009_v63 = vpop.xlane.xlu1 %11008 }
0x530c   :  { %v11011_v57 = vsub.f32 %v11003_v59, %v11009_v63 }
0x530e   :  { %v11014_v4 = vmul.f32 1.442695, %v11011_v57 }
0x530f   :  { %v11103_v12 = vpop.permute.xlu1 %11102 }
0x5310   :  { %14261 = vpow2.f32 %v11014_v4  ;;  %13868 = vmatpush3.msra.mxu0 %v11103_v12  ;;  %v12711_v4 = vld [vmem:[%s16109_s10 + $0x30] sm:$0xff] }
0x5311   :  { %13877 = vmatprep.subr.mxu0 %v14359_v44  ;;  %14263 = vrcp.f32 %v11018_v47 }
0x5313   :  { %v11264_v19 = vpop.permute.xlu1 %11263 }
0x5317   :  { %v11342_v8 = vpop.permute.xlu1 %11341 }
0x531b   :  { %v11340_v45 = vpop.permute.xlu1 %11339 }
0x531d   :  { %v14262_v49 = vpop.eup %14261 }
0x531e   :  { %v11019_v15 = vsel %vm339_vm6, %v14262_v49, 0.0  ;;  %v14264_v17 = vpop.eup %14263 }
0x531f   :  { %11020 = vadd.xlane.f32.xlu0 %v11019_v15  ;;  %v11024_v11 = vmul.f32 %v14264_v17, %v14260_v33 }
0x5335   :  { %11026 = vrot.lane.b32.xlu0 %v15832_v60, %s14363_s13 }
0x5339   :  { %11261 = vrot.lane.b32.xlu0 %v15844_v55, %s14367_s22 }
0x53a8   :  { %v11021_v10 = vpop.xlane.xlu0 %11020 }
0x53a9   :  { %14265 = vrcp.f32 %v11021_v10 }
0x53ac   :  { %v11027_v3 = vpop.permute.xlu0 %11026 }
0x53ad   :  { %13863 = vmatpush3.msra.mxu1 %v11027_v3 }
0x53ae   :  { %13865 = vmatmul.mubr.msk.f32.vlgmr.msra.gmra.mxu1 %vm339_vm6, %v11024_v11  ;;  %13872 = vmatprep.subr.mxu1 %v12710_v9 }
0x53af   :  { %13873 = vmatpush3.msra.mxu1 %v12710_v9 }
0x53b0   :  { %v11262_v23 = vpop.permute.xlu0 %11261  ;;  %13882 = vmatprep.subr.mxu1 %v14359_v44 }
0x53b6   :  { %v14266_v38 = vpop.eup %14265 }
0x53b7   :  { %v11025_v43 = vmul.f32 %v14266_v38, %v14262_v49 }
0x53b9   :  { %13870 = vmatmul.mubr.msk.f32.vlgmr.msra.gmra.mxu0 %vm339_vm6, %v11025_v43 }
0x53ba   :  { %13878 = vmatpush3.xpose.msk.msra.mxu0 %vm339_vm6, %v11264_v19  ;;  %13879 = vmatprep.mubr.msk.f32.mxu0 %vm14360_vm5, %v14359_v44 }
0x53bb   :  { %13887 = vmatprep.subr.mxu0 %v14359_v44 }
0x53bd   :  { %13880 = vmatmul.mubr.msk.f32.vlgmr.msra.gmra.mxu0 %vm339_vm6, %v11262_v23 }
0x53be   :  { %13889 = vmatprep.mubr.msk.f32.mxu0 %vm14360_vm5, %v14359_v44 }
0x546e   :  { %v11098_v13 = vpop.f32.mrf.mxu1 }
0x546f   :  { %13874 = vmatprep.mubr.msk.f32.mxu1 %vm339_vm6, %v11098_v13 }
0x5470   :  { %v13866_v26 = vpop.f32.mrf.mxu1 }
0x5479   :  { %v11174_v21 = vpop.f32.mrf.mxu0 }
0x547a   :  { %13875 = vmatmul.mubr.msk.f32.vlgmr.msra.gmra.mxu1 %vm339_vm6, %v11174_v21 }
0x547b   :  { %13883 = vmatpush3.xpose.msk.msra.mxu1 %vm339_vm6, %v11342_v8  ;;  %v13871_v22 = vpop.f32.mrf.mxu0  ;;  %13884 = vmatprep.mubr.msk.f32.mxu1 %vm14360_vm5, %v14359_v44 }
0x547c   :  { %13892 = vmatprep.subr.mxu1 %v14359_v44 }
0x547d   :  { %v11335_v27 = vpop.f32.mrf.mxu0 }
0x547e   :  { %v11417_v28 = vmul.f32 0.35355338, %v11335_v27  ;;  %13885 = vmatmul.mubr.msk.f32.vlgmr.msra.gmra.mxu1 %vm339_vm6, %v11340_v45 }
0x547f   :  { %v13881_v31 = vpop.f32.mrf.mxu0  ;;  %13894 = vmatprep.mubr.msk.f32.mxu1 %vm14360_vm5, %v14359_v44 }
0x5480   :  { %v11419_v32 = vsel %vm175_vm8, %v11417_v28, -1e+09 }
0x5481   :  { %v11421_v34 = vsel %vm339_vm6, %v11419_v32, -inf }
0x5482   :  { %11422 = vmax.xlane.f32.xlu0 %v11421_v34 }
0x550b   :  { %v11423_v35 = vpop.xlane.xlu0 %11422 }
0x550c   :  { %v11427_v36 = vsub.f32 %v11419_v32, %v11423_v35 }
0x550e   :  { %v11429_v41 = vmul.f32 1.442695, %v11427_v36 }
0x5510   :  { %14267 = vpow2.f32 %v11429_v41 }
0x551d   :  { %v14268_v25 = vpop.eup %14267 }
0x551e   :  { %v11433_v1 = vsel %vm339_vm6, %v14268_v25, 0.0 }
0x551f   :  { %11434 = vadd.xlane.f32.xlu0 %v11433_v1 }
0x553a   :  { %v13876_v16 = vpop.f32.mrf.mxu1 }
0x553b   :  { %v15947_v20 = vadd.f32 %v13876_v16, %v10843_v24 }
0x553c   :  { %v11250_v48 = vpop.f32.mrf.mxu1 }
0x553d   :  { %v15949_v7 = vadd.f32 %v11250_v48, %v10842_v0  ;;  %v12712_v48 = vld [vmem:[%s16109_s10 + $0x38] sm:$0xff] }
0x553e   :  { %v11413_v18 = vpop.f32.mrf.mxu1 }
0x553f   :  { %v11418_v2 = vmul.f32 0.35355338, %v11413_v18 }
0x5540   :  { %v13886_v50 = vpop.f32.mrf.mxu1 }
0x5541   :  { %v11420_v39 = vsel %vm176_vm7, %v11418_v2, -1e+09 }
0x5542   :  { %v11424_v51 = vsel %vm339_vm6, %v11420_v39, -inf }
0x5543   :  { %11425 = vmax.xlane.f32.xlu1 %v11424_v51 }
0x5554   :  { %11519 = vrot.lane.b32.xlu1 %v15830_v54, %s14366_s18 }
0x5558   :  { %11680 = vrot.lane.b32.xlu1 %v15832_v60, %s14370_s28 }
0x555c   :  { %11758 = vrot.lane.b32.xlu1 %v15830_v54, %s14370_s28 }
0x5560   :  { %11756 = vrot.lane.b32.xlu1 %v15841_v62, %s14370_s28 }
0x55a8   :  { %v11435_v58 = vpop.xlane.xlu0 %11434 }
0x55cc   :  { %v11426_v42 = vpop.xlane.xlu1 %11425 }
0x55cd   :  { %v11428_v30 = vsub.f32 %v11420_v39, %v11426_v42 }
0x55cf   :  { %v11431_v33 = vmul.f32 1.442695, %v11428_v30 }
0x55d0   :  { %v11520_v56 = vpop.permute.xlu1 %11519 }
0x55d1   :  { %14269 = vpow2.f32 %v11431_v33  ;;  %13893 = vmatpush3.msra.mxu1 %v11520_v56 }
0x55d2   :  { %13902 = vmatprep.subr.mxu1 %v14359_v44  ;;  %14271 = vrcp.f32 %v11435_v58 }
0x55d4   :  { %v11681_v57 = vpop.permute.xlu1 %11680 }
0x55d8   :  { %v11759_v15 = vpop.permute.xlu1 %11758 }
0x55dc   :  { %v11757_v17 = vpop.permute.xlu1 %11756 }
0x55de   :  { %v14270_v37 = vpop.eup %14269 }
0x55df   :  { %v11436_v14 = vsel %vm339_vm6, %v14270_v37, 0.0  ;;  %v14272_v40 = vpop.eup %14271 }
0x55e0   :  { %11437 = vadd.xlane.f32.xlu0 %v11436_v14  ;;  %v11441_v5 = vmul.f32 %v14272_v40, %v14268_v25 }
0x55f6   :  { %11443 = vrot.lane.b32.xlu0 %v15832_v60, %s14366_s18 }
0x55fa   :  { %11678 = vrot.lane.b32.xlu0 %v15844_v55, %s14370_s28 }
0x5669   :  { %v11438_v62 = vpop.xlane.xlu0 %11437 }
0x566a   :  { %14273 = vrcp.f32 %v11438_v62 }
0x566d   :  { %v11444_v59 = vpop.permute.xlu0 %11443 }
0x566e   :  { %13888 = vmatpush3.msra.mxu0 %v11444_v59 }
0x566f   :  { %13890 = vmatmul.mubr.msk.f32.vlgmr.msra.gmra.mxu0 %vm339_vm6, %v11441_v5  ;;  %13897 = vmatprep.subr.mxu0 %v12711_v4 }
0x5670   :  { %13898 = vmatpush3.msra.mxu0 %v12711_v4  ;;  %v12754_v4 = vld [vmem:[%s16111_s21 + $0x28] sm:$0xff] }
0x5671   :  { %v11679_v55 = vpop.permute.xlu0 %11678  ;;  %13907 = vmatprep.subr.mxu0 %v14359_v44 }
0x5677   :  { %v14274_v61 = vpop.eup %14273 }
0x5678   :  { %v11442_v63 = vmul.f32 %v14274_v61, %v14270_v37 }
0x567a   :  { %13895 = vmatmul.mubr.msk.f32.vlgmr.msra.gmra.mxu1 %vm339_vm6, %v11442_v63 }
0x567b   :  { %13903 = vmatpush3.xpose.msk.msra.mxu1 %vm339_vm6, %v11681_v57  ;;  %13904 = vmatprep.mubr.msk.f32.mxu1 %vm14360_vm5, %v14359_v44  ;;  %v12756_v57 = vld [vmem:[%s16111_s21 + $0x38] sm:$0xff] }
0x567c   :  { %13912 = vmatprep.subr.mxu1 %v14359_v44 }
0x567e   :  { %13905 = vmatmul.mubr.msk.f32.vlgmr.msra.gmra.mxu1 %vm339_vm6, %v11679_v55  ;;  %v12755_v55 = vld [vmem:[%s16111_s21 + $0x30] sm:$0xff] }
0x567f   :  { %13914 = vmatprep.mubr.msk.f32.mxu1 %vm14360_vm5, %v14359_v44 }
0x572f   :  { %v11515_v12 = vpop.f32.mrf.mxu0 }
0x5730   :  { %13899 = vmatprep.mubr.msk.f32.mxu0 %vm339_vm6, %v11515_v12  ;;  %v12753_v12 = vld [vmem:[%s16111_s21 + $0x20] sm:$0xff] }
0x5731   :  { %v13891_v49 = vpop.f32.mrf.mxu0 }
0x5732   :  { %v12764_v49 = vld [vmem:[%s16112_s14 + $0x78] sm:$0xff] }
0x573a   :  { %v11591_v47 = vpop.f32.mrf.mxu1 }
0x573b   :  { %13900 = vmatmul.mubr.msk.f32.vlgmr.msra.gmra.mxu0 %vm339_vm6, %v11591_v47  ;;  %v12762_v47 = vld [vmem:[%s16112_s14 + $0x68] sm:$0xff] }
0x573c   :  { %13908 = vmatpush3.xpose.msk.msra.mxu0 %vm339_vm6, %v11759_v15  ;;  %v13896_v10 = vpop.f32.mrf.mxu1  ;;  %13909 = vmatprep.mubr.msk.f32.mxu0 %vm14360_vm5, %v14359_v44  ;;  %v12763_v15 = vld [vmem:[%s16112_s14 + $0x70] sm:$0xff] }
0x573d   :  { %13917 = vmatprep.subr.mxu0 %v14359_v44  ;;  %v12761_v10 = vld [vmem:[%s16112_s14 + $0x60] sm:$0xff] }
0x573e   :  { %v11752_v11 = vpop.f32.mrf.mxu1 }
0x573f   :  { %v11834_v3 = vmul.f32 0.35355338, %v11752_v11  ;;  %13910 = vmatmul.mubr.msk.f32.vlgmr.msra.gmra.mxu0 %vm339_vm6, %v11757_v17 }
0x5740   :  { %v13906_v38 = vpop.f32.mrf.mxu1  ;;  %13919 = vmatprep.mubr.msk.f32.mxu0 %vm14360_vm5, %v14359_v44 }
0x5741   :  { %v11836_v43 = vsel %vm175_vm8, %v11834_v3, -1e+09 }
0x5742   :  { %v11838_v19 = vsel %vm339_vm6, %v11836_v43, -inf }
0x5743   :  { %11839 = vmax.xlane.f32.xlu0 %v11838_v19 }
0x57cc   :  { %v11840_v23 = vpop.xlane.xlu0 %11839 }
0x57cd   :  { %v11844_v9 = vsub.f32 %v11836_v43, %v11840_v23 }
0x57cf   :  { %v11846_v13 = vmul.f32 1.442695, %v11844_v9 }
0x57d1   :  { %14275 = vpow2.f32 %v11846_v13 }
0x57de   :  { %v14276_v26 = vpop.eup %14275 }
0x57df   :  { %v11850_v8 = vsel %vm339_vm6, %v14276_v26, 0.0 }
0x57e0   :  { %11851 = vadd.xlane.f32.xlu0 %v11850_v8 }
0x57fb   :  { %v13901_v21 = vpop.f32.mrf.mxu0 }
0x57fc   :  { %v11677_v22 = vadd.f32 %v13901_v21, %v15947_v20 }
0x57fd   :  { %v11667_v45 = vpop.f32.mrf.mxu0 }
0x57fe   :  { %v11676_v44 = vadd.f32 %v11667_v45, %v15949_v7 }
0x57ff   :  { %v11830_v27 = vpop.f32.mrf.mxu0 }
0x5800   :  { %v11835_v53 = vmul.f32 0.35355338, %v11830_v27 }
0x5801   :  { %v13911_v28 = vpop.f32.mrf.mxu0 }
0x5802   :  { %v11837_v31 = vsel %vm176_vm7, %v11835_v53, -1e+09  ;;  %v12751_v53 = vld [vmem:[%s16113_s6 + $0x1] ss:$0 sm:$0xff] }
0x5803   :  { %v11841_v32 = vsel %vm339_vm6, %v11837_v31, -inf }
0x5804   :  { %11842 = vmax.xlane.f32.xlu1 %v11841_v32 }
0x5815   :  { %11936 = vrot.lane.b32.xlu1 %v15830_v54, %s14369_s26 }
0x5869   :  { %v11852_v52 = vpop.xlane.xlu0 %11851 }
0x588d   :  { %v11843_v34 = vpop.xlane.xlu1 %11842 }
0x588e   :  { %v11845_v35 = vsub.f32 %v11837_v31, %v11843_v34 }
0x5890   :  { %v11848_v36 = vmul.f32 1.442695, %v11845_v35 }
0x5891   :  { %v11937_v41 = vpop.permute.xlu1 %11936 }
0x5892   :  { %14277 = vpow2.f32 %v11848_v36  ;;  %13918 = vmatpush3.msra.mxu0 %v11937_v41  ;;  %v12752_v36 = vld [vmem:[%s16114_s12 + $0x1] ss:$0 sm:$0xff] }
0x5893   :  { %14279 = vrcp.f32 %v11852_v52  ;;  %13927 = vmatprep.subr.mxu0 %v12756_v57  ;;  %v12760_v52 = vld [vmem:[%s16112_s14 + $0x58] sm:$0xff] }
0x589f   :  { %v14278_v25 = vpop.eup %14277 }
0x58a0   :  { %v11853_v1 = vsel %vm339_vm6, %v14278_v25, 0.0  ;;  %v14280_v24 = vpop.eup %14279 }
0x58a1   :  { %11854 = vadd.xlane.f32.xlu0 %v11853_v1  ;;  %v11858_v54 = vmul.f32 %v14280_v24, %v14276_v26  ;;  %v12758_v24 = vld [vmem:[%s16112_s14 + $0x48] sm:$0xff] }
0x58b7   :  { %11860 = vrot.lane.b32.xlu0 %v15832_v60, %s14369_s26 }
0x592a   :  { %v11855_v46 = vpop.xlane.xlu0 %11854 }
0x592b   :  { %14281 = vrcp.f32 %v11855_v46  ;;  %v12759_v46 = vld [vmem:[%s16112_s14 + $0x50] sm:$0xff] }
0x592e   :  { %v11861_v16 = vpop.permute.xlu0 %11860 }
0x592f   :  { %13913 = vmatpush3.msra.mxu1 %v11861_v16  ;;  %v12765_v16 = vld [vmem:[%s16115_s1 + $0x1] ss:$0 sm:$0xff] }
0x5930   :  { %13915 = vmatmul.mubr.msk.f32.vlgmr.msra.gmra.mxu1 %vm339_vm6, %v11858_v54  ;;  %13922 = vmatprep.subr.mxu1 %v12712_v48  ;;  %v12757_v54 = vld [vmem:[%s16112_s14 + $0x40] sm:$0xff] }
0x5931   :  { %13923 = vmatpush3.msra.mxu1 %v12712_v48 }
0x5932   :  { %13938 = vmatprep.subr.mxu1 %v12764_v49 }
0x5938   :  { %v14282_v0 = vpop.eup %14281 }
0x5939   :  { %v11859_v20 = vmul.f32 %v14282_v0, %v14278_v25 }
0x593b   :  { %13920 = vmatmul.mubr.msk.f32.vlgmr.msra.gmra.mxu0 %vm339_vm6, %v11859_v20 }
0x593c   :  { %13928 = vmatpush3.msra.mxu0 %v12756_v57 }
0x593d   :  { %13929 = vmatprep.subr.mxu0 %v12755_v55 }
0x593e   :  { %13930 = vmatpush3.msra.mxu0 %v12755_v55 }
0x593f   :  { %13931 = vmatprep.subr.mxu0 %v12754_v4 }
0x5940   :  { %13932 = vmatpush3.msra.mxu0 %v12754_v4 }
0x5941   :  { %13933 = vmatprep.subr.mxu0 %v12753_v12 }
0x5942   :  { %13934 = vmatpush3.msra.mxu0 %v12753_v12 }
0x59f0   :  { %v11932_v7 = vpop.f32.mrf.mxu1 }
0x59f1   :  { %13924 = vmatprep.mubr.msk.f32.mxu1 %vm339_vm6, %v11932_v7 }
0x59f2   :  { %v13916_v60 = vpop.f32.mrf.mxu1 }
0x59fb   :  { %v12008_v18 = vpop.f32.mrf.mxu0 }
0x59fc   :  { %13925 = vmatmul.mubr.msk.f32.vlgmr.msra.gmra.mxu1 %vm339_vm6, %v12008_v18 }
0x59fd   :  { %v13921_v2 = vpop.f32.mrf.mxu0  ;;  %13939 = vmatpush3.msra.mxu1 %v12764_v49 }
0x59fe   :  { %13940 = vmatprep.subr.mxu1 %v12763_v15  ;;  %v12768_v2 = vld [vmem:[%s14558_s9 + $0x1] ss:$0 sm:$0xff]  ;;  %s14372_s9 = smov [#allocation2]  }
0x59ff   :  { %13941 = vmatpush3.msra.mxu1 %v12763_v15  ;;  %s12406_s0 = sshll.u32 %s14372_s9, 4  ;;  %s12407_s0 = int_to_ptr.vmem [resolvable:$true] %s12406_s0 }
0x5a00   :  { %13942 = vmatprep.subr.mxu1 %v12762_v47  ;;  %s14299_s13 = scalar_lea.vmem %s12407_s0, 256  ;;  %p14304_p1 = scmp.lt.s32.totalorder %s12407_s0, %s12407_s0 }
0x5a01   :  { %13943 = vmatpush3.msra.mxu1 %v12762_v47  ;;  %p14300_p0 = scmp.ne.s32.totalorder %s12407_s0, %s14299_s13  ;;  %p14305_p2 = scmp.lt.s32.totalorder %s14299_s13, %s14299_s13 }
0x5a02   :  { %13944 = vmatprep.subr.mxu1 %v12761_v10 }
0x5a03   :  { %13945 = vmatpush3.msra.mxu1 %v12761_v10  ;;  %p14306_p3 = por %p14305_p2, %p14304_p1 }
0x5a04   :  { %13946 = vmatprep.subr.mxu1 %v12760_v52 }
0x5a05   :  { %13947 = vmatpush3.msra.mxu1 %v12760_v52  ;;  %p14307_p4 = pnand %p14306_p3, %p14300_p0 }
0x5a06   :  { %13948 = vmatprep.subr.mxu1 %v12759_v46 }
0x5a07   :  { %13949 = vmatpush3.msra.mxu1 %v12759_v46 }
0x5a08   :  { %13950 = vmatprep.subr.mxu1 %v12758_v24 }
0x5a09   :  { %13951 = vmatpush3.msra.mxu1 %v12758_v24 }
0x5a0a   :  { %13952 = vmatprep.subr.mxu1 %v12757_v54 }
0x5a0b   :  { %13953 = vmatpush3.msra.mxu1 %v12757_v54 }
0x5abc   :  { %v13926_v50 = vpop.f32.mrf.mxu1 }
0x5abd   :  { %v12094_v39 = vadd.f32 %v13926_v50, %v11677_v22 }
0x5abe   :  { %v12084_v51 = vpop.f32.mrf.mxu1 }
0x5abf   :  { %v16008_v42 = vadd.f32 %v12094_v39, %v15792_v6  ;;  %v12093_v30 = vadd.f32 %v12084_v51, %v11676_v44 }
0x5ac1   :  { %v16011_v33 = vadd.f32 %v12093_v30, %v15795_v29  ;;  %v12102_v56 = vsel %vm183_vm0, %v16008_v42, 0.0 }
0x5ac2   :  { %12103 = vadd.xlane.f32.xlu0 %v12102_v56 }
0x5ac3   :  { %v12099_v37 = vsel %vm183_vm0, %v16011_v33, 0.0 }
0x5ac4   :  { %12100 = vadd.xlane.f32.xlu1 %v12099_v37 }
0x5b4b   :  { %v12104_v14 = vpop.xlane.xlu0 %12103 }
0x5b4c   :  { %v12106_v58 = vmul.f32 0.03125, %v12104_v14 }
0x5b4d   :  { %v12101_v62 = vpop.xlane.xlu1 %12100 }
0x5b4e   :  { %v12108_v6 = vsub.f32 %v16008_v42, %v12106_v58  ;;  %v12105_v40 = vmul.f32 0.03125, %v12101_v62 }
0x5b50   :  { %v12107_v29 = vsub.f32 %v16011_v33, %v12105_v40  ;;  %v12110_v5 = vmul.f32 %v12108_v6, %v12108_v6  ;;  %v12142_v31 = vmul.f32 %v12751_v53, %v12108_v6 }
0x5b52   :  { %v12114_v59 = vsel %vm183_vm0, %v12110_v5, 0.0  ;;  %v12109_v61 = vmul.f32 %v12107_v29, %v12107_v29  ;;  %v12141_v32 = vmul.f32 %v12751_v53, %v12107_v29 }
0x5b53   :  { %12115 = vadd.xlane.f32.xlu1 %v12114_v59 }
0x5b54   :  { %v12111_v63 = vsel %vm183_vm0, %v12109_v61, 0.0 }
0x5b55   :  { %12112 = vadd.xlane.f32.xlu0 %v12111_v63 }
0x5bdc   :  { %v12116_v17 = vpop.xlane.xlu1 %12115 }
0x5bdd   :  { %v12118_v11 = vmul.f32 0.032258064, %v12116_v17 }
0x5bde   :  { %v12113_v3 = vpop.xlane.xlu0 %12112 }
0x5bdf   :  { %14283 = vrsqrt.f32 %v12118_v11  ;;  %v12117_v38 = vmul.f32 0.032258064, %v12113_v3  ;;  %vm12128_vm5 = vcmp.eq.f32.partialorder %v12118_v11, inf  ;;  %v12131_v23 = vand.u32 2147483648, %v12118_v11 }
0x5be0   :  { %vm12130_vm6 = vcmp.eq.f32.partialorder %v12118_v11, 0.0 }
0x5be1   :  { %14285 = vrsqrt.f32 %v12117_v38  ;;  %vm12121_vm7 = vcmp.eq.f32.partialorder %v12117_v38, inf  ;;  %v12124_v22 = vand.u32 2147483648, %v12117_v38  ;;  %vm12123_vm8 = vcmp.eq.f32.partialorder %v12117_v38, 0.0 }
0x5bec   :  { %v14284_v43 = vpop.eup %14283 }
0x5bed   :  { %v12127_v19 = vmul.f32 %v14284_v43, %v12118_v11 }
0x5bee   :  { %v14286_v9 = vpop.eup %14285 }
0x5bef   :  { %v12129_v13 = vsel %vm12128_vm5, %v12118_v11, %v12127_v19  ;;  %v12120_v8 = vmul.f32 %v14286_v9, %v12117_v38 }
0x5bf0   :  { %v12132_v26 = vsel %vm12130_vm6, %v12131_v23, %v12129_v13  ;;  %v12771_v13 = vld [vmem:[%s14563_s27] ss:$0 sm:$0xff] }
0x5bf1   :  { %v12134_v21 = vadd.f32 1e-06, %v12132_v26  ;;  %v12122_v45 = vsel %vm12121_vm7, %v12117_v38, %v12120_v8 }
0x5bf2   :  { %v12125_v44 = vsel %vm12123_vm8, %v12124_v22, %v12122_v45 }
0x5bf3   :  { %14287 = vrcp.f32 %v12134_v21  ;;  %v12133_v27 = vadd.f32 1e-06, %v12125_v44  ;;  %v12772_v21 = vld [vmem:[%s14568_s4] ss:$0 sm:$0xff] }
0x5bf5   :  { %14289 = vrcp.f32 %v12133_v27 }
0x5c00   :  { %v14288_v28 = vpop.eup %14287 }
0x5c01   :  { %v12144_v35 = vmul.f32 %v14288_v28, %v12142_v31 }
0x5c02   :  { %v14290_v34 = vpop.eup %14289 }
0x5c03   :  { %v12143_v41 = vmul.f32 %v14290_v34, %v12141_v32  ;;  %v12150_v1 = vadd.f32 %v12752_v36, %v12144_v35 }
0x5c05   :  { %v12149_v25 = vadd.f32 %v12752_v36, %v12143_v41 }
0x5c07   :  { %13935 = vmatprep.mubr.msk.f32.mxu0 %vm183_vm0, %v12149_v25 }
0x5c08   :  { %13936 = vmatmul.mubr.msk.f32.vlgmr.msra.gmra.mxu0 %vm183_vm0, %v12150_v1 }
0x5cc8   :  { %v13937_v0 = vpop.f32.mrf.mxu0 }
0x5cc9   :  { %v12249_v20 = vadd.f32 %v13937_v0, %v12765_v16 }
0x5cca   :  { %v12243_v48 = vpop.f32.mrf.mxu0 }
0x5ccb   :  { %v12244_v7 = vadd.f32 %v12765_v16, %v12243_v48  ;;  %v12253_v18 = vmax.f32 %v12249_v20, 0.0 }
0x5ccd   :  { %v12252_v60 = vmax.f32 %v12244_v7, 0.0 }
0x5ccf   :  { %13954 = vmatprep.mubr.msk.f32.mxu1 %vm2164_vm13, %v12252_v60 }
0x5cd0   :  { %13955 = vmatmul.mubr.msk.f32.vlgmr.msra.gmra.mxu1 %vm2164_vm13, %v12253_v18 }
0x5d90   :  { %v13956_v50 = vpop.f32.mrf.mxu1 }
0x5d91   :  { %v12336_v39 = vadd.f32 %v13956_v50, %v12768_v2 }
0x5d92   :  { %v12330_v51 = vpop.f32.mrf.mxu1 }
0x5d93   :  { %v12340_v30 = vadd.f32 %v12336_v39, %v16008_v42  ;;  %v12331_v56 = vadd.f32 %v12768_v2, %v12330_v51 }
0x5d95   :  { %v12339_v37 = vadd.f32 %v12331_v56, %v16011_v33  ;;  %v12346_v14 = vsel %vm183_vm0, %v12340_v30, 0.0 }
0x5d96   :  { %12347 = vadd.xlane.f32.xlu1 %v12346_v14 }
0x5d97   :  { %v12343_v58 = vsel %vm183_vm0, %v12339_v37, 0.0 }
0x5d98   :  { %12344 = vadd.xlane.f32.xlu0 %v12343_v58 }
0x5e1f   :  { %v12348_v62 = vpop.xlane.xlu1 %12347 }
0x5e20   :  { %v12350_v6 = vmul.f32 0.03125, %v12348_v62 }
0x5e21   :  { %v12345_v40 = vpop.xlane.xlu0 %12344 }
0x5e22   :  { %v12352_v29 = vsub.f32 %v12340_v30, %v12350_v6  ;;  %v12349_v5 = vmul.f32 0.03125, %v12345_v40 }
0x5e24   :  { %v12351_v59 = vsub.f32 %v12339_v37, %v12349_v5  ;;  %v12354_v61 = vmul.f32 %v12352_v29, %v12352_v29  ;;  %v12388_v26 = vmul.f32 %v12771_v13, %v12352_v29 }
0x5e26   :  { %v12358_v63 = vsel %vm183_vm0, %v12354_v61, 0.0  ;;  %v12353_v57 = vmul.f32 %v12351_v59, %v12351_v59  ;;  %v12387_v45 = vmul.f32 %v12771_v13, %v12351_v59 }
0x5e27   :  { %12359 = vadd.xlane.f32.xlu1 %v12358_v63 }
0x5e28   :  { %v12355_v42 = vsel %vm183_vm0, %v12353_v57, 0.0 }
0x5e29   :  { %12356 = vadd.xlane.f32.xlu0 %v12355_v42 }
0x5eb0   :  { %v12360_v33 = vpop.xlane.xlu1 %12359 }
0x5eb1   :  { %v12362_v55 = vmul.f32 0.032258064, %v12360_v33 }
0x5eb2   :  { %v12357_v4 = vpop.xlane.xlu0 %12356 }
0x5eb3   :  { %14291 = vrsqrt.f32 %v12362_v55  ;;  %v12361_v12 = vmul.f32 0.032258064, %v12357_v4  ;;  %vm12372_vm13 = vcmp.eq.f32.partialorder %v12362_v55, inf  ;;  %v12375_v47 = vand.u32 2147483648, %v12362_v55 }
0x5eb4   :  { %vm12374_vm9 = vcmp.eq.f32.partialorder %v12362_v55, 0.0 }
0x5eb5   :  { %14293 = vrsqrt.f32 %v12361_v12  ;;  %vm12365_vm10 = vcmp.eq.f32.partialorder %v12361_v12, inf  ;;  %v12368_v43 = vand.u32 2147483648, %v12361_v12  ;;  %vm12367_vm11 = vcmp.eq.f32.partialorder %v12361_v12, 0.0 }
0x5ec0   :  { %v14292_v49 = vpop.eup %14291 }
0x5ec1   :  { %v12371_v15 = vmul.f32 %v14292_v49, %v12362_v55 }
0x5ec2   :  { %v14294_v10 = vpop.eup %14293 }
0x5ec3   :  { %v12373_v17 = vsel %vm12372_vm13, %v12362_v55, %v12371_v15  ;;  %v12364_v3 = vmul.f32 %v14294_v10, %v12361_v12 }
0x5ec4   :  { %v12376_v11 = vsel %vm12374_vm9, %v12375_v47, %v12373_v17 }
0x5ec5   :  { %v12378_v38 = vadd.f32 1e-06, %v12376_v11  ;;  %v12366_v19 = vsel %vm12365_vm10, %v12361_v12, %v12364_v3 }
0x5ec6   :  { %v12369_v23 = vsel %vm12367_vm11, %v12368_v43, %v12366_v19 }
0x5ec7   :  { %14295 = vrcp.f32 %v12378_v38  ;;  %v12377_v9 = vadd.f32 1e-06, %v12369_v23 }
0x5ec9   :  { %14297 = vrcp.f32 %v12377_v9 }
0x5ed4   :  { %v14296_v8 = vpop.eup %14295 }
0x5ed5   :  { %v12390_v22 = vmul.f32 %v14296_v8, %v12388_v26 }
0x5ed6   :  { %v14298_v44 = vpop.eup %14297 }
0x5ed7   :  { %v12398_v27 = vadd.f32 %v12772_v21, %v12390_v22  ;;  %v12389_v53 = vmul.f32 %v14298_v44, %v12387_v45 }
0x5ed9   :  { %12400 = vst.msk [vmem:[#allocation2 + $0x8] sm:$0xff] %vm183_vm0, %v12398_v27  ;;  %v12397_v28 = vadd.f32 %v12772_v21, %v12389_v53 }
0x5edb   :  { %12399 = vst.msk [vmem:[#allocation2] sm:$0xff] %vm183_vm0, %v12397_v28 }
0x5edc   :  { %14310 = shalt.err (!%p14307_p4)
}
0x5edd   :  { %s14373_s27 = smov 128   ;;  %s14374_s4 = smov 8  }
0x5ede   :  { %12412 = dma.vmem_to_hbm [thread:$0]  %s12407_s0, 256, %s14573_s17, [#allocation3], %s14373_s27, %s14373_s27, %s14374_s4  }
0x5edf   :  { %14319 = dma.done.wait [#allocation3], 256  }
0x5ee0   :  { %14320 = vsyncadd [#allocation3], 4294967040 }
0x5ee1   :  { %12416 = vsyncpa [#allocation3], 1 }

</bundles_post_ra>
